<compile_context>
chip_gen: v7x
topology: tpu7x:2x2x1
jax: 0.10.0
libtpu: 0.0.40
codegen_flags: <defaults>
</compile_context>

<pallas_src>
import math

import jax
import jax.numpy as jnp
from jax.experimental import pallas as pl
from jax.experimental.pallas import tpu as pltpu


# ----------------------------------------------------------------------------
# Pallas matmul kernel: bf16 x bf16 -> f32 accumulate, bias fused, bf16 store.
# ----------------------------------------------------------------------------
def _round_up(x, m):
    return (x + m - 1) // m * m


def _mm_bias_kernel(a_ref, b_ref, bias_ref, o_ref):
    acc = jnp.dot(a_ref[...], b_ref[...], preferred_element_type=jnp.float32)
    o_ref[...] = (acc + bias_ref[...]).astype(o_ref.dtype)


_PALLAS_MIN_M = 128
_PALLAS_MIN_N = 64
_PALLAS_MIN_K = 32
_K_ALIGN = 16            # bf16 sublane-packing alignment of the contraction dim


def _pick_tiles(M, N, K):
    # tn: largest of (256, 128) dividing N, else the full (already small) N.
    if N % 256 == 0 and N > 256:
        tn = 256
    elif N % 128 == 0:
        tn = 128
    else:
        tn = N
    n_blk = N // tn
    # tm: biggest tile that still leaves >= 2 parallel grid blocks (v7x has 2
    # TensorCores under dimension_semantics=("parallel","parallel")).
    tm = 128
    for cand in (512, 256, 128):
        if M >= cand and (M // cand) * n_blk >= 2:
            tm = cand
            break
    # VMEM guard: double-buffered bf16 A/B blocks stay far below the scoped
    # VMEM default on v5e/v6e/v7x.
    while tm > 128 and (tm * K + K * tn) * 2 * 2 > (8 << 20):
        tm //= 2
    return tm, tn, _round_up(M, tm)


def matmul_bias(a, b, bias=None):
    """a: (M, K), b: (K, N) bf16 (prepped weight), bias: (N,) or None -> (M, N) bf16."""
    M, K = a.shape
    Kb, N = b.shape
    assert K == Kb
    if M >= _PALLAS_MIN_M and N >= _PALLAS_MIN_N and K >= _PALLAS_MIN_K:
        a = a.astype(jnp.bfloat16)
        b = b.astype(jnp.bfloat16)          # no-op for prepped weights
        if K % _K_ALIGN:                    # only the 7x7x3 first conv hits this
            kpad = _round_up(K, _K_ALIGN) - K
            a = jnp.pad(a, ((0, 0), (0, kpad)))
            b = jnp.pad(b, ((0, kpad), (0, 0)))
            K += kpad
        tm, tn, Mp = _pick_tiles(M, N, K)
        if Mp != M:
            a = jnp.pad(a, ((0, Mp - M), (0, 0)))
        bias2 = (jnp.zeros((1, N), jnp.float32) if bias is None
                 else bias.astype(jnp.float32).reshape(1, N))
        out = pl.pallas_call(
            _mm_bias_kernel,
            out_shape=jax.ShapeDtypeStruct((Mp, N), jnp.bfloat16),
            grid_spec=pltpu.PrefetchScalarGridSpec(
                num_scalar_prefetch=0,
                grid=(Mp // tm, N // tn),
                in_specs=[pl.BlockSpec((tm, K), lambda i, j: (i, 0)),
                          pl.BlockSpec((K, tn), lambda i, j: (0, j)),
                          pl.BlockSpec((1, tn), lambda i, j: (0, j))],
                out_specs=pl.BlockSpec((tm, tn), lambda i, j: (i, j))),
            compiler_params=pltpu.CompilerParams(
                dimension_semantics=("parallel", "parallel")),
        )(a, b, bias2)
        return out[:M] if Mp != M else out
    # Sub-MXU-tile shapes (Cout=1/2/48 heads, tiny-spatial deep layers): padding
    # them to 128-lane MXU tiles wastes 8-64x of the array; let XLA handle them.
    out = jnp.dot(a.astype(jnp.float32), b.astype(jnp.float32))
    if bias is not None:
        out = out + bias.astype(jnp.float32)[None, :]
    return out.astype(jnp.bfloat16)


# ----------------------------------------------------------------------------
# Conv / pooling / resize helpers (all NHWC; conv compute via matmul_bias)
# ----------------------------------------------------------------------------
def prep_conv_w(w):
    """PyTorch (Cout, Cin, kh, kw) f32 -> (kh, kw, Cin, Cout) bf16 (matmul-ready)."""
    return jnp.transpose(w, (2, 3, 1, 0)).astype(jnp.bfloat16)


def prepare_params(p):
    if isinstance(p, dict):
        return {k: prepare_params(v) for k, v in p.items()}
    if isinstance(p, (list, tuple)):
        return type(p)(prepare_params(v) for v in p)
    if hasattr(p, 'ndim') and p.ndim == 4:
        return prep_conv_w(p)
    return p


def conv2d(x, wp, b=None, stride=1, padding=0):
    """x: (N, H, W, Cin) bf16, wp: (kh, kw, Cin, Cout) bf16 -> (N, Ho, Wo, Cout) bf16."""
    N, H, W, Cin = x.shape
    kh, kw, cin, cout = wp.shape
    assert Cin == cin
    if padding:
        x = jnp.pad(x, ((0, 0), (padding, padding), (padding, padding), (0, 0)))
    Hp, Wp = H + 2 * padding, W + 2 * padding
    Hout = (Hp - kh) // stride + 1
    Wout = (Wp - kw) // stride + 1
    if kh == 1 and kw == 1 and stride == 1:
        A = x.reshape(N * Hout * Wout, Cin)
    else:
        cols = []
        for di in range(kh):
            for dj in range(kw):
                cols.append(x[:, di:di + stride * (Hout - 1) + 1:stride,
                                 dj:dj + stride * (Wout - 1) + 1:stride, :])
        # Channel-last patch layout: column = (di*kw + dj)*Cin + c, matching the
        # (kh, kw, Cin, Cout) weight reshape below.
        A = jnp.concatenate(cols, axis=-1).reshape(N * Hout * Wout, kh * kw * Cin)
    out = matmul_bias(A, wp.reshape(kh * kw * cin, cout), b)
    return out.reshape(N, Hout, Wout, cout)


def conv1d_k1(x, wp, b=None):
    """Conv1d kernel-1.  x: (N, Cin, L) f32, wp: (1,1,Cin,Cout) bf16."""
    w2 = wp.reshape(wp.shape[2], wp.shape[3]).astype(jnp.float32)
    y = jnp.einsum('ncl,co->nol', x.astype(jnp.float32), w2)
    if b is not None:
        y = y + b.astype(jnp.float32)[None, :, None]
    return y


def relu(x):
    return jnp.maximum(x, 0)


def batchnorm(x, bnp, eps=1e-5, relu=False):
    """BatchNorm2d (training-mode batch statistics), one-pass stats, NHWC, optional fused ReLU."""
    xf = x.astype(jnp.float32)
    mean = jnp.mean(xf, axis=(0, 1, 2))
    meansq = jnp.mean(xf * xf, axis=(0, 1, 2))
    var = jnp.maximum(meansq - mean * mean, 0.0)
    scale = bnp['g'] * jax.lax.rsqrt(var + eps)
    shift = bnp['b'] - mean * scale
    y = xf * scale + shift
    if relu:
        y = jnp.maximum(y, 0.0)
    return y.astype(x.dtype)


def softmax(x, axis):
    x = x.astype(jnp.float32)
    m = jnp.max(x, axis=axis, keepdims=True)
    e = jnp.exp(x - m)
    return e / jnp.sum(e, axis=axis, keepdims=True)


def maxpool_3x3_s2_p1(x):
    return jax.lax.reduce_window(
        x, jnp.array(-jnp.inf, x.dtype), jax.lax.max,
        window_dimensions=(1, 3, 3, 1),
        window_strides=(1, 2, 2, 1),
        padding=((0, 0), (1, 1), (1, 1), (0, 0)))


def _adaptive_pool_matrix(o, i):
    """(o, i) averaging matrix reproducing PyTorch AdaptiveAvgPool boundaries."""
    idx = jnp.arange(i)[None, :]
    k = jnp.arange(o)[:, None]
    start = (k * i) // o
    end = -((-(k + 1) * i) // o)                     # ceil((k+1)*i/o)
    m = ((idx >= start) & (idx < end)).astype(jnp.float32)
    return m / (end - start).astype(jnp.float32)


def adaptive_avg_pool2d(x, oh, ow):
    """x: NHWC -> (N, oh, ow, C) via two small pooling matrices (no Python loops)."""
    N, H, W, C = x.shape
    ph = _adaptive_pool_matrix(oh, H)
    pw = _adaptive_pool_matrix(ow, W)
    xf = x.astype(jnp.float32)
    y = jnp.einsum('oh,nhwc->nowc', ph, xf)
    y = jnp.einsum('pw,nowc->nopc', pw, y)
    return y.astype(x.dtype)


def _resize_matrix(o, i):
    """(o, i) bilinear weight matrix, align_corners=True."""
    if i == 1 or o == 1:
        src = jnp.zeros((o,), jnp.float32)
    else:
        src = jnp.arange(o, dtype=jnp.float32) * ((i - 1) / (o - 1))
    i0 = jnp.clip(jnp.floor(src).astype(jnp.int32), 0, i - 1)
    i1 = jnp.clip(i0 + 1, 0, i - 1)
    w = src - i0.astype(jnp.float32)
    grid = jnp.arange(i)[None, :]
    return ((grid == i0[:, None]).astype(jnp.float32) * (1.0 - w)[:, None]
            + (grid == i1[:, None]).astype(jnp.float32) * w[:, None])


def interp_bilinear(x, oh, ow):
    """F.interpolate(mode='bilinear', align_corners=True), NHWC, separable matrices."""
    N, H, W, C = x.shape
    if H == oh and W == ow:
        return x
    mh = _resize_matrix(oh, H)
    mw = _resize_matrix(ow, W)
    y = jnp.einsum('oh,nhwc->nowc', mh, x.astype(jnp.float32))
    y = jnp.einsum('pw,nowc->nopc', mw, y)
    return y.astype(x.dtype)


def interp_nearest(x, oh, ow):
    """F.upsample default mode='nearest', NHWC."""
    N, H, W, C = x.shape
    if H == oh and W == ow:
        return x
    iy = jnp.clip(jnp.floor(jnp.arange(oh) * (H / oh)).astype(jnp.int32), 0, H - 1)
    ix = jnp.clip(jnp.floor(jnp.arange(ow) * (W / ow)).astype(jnp.int32), 0, W - 1)
    return x[:, iy][:, :, ix]


# ----------------------------------------------------------------------------
# Parameter initialization (deterministic, synthetic — no checkpoint load)
# ----------------------------------------------------------------------------
class KeyGen:
    def __init__(self, key):
        self._k = key

    def __call__(self):
        self._k, sub = jax.random.split(self._k)
        return sub


def init_params(key, n_channels, n_classes):
    kg = KeyGen(key)

    def cw(cout, cin, kh=1, kw=1):
        fan = cin * kh * kw
        return jax.random.normal(kg(), (cout, cin, kh, kw), jnp.float32) / math.sqrt(fan)

    def cb(cout):
        return jax.random.normal(kg(), (cout,), jnp.float32) * 0.01

    def bn(c):
        return {'g': jnp.ones((c,), jnp.float32), 'b': jnp.zeros((c,), jnp.float32)}

    def basic_block(cin, cout, stride):
        p = {'conv1_w': cw(cout, cin, 3, 3), 'bn1': bn(cout),
             'conv2_w': cw(cout, cout, 3, 3), 'bn2': bn(cout)}
        if stride != 1 or cin != cout:
            p['ds_w'] = cw(cout, cin, 1, 1)
            p['ds_bn'] = bn(cout)
        return p

    params = {
        'firstconv_w': cw(64, n_channels, 7, 7), 'firstconv_b': cb(64),
        'firstbn': bn(64),
        'layer1': [basic_block(64, 64, 1), basic_block(64, 64, 1)],
        'layer2': [basic_block(64, 128, 2), basic_block(128, 128, 1)],
        'layer3': [basic_block(128, 256, 2), basic_block(256, 256, 1)],
        'layer4': [basic_block(256, 512, 2), basic_block(512, 512, 1)],
        'edge': {
            'c1_w': cw(64, 64), 'c1_bn': bn(64),
            'c2_w': cw(64, 128), 'c2_bn': bn(64),
            'c3_w': cw(64, 256), 'c3_bn': bn(64),
            'c4_w': cw(2, 64, 3, 3), 'c4_b': cb(2),
            'c5_w': cw(2, 6), 'c5_b': cb(2),
        },
    }

    def cgr(num_in, num_s, num_n):
        return {
            'state_w': cw(num_s, num_in), 'state_b': cb(num_s),
            'proj_w': cw(num_s, num_in), 'proj_b': cb(num_s),
            'gcn1_w': cw(num_n, num_n), 'gcn1_b': cb(num_n),
            'gcn2_w': cw(num_s, num_s),
            'extend_w': cw(num_in, num_s),
            'blocker_bn': bn(num_in),
        }

    params['block1'] = cgr(512, 128, 16)
    params['block2'] = cgr(64, 64, 16)
    params['psp'] = {
        'stages': [{'w': cw(512, 512), 'bn': bn(512)} for _ in range(4)],
        'bottleneck_w': cw(512, 512 + 4 * 512, 3, 3),
        'bottleneck_bn': bn(512),
    }
    params['dec'] = {
        'c1_w': cw(256, 512), 'c1_bn': bn(256),
        'c2_w': cw(48, 64), 'c2_bn': bn(48),
        'c3a_w': cw(256, 304), 'c3a_bn': bn(256),
        'c3b_w': cw(256, 256), 'c3b_bn': bn(256),
        'c4_w': cw(n_classes, 256), 'c4_b': cb(n_classes),
    }
    params['out_w'] = cw(1, 2)
    params['out_b'] = cb(1)
    params['out1_w'] = cw(1, 258)
    params['out1_b'] = cb(1)
    return params


# ----------------------------------------------------------------------------
# Module forward passes (all activations NHWC bf16)
# ----------------------------------------------------------------------------
def basic_block_fwd(p, x, stride):
    out = batchnorm(conv2d(x, p['conv1_w'], None, stride, 1), p['bn1'], relu=True)
    out = batchnorm(conv2d(out, p['conv2_w'], None, 1, 1), p['bn2'])
    if 'ds_w' in p:
        sc = batchnorm(conv2d(x, p['ds_w'], None, stride, 0), p['ds_bn'])
    else:
        sc = x
    return relu(out + sc)


def layer_fwd(plist, x, stride):
    x = basic_block_fwd(plist[0], x, stride)
    x = basic_block_fwd(plist[1], x, 1)
    return x


def edge_fwd(p, x1, x2, x3):
    h, w = x1.shape[1], x1.shape[2]
    e1f = batchnorm(conv2d(x1, p['c1_w']), p['c1_bn'])
    e1 = conv2d(e1f, p['c4_w'], p['c4_b'], 1, 1)
    e2f = batchnorm(conv2d(x2, p['c2_w']), p['c2_bn'])
    e2 = conv2d(e2f, p['c4_w'], p['c4_b'], 1, 1)
    e3f = batchnorm(conv2d(x3, p['c3_w']), p['c3_bn'])
    e3 = conv2d(e3f, p['c4_w'], p['c4_b'], 1, 1)
    e2f = interp_bilinear(e2f, h, w)
    e3f = interp_bilinear(e3f, h, w)
    e2 = interp_bilinear(e2, h, w)
    e3 = interp_bilinear(e3, h, w)
    edge = jnp.concatenate([e1, e2, e3], axis=-1)
    edge_fea = jnp.concatenate([e1f, e2f, e3f], axis=-1)
    edge = conv2d(edge, p['c5_w'], p['c5_b'])
    return edge, edge_fea


def psp_fwd(p, feats, sizes=(1, 2, 3, 6)):
    h, w = feats.shape[1], feats.shape[2]
    priors = []
    for sp, size in zip(p['stages'], sizes):
        y = adaptive_avg_pool2d(feats, size, size)
        y = batchnorm(conv2d(y, sp['w']), sp['bn'])
        priors.append(interp_bilinear(y, h, w))
    priors.append(feats)
    cat = jnp.concatenate(priors, axis=-1)
    return batchnorm(conv2d(cat, p['bottleneck_w'], None, 1, 1), p['bottleneck_bn'])


def gcn_fwd(p, x):
    # x: (n, num_state, num_node) f32
    xt = jnp.swapaxes(x, 1, 2)                            # (n, num_node, num_state)
    h = conv1d_k1(xt, p['gcn1_w'], p['gcn1_b'])
    h = jnp.swapaxes(h, 1, 2)
    h = h - x
    h = jnp.maximum(conv1d_k1(h, p['gcn2_w'], None), 0.0)
    return h


def cgr_fwd(p, x, edge, num_s, mids=4):
    n, h, w, c = x.shape
    num_n = mids * mids
    edge = interp_nearest(edge, h, w)                     # F.upsample default (nearest)
    edge = softmax(edge, axis=-1)
    x_state = conv2d(x, p['state_w'], p['state_b'])       # (n, h, w, num_s)
    x_state_r = jnp.transpose(x_state.reshape(n, h * w, num_s),
                              (0, 2, 1)).astype(jnp.float32)      # (n, num_s, h*w)
    x_proj = conv2d(x, p['proj_w'], p['proj_b'])
    # TODO(synk): PyTorch `x_proj * edge` multiplies (n,num_s,h,w) by (n,2,h,w),
    # which does not broadcast; we use the softmaxed foreground edge channel
    # (channel 1) as the spatial mask instead.
    x_mask = x_proj.astype(jnp.float32) * edge[..., 1:2]
    x_anchor = adaptive_avg_pool2d(x_mask, mids + 2, mids + 2)[:, 1:-1, 1:-1, :]
    x_anchor = x_anchor.reshape(n, num_n, num_s).astype(jnp.float32)   # (n, num_n, num_s)
    x_proj_flat = jnp.transpose(x_proj.reshape(n, h * w, num_s),
                                (0, 2, 1)).astype(jnp.float32)          # (n, num_s, h*w)
    # The CGR matmuls are tiny (num_n=16, small h*w): batched XLA matmuls beat
    # per-batch padded MXU launches here.
    x_proj_r = jnp.matmul(x_anchor, x_proj_flat)          # (n, num_n, h*w)
    x_proj_r = softmax(x_proj_r, axis=1)
    x_n_state = jnp.matmul(x_state_r, jnp.swapaxes(x_proj_r, 1, 2))   # (n, num_s, num_n)
    x_n_rel = gcn_fwd(p, x_n_state)
    x_state_r2 = jnp.matmul(x_n_rel, x_proj_r)            # (n, num_s, h*w)
    x_state2 = jnp.transpose(x_state_r2, (0, 2, 1)).reshape(n, h, w, num_s)
    x_state2 = x_state2.astype(x.dtype)
    out = x + batchnorm(conv2d(x_state2, p['extend_w']), p['blocker_bn'])
    return out


def decoder_fwd(p, xt, xl):
    h, w = xl.shape[1], xl.shape[2]
    xt = batchnorm(conv2d(xt, p['c1_w']), p['c1_bn'])
    xt = interp_bilinear(xt, h, w)
    xl = batchnorm(conv2d(xl, p['c2_w']), p['c2_bn'])
    x = jnp.concatenate([xt, xl], axis=-1)
    x = batchnorm(conv2d(x, p['c3a_w']), p['c3a_bn'])
    x = batchnorm(conv2d(x, p['c3b_w']), p['c3b_bn'])
    seg = conv2d(x, p['c4_w'], p['c4_b'])
    return seg, x


def cgrnet_forward(params, x):
    N, C, H, W = x.shape
    # One NCHW->NHWC transpose + bf16 cast for the whole network.
    xh = jnp.transpose(x, (0, 2, 3, 1)).astype(jnp.bfloat16)
    y = conv2d(xh, params['firstconv_w'], params['firstconv_b'], stride=2, padding=3)
    y = batchnorm(y, params['firstbn'], relu=True)
    x1 = maxpool_3x3_s2_p1(y)
    x2 = layer_fwd(params['layer1'], x1, 1)
    x3 = layer_fwd(params['layer2'], x2, 2)
    x4 = layer_fwd(params['layer3'], x3, 2)
    x5 = layer_fwd(params['layer4'], x4, 2)
    x6 = psp_fwd(params['psp'], x5)
    edge, edge_fea = edge_fwd(params['edge'], x2, x3, x4)
    edge_d = jax.lax.stop_gradient(edge)                  # edge.detach()
    x11 = cgr_fwd(params['block1'], x6, edge_d, num_s=128)
    x2b = cgr_fwd(params['block2'], x2, edge_d, num_s=64)
    seg_unused, xd = decoder_fwd(params['dec'], x11, x2b)   # `seg` is overwritten in torch
    segc = jnp.concatenate([xd, edge], axis=-1)
    segc = conv2d(segc, params['out1_w'], params['out1_b'])
    edge_out = conv2d(edge, params['out_w'], params['out_b'])
    edge_out = interp_bilinear(edge_out, H, W)
    segc = interp_bilinear(segc, H, W)
    # Back to NCHW f32 once at the output.
    edge_out = jnp.transpose(edge_out, (0, 3, 1, 2)).astype(jnp.float32)
    segc = jnp.transpose(segc, (0, 3, 1, 2)).astype(jnp.float32)
    return edge_out, segc


if __name__ == "__main__":
    key = jax.random.PRNGKey(0)
    pkey, xkey = jax.random.split(key)
    n_channels, n_classes = 3, 2
    params = prepare_params(init_params(pkey, n_channels, n_classes))
    # Small input consistent with the module: NCHW, spatial 64 so the deepest
    # feature map (H/32 = 2) is still valid for all adaptive pools.
    x = jax.random.normal(xkey, (2, n_channels, 64, 64), jnp.float32)
    fwd = jax.jit(cgrnet_forward)
    edge_out, seg = fwd(params, x)
    jax.block_until_ready((edge_out, seg))
    assert edge_out.shape == (2, 1, 64, 64), edge_out.shape
    assert seg.shape == (2, 1, 64, 64), seg.shape
    assert bool(jnp.all(jnp.isfinite(edge_out))) and bool(jnp.all(jnp.isfinite(seg)))
    print("KERNEL_OK")
</pallas_src>

<mosaic_0001>
module attributes {stable_mosaic.version = 11 : i64} {
  func.func @_mm_bias_kernel(%arg0: i32, %arg1: i32, %arg2: memref<512x160xbf16, #tpu.memory_space<vmem>>, %arg3: memref<160x64xbf16, #tpu.memory_space<vmem>>, %arg4: memref<1x64xf32, #tpu.memory_space<vmem>>, %arg5: memref<512x64xbf16, #tpu.memory_space<vmem>>) attributes {dimension_semantics = [#tpu.dimension_semantics<parallel>, #tpu.dimension_semantics<parallel>], iteration_bounds = array<i64: 4, 1>, scalar_prefetch = 0 : i64, scratch_operands = 0 : i64, tpu.core_type = #tpu.core_type<tc>, window_params = [{transform_indices = @transform_0, window_bounds = array<i64: 512, 160>}, {transform_indices = @transform_1, window_bounds = array<i64: 160, 64>}, {transform_indices = @transform_2, window_bounds = array<i64: 1, 64>}, {transform_indices = @transform_3, window_bounds = array<i64: 512, 64>}]} {
    %c0 = arith.constant 0 : index
    %c0_0 = arith.constant 0 : index
    %0 = vector.load %arg2[%c0, %c0_0] : memref<512x160xbf16, #tpu.memory_space<vmem>>, vector<512x160xbf16>
    %c0_1 = arith.constant 0 : index
    %c0_2 = arith.constant 0 : index
    %1 = vector.load %arg3[%c0_1, %c0_2] : memref<160x64xbf16, #tpu.memory_space<vmem>>, vector<160x64xbf16>
    %cst = arith.constant dense<0.000000e+00> : vector<512x64xf32>
    %2 = tpu.matmul %0, %1, %cst {dimension_numbers = #tpu.dot_dimension_numbers<[1], [0], [0], [1], [0, 0, 1, 1], [], []>} : vector<512x160xbf16>, vector<160x64xbf16>, vector<512x64xf32> -> vector<512x64xf32>
    %c0_3 = arith.constant 0 : index
    %c0_4 = arith.constant 0 : index
    %3 = vector.load %arg4[%c0_3, %c0_4] : memref<1x64xf32, #tpu.memory_space<vmem>>, vector<1x64xf32>
    %4 = vector.broadcast %3 : vector<1x64xf32> to vector<512x64xf32>
    %5 = arith.addf %2, %4 : vector<512x64xf32>
    %6 = arith.truncf %5 : vector<512x64xf32> to vector<512x64xbf16>
    %c0_5 = arith.constant 0 : index
    %c0_6 = arith.constant 0 : index
    %7 = vector.load %arg5[%c0_5, %c0_6] : memref<512x64xbf16, #tpu.memory_space<vmem>>, vector<512x64xbf16>
    tpu.vector_store %arg5[%c0_5, %c0_6], %6 {strides = array<i32>} : memref<512x64xbf16, #tpu.memory_space<vmem>>, vector<512x64xbf16>,
    return
  }
  func.func @transform_0(%arg0: i32, %arg1: i32) -> (i32, i32) {
    %c0_i32 = arith.constant 0 : i32
    %c0_i32_0 = arith.constant 0 : i32
    return %arg0, %c0_i32 : i32, i32
  }
  func.func @transform_1(%arg0: i32, %arg1: i32) -> (i32, i32) {
    %c0_i32 = arith.constant 0 : i32
    %c0_i32_0 = arith.constant 0 : i32
    return %c0_i32, %arg1 : i32, i32
  }
  func.func @transform_2(%arg0: i32, %arg1: i32) -> (i32, i32) {
    %c0_i32 = arith.constant 0 : i32
    %c0_i32_0 = arith.constant 0 : i32
    return %c0_i32, %arg1 : i32, i32
  }
  func.func @transform_3(%arg0: i32, %arg1: i32) -> (i32, i32) {
    %c0_i32 = arith.constant 0 : i32
    return %arg0, %arg1 : i32, i32
  }
}

module attributes {stable_mosaic.version = 11 : i64} {
  func.func @_mm_bias_kernel(%arg0: i32, %arg1: i32, %arg2: memref<256x576xbf16, #tpu.memory_space<vmem>>, %arg3: memref<576x64xbf16, #tpu.memory_space<vmem>>, %arg4: memref<1x64xf32, #tpu.memory_space<vmem>>, %arg5: memref<256x64xbf16, #tpu.memory_space<vmem>>) attributes {dimension_semantics = [#tpu.dimension_semantics<parallel>, #tpu.dimension_semantics<parallel>], iteration_bounds = array<i64: 2, 1>, scalar_prefetch = 0 : i64, scratch_operands = 0 : i64, tpu.core_type = #tpu.core_type<tc>, window_params = [{transform_indices = @transform_0, window_bounds = array<i64: 256, 576>}, {transform_indices = @transform_1, window_bounds = array<i64: 576, 64>}, {transform_indices = @transform_2, window_bounds = array<i64: 1, 64>}, {transform_indices = @transform_3, window_bounds = array<i64: 256, 64>}]} {
    %c0 = arith.constant 0 : index
    %c0_0 = arith.constant 0 : index
    %0 = vector.load %arg2[%c0, %c0_0] : memref<256x576xbf16, #tpu.memory_space<vmem>>, vector<256x576xbf16>
    %c0_1 = arith.constant 0 : index
    %c0_2 = arith.constant 0 : index
    %1 = vector.load %arg3[%c0_1, %c0_2] : memref<576x64xbf16, #tpu.memory_space<vmem>>, vector<576x64xbf16>
    %cst = arith.constant dense<0.000000e+00> : vector<256x64xf32>
    %2 = tpu.matmul %0, %1, %cst {dimension_numbers = #tpu.dot_dimension_numbers<[1], [0], [0], [1], [0, 0, 1, 1], [], []>} : vector<256x576xbf16>, vector<576x64xbf16>, vector<256x64xf32> -> vector<256x64xf32>
    %c0_3 = arith.constant 0 : index
    %c0_4 = arith.constant 0 : index
    %3 = vector.load %arg4[%c0_3, %c0_4] : memref<1x64xf32, #tpu.memory_space<vmem>>, vector<1x64xf32>
    %4 = vector.broadcast %3 : vector<1x64xf32> to vector<256x64xf32>
    %5 = arith.addf %2, %4 : vector<256x64xf32>
    %6 = arith.truncf %5 : vector<256x64xf32> to vector<256x64xbf16>
    %c0_5 = arith.constant 0 : index
    %c0_6 = arith.constant 0 : index
    %7 = vector.load %arg5[%c0_5, %c0_6] : memref<256x64xbf16, #tpu.memory_space<vmem>>, vector<256x64xbf16>
    tpu.vector_store %arg5[%c0_5, %c0_6], %6 {strides = array<i32>} : memref<256x64xbf16, #tpu.memory_space<vmem>>, vector<256x64xbf16>,
    return
  }
  func.func @transform_0(%arg0: i32, %arg1: i32) -> (i32, i32) {
    %c0_i32 = arith.constant 0 : i32
    %c0_i32_0 = arith.constant 0 : i32
    return %arg0, %c0_i32 : i32, i32
  }
  func.func @transform_1(%arg0: i32, %arg1: i32) -> (i32, i32) {
    %c0_i32 = arith.constant 0 : i32
    %c0_i32_0 = arith.constant 0 : i32
    return %c0_i32, %arg1 : i32, i32
  }
  func.func @transform_2(%arg0: i32, %arg1: i32) -> (i32, i32) {
    %c0_i32 = arith.constant 0 : i32
    %c0_i32_0 = arith.constant 0 : i32
    return %c0_i32, %arg1 : i32, i32
  }
  func.func @transform_3(%arg0: i32, %arg1: i32) -> (i32, i32) {
    %c0_i32 = arith.constant 0 : i32
    return %arg0, %arg1 : i32, i32
  }
}

module attributes {stable_mosaic.version = 11 : i64} {
  func.func @_mm_bias_kernel(%arg0: i32, %arg1: i32, %arg2: memref<256x576xbf16, #tpu.memory_space<vmem>>, %arg3: memref<576x64xbf16, #tpu.memory_space<vmem>>, %arg4: memref<1x64xf32, #tpu.memory_space<vmem>>, %arg5: memref<256x64xbf16, #tpu.memory_space<vmem>>) attributes {dimension_semantics = [#tpu.dimension_semantics<parallel>, #tpu.dimension_semantics<parallel>], iteration_bounds = array<i64: 2, 1>, scalar_prefetch = 0 : i64, scratch_operands = 0 : i64, tpu.core_type = #tpu.core_type<tc>, window_params = [{transform_indices = @transform_0, window_bounds = array<i64: 256, 576>}, {transform_indices = @transform_1, window_bounds = array<i64: 576, 64>}, {transform_indices = @transform_2, window_bounds = array<i64: 1, 64>}, {transform_indices = @transform_3, window_bounds = array<i64: 256, 64>}]} {
    %c0 = arith.constant 0 : index
    %c0_0 = arith.constant 0 : index
    %0 = vector.load %arg2[%c0, %c0_0] : memref<256x576xbf16, #tpu.memory_space<vmem>>, vector<256x576xbf16>
    %c0_1 = arith.constant 0 : index
    %c0_2 = arith.constant 0 : index
    %1 = vector.load %arg3[%c0_1, %c0_2] : memref<576x64xbf16, #tpu.memory_space<vmem>>, vector<576x64xbf16>
    %cst = arith.constant dense<0.000000e+00> : vector<256x64xf32>
    %2 = tpu.matmul %0, %1, %cst {dimension_numbers = #tpu.dot_dimension_numbers<[1], [0], [0], [1], [0, 0, 1, 1], [], []>} : vector<256x576xbf16>, vector<576x64xbf16>, vector<256x64xf32> -> vector<256x64xf32>
    %c0_3 = arith.constant 0 : index
    %c0_4 = arith.constant 0 : index
    %3 = vector.load %arg4[%c0_3, %c0_4] : memref<1x64xf32, #tpu.memory_space<vmem>>, vector<1x64xf32>
    %4 = vector.broadcast %3 : vector<1x64xf32> to vector<256x64xf32>
    %5 = arith.addf %2, %4 : vector<256x64xf32>
    %6 = arith.truncf %5 : vector<256x64xf32> to vector<256x64xbf16>
    %c0_5 = arith.constant 0 : index
    %c0_6 = arith.constant 0 : index
    %7 = vector.load %arg5[%c0_5, %c0_6] : memref<256x64xbf16, #tpu.memory_space<vmem>>, vector<256x64xbf16>
    tpu.vector_store %arg5[%c0_5, %c0_6], %6 {strides = array<i32>} : memref<256x64xbf16, #tpu.memory_space<vmem>>, vector<256x64xbf16>,
    return
  }
  func.func @transform_0(%arg0: i32, %arg1: i32) -> (i32, i32) {
    %c0_i32 = arith.constant 0 : i32
    %c0_i32_0 = arith.constant 0 : i32
    return %arg0, %c0_i32 : i32, i32
  }
  func.func @transform_1(%arg0: i32, %arg1: i32) -> (i32, i32) {
    %c0_i32 = arith.constant 0 : i32
    %c0_i32_0 = arith.constant 0 : i32
    return %c0_i32, %arg1 : i32, i32
  }
  func.func @transform_2(%arg0: i32, %arg1: i32) -> (i32, i32) {
    %c0_i32 = arith.constant 0 : i32
    %c0_i32_0 = arith.constant 0 : i32
    return %c0_i32, %arg1 : i32, i32
  }
  func.func @transform_3(%arg0: i32, %arg1: i32) -> (i32, i32) {
    %c0_i32 = arith.constant 0 : i32
    return %arg0, %arg1 : i32, i32
  }
}

module attributes {stable_mosaic.version = 11 : i64} {
  func.func @_mm_bias_kernel(%arg0: i32, %arg1: i32, %arg2: memref<256x64xbf16, #tpu.memory_space<vmem>>, %arg3: memref<64x64xbf16, #tpu.memory_space<vmem>>, %arg4: memref<1x64xf32, #tpu.memory_space<vmem>>, %arg5: memref<256x64xbf16, #tpu.memory_space<vmem>>) attributes {dimension_semantics = [#tpu.dimension_semantics<parallel>, #tpu.dimension_semantics<parallel>], iteration_bounds = array<i64: 2, 1>, scalar_prefetch = 0 : i64, scratch_operands = 0 : i64, tpu.core_type = #tpu.core_type<tc>, window_params = [{transform_indices = @transform_0, window_bounds = array<i64: 256, 64>}, {transform_indices = @transform_1, window_bounds = array<i64: 64, 64>}, {transform_indices = @transform_2, window_bounds = array<i64: 1, 64>}, {transform_indices = @transform_3, window_bounds = array<i64: 256, 64>}]} {
    %c0 = arith.constant 0 : index
    %c0_0 = arith.constant 0 : index
    %0 = vector.load %arg2[%c0, %c0_0] : memref<256x64xbf16, #tpu.memory_space<vmem>>, vector<256x64xbf16>
    %c0_1 = arith.constant 0 : index
    %c0_2 = arith.constant 0 : index
    %1 = vector.load %arg3[%c0_1, %c0_2] : memref<64x64xbf16, #tpu.memory_space<vmem>>, vector<64x64xbf16>
    %cst = arith.constant dense<0.000000e+00> : vector<256x64xf32>
    %2 = tpu.matmul %0, %1, %cst {dimension_numbers = #tpu.dot_dimension_numbers<[1], [0], [0], [1], [0, 0, 1, 1], [], []>} : vector<256x64xbf16>, vector<64x64xbf16>, vector<256x64xf32> -> vector<256x64xf32>
    %c0_3 = arith.constant 0 : index
    %c0_4 = arith.constant 0 : index
    %3 = vector.load %arg4[%c0_3, %c0_4] : memref<1x64xf32, #tpu.memory_space<vmem>>, vector<1x64xf32>
    %4 = vector.broadcast %3 : vector<1x64xf32> to vector<256x64xf32>
    %5 = arith.addf %2, %4 : vector<256x64xf32>
    %6 = arith.truncf %5 : vector<256x64xf32> to vector<256x64xbf16>
    %c0_5 = arith.constant 0 : index
    %c0_6 = arith.constant 0 : index
    %7 = vector.load %arg5[%c0_5, %c0_6] : memref<256x64xbf16, #tpu.memory_space<vmem>>, vector<256x64xbf16>
    tpu.vector_store %arg5[%c0_5, %c0_6], %6 {strides = array<i32>} : memref<256x64xbf16, #tpu.memory_space<vmem>>, vector<256x64xbf16>,
    return
  }
  func.func @transform_0(%arg0: i32, %arg1: i32) -> (i32, i32) {
    %c0_i32 = arith.constant 0 : i32
    %c0_i32_0 = arith.constant 0 : i32
    return %arg0, %c0_i32 : i32, i32
  }
  func.func @transform_1(%arg0: i32, %arg1: i32) -> (i32, i32) {
    %c0_i32 = arith.constant 0 : i32
    %c0_i32_0 = arith.constant 0 : i32
    return %c0_i32, %arg1 : i32, i32
  }
  func.func @transform_2(%arg0: i32, %arg1: i32) -> (i32, i32) {
    %c0_i32 = arith.constant 0 : i32
    %c0_i32_0 = arith.constant 0 : i32
    return %c0_i32, %arg1 : i32, i32
  }
  func.func @transform_3(%arg0: i32, %arg1: i32) -> (i32, i32) {
    %c0_i32 = arith.constant 0 : i32
    return %arg0, %arg1 : i32, i32
  }
}

module attributes {stable_mosaic.version = 11 : i64} {
  func.func @_mm_bias_kernel(%arg0: i32, %arg1: i32, %arg2: memref<128x576xbf16, #tpu.memory_space<vmem>>, %arg3: memref<576x128xbf16, #tpu.memory_space<vmem>>, %arg4: memref<1x128xf32, #tpu.memory_space<vmem>>, %arg5: memref<128x128xbf16, #tpu.memory_space<vmem>>) attributes {dimension_semantics = [#tpu.dimension_semantics<parallel>, #tpu.dimension_semantics<parallel>], iteration_bounds = array<i64: 1, 1>, scalar_prefetch = 0 : i64, scratch_operands = 0 : i64, tpu.core_type = #tpu.core_type<tc>, window_params = [{transform_indices = @transform_0, window_bounds = array<i64: 128, 576>}, {transform_indices = @transform_1, window_bounds = array<i64: 576, 128>}, {transform_indices = @transform_2, window_bounds = array<i64: 1, 128>}, {transform_indices = @transform_3, window_bounds = array<i64: 128, 128>}]} {
    %c0 = arith.constant 0 : index
    %c0_0 = arith.constant 0 : index
    %0 = vector.load %arg2[%c0, %c0_0] : memref<128x576xbf16, #tpu.memory_space<vmem>>, vector<128x576xbf16>
    %c0_1 = arith.constant 0 : index
    %c0_2 = arith.constant 0 : index
    %1 = vector.load %arg3[%c0_1, %c0_2] : memref<576x128xbf16, #tpu.memory_space<vmem>>, vector<576x128xbf16>
    %cst = arith.constant dense<0.000000e+00> : vector<128x128xf32>
    %2 = tpu.matmul %0, %1, %cst {dimension_numbers = #tpu.dot_dimension_numbers<[1], [0], [0], [1], [0, 0, 1, 1], [], []>} : vector<128x576xbf16>, vector<576x128xbf16>, vector<128x128xf32> -> vector<128x128xf32>
    %c0_3 = arith.constant 0 : index
    %c0_4 = arith.constant 0 : index
    %3 = vector.load %arg4[%c0_3, %c0_4] : memref<1x128xf32, #tpu.memory_space<vmem>>, vector<1x128xf32>
    %4 = vector.broadcast %3 : vector<1x128xf32> to vector<128x128xf32>
    %5 = arith.addf %2, %4 : vector<128x128xf32>
    %6 = arith.truncf %5 : vector<128x128xf32> to vector<128x128xbf16>
    %c0_5 = arith.constant 0 : index
    %c0_6 = arith.constant 0 : index
    %7 = vector.load %arg5[%c0_5, %c0_6] : memref<128x128xbf16, #tpu.memory_space<vmem>>, vector<128x128xbf16>
    tpu.vector_store %arg5[%c0_5, %c0_6], %6 {strides = array<i32>} : memref<128x128xbf16, #tpu.memory_space<vmem>>, vector<128x128xbf16>,
    return
  }
  func.func @transform_0(%arg0: i32, %arg1: i32) -> (i32, i32) {
    %c0_i32 = arith.constant 0 : i32
    %c0_i32_0 = arith.constant 0 : i32
    return %arg0, %c0_i32 : i32, i32
  }
  func.func @transform_1(%arg0: i32, %arg1: i32) -> (i32, i32) {
    %c0_i32 = arith.constant 0 : i32
    %c0_i32_0 = arith.constant 0 : i32
    return %c0_i32, %arg1 : i32, i32
  }
  func.func @transform_2(%arg0: i32, %arg1: i32) -> (i32, i32) {
    %c0_i32 = arith.constant 0 : i32
    %c0_i32_0 = arith.constant 0 : i32
    return %c0_i32, %arg1 : i32, i32
  }
  func.func @transform_3(%arg0: i32, %arg1: i32) -> (i32, i32) {
    %c0_i32 = arith.constant 0 : i32
    return %arg0, %arg1 : i32, i32
  }
}

module attributes {stable_mosaic.version = 11 : i64} {
  func.func @_mm_bias_kernel(%arg0: i32, %arg1: i32, %arg2: memref<128x64xbf16, #tpu.memory_space<vmem>>, %arg3: memref<64x128xbf16, #tpu.memory_space<vmem>>, %arg4: memref<1x128xf32, #tpu.memory_space<vmem>>, %arg5: memref<128x128xbf16, #tpu.memory_space<vmem>>) attributes {dimension_semantics = [#tpu.dimension_semantics<parallel>, #tpu.dimension_semantics<parallel>], iteration_bounds = array<i64: 1, 1>, scalar_prefetch = 0 : i64, scratch_operands = 0 : i64, tpu.core_type = #tpu.core_type<tc>, window_params = [{transform_indices = @transform_0, window_bounds = array<i64: 128, 64>}, {transform_indices = @transform_1, window_bounds = array<i64: 64, 128>}, {transform_indices = @transform_2, window_bounds = array<i64: 1, 128>}, {transform_indices = @transform_3, window_bounds = array<i64: 128, 128>}]} {
    %c0 = arith.constant 0 : index
    %c0_0 = arith.constant 0 : index
    %0 = vector.load %arg2[%c0, %c0_0] : memref<128x64xbf16, #tpu.memory_space<vmem>>, vector<128x64xbf16>
    %c0_1 = arith.constant 0 : index
    %c0_2 = arith.constant 0 : index
    %1 = vector.load %arg3[%c0_1, %c0_2] : memref<64x128xbf16, #tpu.memory_space<vmem>>, vector<64x128xbf16>
    %cst = arith.constant dense<0.000000e+00> : vector<128x128xf32>
    %2 = tpu.matmul %0, %1, %cst {dimension_numbers = #tpu.dot_dimension_numbers<[1], [0], [0], [1], [0, 0, 1, 1], [], []>} : vector<128x64xbf16>, vector<64x128xbf16>, vector<128x128xf32> -> vector<128x128xf32>
    %c0_3 = arith.constant 0 : index
    %c0_4 = arith.constant 0 : index
    %3 = vector.load %arg4[%c0_3, %c0_4] : memref<1x128xf32, #tpu.memory_space<vmem>>, vector<1x128xf32>
    %4 = vector.broadcast %3 : vector<1x128xf32> to vector<128x128xf32>
    %5 = arith.addf %2, %4 : vector<128x128xf32>
    %6 = arith.truncf %5 : vector<128x128xf32> to vector<128x128xbf16>
    %c0_5 = arith.constant 0 : index
    %c0_6 = arith.constant 0 : index
    %7 = vector.load %arg5[%c0_5, %c0_6] : memref<128x128xbf16, #tpu.memory_space<vmem>>, vector<128x128xbf16>
    tpu.vector_store %arg5[%c0_5, %c0_6], %6 {strides = array<i32>} : memref<128x128xbf16, #tpu.memory_space<vmem>>, vector<128x128xbf16>,
    return
  }
  func.func @transform_0(%arg0: i32, %arg1: i32) -> (i32, i32) {
    %c0_i32 = arith.constant 0 : i32
    %c0_i32_0 = arith.constant 0 : i32
    return %arg0, %c0_i32 : i32, i32
  }
  func.func @transform_1(%arg0: i32, %arg1: i32) -> (i32, i32) {
    %c0_i32 = arith.constant 0 : i32
    %c0_i32_0 = arith.constant 0 : i32
    return %c0_i32, %arg1 : i32, i32
  }
  func.func @transform_2(%arg0: i32, %arg1: i32) -> (i32, i32) {
    %c0_i32 = arith.constant 0 : i32
    %c0_i32_0 = arith.constant 0 : i32
    return %c0_i32, %arg1 : i32, i32
  }
  func.func @transform_3(%arg0: i32, %arg1: i32) -> (i32, i32) {
    %c0_i32 = arith.constant 0 : i32
    return %arg0, %arg1 : i32, i32
  }
}

module attributes {stable_mosaic.version = 11 : i64} {
  func.func @_mm_bias_kernel(%arg0: i32, %arg1: i32, %arg2: memref<128x1152xbf16, #tpu.memory_space<vmem>>, %arg3: memref<1152x128xbf16, #tpu.memory_space<vmem>>, %arg4: memref<1x128xf32, #tpu.memory_space<vmem>>, %arg5: memref<128x128xbf16, #tpu.memory_space<vmem>>) attributes {dimension_semantics = [#tpu.dimension_semantics<parallel>, #tpu.dimension_semantics<parallel>], iteration_bounds = array<i64: 1, 1>, scalar_prefetch = 0 : i64, scratch_operands = 0 : i64, tpu.core_type = #tpu.core_type<tc>, window_params = [{transform_indices = @transform_0, window_bounds = array<i64: 128, 1152>}, {transform_indices = @transform_1, window_bounds = array<i64: 1152, 128>}, {transform_indices = @transform_2, window_bounds = array<i64: 1, 128>}, {transform_indices = @transform_3, window_bounds = array<i64: 128, 128>}]} {
    %c0 = arith.constant 0 : index
    %c0_0 = arith.constant 0 : index
    %0 = vector.load %arg2[%c0, %c0_0] : memref<128x1152xbf16, #tpu.memory_space<vmem>>, vector<128x1152xbf16>
    %c0_1 = arith.constant 0 : index
    %c0_2 = arith.constant 0 : index
    %1 = vector.load %arg3[%c0_1, %c0_2] : memref<1152x128xbf16, #tpu.memory_space<vmem>>, vector<1152x128xbf16>
    %cst = arith.constant dense<0.000000e+00> : vector<128x128xf32>
    %2 = tpu.matmul %0, %1, %cst {dimension_numbers = #tpu.dot_dimension_numbers<[1], [0], [0], [1], [0, 0, 1, 1], [], []>} : vector<128x1152xbf16>, vector<1152x128xbf16>, vector<128x128xf32> -> vector<128x128xf32>
    %c0_3 = arith.constant 0 : index
    %c0_4 = arith.constant 0 : index
    %3 = vector.load %arg4[%c0_3, %c0_4] : memref<1x128xf32, #tpu.memory_space<vmem>>, vector<1x128xf32>
    %4 = vector.broadcast %3 : vector<1x128xf32> to vector<128x128xf32>
    %5 = arith.addf %2, %4 : vector<128x128xf32>
    %6 = arith.truncf %5 : vector<128x128xf32> to vector<128x128xbf16>
    %c0_5 = arith.constant 0 : index
    %c0_6 = arith.constant 0 : index
    %7 = vector.load %arg5[%c0_5, %c0_6] : memref<128x128xbf16, #tpu.memory_space<vmem>>, vector<128x128xbf16>
    tpu.vector_store %arg5[%c0_5, %c0_6], %6 {strides = array<i32>} : memref<128x128xbf16, #tpu.memory_space<vmem>>, vector<128x128xbf16>,
    return
  }
  func.func @transform_0(%arg0: i32, %arg1: i32) -> (i32, i32) {
    %c0_i32 = arith.constant 0 : i32
    %c0_i32_0 = arith.constant 0 : i32
    return %arg0, %c0_i32 : i32, i32
  }
  func.func @transform_1(%arg0: i32, %arg1: i32) -> (i32, i32) {
    %c0_i32 = arith.constant 0 : i32
    %c0_i32_0 = arith.constant 0 : i32
    return %c0_i32, %arg1 : i32, i32
  }
  func.func @transform_2(%arg0: i32, %arg1: i32) -> (i32, i32) {
    %c0_i32 = arith.constant 0 : i32
    %c0_i32_0 = arith.constant 0 : i32
    return %c0_i32, %arg1 : i32, i32
  }
  func.func @transform_3(%arg0: i32, %arg1: i32) -> (i32, i32) {
    %c0_i32 = arith.constant 0 : i32
    return %arg0, %arg1 : i32, i32
  }
}

module attributes {stable_mosaic.version = 11 : i64} {
  func.func @_mm_bias_kernel(%arg0: i32, %arg1: i32, %arg2: memref<128x128xbf16, #tpu.memory_space<vmem>>, %arg3: memref<128x64xbf16, #tpu.memory_space<vmem>>, %arg4: memref<1x64xf32, #tpu.memory_space<vmem>>, %arg5: memref<128x64xbf16, #tpu.memory_space<vmem>>) attributes {dimension_semantics = [#tpu.dimension_semantics<parallel>, #tpu.dimension_semantics<parallel>], iteration_bounds = array<i64: 1, 1>, scalar_prefetch = 0 : i64, scratch_operands = 0 : i64, tpu.core_type = #tpu.core_type<tc>, window_params = [{transform_indices = @transform_0, window_bounds = array<i64: 128, 128>}, {transform_indices = @transform_1, window_bounds = array<i64: 128, 64>}, {transform_indices = @transform_2, window_bounds = array<i64: 1, 64>}, {transform_indices = @transform_3, window_bounds = array<i64: 128, 64>}]} {
    %c0 = arith.constant 0 : index
    %c0_0 = arith.constant 0 : index
    %0 = vector.load %arg2[%c0, %c0_0] : memref<128x128xbf16, #tpu.memory_space<vmem>>, vector<128x128xbf16>
    %c0_1 = arith.constant 0 : index
    %c0_2 = arith.constant 0 : index
    %1 = vector.load %arg3[%c0_1, %c0_2] : memref<128x64xbf16, #tpu.memory_space<vmem>>, vector<128x64xbf16>
    %cst = arith.constant dense<0.000000e+00> : vector<128x64xf32>
    %2 = tpu.matmul %0, %1, %cst {dimension_numbers = #tpu.dot_dimension_numbers<[1], [0], [0], [1], [0, 0, 1, 1], [], []>} : vector<128x128xbf16>, vector<128x64xbf16>, vector<128x64xf32> -> vector<128x64xf32>
    %c0_3 = arith.constant 0 : index
    %c0_4 = arith.constant 0 : index
    %3 = vector.load %arg4[%c0_3, %c0_4] : memref<1x64xf32, #tpu.memory_space<vmem>>, vector<1x64xf32>
    %4 = vector.broadcast %3 : vector<1x64xf32> to vector<128x64xf32>
    %5 = arith.addf %2, %4 : vector<128x64xf32>
    %6 = arith.truncf %5 : vector<128x64xf32> to vector<128x64xbf16>
    %c0_5 = arith.constant 0 : index
    %c0_6 = arith.constant 0 : index
    %7 = vector.load %arg5[%c0_5, %c0_6] : memref<128x64xbf16, #tpu.memory_space<vmem>>, vector<128x64xbf16>
    tpu.vector_store %arg5[%c0_5, %c0_6], %6 {strides = array<i32>} : memref<128x64xbf16, #tpu.memory_space<vmem>>, vector<128x64xbf16>,
    return
  }
  func.func @transform_0(%arg0: i32, %arg1: i32) -> (i32, i32) {
    %c0_i32 = arith.constant 0 : i32
    %c0_i32_0 = arith.constant 0 : i32
    return %arg0, %c0_i32 : i32, i32
  }
  func.func @transform_1(%arg0: i32, %arg1: i32) -> (i32, i32) {
    %c0_i32 = arith.constant 0 : i32
    %c0_i32_0 = arith.constant 0 : i32
    return %c0_i32, %arg1 : i32, i32
  }
  func.func @transform_2(%arg0: i32, %arg1: i32) -> (i32, i32) {
    %c0_i32 = arith.constant 0 : i32
    %c0_i32_0 = arith.constant 0 : i32
    return %c0_i32, %arg1 : i32, i32
  }
  func.func @transform_3(%arg0: i32, %arg1: i32) -> (i32, i32) {
    %c0_i32 = arith.constant 0 : i32
    return %arg0, %arg1 : i32, i32
  }
}

module attributes {stable_mosaic.version = 11 : i64} {
  func.func @_mm_bias_kernel(%arg0: i32, %arg1: i32, %arg2: memref<256x64xbf16, #tpu.memory_space<vmem>>, %arg3: memref<64x64xbf16, #tpu.memory_space<vmem>>, %arg4: memref<1x64xf32, #tpu.memory_space<vmem>>, %arg5: memref<256x64xbf16, #tpu.memory_space<vmem>>) attributes {dimension_semantics = [#tpu.dimension_semantics<parallel>, #tpu.dimension_semantics<parallel>], iteration_bounds = array<i64: 2, 1>, scalar_prefetch = 0 : i64, scratch_operands = 0 : i64, tpu.core_type = #tpu.core_type<tc>, window_params = [{transform_indices = @transform_0, window_bounds = array<i64: 256, 64>}, {transform_indices = @transform_1, window_bounds = array<i64: 64, 64>}, {transform_indices = @transform_2, window_bounds = array<i64: 1, 64>}, {transform_indices = @transform_3, window_bounds = array<i64: 256, 64>}]} {
    %c0 = arith.constant 0 : index
    %c0_0 = arith.constant 0 : index
    %0 = vector.load %arg2[%c0, %c0_0] : memref<256x64xbf16, #tpu.memory_space<vmem>>, vector<256x64xbf16>
    %c0_1 = arith.constant 0 : index
    %c0_2 = arith.constant 0 : index
    %1 = vector.load %arg3[%c0_1, %c0_2] : memref<64x64xbf16, #tpu.memory_space<vmem>>, vector<64x64xbf16>
    %cst = arith.constant dense<0.000000e+00> : vector<256x64xf32>
    %2 = tpu.matmul %0, %1, %cst {dimension_numbers = #tpu.dot_dimension_numbers<[1], [0], [0], [1], [0, 0, 1, 1], [], []>} : vector<256x64xbf16>, vector<64x64xbf16>, vector<256x64xf32> -> vector<256x64xf32>
    %c0_3 = arith.constant 0 : index
    %c0_4 = arith.constant 0 : index
    %3 = vector.load %arg4[%c0_3, %c0_4] : memref<1x64xf32, #tpu.memory_space<vmem>>, vector<1x64xf32>
    %4 = vector.broadcast %3 : vector<1x64xf32> to vector<256x64xf32>
    %5 = arith.addf %2, %4 : vector<256x64xf32>
    %6 = arith.truncf %5 : vector<256x64xf32> to vector<256x64xbf16>
    %c0_5 = arith.constant 0 : index
    %c0_6 = arith.constant 0 : index
    %7 = vector.load %arg5[%c0_5, %c0_6] : memref<256x64xbf16, #tpu.memory_space<vmem>>, vector<256x64xbf16>
    tpu.vector_store %arg5[%c0_5, %c0_6], %6 {strides = array<i32>} : memref<256x64xbf16, #tpu.memory_space<vmem>>, vector<256x64xbf16>,
    return
  }
  func.func @transform_0(%arg0: i32, %arg1: i32) -> (i32, i32) {
    %c0_i32 = arith.constant 0 : i32
    %c0_i32_0 = arith.constant 0 : i32
    return %arg0, %c0_i32 : i32, i32
  }
  func.func @transform_1(%arg0: i32, %arg1: i32) -> (i32, i32) {
    %c0_i32 = arith.constant 0 : i32
    %c0_i32_0 = arith.constant 0 : i32
    return %c0_i32, %arg1 : i32, i32
  }
  func.func @transform_2(%arg0: i32, %arg1: i32) -> (i32, i32) {
    %c0_i32 = arith.constant 0 : i32
    %c0_i32_0 = arith.constant 0 : i32
    return %c0_i32, %arg1 : i32, i32
  }
  func.func @transform_3(%arg0: i32, %arg1: i32) -> (i32, i32) {
    %c0_i32 = arith.constant 0 : i32
    return %arg0, %arg1 : i32, i32
  }
}

module attributes {stable_mosaic.version = 11 : i64} {
  func.func @_mm_bias_kernel(%arg0: i32, %arg1: i32, %arg2: memref<512x304xbf16, #tpu.memory_space<vmem>>, %arg3: memref<304x128xbf16, #tpu.memory_space<vmem>>, %arg4: memref<1x128xf32, #tpu.memory_space<vmem>>, %arg5: memref<512x128xbf16, #tpu.memory_space<vmem>>) attributes {dimension_semantics = [#tpu.dimension_semantics<parallel>, #tpu.dimension_semantics<parallel>], iteration_bounds = array<i64: 1, 2>, scalar_prefetch = 0 : i64, scratch_operands = 0 : i64, tpu.core_type = #tpu.core_type<tc>, window_params = [{transform_indices = @transform_0, window_bounds = array<i64: 512, 304>}, {transform_indices = @transform_1, window_bounds = array<i64: 304, 128>}, {transform_indices = @transform_2, window_bounds = array<i64: 1, 128>}, {transform_indices = @transform_3, window_bounds = array<i64: 512, 128>}]} {
    %c0 = arith.constant 0 : index
    %c0_0 = arith.constant 0 : index
    %0 = vector.load %arg2[%c0, %c0_0] : memref<512x304xbf16, #tpu.memory_space<vmem>>, vector<512x304xbf16>
    %c0_1 = arith.constant 0 : index
    %c0_2 = arith.constant 0 : index
    %1 = vector.load %arg3[%c0_1, %c0_2] : memref<304x128xbf16, #tpu.memory_space<vmem>>, vector<304x128xbf16>
    %cst = arith.constant dense<0.000000e+00> : vector<512x128xf32>
    %2 = tpu.matmul %0, %1, %cst {dimension_numbers = #tpu.dot_dimension_numbers<[1], [0], [0], [1], [0, 0, 1, 1], [], []>} : vector<512x304xbf16>, vector<304x128xbf16>, vector<512x128xf32> -> vector<512x128xf32>
    %c0_3 = arith.constant 0 : index
    %c0_4 = arith.constant 0 : index
    %3 = vector.load %arg4[%c0_3, %c0_4] : memref<1x128xf32, #tpu.memory_space<vmem>>, vector<1x128xf32>
    %4 = vector.broadcast %3 : vector<1x128xf32> to vector<512x128xf32>
    %5 = arith.addf %2, %4 : vector<512x128xf32>
    %6 = arith.truncf %5 : vector<512x128xf32> to vector<512x128xbf16>
    %c0_5 = arith.constant 0 : index
    %c0_6 = arith.constant 0 : index
    %7 = vector.load %arg5[%c0_5, %c0_6] : memref<512x128xbf16, #tpu.memory_space<vmem>>, vector<512x128xbf16>
    tpu.vector_store %arg5[%c0_5, %c0_6], %6 {strides = array<i32>} : memref<512x128xbf16, #tpu.memory_space<vmem>>, vector<512x128xbf16>,
    return
  }
  func.func @transform_0(%arg0: i32, %arg1: i32) -> (i32, i32) {
    %c0_i32 = arith.constant 0 : i32
    %c0_i32_0 = arith.constant 0 : i32
    return %arg0, %c0_i32 : i32, i32
  }
  func.func @transform_1(%arg0: i32, %arg1: i32) -> (i32, i32) {
    %c0_i32 = arith.constant 0 : i32
    %c0_i32_0 = arith.constant 0 : i32
    return %c0_i32, %arg1 : i32, i32
  }
  func.func @transform_2(%arg0: i32, %arg1: i32) -> (i32, i32) {
    %c0_i32 = arith.constant 0 : i32
    %c0_i32_0 = arith.constant 0 : i32
    return %c0_i32, %arg1 : i32, i32
  }
  func.func @transform_3(%arg0: i32, %arg1: i32) -> (i32, i32) {
    %c0_i32 = arith.constant 0 : i32
    return %arg0, %arg1 : i32, i32
  }
}

module attributes {stable_mosaic.version = 11 : i64} {
  func.func @_mm_bias_kernel(%arg0: i32, %arg1: i32, %arg2: memref<512x256xbf16, #tpu.memory_space<vmem>>, %arg3: memref<256x128xbf16, #tpu.memory_space<vmem>>, %arg4: memref<1x128xf32, #tpu.memory_space<vmem>>, %arg5: memref<512x128xbf16, #tpu.memory_space<vmem>>) attributes {dimension_semantics = [#tpu.dimension_semantics<parallel>, #tpu.dimension_semantics<parallel>], iteration_bounds = array<i64: 1, 2>, scalar_prefetch = 0 : i64, scratch_operands = 0 : i64, tpu.core_type = #tpu.core_type<tc>, window_params = [{transform_indices = @transform_0, window_bounds = array<i64: 512, 256>}, {transform_indices = @transform_1, window_bounds = array<i64: 256, 128>}, {transform_indices = @transform_2, window_bounds = array<i64: 1, 128>}, {transform_indices = @transform_3, window_bounds = array<i64: 512, 128>}]} {
    %c0 = arith.constant 0 : index
    %c0_0 = arith.constant 0 : index
    %0 = vector.load %arg2[%c0, %c0_0] : memref<512x256xbf16, #tpu.memory_space<vmem>>, vector<512x256xbf16>
    %c0_1 = arith.constant 0 : index
    %c0_2 = arith.constant 0 : index
    %1 = vector.load %arg3[%c0_1, %c0_2] : memref<256x128xbf16, #tpu.memory_space<vmem>>, vector<256x128xbf16>
    %cst = arith.constant dense<0.000000e+00> : vector<512x128xf32>
    %2 = tpu.matmul %0, %1, %cst {dimension_numbers = #tpu.dot_dimension_numbers<[1], [0], [0], [1], [0, 0, 1, 1], [], []>} : vector<512x256xbf16>, vector<256x128xbf16>, vector<512x128xf32> -> vector<512x128xf32>
    %c0_3 = arith.constant 0 : index
    %c0_4 = arith.constant 0 : index
    %3 = vector.load %arg4[%c0_3, %c0_4] : memref<1x128xf32, #tpu.memory_space<vmem>>, vector<1x128xf32>
    %4 = vector.broadcast %3 : vector<1x128xf32> to vector<512x128xf32>
    %5 = arith.addf %2, %4 : vector<512x128xf32>
    %6 = arith.truncf %5 : vector<512x128xf32> to vector<512x128xbf16>
    %c0_5 = arith.constant 0 : index
    %c0_6 = arith.constant 0 : index
    %7 = vector.load %arg5[%c0_5, %c0_6] : memref<512x128xbf16, #tpu.memory_space<vmem>>, vector<512x128xbf16>
    tpu.vector_store %arg5[%c0_5, %c0_6], %6 {strides = array<i32>} : memref<512x128xbf16, #tpu.memory_space<vmem>>, vector<512x128xbf16>,
    return
  }
  func.func @transform_0(%arg0: i32, %arg1: i32) -> (i32, i32) {
    %c0_i32 = arith.constant 0 : i32
    %c0_i32_0 = arith.constant 0 : i32
    return %arg0, %c0_i32 : i32, i32
  }
  func.func @transform_1(%arg0: i32, %arg1: i32) -> (i32, i32) {
    %c0_i32 = arith.constant 0 : i32
    %c0_i32_0 = arith.constant 0 : i32
    return %c0_i32, %arg1 : i32, i32
  }
  func.func @transform_2(%arg0: i32, %arg1: i32) -> (i32, i32) {
    %c0_i32 = arith.constant 0 : i32
    %c0_i32_0 = arith.constant 0 : i32
    return %c0_i32, %arg1 : i32, i32
  }
  func.func @transform_3(%arg0: i32, %arg1: i32) -> (i32, i32) {
    %c0_i32 = arith.constant 0 : i32
    return %arg0, %arg1 : i32, i32
  }
}

</mosaic_0001>

<bundles_post_ra>
// kernel: cgrnet_forward.17
= control target key start
LH: loop header
LB: loop body
LE: loop exit
PB: predicated region body
PF: predicated region fallthrough
CT: control target
= control target key end

     0   :  { %s1923_s12 = smov 0   ;;  %s1925_s13 = smov 0   ;;  %s2287_s0 = inlined_call_operand.vmem [shape: bf16[2048,160], index: 0, kind: input, shape index: {}]   ;;  %s2288_s1 = inlined_call_operand.vmem [shape: bf16[160,64], index: 1, kind: input, shape index: {}]   ;;  %s2289_s2 = inlined_call_operand.vmem [shape: f32[1,64], index: 2, kind: input, shape index: {}]   ;;  %s2290_s3 = inlined_call_operand.vmem [shape: bf16[2048,64], index: 3, kind: output, shape index: {}]  }
   0x1   :  { %s1927_s14 = smov 0  }
   0x2 LB: > { %s25_s15 = sadd.s32 1, %s1896_s13  ;;  %p1483_p0 = scmp.ge.s32.totalorder %s1900_s14, 1  ;;  %s1900_s14 = sphi %s1927_s14, %s13_s14   ;;  %s1896_s13 = sphi %s1925_s13, %s2292_s13   ;;  %s1892_s12 = sphi %s1923_s12, %s2291_s12  }
   0x3   : > { %p27_p1 = scmp.ge.s32.totalorder %s25_s15, 4  ;;  %p170_p2 = scmp.lt.s32.totalorder %s1900_s14, 5 }
   0x5   : > { %s2294_s15 = smov (%p27_p1, %s25_s15), 0  ;;  %p171_p3 = pnand %p1483_p0, %p170_p2 }
   0x6   : > { %v1772_v0 = vld [vmem:[%s2288_s1] sm:$0xff] (!%p171_p3)   ;;  %v1902_v1 = vmov (!%p171_p3), 0   ;;  %s1484_s18 = sshll.u32 (!%p171_p3), %s1892_s12, 6  ;;  %v1773_v2 = vld [vmem:[%s2288_s1 + $0x8] sm:$0xff] (!%p171_p3)   ;;  %v1774_v3 = vld [vmem:[%s2288_s1 + $0x10] sm:$0xff] (!%p171_p3)   ;;  %vm668_vm0 = vcmask (!%p171_p3), 261120  }
   0x7   : > { %174 = sbr.rel (%p171_p3) target bundleno = 386 (0x182), region = 32  ;;  %765 = vmatprep.subr.bf16.mxu0 (!%p171_p3), %v1902_v1  ;;  %1727 = vmatprep.subr.bf16.mxu1 (!%p171_p3), %v1902_v1  ;;  %p206_p4 = scmp.lt.s32.totalorder (!%p171_p3), %s1484_s18, 255  ;;  %v1775_v4 = vld [vmem:[%s2288_s1 + $0x18] sm:$0xff] (!%p171_p3)   ;;  %v1776_v7 = vld [vmem:[%s2288_s1 + $0x20] sm:$0xff] (!%p171_p3)   ;;  %v1777_v8 = vld [vmem:[%s2288_s1 + $0x28] sm:$0xff] (!%p171_p3)   ;;  %vm1310_vm1 = vcmask (!%p171_p3), 519168  }
   0x8   : > { %766 = vmatpush1.bf16.msra.mxu0 (!%p171_p3), %v1772_v0  ;;  %1737 = vmatpush1.bf16.msra.mxu1 (!%p171_p3), %v1772_v0  ;;  %v1778_v9 = vld [vmem:[%s2288_s1 + $0x30] sm:$0xff] (!%p171_p3)   ;;  %v1779_v10 = vld [vmem:[%s2288_s1 + $0x38] sm:$0xff] (!%p171_p3)   ;;  %v1780_v11 = vld [vmem:[%s2288_s1 + $0x40] sm:$0xff] (!%p171_p3)  }
   0x9   : > { %767 = vmatprep.subr.bf16.mxu0 (!%p171_p3), %v1902_v1  ;;  %1728 = vmatprep.subr.bf16.mxu1 (!%p171_p3), %v1902_v1  ;;  %v1781_v12 = vld [vmem:[%s2288_s1 + $0x48] sm:$0xff] (!%p171_p3)  }
   0xc   : > { %768 = vmatpush1.bf16.msra.mxu0 (!%p171_p3), %v1773_v2  ;;  %1738 = vmatpush1.bf16.msra.mxu1 (!%p171_p3), %v1773_v2 }
   0xd   : > { %769 = vmatprep.subr.bf16.mxu0 (!%p171_p3), %v1902_v1  ;;  %1729 = vmatprep.subr.bf16.mxu1 (!%p171_p3), %v1902_v1 }
   0xe   : > { %s2296_s18 = smov (!%p206_p4, %s1484_s18), 255 }
   0xf   : > { %s1662_s23 = sshll.u32 %s2296_s18, 3  ;;  %s1488_s20 = sshll.u32 %s2296_s18, 2 }
  0x10   : > { %s1956_s26 = scalar_lea.vmem %s2287_s0, %s1662_s23  ;;  %770 = vmatpush1.bf16.msra.mxu0 %v1774_v3  ;;  %1739 = vmatpush1.bf16.msra.mxu1 %v1774_v3  ;;  %s2086_s23 = scalar_lea.vmem %s2290_s3, %s1488_s20 }
  0x11   : > { %771 = vmatprep.subr.bf16.mxu0 %v1902_v1  ;;  %1730 = vmatprep.subr.bf16.mxu1 %v1902_v1  ;;  %v1784_v5 = vld [vmem:[%s1956_s26 + $0x4] ss:$8 sps:$4 sm:$0xff]   ;;  %v1782_v13 = vld [vmem:[%s1956_s26] ss:$8 sps:$4 sm:$0xff]   ;;  %v1788_v15 = vld [vmem:[%s1956_s26 + $0x14] ss:$8 sps:$4 sm:$0xff]  }
  0x12   : > { %v1787_v6 = vld [vmem:[%s1956_s26 + $0x104] ss:$8 sps:$4 sm:$0xff]   ;;  %1564 = vmatprep.mubr.msk.bf16.mxu0 %vm668_vm0, %v1784_v5  ;;  %v1785_v14 = vld [vmem:[%s1956_s26 + $0x100] ss:$8 sps:$4 sm:$0xff]   ;;  %v1790_v16 = vld [vmem:[%s1956_s26 + $0x114] ss:$8 sps:$4 sm:$0xff]  }
  0x13   : > { %1580 = vmatprep.mubr.msk.bf16.mxu1 %vm668_vm0, %v1787_v6  ;;  %v1792_v17 = vld [vmem:[%s1956_s26 + $0x10] ss:$8 sps:$4 sm:$0xff]   ;;  %v1794_v19 = vld [vmem:[%s1956_s26 + $0x24] ss:$8 sps:$4 sm:$0xff]   ;;  %v1798_v21 = vld [vmem:[%s1956_s26 + $0x20] ss:$8 sps:$4 sm:$0xff]  }
  0x14   : > { %772 = vmatpush1.bf16.msra.mxu0 %v1775_v4  ;;  %1740 = vmatpush1.bf16.msra.mxu1 %v1775_v4  ;;  %v1793_v18 = vld [vmem:[%s1956_s26 + $0x110] ss:$8 sps:$4 sm:$0xff]   ;;  %v1796_v20 = vld [vmem:[%s1956_s26 + $0x124] ss:$8 sps:$4 sm:$0xff]   ;;  %v1799_v22 = vld [vmem:[%s1956_s26 + $0x120] ss:$8 sps:$4 sm:$0xff]  }
  0x15   : > { %773 = vmatprep.subr.bf16.mxu0 %v1902_v1  ;;  %1731 = vmatprep.subr.bf16.mxu1 %v1902_v1  ;;  %v1800_v23 = vld [vmem:[%s1956_s26 + $0x34] ss:$8 sps:$4 sm:$0xff]   ;;  %v1804_v25 = vld [vmem:[%s1956_s26 + $0x30] ss:$8 sps:$4 sm:$0xff]   ;;  %v1806_v27 = vld [vmem:[%s1956_s26 + $0x44] ss:$8 sps:$4 sm:$0xff]  }
  0x16   : > { %v1802_v24 = vld [vmem:[%s1956_s26 + $0x134] ss:$8 sps:$4 sm:$0xff]   ;;  %v1805_v26 = vld [vmem:[%s1956_s26 + $0x130] ss:$8 sps:$4 sm:$0xff]   ;;  %v1808_v28 = vld [vmem:[%s1956_s26 + $0x144] ss:$8 sps:$4 sm:$0xff]  }
  0x17   : > { %v1810_v29 = vld [vmem:[%s1956_s26 + $0x40] ss:$8 sps:$4 sm:$0xff]   ;;  %v1812_v31 = vld [vmem:[%s1956_s26 + $0x54] ss:$8 sps:$4 sm:$0xff]   ;;  %v1816_v33 = vld [vmem:[%s1956_s26 + $0x50] ss:$8 sps:$4 sm:$0xff]  }
  0x18   : > { %774 = vmatpush1.bf16.msra.mxu0 %v1776_v7  ;;  %1741 = vmatpush1.bf16.msra.mxu1 %v1776_v7  ;;  %v1811_v30 = vld [vmem:[%s1956_s26 + $0x140] ss:$8 sps:$4 sm:$0xff]   ;;  %v1814_v32 = vld [vmem:[%s1956_s26 + $0x154] ss:$8 sps:$4 sm:$0xff]   ;;  %v1817_v34 = vld [vmem:[%s1956_s26 + $0x150] ss:$8 sps:$4 sm:$0xff]  }
  0x19   : > { %775 = vmatprep.subr.bf16.mxu0 %v1902_v1  ;;  %1732 = vmatprep.subr.bf16.mxu1 %v1902_v1  ;;  %v1818_v35 = vld [vmem:[%s1956_s26 + $0x64] ss:$8 sps:$4 sm:$0xff]   ;;  %v1822_v37 = vld [vmem:[%s1956_s26 + $0x60] ss:$8 sps:$4 sm:$0xff]   ;;  %v1824_v39 = vld [vmem:[%s1956_s26 + $0x74] ss:$8 sps:$4 sm:$0xff]  }
  0x1a   : > { %v1820_v36 = vld [vmem:[%s1956_s26 + $0x164] ss:$8 sps:$4 sm:$0xff]   ;;  %v1823_v38 = vld [vmem:[%s1956_s26 + $0x160] ss:$8 sps:$4 sm:$0xff]   ;;  %v1826_v40 = vld [vmem:[%s1956_s26 + $0x174] ss:$8 sps:$4 sm:$0xff]  }
  0x1b   : > { %v1828_v41 = vld [vmem:[%s1956_s26 + $0x70] ss:$8 sps:$4 sm:$0xff]   ;;  %v1830_v43 = vld [vmem:[%s1956_s26 + $0x84] ss:$8 sps:$4 sm:$0xff]   ;;  %v1834_v45 = vld [vmem:[%s1956_s26 + $0x80] ss:$8 sps:$4 sm:$0xff]  }
  0x1c   : > { %776 = vmatpush1.bf16.msra.mxu0 %v1777_v8  ;;  %1742 = vmatpush1.bf16.msra.mxu1 %v1777_v8  ;;  %v1829_v42 = vld [vmem:[%s1956_s26 + $0x170] ss:$8 sps:$4 sm:$0xff]   ;;  %v1832_v44 = vld [vmem:[%s1956_s26 + $0x184] ss:$8 sps:$4 sm:$0xff]   ;;  %v1835_v46 = vld [vmem:[%s1956_s26 + $0x180] ss:$8 sps:$4 sm:$0xff]  }
  0x1d   : > { %777 = vmatprep.subr.bf16.mxu0 %v1902_v1  ;;  %1733 = vmatprep.subr.bf16.mxu1 %v1902_v1  ;;  %v1836_v47 = vld [vmem:[%s1956_s26 + $0x94] ss:$8 sps:$4 sm:$0xff]   ;;  %v1840_v49 = vld [vmem:[%s1956_s26 + $0x90] ss:$8 sps:$4 sm:$0xff]   ;;  %v1842_v51 = vld [vmem:[%s1956_s26 + $0xa4] ss:$8 sps:$4 sm:$0xff]  }
  0x1e   : > { %v1838_v48 = vld [vmem:[%s1956_s26 + $0x194] ss:$8 sps:$4 sm:$0xff]   ;;  %v1841_v50 = vld [vmem:[%s1956_s26 + $0x190] ss:$8 sps:$4 sm:$0xff]   ;;  %v1844_v52 = vld [vmem:[%s1956_s26 + $0x1a4] ss:$8 sps:$4 sm:$0xff]  }
  0x1f   : > { %v1846_v53 = vld [vmem:[%s1956_s26 + $0xa0] ss:$8 sps:$4 sm:$0xff]   ;;  %v1848_v55 = vld [vmem:[%s1956_s26 + $0xb4] ss:$8 sps:$4 sm:$0xff]   ;;  %v1852_v57 = vld [vmem:[%s1956_s26 + $0xb0] ss:$8 sps:$4 sm:$0xff]  }
  0x20   : > { %778 = vmatpush1.bf16.msra.mxu0 %v1778_v9  ;;  %1743 = vmatpush1.bf16.msra.mxu1 %v1778_v9  ;;  %v1847_v54 = vld [vmem:[%s1956_s26 + $0x1a0] ss:$8 sps:$4 sm:$0xff]   ;;  %v1850_v56 = vld [vmem:[%s1956_s26 + $0x1b4] ss:$8 sps:$4 sm:$0xff]   ;;  %v1853_v58 = vld [vmem:[%s1956_s26 + $0x1b0] ss:$8 sps:$4 sm:$0xff]  }
  0x21   : > { %779 = vmatprep.subr.bf16.mxu0 %v1902_v1  ;;  %1734 = vmatprep.subr.bf16.mxu1 %v1902_v1  ;;  %v1854_v59 = vld [vmem:[%s1956_s26 + $0xc4] ss:$8 sps:$4 sm:$0xff]   ;;  %v1858_v61 = vld [vmem:[%s1956_s26 + $0xc0] ss:$8 sps:$4 sm:$0xff]   ;;  %v1860_v63 = vld [vmem:[%s1956_s26 + $0xd4] ss:$8 sps:$4 sm:$0xff]  }
  0x22   : > { %v1856_v60 = vld [vmem:[%s1956_s26 + $0x1c4] ss:$8 sps:$4 sm:$0xff]   ;;  %v1859_v62 = vld [vmem:[%s1956_s26 + $0x1c0] ss:$8 sps:$4 sm:$0xff]   ;;  %v1862_v0 = vld [vmem:[%s1956_s26 + $0x1d4] ss:$8 sps:$4 sm:$0xff]  }
  0x23   : > { %v1865_v2 = vld [vmem:[%s1956_s26 + $0x1d0] ss:$8 sps:$4 sm:$0xff]   ;;  %v1866_v3 = vld [vmem:[%s1956_s26 + $0xe4] ss:$8 sps:$4 sm:$0xff]   ;;  %v1870_v5 = vld [vmem:[%s1956_s26 + $0xe0] ss:$8 sps:$4 sm:$0xff]  }
  0x24   : > { %780 = vmatpush1.bf16.msra.mxu0 %v1779_v10  ;;  %1744 = vmatpush1.bf16.msra.mxu1 %v1779_v10  ;;  %v1868_v4 = vld [vmem:[%s1956_s26 + $0x1e4] ss:$8 sps:$4 sm:$0xff]   ;;  %v1871_v6 = vld [vmem:[%s1956_s26 + $0x1e0] ss:$8 sps:$4 sm:$0xff]   ;;  %v1872_v7 = vld [vmem:[%s1956_s26 + $0xf4] ss:$8 sps:$4 sm:$0xff]  }
  0x25   : > { %781 = vmatprep.subr.bf16.mxu0 %v1902_v1  ;;  %1735 = vmatprep.subr.bf16.mxu1 %v1902_v1  ;;  %v1874_v8 = vld [vmem:[%s1956_s26 + $0x1f4] ss:$8 sps:$4 sm:$0xff]   ;;  %v1876_v9 = vld [vmem:[%s1956_s26 + $0xf0] ss:$8 sps:$4 sm:$0xff]  }
  0x26   : > { %v1877_v10 = vld [vmem:[%s1956_s26 + $0x1f0] ss:$8 sps:$4 sm:$0xff]  }
  0x28   : > { %782 = vmatpush1.bf16.msra.mxu0 %v1780_v11  ;;  %1745 = vmatpush1.bf16.msra.mxu1 %v1780_v11  ;;  %v2078_v11 = vld [vmem:[%s2289_s2] ss:$0 sm:$0xff] }
  0x29   : > { %783 = vmatprep.subr.bf16.mxu0 %v1902_v1  ;;  %1736 = vmatprep.subr.bf16.mxu1 %v1902_v1  ;;  %v1864_v1 = vld [vmem:[%s1956_s26 + $0xd0] ss:$8 sps:$4 sm:$0xff]  }
  0x2c   : > { %784 = vmatpush1.bf16.msra.mxu0 %v1781_v12  ;;  %1746 = vmatpush1.bf16.msra.mxu1 %v1781_v12 }
  0x2f   : > { %798 = vmatmul.mubr.bf16.vlgmr.msra.gmra.mrb[0].mxu0 %v1782_v13  ;;  %926 = vmatmul.mubr.bf16.vlgmr.msra.gmra.mrb[0].mxu1 %v1785_v14 }
  0x30   : > { %1565 = vmatprep.mubr.msk.bf16.mxu0 %vm668_vm0, %v1788_v15  ;;  %1581 = vmatprep.mubr.msk.bf16.mxu1 %vm668_vm0, %v1790_v16 }
  0x37   : > { %806 = vmatmul.mubr.bf16.gmra.mrb[4].mxu0 %v1792_v17  ;;  %934 = vmatmul.mubr.bf16.gmra.mrb[4].mxu1 %v1793_v18 }
  0x38   : > { %1566 = vmatprep.mubr.msk.bf16.mxu0 %vm668_vm0, %v1794_v19  ;;  %1582 = vmatprep.mubr.msk.bf16.mxu1 %vm668_vm0, %v1796_v20 }
  0x3f   : > { %814 = vmatmul.mubr.bf16.gmra.mrb[8].mxu0 %v1798_v21  ;;  %942 = vmatmul.mubr.bf16.gmra.mrb[8].mxu1 %v1799_v22 }
  0x40   : > { %1567 = vmatprep.mubr.msk.bf16.mxu0 %vm668_vm0, %v1800_v23  ;;  %1583 = vmatprep.mubr.msk.bf16.mxu1 %vm668_vm0, %v1802_v24 }
  0x47   : > { %822 = vmatmul.mubr.bf16.gmra.mrb[12].mxu0 %v1804_v25  ;;  %950 = vmatmul.mubr.bf16.gmra.mrb[12].mxu1 %v1805_v26 }
  0x48   : > { %1568 = vmatprep.mubr.msk.bf16.mxu0 %vm668_vm0, %v1806_v27  ;;  %1584 = vmatprep.mubr.msk.bf16.mxu1 %vm668_vm0, %v1808_v28 }
  0x4f   : > { %830 = vmatmul.mubr.bf16.gmra.mrb[16].mxu0 %v1810_v29  ;;  %958 = vmatmul.mubr.bf16.gmra.mrb[16].mxu1 %v1811_v30 }
  0x50   : > { %1569 = vmatprep.mubr.msk.bf16.mxu0 %vm668_vm0, %v1812_v31  ;;  %1585 = vmatprep.mubr.msk.bf16.mxu1 %vm668_vm0, %v1814_v32 }
  0x57   : > { %838 = vmatmul.mubr.bf16.gmra.mrb[20].mxu0 %v1816_v33  ;;  %966 = vmatmul.mubr.bf16.gmra.mrb[20].mxu1 %v1817_v34 }
  0x58   : > { %1570 = vmatprep.mubr.msk.bf16.mxu0 %vm668_vm0, %v1818_v35  ;;  %1586 = vmatprep.mubr.msk.bf16.mxu1 %vm668_vm0, %v1820_v36 }
  0x5f   : > { %846 = vmatmul.mubr.bf16.gmra.mrb[24].mxu0 %v1822_v37  ;;  %974 = vmatmul.mubr.bf16.gmra.mrb[24].mxu1 %v1823_v38 }
  0x60   : > { %1571 = vmatprep.mubr.msk.bf16.mxu0 %vm668_vm0, %v1824_v39  ;;  %1587 = vmatprep.mubr.msk.bf16.mxu1 %vm668_vm0, %v1826_v40 }
  0x67   : > { %854 = vmatmul.mubr.bf16.gmra.mrb[28].mxu0 %v1828_v41  ;;  %982 = vmatmul.mubr.bf16.gmra.mrb[28].mxu1 %v1829_v42 }
  0x68   : > { %1572 = vmatprep.mubr.msk.bf16.mxu0 %vm668_vm0, %v1830_v43  ;;  %1588 = vmatprep.mubr.msk.bf16.mxu1 %vm668_vm0, %v1832_v44 }
  0x6f   : > { %862 = vmatmul.mubr.bf16.gmra.mrb[32].mxu0 %v1834_v45  ;;  %990 = vmatmul.mubr.bf16.gmra.mrb[32].mxu1 %v1835_v46 }
  0x70   : > { %1573 = vmatprep.mubr.msk.bf16.mxu0 %vm668_vm0, %v1836_v47  ;;  %1589 = vmatprep.mubr.msk.bf16.mxu1 %vm668_vm0, %v1838_v48 }
  0x77   : > { %870 = vmatmul.mubr.bf16.gmra.mrb[36].mxu0 %v1840_v49  ;;  %998 = vmatmul.mubr.bf16.gmra.mrb[36].mxu1 %v1841_v50 }
  0x78   : > { %1574 = vmatprep.mubr.msk.bf16.mxu0 %vm668_vm0, %v1842_v51  ;;  %1590 = vmatprep.mubr.msk.bf16.mxu1 %vm668_vm0, %v1844_v52 }
  0x7f   : > { %878 = vmatmul.mubr.bf16.gmra.mrb[40].mxu0 %v1846_v53  ;;  %1006 = vmatmul.mubr.bf16.gmra.mrb[40].mxu1 %v1847_v54 }
  0x80   : > { %1575 = vmatprep.mubr.msk.bf16.mxu0 %vm668_vm0, %v1848_v55  ;;  %1591 = vmatprep.mubr.msk.bf16.mxu1 %vm668_vm0, %v1850_v56 }
  0x87   : > { %886 = vmatmul.mubr.bf16.gmra.mrb[44].mxu0 %v1852_v57  ;;  %1014 = vmatmul.mubr.bf16.gmra.mrb[44].mxu1 %v1853_v58 }
  0x88   : > { %1576 = vmatprep.mubr.msk.bf16.mxu0 %vm668_vm0, %v1854_v59  ;;  %1592 = vmatprep.mubr.msk.bf16.mxu1 %vm668_vm0, %v1856_v60 }
  0x8f   : > { %894 = vmatmul.mubr.bf16.gmra.mrb[48].mxu0 %v1858_v61  ;;  %1022 = vmatmul.mubr.bf16.gmra.mrb[48].mxu1 %v1859_v62 }
  0x90   : > { %1577 = vmatprep.mubr.msk.bf16.mxu0 %vm668_vm0, %v1860_v63  ;;  %1593 = vmatprep.mubr.msk.bf16.mxu1 %vm668_vm0, %v1862_v0 }
  0x97   : > { %902 = vmatmul.mubr.bf16.gmra.mrb[52].mxu0 %v1864_v1  ;;  %1030 = vmatmul.mubr.bf16.gmra.mrb[52].mxu1 %v1865_v2 }
  0x98   : > { %1578 = vmatprep.mubr.msk.bf16.mxu0 %vm668_vm0, %v1866_v3  ;;  %1594 = vmatprep.mubr.msk.bf16.mxu1 %vm668_vm0, %v1868_v4 }
  0x9f   : > { %910 = vmatmul.mubr.bf16.gmra.mrb[56].mxu0 %v1870_v5  ;;  %1038 = vmatmul.mubr.bf16.gmra.mrb[56].mxu1 %v1871_v6 }
  0xa0   : > { %1579 = vmatprep.mubr.msk.bf16.mxu0 %vm668_vm0, %v1872_v7  ;;  %1595 = vmatprep.mubr.msk.bf16.mxu1 %vm668_vm0, %v1874_v8 }
  0xa7   : > { %918 = vmatmul.mubr.bf16.gmra.mrb[60].mxu0 %v1876_v9  ;;  %1046 = vmatmul.mubr.bf16.gmra.mrb[60].mxu1 %v1877_v10 }
 0x102   : > { %v799_v12 = vpop.f32.mrb[0].mxu0  ;;  %v927_v13 = vpop.f32.mrb[0].mxu1 }
 0x103   : > { %v800_v14 = vadd.f32 %v2078_v11, %v799_v12  ;;  %v928_v15 = vadd.f32 %v2078_v11, %v927_v13  ;;  %v801_v16 = vpop.f32.mrb[1].mxu0  ;;  %v929_v17 = vpop.f32.mrb[1].mxu1 }
 0x104   : > { %v802_v18 = vpop.f32.mrb[2].mxu0  ;;  %v930_v19 = vpop.f32.mrb[2].mxu1 }
 0x105   : > { %v1663_v20 = vpack.c.bf16 %v800_v14, %v800_v14  ;;  %v1695_v21 = vpack.c.bf16 %v928_v15, %v928_v15  ;;  %v803_v22 = vadd.f32 %v2078_v11, %v802_v18  ;;  %v931_v23 = vadd.f32 %v2078_v11, %v930_v19  ;;  %v804_v24 = vpop.f32.mrb[3].mxu0  ;;  %v932_v25 = vpop.f32.mrb[3].mxu1 }
 0x107   : > { %1311 = vst.msk [vmem:[%s2086_s23] sm:$0xf] %vm1310_vm1, %v1663_v20  ;;  %1343 = vst.msk [vmem:[%s2086_s23 + $0x80] sm:$0xf] %vm1310_vm1, %v1695_v21  ;;  %v1664_v26 = vpack.c.bf16 %v803_v22, %v803_v22  ;;  %v1696_v27 = vpack.c.bf16 %v931_v23, %v931_v23 }
 0x109   : > { %1312 = vst.msk [vmem:[%s2086_s23 + $0x4] sm:$0xf] %vm1310_vm1, %v1664_v26  ;;  %1344 = vst.msk [vmem:[%s2086_s23 + $0x84] sm:$0xf] %vm1310_vm1, %v1696_v27 }
 0x10a   : > { %v807_v28 = vpop.f32.mrb[4].mxu0  ;;  %v935_v29 = vpop.f32.mrb[4].mxu1 }
 0x10b   : > { %v808_v30 = vadd.f32 %v2078_v11, %v807_v28  ;;  %v936_v31 = vadd.f32 %v2078_v11, %v935_v29  ;;  %v809_v32 = vpop.f32.mrb[5].mxu0  ;;  %v937_v33 = vpop.f32.mrb[5].mxu1 }
 0x10c   : > { %v810_v34 = vpop.f32.mrb[6].mxu0  ;;  %v938_v35 = vpop.f32.mrb[6].mxu1 }
 0x10d   : > { %v1665_v36 = vpack.c.bf16 %v808_v30, %v808_v30  ;;  %v1697_v37 = vpack.c.bf16 %v936_v31, %v936_v31  ;;  %v811_v38 = vadd.f32 %v2078_v11, %v810_v34  ;;  %v939_v39 = vadd.f32 %v2078_v11, %v938_v35  ;;  %v812_v40 = vpop.f32.mrb[7].mxu0  ;;  %v940_v41 = vpop.f32.mrb[7].mxu1 }
 0x10f   : > { %1313 = vst.msk [vmem:[%s2086_s23 + $0x8] sm:$0xf] %vm1310_vm1, %v1665_v36  ;;  %1345 = vst.msk [vmem:[%s2086_s23 + $0x88] sm:$0xf] %vm1310_vm1, %v1697_v37  ;;  %v1666_v42 = vpack.c.bf16 %v811_v38, %v811_v38  ;;  %v1698_v43 = vpack.c.bf16 %v939_v39, %v939_v39 }
 0x111   : > { %1314 = vst.msk [vmem:[%s2086_s23 + $0xc] sm:$0xf] %vm1310_vm1, %v1666_v42  ;;  %1346 = vst.msk [vmem:[%s2086_s23 + $0x8c] sm:$0xf] %vm1310_vm1, %v1698_v43 }
 0x112   : > { %v815_v44 = vpop.f32.mrb[8].mxu0  ;;  %v943_v45 = vpop.f32.mrb[8].mxu1 }
 0x113   : > { %v816_v46 = vadd.f32 %v2078_v11, %v815_v44  ;;  %v944_v47 = vadd.f32 %v2078_v11, %v943_v45  ;;  %v817_v48 = vpop.f32.mrb[9].mxu0  ;;  %v945_v49 = vpop.f32.mrb[9].mxu1 }
 0x114   : > { %v818_v50 = vpop.f32.mrb[10].mxu0  ;;  %v946_v51 = vpop.f32.mrb[10].mxu1 }
 0x115   : > { %v1667_v52 = vpack.c.bf16 %v816_v46, %v816_v46  ;;  %v1699_v53 = vpack.c.bf16 %v944_v47, %v944_v47  ;;  %v819_v54 = vadd.f32 %v2078_v11, %v818_v50  ;;  %v947_v55 = vadd.f32 %v2078_v11, %v946_v51  ;;  %v820_v56 = vpop.f32.mrb[11].mxu0  ;;  %v948_v57 = vpop.f32.mrb[11].mxu1 }
 0x117   : > { %1315 = vst.msk [vmem:[%s2086_s23 + $0x10] sm:$0xf] %vm1310_vm1, %v1667_v52  ;;  %1347 = vst.msk [vmem:[%s2086_s23 + $0x90] sm:$0xf] %vm1310_vm1, %v1699_v53  ;;  %v1668_v58 = vpack.c.bf16 %v819_v54, %v819_v54  ;;  %v1700_v59 = vpack.c.bf16 %v947_v55, %v947_v55 }
 0x119   : > { %1316 = vst.msk [vmem:[%s2086_s23 + $0x14] sm:$0xf] %vm1310_vm1, %v1668_v58  ;;  %1348 = vst.msk [vmem:[%s2086_s23 + $0x94] sm:$0xf] %vm1310_vm1, %v1700_v59 }
 0x11a   : > { %v823_v60 = vpop.f32.mrb[12].mxu0  ;;  %v951_v61 = vpop.f32.mrb[12].mxu1 }
 0x11b   : > { %v824_v62 = vadd.f32 %v2078_v11, %v823_v60  ;;  %v952_v63 = vadd.f32 %v2078_v11, %v951_v61  ;;  %v825_v0 = vpop.f32.mrb[13].mxu0  ;;  %v953_v1 = vpop.f32.mrb[13].mxu1 }
 0x11c   : > { %v826_v2 = vpop.f32.mrb[14].mxu0  ;;  %v954_v3 = vpop.f32.mrb[14].mxu1 }
 0x11d   : > { %v1669_v4 = vpack.c.bf16 %v824_v62, %v824_v62  ;;  %v1701_v5 = vpack.c.bf16 %v952_v63, %v952_v63  ;;  %v827_v6 = vadd.f32 %v2078_v11, %v826_v2  ;;  %v955_v7 = vadd.f32 %v2078_v11, %v954_v3  ;;  %v828_v8 = vpop.f32.mrb[15].mxu0  ;;  %v956_v9 = vpop.f32.mrb[15].mxu1 }
 0x11f   : > { %1317 = vst.msk [vmem:[%s2086_s23 + $0x18] sm:$0xf] %vm1310_vm1, %v1669_v4  ;;  %1349 = vst.msk [vmem:[%s2086_s23 + $0x98] sm:$0xf] %vm1310_vm1, %v1701_v5  ;;  %v1670_v10 = vpack.c.bf16 %v827_v6, %v827_v6  ;;  %v1702_v12 = vpack.c.bf16 %v955_v7, %v955_v7 }
 0x121   : > { %1318 = vst.msk [vmem:[%s2086_s23 + $0x1c] sm:$0xf] %vm1310_vm1, %v1670_v10  ;;  %1350 = vst.msk [vmem:[%s2086_s23 + $0x9c] sm:$0xf] %vm1310_vm1, %v1702_v12 }
 0x122   : > { %v831_v13 = vpop.f32.mrb[16].mxu0  ;;  %v959_v14 = vpop.f32.mrb[16].mxu1 }
 0x123   : > { %v832_v15 = vadd.f32 %v2078_v11, %v831_v13  ;;  %v960_v16 = vadd.f32 %v2078_v11, %v959_v14  ;;  %v833_v17 = vpop.f32.mrb[17].mxu0  ;;  %v961_v18 = vpop.f32.mrb[17].mxu1 }
 0x124   : > { %v834_v19 = vpop.f32.mrb[18].mxu0  ;;  %v962_v20 = vpop.f32.mrb[18].mxu1 }
 0x125   : > { %v1671_v21 = vpack.c.bf16 %v832_v15, %v832_v15  ;;  %v1703_v22 = vpack.c.bf16 %v960_v16, %v960_v16  ;;  %v835_v23 = vadd.f32 %v2078_v11, %v834_v19  ;;  %v963_v24 = vadd.f32 %v2078_v11, %v962_v20  ;;  %v836_v25 = vpop.f32.mrb[19].mxu0  ;;  %v964_v26 = vpop.f32.mrb[19].mxu1 }
 0x127   : > { %1319 = vst.msk [vmem:[%s2086_s23 + $0x20] sm:$0xf] %vm1310_vm1, %v1671_v21  ;;  %1351 = vst.msk [vmem:[%s2086_s23 + $0xa0] sm:$0xf] %vm1310_vm1, %v1703_v22  ;;  %v1672_v27 = vpack.c.bf16 %v835_v23, %v835_v23  ;;  %v1704_v28 = vpack.c.bf16 %v963_v24, %v963_v24 }
 0x129   : > { %1320 = vst.msk [vmem:[%s2086_s23 + $0x24] sm:$0xf] %vm1310_vm1, %v1672_v27  ;;  %1352 = vst.msk [vmem:[%s2086_s23 + $0xa4] sm:$0xf] %vm1310_vm1, %v1704_v28 }
 0x12a   : > { %v839_v29 = vpop.f32.mrb[20].mxu0  ;;  %v967_v30 = vpop.f32.mrb[20].mxu1 }
 0x12b   : > { %v840_v31 = vadd.f32 %v2078_v11, %v839_v29  ;;  %v968_v32 = vadd.f32 %v2078_v11, %v967_v30  ;;  %v841_v33 = vpop.f32.mrb[21].mxu0  ;;  %v969_v34 = vpop.f32.mrb[21].mxu1 }
 0x12c   : > { %v842_v35 = vpop.f32.mrb[22].mxu0  ;;  %v970_v36 = vpop.f32.mrb[22].mxu1 }
 0x12d   : > { %v1673_v37 = vpack.c.bf16 %v840_v31, %v840_v31  ;;  %v1705_v38 = vpack.c.bf16 %v968_v32, %v968_v32  ;;  %v843_v39 = vadd.f32 %v2078_v11, %v842_v35  ;;  %v971_v40 = vadd.f32 %v2078_v11, %v970_v36  ;;  %v844_v41 = vpop.f32.mrb[23].mxu0  ;;  %v972_v42 = vpop.f32.mrb[23].mxu1 }
 0x12f   : > { %1321 = vst.msk [vmem:[%s2086_s23 + $0x28] sm:$0xf] %vm1310_vm1, %v1673_v37  ;;  %1353 = vst.msk [vmem:[%s2086_s23 + $0xa8] sm:$0xf] %vm1310_vm1, %v1705_v38  ;;  %v1674_v43 = vpack.c.bf16 %v843_v39, %v843_v39  ;;  %v1706_v44 = vpack.c.bf16 %v971_v40, %v971_v40 }
 0x131   : > { %1322 = vst.msk [vmem:[%s2086_s23 + $0x2c] sm:$0xf] %vm1310_vm1, %v1674_v43  ;;  %1354 = vst.msk [vmem:[%s2086_s23 + $0xac] sm:$0xf] %vm1310_vm1, %v1706_v44 }
 0x132   : > { %v847_v45 = vpop.f32.mrb[24].mxu0  ;;  %v975_v46 = vpop.f32.mrb[24].mxu1 }
 0x133   : > { %v848_v47 = vadd.f32 %v2078_v11, %v847_v45  ;;  %v976_v48 = vadd.f32 %v2078_v11, %v975_v46  ;;  %v849_v49 = vpop.f32.mrb[25].mxu0  ;;  %v977_v50 = vpop.f32.mrb[25].mxu1 }
 0x134   : > { %v850_v51 = vpop.f32.mrb[26].mxu0  ;;  %v978_v52 = vpop.f32.mrb[26].mxu1 }
 0x135   : > { %v1675_v53 = vpack.c.bf16 %v848_v47, %v848_v47  ;;  %v1707_v54 = vpack.c.bf16 %v976_v48, %v976_v48  ;;  %v851_v55 = vadd.f32 %v2078_v11, %v850_v51  ;;  %v979_v56 = vadd.f32 %v2078_v11, %v978_v52  ;;  %v852_v57 = vpop.f32.mrb[27].mxu0  ;;  %v980_v58 = vpop.f32.mrb[27].mxu1 }
 0x137   : > { %1323 = vst.msk [vmem:[%s2086_s23 + $0x30] sm:$0xf] %vm1310_vm1, %v1675_v53  ;;  %1355 = vst.msk [vmem:[%s2086_s23 + $0xb0] sm:$0xf] %vm1310_vm1, %v1707_v54  ;;  %v1676_v59 = vpack.c.bf16 %v851_v55, %v851_v55  ;;  %v1708_v60 = vpack.c.bf16 %v979_v56, %v979_v56 }
 0x139   : > { %1324 = vst.msk [vmem:[%s2086_s23 + $0x34] sm:$0xf] %vm1310_vm1, %v1676_v59  ;;  %1356 = vst.msk [vmem:[%s2086_s23 + $0xb4] sm:$0xf] %vm1310_vm1, %v1708_v60 }
 0x13a   : > { %v855_v61 = vpop.f32.mrb[28].mxu0  ;;  %v983_v62 = vpop.f32.mrb[28].mxu1 }
 0x13b   : > { %v856_v63 = vadd.f32 %v2078_v11, %v855_v61  ;;  %v984_v0 = vadd.f32 %v2078_v11, %v983_v62  ;;  %v857_v1 = vpop.f32.mrb[29].mxu0  ;;  %v985_v2 = vpop.f32.mrb[29].mxu1 }
 0x13c   : > { %v858_v3 = vpop.f32.mrb[30].mxu0  ;;  %v986_v4 = vpop.f32.mrb[30].mxu1 }
 0x13d   : > { %v1677_v5 = vpack.c.bf16 %v856_v63, %v856_v63  ;;  %v1709_v6 = vpack.c.bf16 %v984_v0, %v984_v0  ;;  %v859_v7 = vadd.f32 %v2078_v11, %v858_v3  ;;  %v987_v8 = vadd.f32 %v2078_v11, %v986_v4  ;;  %v860_v9 = vpop.f32.mrb[31].mxu0  ;;  %v988_v10 = vpop.f32.mrb[31].mxu1 }
 0x13f   : > { %1325 = vst.msk [vmem:[%s2086_s23 + $0x38] sm:$0xf] %vm1310_vm1, %v1677_v5  ;;  %1357 = vst.msk [vmem:[%s2086_s23 + $0xb8] sm:$0xf] %vm1310_vm1, %v1709_v6  ;;  %v1678_v12 = vpack.c.bf16 %v859_v7, %v859_v7  ;;  %v1710_v13 = vpack.c.bf16 %v987_v8, %v987_v8 }
 0x141   : > { %1326 = vst.msk [vmem:[%s2086_s23 + $0x3c] sm:$0xf] %vm1310_vm1, %v1678_v12  ;;  %1358 = vst.msk [vmem:[%s2086_s23 + $0xbc] sm:$0xf] %vm1310_vm1, %v1710_v13 }
 0x142   : > { %v863_v14 = vpop.f32.mrb[32].mxu0  ;;  %v991_v15 = vpop.f32.mrb[32].mxu1 }
 0x143   : > { %v864_v16 = vadd.f32 %v2078_v11, %v863_v14  ;;  %v992_v17 = vadd.f32 %v2078_v11, %v991_v15  ;;  %v865_v18 = vpop.f32.mrb[33].mxu0  ;;  %v993_v19 = vpop.f32.mrb[33].mxu1 }
 0x144   : > { %v866_v20 = vpop.f32.mrb[34].mxu0  ;;  %v994_v21 = vpop.f32.mrb[34].mxu1 }
 0x145   : > { %v1679_v22 = vpack.c.bf16 %v864_v16, %v864_v16  ;;  %v1711_v23 = vpack.c.bf16 %v992_v17, %v992_v17  ;;  %v867_v24 = vadd.f32 %v2078_v11, %v866_v20  ;;  %v995_v25 = vadd.f32 %v2078_v11, %v994_v21  ;;  %v868_v26 = vpop.f32.mrb[35].mxu0  ;;  %v996_v27 = vpop.f32.mrb[35].mxu1 }
 0x147   : > { %1327 = vst.msk [vmem:[%s2086_s23 + $0x40] sm:$0xf] %vm1310_vm1, %v1679_v22  ;;  %1359 = vst.msk [vmem:[%s2086_s23 + $0xc0] sm:$0xf] %vm1310_vm1, %v1711_v23  ;;  %v1680_v28 = vpack.c.bf16 %v867_v24, %v867_v24  ;;  %v1712_v29 = vpack.c.bf16 %v995_v25, %v995_v25 }
 0x149   : > { %1328 = vst.msk [vmem:[%s2086_s23 + $0x44] sm:$0xf] %vm1310_vm1, %v1680_v28  ;;  %1360 = vst.msk [vmem:[%s2086_s23 + $0xc4] sm:$0xf] %vm1310_vm1, %v1712_v29 }
 0x14a   : > { %v871_v30 = vpop.f32.mrb[36].mxu0  ;;  %v999_v31 = vpop.f32.mrb[36].mxu1 }
 0x14b   : > { %v872_v32 = vadd.f32 %v2078_v11, %v871_v30  ;;  %v1000_v33 = vadd.f32 %v2078_v11, %v999_v31  ;;  %v873_v34 = vpop.f32.mrb[37].mxu0  ;;  %v1001_v35 = vpop.f32.mrb[37].mxu1 }
 0x14c   : > { %v874_v36 = vpop.f32.mrb[38].mxu0  ;;  %v1002_v37 = vpop.f32.mrb[38].mxu1 }
 0x14d   : > { %v1681_v38 = vpack.c.bf16 %v872_v32, %v872_v32  ;;  %v1713_v39 = vpack.c.bf16 %v1000_v33, %v1000_v33  ;;  %v875_v40 = vadd.f32 %v2078_v11, %v874_v36  ;;  %v1003_v41 = vadd.f32 %v2078_v11, %v1002_v37  ;;  %v876_v42 = vpop.f32.mrb[39].mxu0  ;;  %v1004_v43 = vpop.f32.mrb[39].mxu1 }
 0x14f   : > { %1329 = vst.msk [vmem:[%s2086_s23 + $0x48] sm:$0xf] %vm1310_vm1, %v1681_v38  ;;  %1361 = vst.msk [vmem:[%s2086_s23 + $0xc8] sm:$0xf] %vm1310_vm1, %v1713_v39  ;;  %v1682_v44 = vpack.c.bf16 %v875_v40, %v875_v40  ;;  %v1714_v45 = vpack.c.bf16 %v1003_v41, %v1003_v41 }
 0x151   : > { %1330 = vst.msk [vmem:[%s2086_s23 + $0x4c] sm:$0xf] %vm1310_vm1, %v1682_v44  ;;  %1362 = vst.msk [vmem:[%s2086_s23 + $0xcc] sm:$0xf] %vm1310_vm1, %v1714_v45 }
 0x152   : > { %v879_v46 = vpop.f32.mrb[40].mxu0  ;;  %v1007_v47 = vpop.f32.mrb[40].mxu1 }
 0x153   : > { %v880_v48 = vadd.f32 %v2078_v11, %v879_v46  ;;  %v1008_v49 = vadd.f32 %v2078_v11, %v1007_v47  ;;  %v881_v50 = vpop.f32.mrb[41].mxu0  ;;  %v1009_v51 = vpop.f32.mrb[41].mxu1 }
 0x154   : > { %v882_v52 = vpop.f32.mrb[42].mxu0  ;;  %v1010_v53 = vpop.f32.mrb[42].mxu1 }
 0x155   : > { %v1683_v54 = vpack.c.bf16 %v880_v48, %v880_v48  ;;  %v1715_v55 = vpack.c.bf16 %v1008_v49, %v1008_v49  ;;  %v883_v56 = vadd.f32 %v2078_v11, %v882_v52  ;;  %v1011_v57 = vadd.f32 %v2078_v11, %v1010_v53  ;;  %v884_v58 = vpop.f32.mrb[43].mxu0  ;;  %v1012_v59 = vpop.f32.mrb[43].mxu1 }
 0x157   : > { %1331 = vst.msk [vmem:[%s2086_s23 + $0x50] sm:$0xf] %vm1310_vm1, %v1683_v54  ;;  %1363 = vst.msk [vmem:[%s2086_s23 + $0xd0] sm:$0xf] %vm1310_vm1, %v1715_v55  ;;  %v1684_v60 = vpack.c.bf16 %v883_v56, %v883_v56  ;;  %v1716_v61 = vpack.c.bf16 %v1011_v57, %v1011_v57 }
 0x159   : > { %1332 = vst.msk [vmem:[%s2086_s23 + $0x54] sm:$0xf] %vm1310_vm1, %v1684_v60  ;;  %1364 = vst.msk [vmem:[%s2086_s23 + $0xd4] sm:$0xf] %vm1310_vm1, %v1716_v61 }
 0x15a   : > { %v887_v62 = vpop.f32.mrb[44].mxu0  ;;  %v1015_v63 = vpop.f32.mrb[44].mxu1 }
 0x15b   : > { %v888_v0 = vadd.f32 %v2078_v11, %v887_v62  ;;  %v1016_v1 = vadd.f32 %v2078_v11, %v1015_v63  ;;  %v889_v2 = vpop.f32.mrb[45].mxu0  ;;  %v1017_v3 = vpop.f32.mrb[45].mxu1 }
 0x15c   : > { %v890_v4 = vpop.f32.mrb[46].mxu0  ;;  %v1018_v5 = vpop.f32.mrb[46].mxu1 }
 0x15d   : > { %v1685_v6 = vpack.c.bf16 %v888_v0, %v888_v0  ;;  %v1717_v7 = vpack.c.bf16 %v1016_v1, %v1016_v1  ;;  %v891_v8 = vadd.f32 %v2078_v11, %v890_v4  ;;  %v1019_v9 = vadd.f32 %v2078_v11, %v1018_v5  ;;  %v892_v10 = vpop.f32.mrb[47].mxu0  ;;  %v1020_v12 = vpop.f32.mrb[47].mxu1 }
 0x15f   : > { %1333 = vst.msk [vmem:[%s2086_s23 + $0x58] sm:$0xf] %vm1310_vm1, %v1685_v6  ;;  %1365 = vst.msk [vmem:[%s2086_s23 + $0xd8] sm:$0xf] %vm1310_vm1, %v1717_v7  ;;  %v1686_v13 = vpack.c.bf16 %v891_v8, %v891_v8  ;;  %v1718_v14 = vpack.c.bf16 %v1019_v9, %v1019_v9 }
 0x161   : > { %1334 = vst.msk [vmem:[%s2086_s23 + $0x5c] sm:$0xf] %vm1310_vm1, %v1686_v13  ;;  %1366 = vst.msk [vmem:[%s2086_s23 + $0xdc] sm:$0xf] %vm1310_vm1, %v1718_v14 }
 0x162   : > { %v895_v15 = vpop.f32.mrb[48].mxu0  ;;  %v1023_v16 = vpop.f32.mrb[48].mxu1 }
 0x163   : > { %v896_v17 = vadd.f32 %v2078_v11, %v895_v15  ;;  %v1024_v18 = vadd.f32 %v2078_v11, %v1023_v16  ;;  %v897_v19 = vpop.f32.mrb[49].mxu0  ;;  %v1025_v20 = vpop.f32.mrb[49].mxu1 }
 0x164   : > { %v898_v21 = vpop.f32.mrb[50].mxu0  ;;  %v1026_v22 = vpop.f32.mrb[50].mxu1 }
 0x165   : > { %v1687_v23 = vpack.c.bf16 %v896_v17, %v896_v17  ;;  %v1719_v24 = vpack.c.bf16 %v1024_v18, %v1024_v18  ;;  %v899_v25 = vadd.f32 %v2078_v11, %v898_v21  ;;  %v1027_v26 = vadd.f32 %v2078_v11, %v1026_v22  ;;  %v900_v27 = vpop.f32.mrb[51].mxu0  ;;  %v1028_v28 = vpop.f32.mrb[51].mxu1 }
 0x167   : > { %1335 = vst.msk [vmem:[%s2086_s23 + $0x60] sm:$0xf] %vm1310_vm1, %v1687_v23  ;;  %1367 = vst.msk [vmem:[%s2086_s23 + $0xe0] sm:$0xf] %vm1310_vm1, %v1719_v24  ;;  %v1688_v29 = vpack.c.bf16 %v899_v25, %v899_v25  ;;  %v1720_v30 = vpack.c.bf16 %v1027_v26, %v1027_v26 }
 0x169   : > { %1336 = vst.msk [vmem:[%s2086_s23 + $0x64] sm:$0xf] %vm1310_vm1, %v1688_v29  ;;  %1368 = vst.msk [vmem:[%s2086_s23 + $0xe4] sm:$0xf] %vm1310_vm1, %v1720_v30 }
 0x16a   : > { %v903_v31 = vpop.f32.mrb[52].mxu0  ;;  %v1031_v32 = vpop.f32.mrb[52].mxu1 }
 0x16b   : > { %v904_v33 = vadd.f32 %v2078_v11, %v903_v31  ;;  %v1032_v34 = vadd.f32 %v2078_v11, %v1031_v32  ;;  %v905_v35 = vpop.f32.mrb[53].mxu0  ;;  %v1033_v36 = vpop.f32.mrb[53].mxu1 }
 0x16c   : > { %v906_v37 = vpop.f32.mrb[54].mxu0  ;;  %v1034_v38 = vpop.f32.mrb[54].mxu1 }
 0x16d   : > { %v1689_v39 = vpack.c.bf16 %v904_v33, %v904_v33  ;;  %v1721_v40 = vpack.c.bf16 %v1032_v34, %v1032_v34  ;;  %v907_v41 = vadd.f32 %v2078_v11, %v906_v37  ;;  %v1035_v42 = vadd.f32 %v2078_v11, %v1034_v38  ;;  %v908_v43 = vpop.f32.mrb[55].mxu0  ;;  %v1036_v44 = vpop.f32.mrb[55].mxu1 }
 0x16f   : > { %1337 = vst.msk [vmem:[%s2086_s23 + $0x68] sm:$0xf] %vm1310_vm1, %v1689_v39  ;;  %1369 = vst.msk [vmem:[%s2086_s23 + $0xe8] sm:$0xf] %vm1310_vm1, %v1721_v40  ;;  %v1690_v45 = vpack.c.bf16 %v907_v41, %v907_v41  ;;  %v1722_v46 = vpack.c.bf16 %v1035_v42, %v1035_v42 }
 0x171   : > { %1338 = vst.msk [vmem:[%s2086_s23 + $0x6c] sm:$0xf] %vm1310_vm1, %v1690_v45  ;;  %1370 = vst.msk [vmem:[%s2086_s23 + $0xec] sm:$0xf] %vm1310_vm1, %v1722_v46 }
 0x172   : > { %v911_v47 = vpop.f32.mrb[56].mxu0  ;;  %v1039_v48 = vpop.f32.mrb[56].mxu1 }
 0x173   : > { %v912_v49 = vadd.f32 %v2078_v11, %v911_v47  ;;  %v1040_v50 = vadd.f32 %v2078_v11, %v1039_v48  ;;  %v913_v51 = vpop.f32.mrb[57].mxu0  ;;  %v1041_v52 = vpop.f32.mrb[57].mxu1 }
 0x174   : > { %v914_v53 = vpop.f32.mrb[58].mxu0  ;;  %v1042_v54 = vpop.f32.mrb[58].mxu1 }
 0x175   : > { %v1691_v55 = vpack.c.bf16 %v912_v49, %v912_v49  ;;  %v1723_v56 = vpack.c.bf16 %v1040_v50, %v1040_v50  ;;  %v915_v57 = vadd.f32 %v2078_v11, %v914_v53  ;;  %v1043_v58 = vadd.f32 %v2078_v11, %v1042_v54  ;;  %v916_v59 = vpop.f32.mrb[59].mxu0  ;;  %v1044_v60 = vpop.f32.mrb[59].mxu1 }
 0x177   : > { %1339 = vst.msk [vmem:[%s2086_s23 + $0x70] sm:$0xf] %vm1310_vm1, %v1691_v55  ;;  %1371 = vst.msk [vmem:[%s2086_s23 + $0xf0] sm:$0xf] %vm1310_vm1, %v1723_v56  ;;  %v1692_v61 = vpack.c.bf16 %v915_v57, %v915_v57  ;;  %v1724_v62 = vpack.c.bf16 %v1043_v58, %v1043_v58 }
 0x179   : > { %1340 = vst.msk [vmem:[%s2086_s23 + $0x74] sm:$0xf] %vm1310_vm1, %v1692_v61  ;;  %1372 = vst.msk [vmem:[%s2086_s23 + $0xf4] sm:$0xf] %vm1310_vm1, %v1724_v62 }
 0x17a   : > { %v919_v63 = vpop.f32.mrb[60].mxu0  ;;  %v1047_v0 = vpop.f32.mrb[60].mxu1 }
 0x17b   : > { %v920_v1 = vadd.f32 %v2078_v11, %v919_v63  ;;  %v1048_v2 = vadd.f32 %v2078_v11, %v1047_v0  ;;  %v921_v3 = vpop.f32.mrb[61].mxu0  ;;  %v1049_v4 = vpop.f32.mrb[61].mxu1 }
 0x17c   : > { %v922_v5 = vpop.f32.mrb[62].mxu0  ;;  %v1050_v6 = vpop.f32.mrb[62].mxu1 }
 0x17d   : > { %v1693_v7 = vpack.c.bf16 %v920_v1, %v920_v1  ;;  %v1725_v8 = vpack.c.bf16 %v1048_v2, %v1048_v2  ;;  %v923_v9 = vadd.f32 %v2078_v11, %v922_v5  ;;  %v1051_v10 = vadd.f32 %v2078_v11, %v1050_v6  ;;  %v924_v12 = vpop.f32.mrb[63].mxu0  ;;  %v1052_v13 = vpop.f32.mrb[63].mxu1 }
 0x17f   : > { %1341 = vst.msk [vmem:[%s2086_s23 + $0x78] sm:$0xf] %vm1310_vm1, %v1693_v7  ;;  %1373 = vst.msk [vmem:[%s2086_s23 + $0xf8] sm:$0xf] %vm1310_vm1, %v1725_v8  ;;  %v1694_v14 = vpack.c.bf16 %v923_v9, %v923_v9  ;;  %v1726_v15 = vpack.c.bf16 %v1051_v10, %v1051_v10 }
 0x181   : > { %1342 = vst.msk [vmem:[%s2086_s23 + $0x7c] sm:$0xf] %vm1310_vm1, %v1694_v14  ;;  %1374 = vst.msk [vmem:[%s2086_s23 + $0xfc] sm:$0xf] %vm1310_vm1, %v1726_v15 }
 0x182 PF: > { %s13_s14 = sadd.s32 1, %s1900_s14   ;;  %s2291_s12 = smov %s1896_s13 }
 0x183   : > { %p10_p5 = scmp.ge.s32.totalorder %s13_s14, 6   ;;  %s2292_s13 = smov %s2294_s15 }
 0x185   :  { %12 = sbr.rel (!%p10_p5) target bundleno = 2 (0x2), region = 68 }

// kernel: cgrnet_forward.18
= control target key start
LH: loop header
LB: loop body
LE: loop exit
PB: predicated region body
PF: predicated region fallthrough
CT: control target
= control target key end

     0   :  { %s2542_s12 = smov 0   ;;  %s2544_s13 = smov 0   ;;  %s2999_s0 = inlined_call_operand.vmem [shape: bf16[512,576], index: 0, kind: input, shape index: {}]   ;;  %s3000_s1 = inlined_call_operand.vmem [shape: bf16[576,64], index: 1, kind: input, shape index: {}]   ;;  %s3001_s2 = inlined_call_operand.vmem [shape: f32[1,64], index: 2, kind: input, shape index: {}]   ;;  %s3002_s3 = inlined_call_operand.vmem [shape: bf16[512,64], index: 3, kind: output, shape index: {}]  }
   0x1   :  { %s2546_s14 = smov 0  }
   0x2 LB: > { %s25_s15 = sadd.s32 1, %s2516_s13  ;;  %p1821_p0 = scmp.ge.s32.totalorder %s2520_s14, 1  ;;  %s2520_s14 = sphi %s2546_s14, %s13_s14   ;;  %s2516_s13 = sphi %s2544_s13, %s3004_s13   ;;  %s2512_s12 = sphi %s2542_s12, %s3003_s12  }
   0x3   : > { %p27_p1 = scmp.ge.s32.totalorder %s25_s15, 2  ;;  %p170_p2 = scmp.lt.s32.totalorder %s2520_s14, 3 }
   0x5   : > { %s3006_s15 = smov (%p27_p1, %s25_s15), 0  ;;  %p171_p3 = pnand %p1821_p0, %p170_p2 }
   0x6   : > { %v2350_v0 = vld [vmem:[%s3000_s1 + $0x40] sm:$0xff] (!%p171_p3)   ;;  %s1822_s18 = sshll.u32 (!%p171_p3), %s2512_s12, 5  ;;  %v2352_v2 = vld [vmem:[%s3000_s1 + $0x48] sm:$0xff] (!%p171_p3)   ;;  %v2354_v4 = vld [vmem:[%s3000_s1 + $0x50] sm:$0xff] (!%p171_p3)   ;;  %vm1020_vm0 = vcmask (!%p171_p3), 523264   ;;  %vm1680_vm1 = vcmask (!%p171_p3), 519168  }
   0x7   : > { %174 = sbr.rel (%p171_p3) target bundleno = 415 (0x19f), region = 32  ;;  %v2351_v1 = vld [vmem:[%s3000_s1] sm:$0xff] (!%p171_p3)   ;;  %2025 = vmatprep.subr.bf16.mxu0 (!%p171_p3), %v2350_v0  ;;  %2309 = vmatprep.subr.bf16.mxu1 (!%p171_p3), %v2350_v0  ;;  %p206_p4 = scmp.lt.s32.totalorder (!%p171_p3), %s1822_s18, 63  ;;  %v2353_v3 = vld [vmem:[%s3000_s1 + $0x8] sm:$0xff] (!%p171_p3)   ;;  %v2355_v5 = vld [vmem:[%s3000_s1 + $0x10] sm:$0xff] (!%p171_p3)  }
   0x8   : > { %2026 = vmatpush3.bf16.msra.mxu0 (!%p171_p3), %v2351_v1  ;;  %2317 = vmatpush3.bf16.msra.mxu1 (!%p171_p3), %v2351_v1  ;;  %v2356_v6 = vld [vmem:[%s3000_s1 + $0x58] sm:$0xff] (!%p171_p3)   ;;  %v2358_v8 = vld [vmem:[%s3000_s1 + $0x60] sm:$0xff] (!%p171_p3)   ;;  %v2360_v10 = vld [vmem:[%s3000_s1 + $0x68] sm:$0xff] (!%p171_p3)  }
   0x9   : > { %2027 = vmatprep.subr.bf16.mxu0 (!%p171_p3), %v2352_v2  ;;  %2310 = vmatprep.subr.bf16.mxu1 (!%p171_p3), %v2352_v2  ;;  %v2357_v7 = vld [vmem:[%s3000_s1 + $0x18] sm:$0xff] (!%p171_p3)   ;;  %v2359_v9 = vld [vmem:[%s3000_s1 + $0x20] sm:$0xff] (!%p171_p3)   ;;  %v2361_v13 = vld [vmem:[%s3000_s1 + $0x28] sm:$0xff] (!%p171_p3)  }
   0xa   : > { %v2362_v14 = vld [vmem:[%s3000_s1 + $0x70] sm:$0xff] (!%p171_p3)   ;;  %v2364_v16 = vld [vmem:[%s3000_s1 + $0x78] sm:$0xff] (!%p171_p3)   ;;  %v2372_v18 = vld [vmem:[%s3000_s1 + $0xc0] sm:$0xff] (!%p171_p3)  }
   0xb   : > { %v2363_v15 = vld [vmem:[%s3000_s1 + $0x30] sm:$0xff] (!%p171_p3)   ;;  %v2365_v17 = vld [vmem:[%s3000_s1 + $0x38] sm:$0xff] (!%p171_p3)   ;;  %v2375_v19 = vld [vmem:[%s3000_s1 + $0x100] sm:$0xff] (!%p171_p3)  }
   0xc   : > { %2028 = vmatpush3.bf16.msra.mxu0 (!%p171_p3), %v2353_v3  ;;  %2318 = vmatpush3.bf16.msra.mxu1 (!%p171_p3), %v2353_v3  ;;  %v2373_v22 = vld [vmem:[%s3000_s1 + $0x80] sm:$0xff] (!%p171_p3)   ;;  %v2374_v23 = vld [vmem:[%s3000_s1 + $0xc8] sm:$0xff] (!%p171_p3)   ;;  %v2383_v28 = vld [vmem:[%s3000_s1 + $0xd0] sm:$0xff] (!%p171_p3)  }
   0xd   : > { %2029 = vmatprep.subr.bf16.mxu0 (!%p171_p3), %v2354_v4  ;;  %2311 = vmatprep.subr.bf16.mxu1 (!%p171_p3), %v2354_v4  ;;  %v2376_v26 = vld [vmem:[%s3000_s1 + $0x88] sm:$0xff] (!%p171_p3)   ;;  %v2384_v30 = vld [vmem:[%s3000_s1 + $0x90] sm:$0xff] (!%p171_p3)   ;;  %v2385_v31 = vld [vmem:[%s3000_s1 + $0xd8] sm:$0xff] (!%p171_p3)  }
   0xe   : > { %s3008_s18 = smov (!%p206_p4, %s1822_s18), 63  ;;  %v2386_v34 = vld [vmem:[%s3000_s1 + $0x98] sm:$0xff]   ;;  %v2406_v35 = vld [vmem:[%s3000_s1 + $0x108] sm:$0xff]   ;;  %v2393_v37 = vld [vmem:[%s3000_s1 + $0xe0] sm:$0xff]  }
   0xf   : > { %s2325_s4 = smul.u32 20, %s3008_s18  ;;  %v2394_v39 = vld [vmem:[%s3000_s1 + $0xa0] sm:$0xff]   ;;  %v2395_v40 = vld [vmem:[%s3000_s1 + $0xe8] sm:$0xff]   ;;  %v2403_v46 = vld [vmem:[%s3000_s1 + $0xf0] sm:$0xff]   ;;  %s1825_s27 = sshll.u32 %s3008_s18, 2 }
  0x10   : > { %2030 = vmatpush3.bf16.msra.mxu0 %v2355_v5  ;;  %2319 = vmatpush3.bf16.msra.mxu1 %v2355_v5  ;;  %v2396_v43 = vld [vmem:[%s3000_s1 + $0xa8] sm:$0xff]   ;;  %v2426_v47 = vld [vmem:[%s3000_s1 + $0x110] sm:$0xff]   ;;  %v2405_v49 = vld [vmem:[%s3000_s1 + $0xf8] sm:$0xff]   ;;  %s2864_s30 = scalar_lea.vmem %s3002_s3, %s1825_s27 }
  0x11   : > { %2031 = vmatprep.subr.bf16.mxu0 %v2356_v6  ;;  %2312 = vmatprep.subr.bf16.mxu1 %v2356_v6  ;;  %s2593_s11 = scalar_lea.vmem %s2999_s0, %s2325_s4  ;;  %v2404_v48 = vld [vmem:[%s3000_s1 + $0xb0] sm:$0xff]   ;;  %v2407_v52 = vld [vmem:[%s3000_s1 + $0xb8] sm:$0xff]  }
  0x12   : > { %v2368_v11 = vld [vmem:[%s2593_s11 + $0x4] ss:$20 sps:$4 sm:$0xff]   ;;  %v2366_v20 = vld [vmem:[%s2593_s11] ss:$20 sps:$4 sm:$0xff]   ;;  %v2381_v27 = vld [vmem:[%s2593_s11 + $0x28] ss:$20 sps:$4 sm:$0xff]  }
  0x13   : > { %v2371_v12 = vld [vmem:[%s2593_s11 + $0x1e4] ss:$20 sps:$4 sm:$0xff]   ;;  %1101 = vmatprep.mubr.bf16.mxu0 %v2368_v11  ;;  %v2369_v21 = vld [vmem:[%s2593_s11 + $0x1e0] ss:$20 sps:$4 sm:$0xff]   ;;  %v2382_v29 = vld [vmem:[%s2593_s11 + $0x208] ss:$20 sps:$4 sm:$0xff]  }
  0x14   : > { %2032 = vmatpush3.bf16.msra.mxu0 %v2357_v7  ;;  %2320 = vmatpush3.bf16.msra.mxu1 %v2357_v7  ;;  %v2377_v24 = vld [vmem:[%s2593_s11 + $0x2c] ss:$20 sps:$4 sm:$0xff]   ;;  %v2387_v32 = vld [vmem:[%s2593_s11 + $0x54] ss:$20 sps:$4 sm:$0xff]   ;;  %v2391_v36 = vld [vmem:[%s2593_s11 + $0x50] ss:$20 sps:$4 sm:$0xff]  }
  0x15   : > { %2033 = vmatprep.subr.bf16.mxu0 %v2358_v8  ;;  %2313 = vmatprep.subr.bf16.mxu1 %v2358_v8  ;;  %v2379_v25 = vld [vmem:[%s2593_s11 + $0x20c] ss:$20 sps:$4 sm:$0xff]   ;;  %v2389_v33 = vld [vmem:[%s2593_s11 + $0x234] ss:$20 sps:$4 sm:$0xff]   ;;  %v2392_v38 = vld [vmem:[%s2593_s11 + $0x230] ss:$20 sps:$4 sm:$0xff]  }
  0x16   : > { %1197 = vmatprep.mubr.bf16.mxu1 %v2371_v12  ;;  %v2397_v41 = vld [vmem:[%s2593_s11 + $0x7c] ss:$20 sps:$4 sm:$0xff]   ;;  %v2401_v44 = vld [vmem:[%s2593_s11 + $0x78] ss:$20 sps:$4 sm:$0xff]   ;;  %v2413_v54 = vld [vmem:[%s2593_s11 + $0xa0] ss:$20 sps:$4 sm:$0xff]  }
  0x17   : > { %v2399_v42 = vld [vmem:[%s2593_s11 + $0x25c] ss:$20 sps:$4 sm:$0xff]   ;;  %v2402_v45 = vld [vmem:[%s2593_s11 + $0x258] ss:$20 sps:$4 sm:$0xff]   ;;  %v2416_v57 = vld [vmem:[%s2593_s11 + $0x34] ss:$20 sps:$4 sm:$0xff]  }
  0x18   : > { %2034 = vmatpush3.bf16.msra.mxu0 %v2359_v9  ;;  %2321 = vmatpush3.bf16.msra.mxu1 %v2359_v9  ;;  %v2408_v50 = vld [vmem:[%s2593_s11 + $0xa4] ss:$20 sps:$4 sm:$0xff]   ;;  %v2412_v51 = vld [vmem:[%s2593_s11 + $0xc] ss:$20 sps:$4 sm:$0xff]   ;;  %v2410_v53 = vld [vmem:[%s2593_s11 + $0x8] ss:$20 sps:$4 sm:$0xff]  }
  0x19   : > { %2035 = vmatprep.subr.bf16.mxu0 %v2360_v10  ;;  %2314 = vmatprep.subr.bf16.mxu1 %v2360_v10  ;;  %v2414_v55 = vld [vmem:[%s2593_s11 + $0xcc] ss:$20 sps:$4 sm:$0xff]   ;;  %v2445_v56 = vld [vmem:[%s3000_s1 + $0x118] sm:$0xff]   ;;  %v2419_v59 = vld [vmem:[%s2593_s11 + $0x30] ss:$20 sps:$4 sm:$0xff]  }
  0x1a   : > { %v2418_v58 = vld [vmem:[%s2593_s11 + $0xc8] ss:$20 sps:$4 sm:$0xff]   ;;  %v2424_v62 = vld [vmem:[%s2593_s11 + $0xf0] ss:$20 sps:$4 sm:$0xff]   ;;  %v2425_v63 = vld [vmem:[%s2593_s11 + $0x58] ss:$20 sps:$4 sm:$0xff]  }
  0x1b   : > { %v2420_v60 = vld [vmem:[%s2593_s11 + $0xf4] ss:$20 sps:$4 sm:$0xff]   ;;  %v2422_v61 = vld [vmem:[%s2593_s11 + $0x5c] ss:$20 sps:$4 sm:$0xff]   ;;  %v2429_v1 = vld [vmem:[%s2593_s11 + $0x84] ss:$20 sps:$4 sm:$0xff]  }
  0x1c   : > { %2036 = vmatpush3.bf16.msra.mxu0 %v2361_v13  ;;  %2322 = vmatpush3.bf16.msra.mxu1 %v2361_v13  ;;  %v2427_v0 = vld [vmem:[%s2593_s11 + $0x11c] ss:$20 sps:$4 sm:$0xff]   ;;  %v2431_v2 = vld [vmem:[%s2593_s11 + $0x118] ss:$20 sps:$4 sm:$0xff]   ;;  %v2432_v3 = vld [vmem:[%s2593_s11 + $0x80] ss:$20 sps:$4 sm:$0xff]  }
  0x1d   : > { %2037 = vmatprep.subr.bf16.mxu0 %v2362_v14  ;;  %2315 = vmatprep.subr.bf16.mxu1 %v2362_v14  ;;  %v2433_v4 = vld [vmem:[%s2593_s11 + $0x144] ss:$20 sps:$4 sm:$0xff]   ;;  %v2435_v5 = vld [vmem:[%s2593_s11 + $0xac] ss:$20 sps:$4 sm:$0xff]   ;;  %v2438_v7 = vld [vmem:[%s2593_s11 + $0xa8] ss:$20 sps:$4 sm:$0xff]  }
  0x1e   : > { %v2437_v6 = vld [vmem:[%s2593_s11 + $0x140] ss:$20 sps:$4 sm:$0xff]   ;;  %v2443_v10 = vld [vmem:[%s2593_s11 + $0x168] ss:$20 sps:$4 sm:$0xff]   ;;  %v2444_v11 = vld [vmem:[%s2593_s11 + $0xd0] ss:$20 sps:$4 sm:$0xff]  }
  0x1f   : > { %v2439_v8 = vld [vmem:[%s2593_s11 + $0x16c] ss:$20 sps:$4 sm:$0xff]   ;;  %v2441_v9 = vld [vmem:[%s2593_s11 + $0xd4] ss:$20 sps:$4 sm:$0xff]   ;;  %v2448_v13 = vld [vmem:[%s2593_s11 + $0xfc] ss:$20 sps:$4 sm:$0xff]  }
  0x20   : > { %2038 = vmatpush3.bf16.msra.mxu0 %v2363_v15  ;;  %2323 = vmatpush3.bf16.msra.mxu1 %v2363_v15  ;;  %v2446_v12 = vld [vmem:[%s2593_s11 + $0x194] ss:$20 sps:$4 sm:$0xff]   ;;  %v2450_v14 = vld [vmem:[%s2593_s11 + $0x190] ss:$20 sps:$4 sm:$0xff]   ;;  %v2451_v15 = vld [vmem:[%s2593_s11 + $0xf8] ss:$20 sps:$4 sm:$0xff]  }
  0x21   : > { %2039 = vmatprep.subr.bf16.mxu0 %v2364_v16  ;;  %2316 = vmatprep.subr.bf16.mxu1 %v2364_v16  ;;  %v2452_v16 = vld [vmem:[%s2593_s11 + $0x1bc] ss:$20 sps:$4 sm:$0xff]  }
  0x24   : > { %2040 = vmatpush3.bf16.msra.mxu0 %v2365_v17  ;;  %2324 = vmatpush3.bf16.msra.mxu1 %v2365_v17  ;;  %v2454_v17 = vld [vmem:[%s2593_s11 + $0x124] ss:$20 sps:$4 sm:$0xff]  }
  0x25   : > { %2137 = vmatprep.subr.bf16.mxu1 %v2372_v18  ;;  %2269 = vmatprep.subr.bf16.mxu0 %v2375_v19  ;;  %v2456_v18 = vld [vmem:[%s2593_s11 + $0x1b8] ss:$20 sps:$4 sm:$0xff]  }
  0x27   : > { %1102 = vmatmul.mubr.bf16.vlgmr.msra.gmra.mrb[0].mxu0 %v2366_v20  ;;  %1198 = vmatmul.mubr.bf16.vlgmr.msra.gmra.mrb[0].mxu1 %v2369_v21  ;;  %v2458_v20 = vld [vmem:[%s2593_s11 + $0x14c] ss:$20 sps:$4 sm:$0xff]   ;;  %v2460_v21 = vld [vmem:[%s2593_s11 + $0x10] ss:$20 sps:$4 sm:$0xff]  }
  0x28   : > { %2138 = vmatpush3.bf16.msra.mxu1 %v2373_v22  ;;  %2270 = vmatpush3.bf16.msra.mxu0 %v2375_v19  ;;  %v2457_v19 = vld [vmem:[%s2593_s11 + $0x120] ss:$20 sps:$4 sm:$0xff]   ;;  %v2461_v22 = vld [vmem:[%s2593_s11 + $0x148] ss:$20 sps:$4 sm:$0xff]  }
  0x29   : > { %2139 = vmatprep.subr.bf16.mxu1 %v2374_v23  ;;  %1109 = vmatprep.mubr.bf16.mxu0 %v2377_v24  ;;  %v2462_v23 = vld [vmem:[%s2593_s11 + $0x38] ss:$20 sps:$4 sm:$0xff]   ;;  %v2463_v24 = vld [vmem:[%s2593_s11 + $0x174] ss:$20 sps:$4 sm:$0xff]  }
  0x2a   : > { %1205 = vmatprep.mubr.bf16.mxu1 %v2379_v25  ;;  %2271 = vmatprep.subr.bf16.mxu0 %v2406_v35  ;;  %v2465_v25 = vld [vmem:[%s2593_s11 + $0x60] ss:$20 sps:$4 sm:$0xff]  }
  0x2c   : > { %2140 = vmatpush3.bf16.msra.mxu1 %v2376_v26  ;;  %2272 = vmatpush3.bf16.msra.mxu0 %v2406_v35  ;;  %v2466_v26 = vld [vmem:[%s2593_s11 + $0x170] ss:$20 sps:$4 sm:$0xff]   ;;  %v2477_v35 = vld [vmem:[%s2593_s11 + $0x128] ss:$20 sps:$4 sm:$0xff]  }
  0x2d   : > { %2141 = vmatprep.subr.bf16.mxu1 %v2383_v28  ;;  %2273 = vmatprep.subr.bf16.mxu0 %v2426_v47  ;;  %v2468_v28 = vld [vmem:[%s2593_s11 + $0x19c] ss:$20 sps:$4 sm:$0xff]  }
  0x2f   : > { %1110 = vmatmul.mubr.bf16.gmra.mrb[4].mxu0 %v2381_v27  ;;  %1206 = vmatmul.mubr.bf16.gmra.mrb[4].mxu1 %v2382_v29  ;;  %v2467_v27 = vld [vmem:[%s2593_s11 + $0x88] ss:$20 sps:$4 sm:$0xff]   ;;  %v2470_v29 = vld [vmem:[%s2593_s11 + $0xb0] ss:$20 sps:$4 sm:$0xff]  }
  0x30   : > { %2142 = vmatpush3.bf16.msra.mxu1 %v2384_v30  ;;  %1117 = vmatprep.mubr.bf16.mxu0 %v2387_v32  ;;  %v2471_v30 = vld [vmem:[%s2593_s11 + $0x198] ss:$20 sps:$4 sm:$0xff]  }
  0x31   : > { %2143 = vmatprep.subr.bf16.mxu1 %v2385_v31  ;;  %1213 = vmatprep.mubr.bf16.mxu1 %v2389_v33  ;;  %v2472_v31 = vld [vmem:[%s2593_s11 + $0xd8] ss:$20 sps:$4 sm:$0xff]   ;;  %v2475_v33 = vld [vmem:[%s2593_s11 + $0x100] ss:$20 sps:$4 sm:$0xff]  }
  0x32   : > { %2274 = vmatpush3.bf16.msra.mxu0 %v2426_v47  ;;  %v2473_v32 = vld [vmem:[%s2593_s11 + $0x1c4] ss:$20 sps:$4 sm:$0xff]  }
  0x33   : > { %2275 = vmatprep.subr.bf16.mxu0 %v2445_v56  ;;  %v2492_v47 = vld [vmem:[%s2593_s11 + $0x218] ss:$20 sps:$4 sm:$0xff]  }
  0x34   : > { %2144 = vmatpush3.bf16.msra.mxu1 %v2386_v34  ;;  %v2476_v34 = vld [vmem:[%s2593_s11 + $0x1c0] ss:$20 sps:$4 sm:$0xff]  }
  0x35   : > { %2145 = vmatprep.subr.bf16.mxu1 %v2393_v37  ;;  %v2480_v37 = vld [vmem:[%s2593_s11 + $0x150] ss:$20 sps:$4 sm:$0xff]  }
  0x36   : > { %2276 = vmatpush3.bf16.msra.mxu0 %v2445_v56 }
  0x37   : > { %1118 = vmatmul.mubr.bf16.gmra.mrb[8].mxu0 %v2391_v36  ;;  %1214 = vmatmul.mubr.bf16.gmra.mrb[8].mxu1 %v2392_v38  ;;  %v2478_v36 = vld [vmem:[%s2593_s11 + $0x1ec] ss:$20 sps:$4 sm:$0xff]   ;;  %v2481_v38 = vld [vmem:[%s2593_s11 + $0x1e8] ss:$20 sps:$4 sm:$0xff]  }
  0x38   : > { %2146 = vmatpush3.bf16.msra.mxu1 %v2394_v39  ;;  %1125 = vmatprep.mubr.bf16.mxu0 %v2397_v41  ;;  %v2482_v39 = vld [vmem:[%s2593_s11 + $0x178] ss:$20 sps:$4 sm:$0xff]   ;;  %v2485_v41 = vld [vmem:[%s2593_s11 + $0x1a0] ss:$20 sps:$4 sm:$0xff]  }
  0x39   : > { %2147 = vmatprep.subr.bf16.mxu1 %v2395_v40  ;;  %1221 = vmatprep.mubr.bf16.mxu1 %v2399_v42  ;;  %v2483_v40 = vld [vmem:[%s2593_s11 + $0x214] ss:$20 sps:$4 sm:$0xff]   ;;  %v2486_v42 = vld [vmem:[%s2593_s11 + $0x210] ss:$20 sps:$4 sm:$0xff]  }
  0x3c   : > { %2148 = vmatpush3.bf16.msra.mxu1 %v2396_v43  ;;  %v2487_v43 = vld [vmem:[%s2593_s11 + $0x1c8] ss:$20 sps:$4 sm:$0xff]  }
  0x3d   : > { %2149 = vmatprep.subr.bf16.mxu1 %v2403_v46  ;;  %v2491_v46 = vld [vmem:[%s2593_s11 + $0x238] ss:$20 sps:$4 sm:$0xff]  }
  0x3f   : > { %1126 = vmatmul.mubr.bf16.gmra.mrb[12].mxu0 %v2401_v44  ;;  %1222 = vmatmul.mubr.bf16.gmra.mrb[12].mxu1 %v2402_v45  ;;  %v2488_v44 = vld [vmem:[%s2593_s11 + $0x23c] ss:$20 sps:$4 sm:$0xff]  }
  0x40   : > { %2150 = vmatpush3.bf16.msra.mxu1 %v2404_v48  ;;  %1133 = vmatprep.mubr.bf16.mxu0 %v2408_v50  ;;  %v2490_v45 = vld [vmem:[%s2593_s11 + $0x1f0] ss:$20 sps:$4 sm:$0xff]   ;;  %v2496_v50 = vld [vmem:[%s2593_s11 + $0x260] ss:$20 sps:$4 sm:$0xff]  }
  0x41   : > { %2151 = vmatprep.subr.bf16.mxu1 %v2405_v49  ;;  %1262 = vmatprep.mubr.bf16.mxu1 %v2412_v51  ;;  %v2493_v48 = vld [vmem:[%s2593_s11 + $0x264] ss:$20 sps:$4 sm:$0xff]   ;;  %v2495_v49 = vld [vmem:[%s2593_s11 + $0x240] ss:$20 sps:$4 sm:$0xff]   ;;  %v2497_v51 = vld [vmem:[%s2593_s11 + $0x268] ss:$20 sps:$4 sm:$0xff]  }
  0x44   : > { %2152 = vmatpush3.bf16.msra.mxu1 %v2407_v52 }
  0x47   : > { %1134 = vmatmul.mubr.bf16.gmra.mrb[16].mxu0 %v2413_v54  ;;  %1263 = vmatmul.mubr.bf16.vlgmr.msra.gmra.mrb[16].mxu1 %v2410_v53 }
  0x48   : > { %1141 = vmatprep.mubr.bf16.mxu0 %v2414_v55  ;;  %1270 = vmatprep.mubr.bf16.mxu1 %v2416_v57 }
  0x4f   : > { %1142 = vmatmul.mubr.bf16.gmra.mrb[20].mxu0 %v2418_v58  ;;  %1271 = vmatmul.mubr.bf16.gmra.mrb[20].mxu1 %v2419_v59 }
  0x50   : > { %1149 = vmatprep.mubr.bf16.mxu0 %v2420_v60  ;;  %1278 = vmatprep.mubr.bf16.mxu1 %v2422_v61 }
  0x57   : > { %1150 = vmatmul.mubr.bf16.gmra.mrb[24].mxu0 %v2424_v62  ;;  %1279 = vmatmul.mubr.bf16.gmra.mrb[24].mxu1 %v2425_v63 }
  0x58   : > { %1157 = vmatprep.mubr.bf16.mxu0 %v2427_v0  ;;  %1286 = vmatprep.mubr.bf16.mxu1 %v2429_v1 }
  0x5f   : > { %1158 = vmatmul.mubr.bf16.gmra.mrb[28].mxu0 %v2431_v2  ;;  %1287 = vmatmul.mubr.bf16.gmra.mrb[28].mxu1 %v2432_v3 }
  0x60   : > { %1165 = vmatprep.mubr.bf16.mxu0 %v2433_v4  ;;  %1294 = vmatprep.mubr.bf16.mxu1 %v2435_v5 }
  0x67   : > { %1166 = vmatmul.mubr.bf16.gmra.mrb[32].mxu0 %v2437_v6  ;;  %1295 = vmatmul.mubr.bf16.gmra.mrb[32].mxu1 %v2438_v7 }
  0x68   : > { %1173 = vmatprep.mubr.bf16.mxu0 %v2439_v8  ;;  %1302 = vmatprep.mubr.bf16.mxu1 %v2441_v9 }
  0x6f   : > { %1174 = vmatmul.mubr.bf16.gmra.mrb[36].mxu0 %v2443_v10  ;;  %1303 = vmatmul.mubr.bf16.gmra.mrb[36].mxu1 %v2444_v11 }
  0x70   : > { %1181 = vmatprep.mubr.bf16.mxu0 %v2446_v12  ;;  %1310 = vmatprep.mubr.bf16.mxu1 %v2448_v13 }
  0x77   : > { %1182 = vmatmul.mubr.bf16.gmra.mrb[40].mxu0 %v2450_v14  ;;  %1311 = vmatmul.mubr.bf16.gmra.mrb[40].mxu1 %v2451_v15 }
  0x78   : > { %1189 = vmatprep.mubr.bf16.mxu0 %v2452_v16  ;;  %1318 = vmatprep.mubr.bf16.mxu1 %v2454_v17 }
  0x7f   : > { %1190 = vmatmul.mubr.bf16.gmra.mrb[44].mxu0 %v2456_v18  ;;  %1319 = vmatmul.mubr.bf16.gmra.mrb[44].mxu1 %v2457_v19 }
  0x80   : > { %1326 = vmatprep.mubr.bf16.mxu1 %v2458_v20  ;;  %2277 = vmatprep.mubr.msk.bf16.mxu0 %vm1020_vm0, %v2460_v21 }
  0x87   : > { %1327 = vmatmul.mubr.bf16.gmra.mrb[48].mxu1 %v2461_v22  ;;  %2278 = vmatmul.mubr.msk.bf16.vlgmr.msra.gmra.mrb[48].mxu0 %vm1020_vm0, %v2462_v23 }
  0x88   : > { %1334 = vmatprep.mubr.bf16.mxu1 %v2463_v24  ;;  %2281 = vmatprep.mubr.msk.bf16.mxu0 %vm1020_vm0, %v2465_v25 }
  0x8f   : > { %1335 = vmatmul.mubr.bf16.gmra.mrb[52].mxu1 %v2466_v26  ;;  %2282 = vmatmul.mubr.msk.bf16.gmra.mrb[52].mxu0 %vm1020_vm0, %v2467_v27 }
  0x90   : > { %1342 = vmatprep.mubr.bf16.mxu1 %v2468_v28  ;;  %2285 = vmatprep.mubr.msk.bf16.mxu0 %vm1020_vm0, %v2470_v29 }
  0x97   : > { %1343 = vmatmul.mubr.bf16.gmra.mrb[56].mxu1 %v2471_v30  ;;  %2286 = vmatmul.mubr.msk.bf16.gmra.mrb[56].mxu0 %vm1020_vm0, %v2472_v31 }
  0x98   : > { %1350 = vmatprep.mubr.bf16.mxu1 %v2473_v32  ;;  %2289 = vmatprep.mubr.msk.bf16.mxu0 %vm1020_vm0, %v2475_v33 }
  0x9f   : > { %1351 = vmatmul.mubr.bf16.gmra.mrb[60].mxu1 %v2476_v34  ;;  %2290 = vmatmul.mubr.msk.bf16.gmra.mrb[60].mxu0 %vm1020_vm0, %v2477_v35 }
  0xa0   : > { %1358 = vmatprep.mubr.bf16.mxu1 %v2478_v36  ;;  %2293 = vmatprep.mubr.msk.bf16.mxu0 %vm1020_vm0, %v2480_v37 }
  0xa7   : > { %1359 = vmatmul.mubr.bf16.gmra.mrb[64].mxu1 %v2481_v38  ;;  %2294 = vmatmul.mubr.msk.bf16.gmra.mrb[64].mxu0 %vm1020_vm0, %v2482_v39  ;;  %v2791_v38 = vld [vmem:[%s3001_s2] ss:$0 sm:$0xff] }
  0xa8   : > { %1366 = vmatprep.mubr.bf16.mxu1 %v2483_v40  ;;  %2297 = vmatprep.mubr.msk.bf16.mxu0 %vm1020_vm0, %v2485_v41 }
  0xaf   : > { %1367 = vmatmul.mubr.bf16.gmra.mrb[68].mxu1 %v2486_v42  ;;  %2298 = vmatmul.mubr.msk.bf16.gmra.mrb[68].mxu0 %vm1020_vm0, %v2487_v43 }
  0xb0   : > { %1374 = vmatprep.mubr.bf16.mxu1 %v2488_v44  ;;  %2301 = vmatprep.mubr.msk.bf16.mxu0 %vm1020_vm0, %v2490_v45 }
  0xb7   : > { %1375 = vmatmul.mubr.bf16.gmra.mrb[72].mxu1 %v2491_v46  ;;  %2302 = vmatmul.mubr.msk.bf16.gmra.mrb[72].mxu0 %vm1020_vm0, %v2492_v47 }
  0xb8   : > { %1382 = vmatprep.mubr.bf16.mxu1 %v2493_v48  ;;  %2305 = vmatprep.mubr.msk.bf16.mxu0 %vm1020_vm0, %v2495_v49 }
  0xbf   : > { %1383 = vmatmul.mubr.bf16.gmra.mrb[76].mxu1 %v2496_v50  ;;  %2306 = vmatmul.mubr.msk.bf16.gmra.mrb[76].mxu0 %vm1020_vm0, %v2497_v51 }
  0xfa   : > { %v2113_v52 = vpop.f32.mrb[0].mxu1  ;;  %v2041_v53 = vpop.f32.mrb[0].mxu0 }
  0xfb   : > { %v2114_v54 = vpop.f32.mrb[1].mxu1  ;;  %v2042_v55 = vpop.f32.mrb[1].mxu0 }
  0xfc   : > { %v2772_v56 = vadd.f32 %v2114_v54, %v2113_v52  ;;  %v2116_v57 = vpop.f32.mrb[2].mxu1  ;;  %v2043_v58 = vadd.f32 %v2042_v55, %v2041_v53  ;;  %v2044_v59 = vpop.f32.mrb[2].mxu0 }
  0xfd   : > { %v2117_v60 = vpop.f32.mrb[3].mxu1  ;;  %v2045_v61 = vpop.f32.mrb[3].mxu0 }
  0xfe   : > { %v2774_v62 = vadd.f32 %v2117_v60, %v2116_v57  ;;  %v2046_v63 = vadd.f32 %v2045_v61, %v2044_v59  ;;  %v1104_v41 = vadd.f32 %v2043_v58, %v2791_v38 }
 0x100   : > { %v1107_v48 = vadd.f32 %v2046_v63, %v2791_v38 }
 0x102   : > { %v2119_v0 = vpop.f32.mrb[4].mxu1  ;;  %v2047_v1 = vpop.f32.mrb[4].mxu0 }
 0x103   : > { %v2120_v2 = vpop.f32.mrb[5].mxu1  ;;  %v2048_v3 = vpop.f32.mrb[5].mxu0 }
 0x104   : > { %v2776_v4 = vadd.f32 %v2120_v2, %v2119_v0  ;;  %v2122_v5 = vpop.f32.mrb[6].mxu1  ;;  %v2049_v6 = vadd.f32 %v2048_v3, %v2047_v1  ;;  %v2050_v7 = vpop.f32.mrb[6].mxu0 }
 0x105   : > { %v2123_v8 = vpop.f32.mrb[7].mxu1  ;;  %v2051_v9 = vpop.f32.mrb[7].mxu0 }
 0x106   : > { %v2778_v10 = vadd.f32 %v2123_v8, %v2122_v5  ;;  %v2052_v11 = vadd.f32 %v2051_v9, %v2050_v7  ;;  %v1112_v58 = vadd.f32 %v2049_v6, %v2791_v38 }
 0x108   : > { %v1115_v63 = vadd.f32 %v2052_v11, %v2791_v38 }
 0x10a   : > { %v2125_v12 = vpop.f32.mrb[8].mxu1  ;;  %v2053_v13 = vpop.f32.mrb[8].mxu0 }
 0x10b   : > { %v2126_v14 = vpop.f32.mrb[9].mxu1  ;;  %v2054_v15 = vpop.f32.mrb[9].mxu0 }
 0x10c   : > { %v2780_v16 = vadd.f32 %v2126_v14, %v2125_v12  ;;  %v2128_v17 = vpop.f32.mrb[10].mxu1  ;;  %v2055_v18 = vadd.f32 %v2054_v15, %v2053_v13  ;;  %v2056_v19 = vpop.f32.mrb[10].mxu0 }
 0x10d   : > { %v2129_v20 = vpop.f32.mrb[11].mxu1  ;;  %v2057_v21 = vpop.f32.mrb[11].mxu0 }
 0x10e   : > { %v2782_v22 = vadd.f32 %v2129_v20, %v2128_v17  ;;  %v2058_v23 = vadd.f32 %v2057_v21, %v2056_v19  ;;  %v1120_v6 = vadd.f32 %v2055_v18, %v2791_v38 }
 0x110   : > { %v1123_v11 = vadd.f32 %v2058_v23, %v2791_v38 }
 0x112   : > { %v2131_v24 = vpop.f32.mrb[12].mxu1  ;;  %v2059_v25 = vpop.f32.mrb[12].mxu0 }
 0x113   : > { %v2132_v26 = vpop.f32.mrb[13].mxu1  ;;  %v2060_v27 = vpop.f32.mrb[13].mxu0 }
 0x114   : > { %v2784_v28 = vadd.f32 %v2132_v26, %v2131_v24  ;;  %v2134_v29 = vpop.f32.mrb[14].mxu1  ;;  %v2061_v30 = vadd.f32 %v2060_v27, %v2059_v25  ;;  %v2062_v31 = vpop.f32.mrb[14].mxu0 }
 0x115   : > { %v2135_v32 = vpop.f32.mrb[15].mxu1  ;;  %v2063_v33 = vpop.f32.mrb[15].mxu0 }
 0x116   : > { %v2786_v34 = vadd.f32 %v2135_v32, %v2134_v29  ;;  %v2064_v35 = vadd.f32 %v2063_v33, %v2062_v31  ;;  %v1128_v18 = vadd.f32 %v2061_v30, %v2791_v38 }
 0x118   : > { %v1131_v23 = vadd.f32 %v2064_v35, %v2791_v38 }
 0x11a   : > { %v2153_v36 = vpop.f32.mrb[16].mxu1  ;;  %v2065_v37 = vpop.f32.mrb[16].mxu0 }
 0x11b   : > { %v2154_v39 = vpop.f32.mrb[17].mxu1  ;;  %v2066_v40 = vpop.f32.mrb[17].mxu0 }
 0x11c   : > { %v2155_v42 = vadd.f32 %v2154_v39, %v2153_v36  ;;  %v2156_v43 = vpop.f32.mrb[18].mxu1  ;;  %v2067_v44 = vadd.f32 %v2066_v40, %v2065_v37  ;;  %v2068_v45 = vpop.f32.mrb[18].mxu0 }
 0x11d   : > { %v2157_v46 = vpop.f32.mrb[19].mxu1  ;;  %v2069_v47 = vpop.f32.mrb[19].mxu0 }
 0x11e   : > { %v2158_v49 = vadd.f32 %v2157_v46, %v2156_v43  ;;  %v2070_v50 = vadd.f32 %v2069_v47, %v2068_v45  ;;  %v2795_v51 = vadd.f32 %v2155_v42, %v1104_v41  ;;  %v1136_v30 = vadd.f32 %v2067_v44, %v2791_v38 }
 0x120   : > { %v2797_v52 = vadd.f32 %v2158_v49, %v1107_v48  ;;  %v1139_v35 = vadd.f32 %v2070_v50, %v2791_v38 }
 0x122   : > { %v2159_v53 = vpop.f32.mrb[20].mxu1  ;;  %v2071_v54 = vpop.f32.mrb[20].mxu0 }
 0x123   : > { %v2160_v55 = vpop.f32.mrb[21].mxu1  ;;  %v2072_v57 = vpop.f32.mrb[21].mxu0 }
 0x124   : > { %v2161_v59 = vadd.f32 %v2160_v55, %v2159_v53  ;;  %v2162_v60 = vpop.f32.mrb[22].mxu1  ;;  %v2073_v61 = vadd.f32 %v2072_v57, %v2071_v54  ;;  %v2074_v0 = vpop.f32.mrb[22].mxu0 }
 0x125   : > { %v2163_v1 = vpop.f32.mrb[23].mxu1  ;;  %v2075_v2 = vpop.f32.mrb[23].mxu0 }
 0x126   : > { %v2164_v3 = vadd.f32 %v2163_v1, %v2162_v60  ;;  %v2076_v5 = vadd.f32 %v2075_v2, %v2074_v0  ;;  %v2801_v7 = vadd.f32 %v2161_v59, %v1112_v58 }
 0x128   : > { %v2803_v8 = vadd.f32 %v2164_v3, %v1115_v63 }
 0x12a   : > { %v2165_v9 = vpop.f32.mrb[24].mxu1  ;;  %v2077_v12 = vpop.f32.mrb[24].mxu0 }
 0x12b   : > { %v2166_v13 = vpop.f32.mrb[25].mxu1  ;;  %v2078_v14 = vpop.f32.mrb[25].mxu0 }
 0x12c   : > { %v2167_v15 = vadd.f32 %v2166_v13, %v2165_v9  ;;  %v2168_v17 = vpop.f32.mrb[26].mxu1  ;;  %v2079_v19 = vadd.f32 %v2078_v14, %v2077_v12  ;;  %v2080_v20 = vpop.f32.mrb[26].mxu0 }
 0x12d   : > { %v2169_v21 = vpop.f32.mrb[27].mxu1  ;;  %v2081_v24 = vpop.f32.mrb[27].mxu0 }
 0x12e   : > { %v2170_v25 = vadd.f32 %v2169_v21, %v2168_v17  ;;  %v2082_v26 = vadd.f32 %v2081_v24, %v2080_v20  ;;  %v2807_v27 = vadd.f32 %v2167_v15, %v1120_v6  ;;  %v1144_v6 = vadd.f32 %v2073_v61, %v2791_v38 }
 0x130   : > { %v2809_v29 = vadd.f32 %v2170_v25, %v1123_v11  ;;  %v1147_v11 = vadd.f32 %v2076_v5, %v2791_v38 }
 0x132   : > { %v2171_v31 = vpop.f32.mrb[28].mxu1  ;;  %v2083_v32 = vpop.f32.mrb[28].mxu0 }
 0x133   : > { %v2172_v33 = vpop.f32.mrb[29].mxu1  ;;  %v2084_v36 = vpop.f32.mrb[29].mxu0 }
 0x134   : > { %v2173_v37 = vadd.f32 %v2172_v33, %v2171_v31  ;;  %v2174_v39 = vpop.f32.mrb[30].mxu1  ;;  %v2085_v40 = vadd.f32 %v2084_v36, %v2083_v32  ;;  %v2086_v41 = vpop.f32.mrb[30].mxu0 }
 0x135   : > { %v2175_v42 = vpop.f32.mrb[31].mxu1  ;;  %v2087_v43 = vpop.f32.mrb[31].mxu0 }
 0x136   : > { %v2176_v45 = vadd.f32 %v2175_v42, %v2174_v39  ;;  %v2088_v46 = vadd.f32 %v2087_v43, %v2086_v41  ;;  %v2813_v47 = vadd.f32 %v2173_v37, %v1128_v18  ;;  %v1152_v39 = vadd.f32 %v2079_v19, %v2791_v38 }
 0x138   : > { %v2815_v48 = vadd.f32 %v2176_v45, %v1131_v23 }
 0x13a   : > { %v2177_v49 = vpop.f32.mrb[32].mxu1  ;;  %v2089_v53 = vpop.f32.mrb[32].mxu0 }
 0x13b   : > { %v2178_v54 = vpop.f32.mrb[33].mxu1  ;;  %v2090_v55 = vpop.f32.mrb[33].mxu0 }
 0x13c   : > { %v2179_v57 = vadd.f32 %v2178_v54, %v2177_v49  ;;  %v2180_v58 = vpop.f32.mrb[34].mxu1  ;;  %v2818_v59 = vadd.f32 %v2090_v55, %v2089_v53  ;;  %v2092_v60 = vpop.f32.mrb[34].mxu0  ;;  %v1155_v49 = vadd.f32 %v2082_v26, %v2791_v38 }
 0x13d   : > { %v2181_v0 = vpop.f32.mrb[35].mxu1  ;;  %v2093_v1 = vpop.f32.mrb[35].mxu0 }
 0x13e   : > { %v2182_v2 = vadd.f32 %v2181_v0, %v2180_v58  ;;  %v2821_v63 = vadd.f32 %v2093_v1, %v2092_v60  ;;  %v2823_v3 = vadd.f32 %v2179_v57, %v1136_v30  ;;  %v1160_v0 = vadd.f32 %v2085_v40, %v2791_v38 }
 0x140   : > { %v2825_v9 = vadd.f32 %v2182_v2, %v1139_v35 }
 0x142   : > { %v2183_v12 = vpop.f32.mrb[36].mxu1  ;;  %v2095_v13 = vpop.f32.mrb[36].mxu0 }
 0x143   : > { %v2184_v14 = vpop.f32.mrb[37].mxu1  ;;  %v2096_v44 = vpop.f32.mrb[37].mxu0 }
 0x144   : > { %v2185_v15 = vadd.f32 %v2184_v14, %v2183_v12  ;;  %v2186_v17 = vpop.f32.mrb[38].mxu1  ;;  %v2828_v20 = vadd.f32 %v2096_v44, %v2095_v13  ;;  %v2098_v21 = vpop.f32.mrb[38].mxu0  ;;  %v1163_v14 = vadd.f32 %v2088_v46, %v2791_v38 }
 0x145   : > { %v2187_v24 = vpop.f32.mrb[39].mxu1  ;;  %v2099_v50 = vpop.f32.mrb[39].mxu0 }
 0x146   : > { %v2188_v25 = vadd.f32 %v2187_v24, %v2186_v17  ;;  %v2831_v31 = vadd.f32 %v2099_v50, %v2098_v21  ;;  %v2833_v32 = vadd.f32 %v2185_v15, %v1144_v6 }
 0x148   : > { %v2835_v33 = vadd.f32 %v2188_v25, %v1147_v11  ;;  %v1168_v25 = vadd.f32 %v2818_v59, %v2791_v38 }
 0x14a   : > { %v2189_v36 = vpop.f32.mrb[40].mxu1  ;;  %v2101_v18 = vpop.f32.mrb[40].mxu0 }
 0x14b   : > { %v2190_v37 = vpop.f32.mrb[41].mxu1  ;;  %v2102_v61 = vpop.f32.mrb[41].mxu0 }
 0x14c   : > { %v2191_v41 = vadd.f32 %v2190_v37, %v2189_v36  ;;  %v2192_v42 = vpop.f32.mrb[42].mxu1  ;;  %v2838_v43 = vadd.f32 %v2102_v61, %v2101_v18  ;;  %v2104_v23 = vpop.f32.mrb[42].mxu0 }
 0x14d   : > { %v2193_v45 = vpop.f32.mrb[43].mxu1  ;;  %v2105_v5 = vpop.f32.mrb[43].mxu0 }
 0x14e   : > { %v2194_v53 = vadd.f32 %v2193_v45, %v2192_v42  ;;  %v2841_v54 = vadd.f32 %v2105_v5, %v2104_v23  ;;  %v2843_v55 = vadd.f32 %v2191_v41, %v1152_v39 }
 0x150   : > { %v2845_v30 = vadd.f32 %v2194_v53, %v1155_v49 }
 0x152   : > { %v2195_v57 = vpop.f32.mrb[44].mxu1  ;;  %v2107_v58 = vpop.f32.mrb[44].mxu0 }
 0x153   : > { %v2196_v19 = vpop.f32.mrb[45].mxu1  ;;  %v2108_v60 = vpop.f32.mrb[45].mxu0 }
 0x154   : > { %v2197_v1 = vadd.f32 %v2196_v19, %v2195_v57  ;;  %v2198_v35 = vpop.f32.mrb[46].mxu1  ;;  %v2848_v2 = vadd.f32 %v2108_v60, %v2107_v58  ;;  %v2110_v12 = vpop.f32.mrb[46].mxu0  ;;  %v1176_v19 = vadd.f32 %v2828_v20, %v2791_v38 }
 0x155   : > { %v2199_v26 = vpop.f32.mrb[47].mxu1  ;;  %v2111_v13 = vpop.f32.mrb[47].mxu0 }
 0x156   : > { %v2200_v44 = vadd.f32 %v2199_v26, %v2198_v35  ;;  %v2851_v6 = vadd.f32 %v2111_v13, %v2110_v12  ;;  %v2853_v15 = vadd.f32 %v2197_v1, %v1160_v0  ;;  %v1179_v12 = vadd.f32 %v2831_v31, %v2791_v38 }
 0x158   : > { %v2855_v17 = vadd.f32 %v2200_v44, %v1163_v14 }
 0x15a   : > { %v2201_v21 = vpop.f32.mrb[48].mxu1  ;;  %v2279_v24 = vpop.f32.mrb[48].mxu0 }
 0x15b   : > { %v1434_v40 = vadd.f32 %v2279_v24, %v2801_v7  ;;  %v2202_v50 = vpop.f32.mrb[49].mxu1  ;;  %v1425_v11 = vpop.f32.mrb[49].mxu0  ;;  %v1171_v7 = vadd.f32 %v2821_v63, %v2791_v38 }
 0x15c   : > { %v2203_v46 = vadd.f32 %v2202_v50, %v2201_v21  ;;  %v1426_v36 = vadd.f32 %v1425_v11, %v2795_v51  ;;  %v2204_v18 = vpop.f32.mrb[50].mxu1  ;;  %v2280_v37 = vpop.f32.mrb[50].mxu0 }
 0x15d   : > { %v1995_v61 = vpack.c.bf16 %v1434_v40, %v1434_v40  ;;  %v1437_v59 = vadd.f32 %v2280_v37, %v2803_v8  ;;  %v2205_v39 = vpop.f32.mrb[51].mxu1  ;;  %v1428_v41 = vpop.f32.mrb[51].mxu0 }
 0x15e   : > { %v1993_v42 = vpack.c.bf16 %v1426_v36, %v1426_v36  ;;  %v2206_v23 = vadd.f32 %v2205_v39, %v2204_v18  ;;  %v1429_v45 = vadd.f32 %v1428_v41, %v2797_v52  ;;  %v2871_v5 = vadd.f32 %v2203_v46, %v1168_v25 }
 0x15f   : > { %1683 = vst.msk [vmem:[%s2864_s30 + $0x8] sm:$0xf] %vm1680_vm1, %v1995_v61  ;;  %v1996_v51 = vpack.c.bf16 %v1437_v59, %v1437_v59  ;;  %v1184_v46 = vadd.f32 %v2838_v43, %v2791_v38  ;;  %v1187_v61 = vadd.f32 %v2841_v54, %v2791_v38 }
 0x160   : > { %1681 = vst.msk [vmem:[%s2864_s30] sm:$0xf] %vm1680_vm1, %v1993_v42  ;;  %v1994_v49 = vpack.c.bf16 %v1429_v45, %v1429_v45  ;;  %v2877_v53 = vadd.f32 %v2206_v23, %v1171_v7 }
 0x161   : > { %1684 = vst.msk [vmem:[%s2864_s30 + $0xc] sm:$0xf] %vm1680_vm1, %v1996_v51 }
 0x162   : > { %1682 = vst.msk [vmem:[%s2864_s30 + $0x4] sm:$0xf] %vm1680_vm1, %v1994_v49  ;;  %v2207_v8 = vpop.f32.mrb[52].mxu1  ;;  %v2283_v63 = vpop.f32.mrb[52].mxu0 }
 0x163   : > { %v1450_v57 = vadd.f32 %v2283_v63, %v2813_v47  ;;  %v2208_v58 = vpop.f32.mrb[53].mxu1  ;;  %v1441_v52 = vpop.f32.mrb[53].mxu0 }
 0x164   : > { %v2209_v60 = vadd.f32 %v2208_v58, %v2207_v8  ;;  %v1442_v0 = vadd.f32 %v1441_v52, %v2807_v27  ;;  %v2210_v1 = vpop.f32.mrb[54].mxu1  ;;  %v2284_v35 = vpop.f32.mrb[54].mxu0 }
 0x165   : > { %v1999_v26 = vpack.c.bf16 %v1450_v57, %v1450_v57  ;;  %v1453_v47 = vadd.f32 %v2284_v35, %v2815_v48  ;;  %v2211_v13 = vpop.f32.mrb[55].mxu1  ;;  %v1444_v14 = vpop.f32.mrb[55].mxu0  ;;  %v1192_v57 = vadd.f32 %v2848_v2, %v2791_v38 }
 0x166   : > { %v1997_v44 = vpack.c.bf16 %v1442_v0, %v1442_v0  ;;  %v2212_v21 = vadd.f32 %v2211_v13, %v2210_v1  ;;  %v1445_v20 = vadd.f32 %v1444_v14, %v2809_v29  ;;  %v1337_v24 = vadd.f32 %v2209_v60, %v1176_v19 }
 0x167   : > { %1687 = vst.msk [vmem:[%s2864_s30 + $0x18] sm:$0xf] %vm1680_vm1, %v1999_v26  ;;  %v2000_v27 = vpack.c.bf16 %v1453_v47, %v1453_v47  ;;  %v1195_v0 = vadd.f32 %v2851_v6, %v2791_v38 }
 0x168   : > { %1685 = vst.msk [vmem:[%s2864_s30 + $0x10] sm:$0xf] %vm1680_vm1, %v1997_v44  ;;  %v1998_v40 = vpack.c.bf16 %v1445_v20, %v1445_v20  ;;  %v2895_v50 = vadd.f32 %v2212_v21, %v1179_v12 }
 0x169   : > { %1688 = vst.msk [vmem:[%s2864_s30 + $0x1c] sm:$0xf] %vm1680_vm1, %v2000_v27 }
 0x16a   : > { %1686 = vst.msk [vmem:[%s2864_s30 + $0x14] sm:$0xf] %vm1680_vm1, %v1998_v40  ;;  %v2213_v48 = vpop.f32.mrb[56].mxu1  ;;  %v2287_v31 = vpop.f32.mrb[56].mxu0 }
 0x16b   : > { %v1466_v11 = vadd.f32 %v2287_v31, %v2833_v32  ;;  %v2214_v25 = vpop.f32.mrb[57].mxu1  ;;  %v1457_v29 = vpop.f32.mrb[57].mxu0 }
 0x16c   : > { %v2215_v36 = vadd.f32 %v2214_v25, %v2213_v48  ;;  %v1458_v18 = vadd.f32 %v1457_v29, %v2823_v3  ;;  %v2216_v37 = vpop.f32.mrb[58].mxu1  ;;  %v2288_v7 = vpop.f32.mrb[58].mxu0  ;;  %v1203_v25 = vadd.f32 %v2774_v62, %v2791_v38 }
 0x16d   : > { %v2003_v59 = vpack.c.bf16 %v1466_v11, %v1466_v11  ;;  %v1469_v32 = vadd.f32 %v2288_v7, %v2835_v33  ;;  %v2217_v39 = vpop.f32.mrb[59].mxu1  ;;  %v1460_v41 = vpop.f32.mrb[59].mxu0 }
 0x16e   : > { %v2001_v42 = vpack.c.bf16 %v1458_v18, %v1458_v18  ;;  %v2218_v23 = vadd.f32 %v2217_v39, %v2216_v37  ;;  %v1461_v43 = vadd.f32 %v1460_v41, %v2825_v9  ;;  %v2909_v45 = vadd.f32 %v2215_v36, %v1184_v46 }
 0x16f   : > { %1691 = vst.msk [vmem:[%s2864_s30 + $0x28] sm:$0xf] %vm1680_vm1, %v2003_v59  ;;  %v2004_v3 = vpack.c.bf16 %v1469_v32, %v1469_v32 }
 0x170   : > { %1689 = vst.msk [vmem:[%s2864_s30 + $0x20] sm:$0xf] %vm1680_vm1, %v2001_v42  ;;  %v2002_v51 = vpack.c.bf16 %v1461_v43, %v1461_v43  ;;  %v2915_v49 = vadd.f32 %v2218_v23, %v1187_v61 }
 0x171   : > { %1692 = vst.msk [vmem:[%s2864_s30 + $0x2c] sm:$0xf] %vm1680_vm1, %v2004_v3 }
 0x172   : > { %1690 = vst.msk [vmem:[%s2864_s30 + $0x24] sm:$0xf] %vm1680_vm1, %v2002_v51  ;;  %v2219_v33 = vpop.f32.mrb[60].mxu1  ;;  %v2291_v54 = vpop.f32.mrb[60].mxu0  ;;  %v1211_v51 = vadd.f32 %v2778_v10, %v2791_v38 }
 0x173   : > { %v1482_v8 = vadd.f32 %v2291_v54, %v2853_v15  ;;  %v2220_v63 = vpop.f32.mrb[61].mxu1  ;;  %v1473_v9 = vpop.f32.mrb[61].mxu0 }
 0x174   : > { %v2221_v58 = vadd.f32 %v2220_v63, %v2219_v33  ;;  %v1474_v52 = vadd.f32 %v1473_v9, %v2843_v55  ;;  %v2222_v19 = vpop.f32.mrb[62].mxu1  ;;  %v2292_v60 = vpop.f32.mrb[62].mxu0 }
 0x175   : > { %v2007_v1 = vpack.c.bf16 %v1482_v8, %v1482_v8  ;;  %v1485_v15 = vadd.f32 %v2292_v60, %v2855_v17  ;;  %v2223_v35 = vpop.f32.mrb[63].mxu1  ;;  %v1476_v12 = vpop.f32.mrb[63].mxu0 }
 0x176   : > { %v2005_v26 = vpack.c.bf16 %v1474_v52, %v1474_v52  ;;  %v2224_v47 = vadd.f32 %v2223_v35, %v2222_v19  ;;  %v1477_v2 = vadd.f32 %v1476_v12, %v2845_v30  ;;  %v1353_v13 = vadd.f32 %v2221_v58, %v1192_v57 }
 0x177   : > { %1695 = vst.msk [vmem:[%s2864_s30 + $0x38] sm:$0xf] %vm1680_vm1, %v2007_v1  ;;  %v2008_v55 = vpack.c.bf16 %v1485_v15, %v1485_v15  ;;  %v1200_v30 = vadd.f32 %v2772_v56, %v2791_v38 }
 0x178   : > { %1693 = vst.msk [vmem:[%s2864_s30 + $0x30] sm:$0xf] %vm1680_vm1, %v2005_v26  ;;  %v2006_v14 = vpack.c.bf16 %v1477_v2, %v1477_v2  ;;  %v1356_v44 = vadd.f32 %v2224_v47, %v1195_v0  ;;  %v1219_v2 = vadd.f32 %v2782_v22, %v2791_v38 }
 0x179   : > { %1696 = vst.msk [vmem:[%s2864_s30 + $0x3c] sm:$0xf] %vm1680_vm1, %v2008_v55 }
 0x17a   : > { %1694 = vst.msk [vmem:[%s2864_s30 + $0x34] sm:$0xf] %vm1680_vm1, %v2006_v14  ;;  %v2225_v6 = vpop.f32.mrb[64].mxu1  ;;  %v2295_v17 = vpop.f32.mrb[64].mxu0 }
 0x17b   : > { %v1498_v21 = vadd.f32 %v2295_v17, %v1337_v24  ;;  %v2226_v20 = vpop.f32.mrb[65].mxu1  ;;  %v1489_v27 = vpop.f32.mrb[65].mxu0 }
 0x17c   : > { %v2227_v40 = vadd.f32 %v2226_v20, %v2225_v6  ;;  %v1490_v48 = vadd.f32 %v1489_v27, %v2871_v5  ;;  %v2228_v31 = vpop.f32.mrb[66].mxu1  ;;  %v2296_v11 = vpop.f32.mrb[66].mxu0 }
 0x17d   : > { %v2011_v29 = vpack.c.bf16 %v1498_v21, %v1498_v21  ;;  %v1501_v24 = vadd.f32 %v2296_v11, %v2895_v50  ;;  %v2229_v46 = vpop.f32.mrb[67].mxu1  ;;  %v1492_v36 = vpop.f32.mrb[67].mxu0  ;;  %v1224_v11 = vadd.f32 %v2784_v28, %v2791_v38 }
 0x17e   : > { %v2009_v18 = vpack.c.bf16 %v1490_v48, %v1490_v48  ;;  %v2230_v37 = vadd.f32 %v2229_v46, %v2228_v31  ;;  %v1493_v56 = vadd.f32 %v1492_v36, %v2877_v53  ;;  %v1361_v7 = vadd.f32 %v2227_v40, %v1200_v30 }
 0x17f   : > { %1699 = vst.msk [vmem:[%s2864_s30 + $0x48] sm:$0xf] %vm1680_vm1, %v2011_v29  ;;  %v2012_v5 = vpack.c.bf16 %v1501_v24, %v1501_v24  ;;  %v1208_v53 = vadd.f32 %v2776_v4, %v2791_v38  ;;  %v1227_v36 = vadd.f32 %v2786_v34, %v2791_v38 }
 0x180   : > { %1697 = vst.msk [vmem:[%s2864_s30 + $0x40] sm:$0xf] %vm1680_vm1, %v2009_v18  ;;  %v2010_v61 = vpack.c.bf16 %v1493_v56, %v1493_v56  ;;  %v1364_v59 = vadd.f32 %v2230_v37, %v1203_v25 }
 0x181   : > { %1700 = vst.msk [vmem:[%s2864_s30 + $0x4c] sm:$0xf] %vm1680_vm1, %v2012_v5 }
 0x182   : > { %1698 = vst.msk [vmem:[%s2864_s30 + $0x44] sm:$0xf] %vm1680_vm1, %v2010_v61  ;;  %v2231_v62 = vpop.f32.mrb[68].mxu1  ;;  %v2299_v50 = vpop.f32.mrb[68].mxu0 }
 0x183   : > { %v1514_v32 = vadd.f32 %v2299_v50, %v1353_v13  ;;  %v2232_v39 = vpop.f32.mrb[69].mxu1  ;;  %v1505_v41 = vpop.f32.mrb[69].mxu0 }
 0x184   : > { %v2233_v42 = vadd.f32 %v2232_v39, %v2231_v62  ;;  %v1506_v23 = vadd.f32 %v1505_v41, %v2909_v45  ;;  %v2234_v43 = vpop.f32.mrb[70].mxu1  ;;  %v2300_v3 = vpop.f32.mrb[70].mxu0 }
 0x185   : > { %v2015_v33 = vpack.c.bf16 %v1514_v32, %v1514_v32  ;;  %v1517_v54 = vadd.f32 %v2300_v3, %v1356_v44  ;;  %v2235_v8 = vpop.f32.mrb[71].mxu1  ;;  %v1508_v63 = vpop.f32.mrb[71].mxu0 }
 0x186   : > { %v2013_v9 = vpack.c.bf16 %v1506_v23, %v1506_v23  ;;  %v2236_v57 = vadd.f32 %v2235_v8, %v2234_v43  ;;  %v1509_v58 = vadd.f32 %v1508_v63, %v2915_v49  ;;  %v1369_v4 = vadd.f32 %v2233_v42, %v1208_v53 }
 0x187   : > { %1703 = vst.msk [vmem:[%s2864_s30 + $0x58] sm:$0xf] %vm1680_vm1, %v2015_v33  ;;  %v2016_v52 = vpack.c.bf16 %v1517_v54, %v1517_v54  ;;  %v1216_v49 = vadd.f32 %v2780_v16, %v2791_v38 }
 0x188   : > { %1701 = vst.msk [vmem:[%s2864_s30 + $0x50] sm:$0xf] %vm1680_vm1, %v2013_v9  ;;  %v2014_v45 = vpack.c.bf16 %v1509_v58, %v1509_v58  ;;  %v1372_v19 = vadd.f32 %v2236_v57, %v1211_v51 }
 0x189   : > { %1704 = vst.msk [vmem:[%s2864_s30 + $0x5c] sm:$0xf] %vm1680_vm1, %v2016_v52 }
 0x18a   : > { %1702 = vst.msk [vmem:[%s2864_s30 + $0x54] sm:$0xf] %vm1680_vm1, %v2014_v45  ;;  %v2237_v10 = vpop.f32.mrb[72].mxu1  ;;  %v2303_v60 = vpop.f32.mrb[72].mxu0 }
 0x18b   : > { %v1530_v0 = vadd.f32 %v2303_v60, %v1369_v4  ;;  %v2238_v1 = vpop.f32.mrb[73].mxu1  ;;  %v1521_v15 = vpop.f32.mrb[73].mxu0 }
 0x18c   : > { %v2239_v35 = vadd.f32 %v2238_v1, %v2237_v10  ;;  %v1522_v12 = vadd.f32 %v1521_v15, %v1361_v7  ;;  %v2240_v26 = vpop.f32.mrb[74].mxu1  ;;  %v2304_v47 = vpop.f32.mrb[74].mxu0 }
 0x18d   : > { %v2019_v13 = vpack.c.bf16 %v1530_v0, %v1530_v0  ;;  %v1533_v55 = vadd.f32 %v2304_v47, %v1372_v19  ;;  %v2241_v14 = vpop.f32.mrb[75].mxu1  ;;  %v1524_v44 = vpop.f32.mrb[75].mxu0 }
 0x18e   : > { %v2017_v6 = vpack.c.bf16 %v1522_v12, %v1522_v12  ;;  %v2242_v17 = vadd.f32 %v2241_v14, %v2240_v26  ;;  %v1525_v21 = vadd.f32 %v1524_v44, %v1364_v59  ;;  %v1377_v20 = vadd.f32 %v2239_v35, %v1216_v49 }
 0x18f   : > { %1707 = vst.msk [vmem:[%s2864_s30 + $0x68] sm:$0xf] %vm1680_vm1, %v2019_v13  ;;  %v2020_v16 = vpack.c.bf16 %v1533_v55, %v1533_v55 }
 0x190   : > { %1705 = vst.msk [vmem:[%s2864_s30 + $0x60] sm:$0xf] %vm1680_vm1, %v2017_v6  ;;  %v2018_v27 = vpack.c.bf16 %v1525_v21, %v1525_v21  ;;  %v1380_v30 = vadd.f32 %v2242_v17, %v1219_v2 }
 0x191   : > { %1708 = vst.msk [vmem:[%s2864_s30 + $0x6c] sm:$0xf] %vm1680_vm1, %v2020_v16 }
 0x192   : > { %1706 = vst.msk [vmem:[%s2864_s30 + $0x64] sm:$0xf] %vm1680_vm1, %v2018_v27  ;;  %v2243_v22 = vpop.f32.mrb[76].mxu1  ;;  %v2307_v40 = vpop.f32.mrb[76].mxu0 }
 0x193   : > { %v2244_v48 = vpop.f32.mrb[77].mxu1  ;;  %v1537_v31 = vpop.f32.mrb[77].mxu0 }
 0x194   : > { %v2245_v25 = vadd.f32 %v2244_v48, %v2243_v22  ;;  %v1538_v29 = vadd.f32 %v1537_v31, %v1377_v20  ;;  %v2246_v24 = vpop.f32.mrb[78].mxu1  ;;  %v2308_v46 = vpop.f32.mrb[78].mxu0 }
 0x195   : > { %v2247_v18 = vpop.f32.mrb[79].mxu1  ;;  %v1540_v37 = vpop.f32.mrb[79].mxu0 }
 0x196   : > { %v1385_v56 = vadd.f32 %v2245_v25, %v1224_v11  ;;  %v2021_v7 = vpack.c.bf16 %v1538_v29, %v1538_v29  ;;  %v2248_v5 = vadd.f32 %v2247_v18, %v2246_v24  ;;  %v1541_v61 = vadd.f32 %v1540_v37, %v1380_v30 }
 0x198   : > { %v1546_v59 = vadd.f32 %v2307_v40, %v1385_v56  ;;  %1709 = vst.msk [vmem:[%s2864_s30 + $0x70] sm:$0xf] %vm1680_vm1, %v2021_v7  ;;  %v1388_v28 = vadd.f32 %v2248_v5, %v1227_v36  ;;  %v2022_v62 = vpack.c.bf16 %v1541_v61, %v1541_v61 }
 0x19a   : > { %v2023_v50 = vpack.c.bf16 %v1546_v59, %v1546_v59  ;;  %v1549_v32 = vadd.f32 %v2308_v46, %v1388_v28  ;;  %1710 = vst.msk [vmem:[%s2864_s30 + $0x74] sm:$0xf] %vm1680_vm1, %v2022_v62 }
 0x19c   : > { %1711 = vst.msk [vmem:[%s2864_s30 + $0x78] sm:$0xf] %vm1680_vm1, %v2023_v50  ;;  %v2024_v39 = vpack.c.bf16 %v1549_v32, %v1549_v32 }
 0x19e   : > { %1712 = vst.msk [vmem:[%s2864_s30 + $0x7c] sm:$0xf] %vm1680_vm1, %v2024_v39 }
 0x19f PF: > { %s13_s14 = sadd.s32 1, %s2520_s14   ;;  %s3003_s12 = smov %s2516_s13 }
 0x1a0   : > { %p10_p5 = scmp.ge.s32.totalorder %s13_s14, 4   ;;  %s3004_s13 = smov %s3006_s15 }
 0x1a2   :  { %12 = sbr.rel (!%p10_p5) target bundleno = 2 (0x2), region = 68 }

// kernel: cgrnet_forward.27
= control target key start
LH: loop header
LB: loop body
LE: loop exit
PB: predicated region body
PF: predicated region fallthrough
CT: control target
= control target key end

     0   :  { %s1120_s12 = smov 0   ;;  %s1122_s13 = smov 0   ;;  %s1309_s0 = inlined_call_operand.vmem [shape: bf16[512,64], index: 0, kind: input, shape index: {}]   ;;  %s1310_s1 = inlined_call_operand.vmem [shape: bf16[64,64], index: 1, kind: input, shape index: {}]   ;;  %s1311_s2 = inlined_call_operand.vmem [shape: f32[1,64], index: 2, kind: input, shape index: {}]   ;;  %s1312_s3 = inlined_call_operand.vmem [shape: bf16[512,64], index: 3, kind: output, shape index: {}]  }
   0x1   :  { %s1124_s14 = smov 0  }
   0x2 LB: > { %s25_s15 = sadd.s32 1, %s1094_s13  ;;  %p856_p0 = scmp.ge.s32.totalorder %s1098_s14, 1  ;;  %s1098_s14 = sphi %s1124_s14, %s13_s14   ;;  %s1094_s13 = sphi %s1122_s13, %s1314_s13   ;;  %s1090_s12 = sphi %s1120_s12, %s1313_s12  }
   0x3   : > { %p27_p1 = scmp.ge.s32.totalorder %s25_s15, 2  ;;  %p169_p2 = scmp.lt.s32.totalorder %s1098_s14, 3 }
   0x5   : > { %s1316_s15 = smov (%p27_p1, %s25_s15), 0  ;;  %p170_p3 = pnand %p856_p0, %p169_p2 }
   0x6   : > { %v1056_v0 = vld [vmem:[%s1310_s1] sm:$0xff] (!%p170_p3)   ;;  %s857_s18 = sshll.u32 (!%p170_p3), %s1090_s12, 5  ;;  %v1057_v1 = vld [vmem:[%s1310_s1 + $0x8] sm:$0xff] (!%p170_p3)   ;;  %v1058_v2 = vld [vmem:[%s1310_s1 + $0x10] sm:$0xff] (!%p170_p3)   ;;  %vm377_vm0 = vcmask (!%p170_p3), 523264   ;;  %vm715_vm1 = vcmask (!%p170_p3), 519168  }
   0x7   : > { %173 = sbr.rel (%p170_p3) target bundleno = 267 (0x10b), region = 32  ;;  %p204_p4 = scmp.lt.s32.totalorder (!%p170_p3), %s857_s18, 63  ;;  %984 = vmatprep.subr.bf16.mxu0 (!%p170_p3), %v1056_v0  ;;  %1024 = vmatprep.subr.bf16.mxu1 (!%p170_p3), %v1056_v0  ;;  %v1059_v3 = vld [vmem:[%s1310_s1 + $0x18] sm:$0xff] (!%p170_p3)   ;;  %v1195_v20 = vld [vmem:[%s1311_s2] ss:$0 sm:$0xff] (!%p170_p3) }
   0x8   : > { %985 = vmatpush3.bf16.msra.mxu0 (!%p170_p3), %v1056_v0  ;;  %1028 = vmatpush3.bf16.msra.mxu1 (!%p170_p3), %v1056_v0 }
   0x9   : > { %986 = vmatprep.subr.bf16.mxu0 (!%p170_p3), %v1057_v1  ;;  %1025 = vmatprep.subr.bf16.mxu1 (!%p170_p3), %v1057_v1 }
   0xc   : > { %987 = vmatpush3.bf16.msra.mxu0 (!%p170_p3), %v1057_v1  ;;  %1029 = vmatpush3.bf16.msra.mxu1 (!%p170_p3), %v1057_v1 }
   0xd   : > { %988 = vmatprep.subr.bf16.mxu0 (!%p170_p3), %v1058_v2  ;;  %1026 = vmatprep.subr.bf16.mxu1 (!%p170_p3), %v1058_v2 }
   0xe   : > { %s1318_s18 = smov (!%p204_p4, %s857_s18), 63 }
   0xf   : > { %s858_s23 = sshll.u32 %s1318_s18, 2 }
  0x10   : > { %s1158_s28 = scalar_lea.vmem %s1309_s0, %s858_s23  ;;  %989 = vmatpush3.bf16.msra.mxu0 %v1058_v2  ;;  %1030 = vmatpush3.bf16.msra.mxu1 %v1058_v2  ;;  %s1204_s6 = scalar_lea.vmem %s1312_s3, %s858_s23 }
  0x11   : > { %v1060_v4 = vld [vmem:[%s1158_s28] sm:$0xff]   ;;  %990 = vmatprep.subr.bf16.mxu0 %v1059_v3  ;;  %1027 = vmatprep.subr.bf16.mxu1 %v1059_v3  ;;  %v1062_v6 = vld [vmem:[%s1158_s28 + $0x8] sm:$0xff]   ;;  %v1064_v8 = vld [vmem:[%s1158_s28 + $0x10] sm:$0xff]  }
  0x12   : > { %v1061_v5 = vld [vmem:[%s1158_s28 + $0x40] sm:$0xff]   ;;  %992 = vmatprep.mubr.msk.bf16.mxu0 %vm377_vm0, %v1060_v4  ;;  %v1063_v7 = vld [vmem:[%s1158_s28 + $0x48] sm:$0xff]   ;;  %v1065_v9 = vld [vmem:[%s1158_s28 + $0x50] sm:$0xff]  }
  0x13   : > { %1008 = vmatprep.mubr.msk.bf16.mxu1 %vm377_vm0, %v1061_v5  ;;  %v1066_v10 = vld [vmem:[%s1158_s28 + $0x18] sm:$0xff]   ;;  %v1068_v12 = vld [vmem:[%s1158_s28 + $0x20] sm:$0xff]   ;;  %v1070_v14 = vld [vmem:[%s1158_s28 + $0x28] sm:$0xff]  }
  0x14   : > { %991 = vmatpush3.bf16.msra.mxu0 %v1059_v3  ;;  %1031 = vmatpush3.bf16.msra.mxu1 %v1059_v3  ;;  %v1067_v11 = vld [vmem:[%s1158_s28 + $0x58] sm:$0xff]   ;;  %v1069_v13 = vld [vmem:[%s1158_s28 + $0x60] sm:$0xff]   ;;  %v1071_v15 = vld [vmem:[%s1158_s28 + $0x68] sm:$0xff]  }
  0x15   : > { %v1072_v16 = vld [vmem:[%s1158_s28 + $0x30] sm:$0xff]   ;;  %v1074_v18 = vld [vmem:[%s1158_s28 + $0x38] sm:$0xff]  }
  0x16   : > { %v1073_v17 = vld [vmem:[%s1158_s28 + $0x70] sm:$0xff]   ;;  %v1075_v19 = vld [vmem:[%s1158_s28 + $0x78] sm:$0xff]  }
  0x17   : > { %993 = vmatmul.mubr.msk.bf16.vlgmr.msra.gmra.mrb[0].mxu0 %vm377_vm0, %v1062_v6  ;;  %1009 = vmatmul.mubr.msk.bf16.vlgmr.msra.gmra.mrb[0].mxu1 %vm377_vm0, %v1063_v7 }
  0x18   : > { %996 = vmatprep.mubr.msk.bf16.mxu0 %vm377_vm0, %v1064_v8  ;;  %1012 = vmatprep.mubr.msk.bf16.mxu1 %vm377_vm0, %v1065_v9 }
  0x1f   : > { %997 = vmatmul.mubr.msk.bf16.gmra.mrb[4].mxu0 %vm377_vm0, %v1066_v10  ;;  %1013 = vmatmul.mubr.msk.bf16.gmra.mrb[4].mxu1 %vm377_vm0, %v1067_v11 }
  0x20   : > { %1000 = vmatprep.mubr.msk.bf16.mxu0 %vm377_vm0, %v1068_v12  ;;  %1016 = vmatprep.mubr.msk.bf16.mxu1 %vm377_vm0, %v1069_v13 }
  0x27   : > { %1001 = vmatmul.mubr.msk.bf16.gmra.mrb[8].mxu0 %vm377_vm0, %v1070_v14  ;;  %1017 = vmatmul.mubr.msk.bf16.gmra.mrb[8].mxu1 %vm377_vm0, %v1071_v15 }
  0x28   : > { %1004 = vmatprep.mubr.msk.bf16.mxu0 %vm377_vm0, %v1072_v16  ;;  %1020 = vmatprep.mubr.msk.bf16.mxu1 %vm377_vm0, %v1073_v17 }
  0x2f   : > { %1005 = vmatmul.mubr.msk.bf16.gmra.mrb[12].mxu0 %vm377_vm0, %v1074_v18  ;;  %1021 = vmatmul.mubr.msk.bf16.gmra.mrb[12].mxu1 %vm377_vm0, %v1075_v19 }
  0xea   : > { %v994_v21 = vpop.f32.mrb[0].mxu0  ;;  %v1010_v22 = vpop.f32.mrb[0].mxu1 }
  0xeb   : > { %v469_v23 = vadd.f32 %v994_v21, %v1195_v20  ;;  %v533_v24 = vadd.f32 %v1010_v22, %v1195_v20  ;;  %v460_v25 = vpop.f32.mrb[1].mxu0  ;;  %v524_v26 = vpop.f32.mrb[1].mxu1 }
  0xec   : > { %v461_v27 = vadd.f32 %v1195_v20, %v460_v25  ;;  %v525_v28 = vadd.f32 %v1195_v20, %v524_v26  ;;  %v995_v29 = vpop.f32.mrb[2].mxu0  ;;  %v1011_v30 = vpop.f32.mrb[2].mxu1 }
  0xed   : > { %v934_v31 = vpack.c.bf16 %v469_v23, %v469_v23  ;;  %v950_v32 = vpack.c.bf16 %v533_v24, %v533_v24  ;;  %v472_v33 = vadd.f32 %v995_v29, %v1195_v20  ;;  %v536_v34 = vadd.f32 %v1011_v30, %v1195_v20  ;;  %v463_v35 = vpop.f32.mrb[3].mxu0  ;;  %v527_v36 = vpop.f32.mrb[3].mxu1 }
  0xee   : > { %v932_v37 = vpack.c.bf16 %v461_v27, %v461_v27  ;;  %v948_v38 = vpack.c.bf16 %v525_v28, %v525_v28  ;;  %v464_v39 = vadd.f32 %v1195_v20, %v463_v35  ;;  %v528_v40 = vadd.f32 %v1195_v20, %v527_v36 }
  0xef   : > { %718 = vst.msk [vmem:[%s1204_s6 + $0x8] sm:$0xf] %vm715_vm1, %v934_v31  ;;  %734 = vst.msk [vmem:[%s1204_s6 + $0x48] sm:$0xf] %vm715_vm1, %v950_v32  ;;  %v935_v41 = vpack.c.bf16 %v472_v33, %v472_v33  ;;  %v951_v42 = vpack.c.bf16 %v536_v34, %v536_v34 }
  0xf0   : > { %716 = vst.msk [vmem:[%s1204_s6] sm:$0xf] %vm715_vm1, %v932_v37  ;;  %732 = vst.msk [vmem:[%s1204_s6 + $0x40] sm:$0xf] %vm715_vm1, %v948_v38  ;;  %v933_v43 = vpack.c.bf16 %v464_v39, %v464_v39  ;;  %v949_v44 = vpack.c.bf16 %v528_v40, %v528_v40 }
  0xf1   : > { %719 = vst.msk [vmem:[%s1204_s6 + $0xc] sm:$0xf] %vm715_vm1, %v935_v41  ;;  %735 = vst.msk [vmem:[%s1204_s6 + $0x4c] sm:$0xf] %vm715_vm1, %v951_v42 }
  0xf2   : > { %717 = vst.msk [vmem:[%s1204_s6 + $0x4] sm:$0xf] %vm715_vm1, %v933_v43  ;;  %733 = vst.msk [vmem:[%s1204_s6 + $0x44] sm:$0xf] %vm715_vm1, %v949_v44  ;;  %v998_v45 = vpop.f32.mrb[4].mxu0  ;;  %v1014_v46 = vpop.f32.mrb[4].mxu1 }
  0xf3   : > { %v485_v47 = vadd.f32 %v998_v45, %v1195_v20  ;;  %v549_v48 = vadd.f32 %v1014_v46, %v1195_v20  ;;  %v476_v49 = vpop.f32.mrb[5].mxu0  ;;  %v540_v50 = vpop.f32.mrb[5].mxu1 }
  0xf4   : > { %v477_v51 = vadd.f32 %v1195_v20, %v476_v49  ;;  %v541_v52 = vadd.f32 %v1195_v20, %v540_v50  ;;  %v999_v53 = vpop.f32.mrb[6].mxu0  ;;  %v1015_v54 = vpop.f32.mrb[6].mxu1 }
  0xf5   : > { %v938_v55 = vpack.c.bf16 %v485_v47, %v485_v47  ;;  %v954_v56 = vpack.c.bf16 %v549_v48, %v549_v48  ;;  %v488_v57 = vadd.f32 %v999_v53, %v1195_v20  ;;  %v552_v58 = vadd.f32 %v1015_v54, %v1195_v20  ;;  %v479_v59 = vpop.f32.mrb[7].mxu0  ;;  %v543_v60 = vpop.f32.mrb[7].mxu1 }
  0xf6   : > { %v936_v61 = vpack.c.bf16 %v477_v51, %v477_v51  ;;  %v952_v62 = vpack.c.bf16 %v541_v52, %v541_v52  ;;  %v480_v63 = vadd.f32 %v1195_v20, %v479_v59  ;;  %v544_v0 = vadd.f32 %v1195_v20, %v543_v60 }
  0xf7   : > { %722 = vst.msk [vmem:[%s1204_s6 + $0x18] sm:$0xf] %vm715_vm1, %v938_v55  ;;  %738 = vst.msk [vmem:[%s1204_s6 + $0x58] sm:$0xf] %vm715_vm1, %v954_v56  ;;  %v939_v1 = vpack.c.bf16 %v488_v57, %v488_v57  ;;  %v955_v2 = vpack.c.bf16 %v552_v58, %v552_v58 }
  0xf8   : > { %720 = vst.msk [vmem:[%s1204_s6 + $0x10] sm:$0xf] %vm715_vm1, %v936_v61  ;;  %736 = vst.msk [vmem:[%s1204_s6 + $0x50] sm:$0xf] %vm715_vm1, %v952_v62  ;;  %v937_v3 = vpack.c.bf16 %v480_v63, %v480_v63  ;;  %v953_v4 = vpack.c.bf16 %v544_v0, %v544_v0 }
  0xf9   : > { %723 = vst.msk [vmem:[%s1204_s6 + $0x1c] sm:$0xf] %vm715_vm1, %v939_v1  ;;  %739 = vst.msk [vmem:[%s1204_s6 + $0x5c] sm:$0xf] %vm715_vm1, %v955_v2 }
  0xfa   : > { %721 = vst.msk [vmem:[%s1204_s6 + $0x14] sm:$0xf] %vm715_vm1, %v937_v3  ;;  %737 = vst.msk [vmem:[%s1204_s6 + $0x54] sm:$0xf] %vm715_vm1, %v953_v4  ;;  %v1002_v5 = vpop.f32.mrb[8].mxu0  ;;  %v1018_v6 = vpop.f32.mrb[8].mxu1 }
  0xfb   : > { %v501_v7 = vadd.f32 %v1002_v5, %v1195_v20  ;;  %v565_v8 = vadd.f32 %v1018_v6, %v1195_v20  ;;  %v492_v9 = vpop.f32.mrb[9].mxu0  ;;  %v556_v10 = vpop.f32.mrb[9].mxu1 }
  0xfc   : > { %v493_v11 = vadd.f32 %v1195_v20, %v492_v9  ;;  %v557_v12 = vadd.f32 %v1195_v20, %v556_v10  ;;  %v1003_v13 = vpop.f32.mrb[10].mxu0  ;;  %v1019_v14 = vpop.f32.mrb[10].mxu1 }
  0xfd   : > { %v942_v15 = vpack.c.bf16 %v501_v7, %v501_v7  ;;  %v958_v16 = vpack.c.bf16 %v565_v8, %v565_v8  ;;  %v504_v17 = vadd.f32 %v1003_v13, %v1195_v20  ;;  %v568_v18 = vadd.f32 %v1019_v14, %v1195_v20  ;;  %v495_v19 = vpop.f32.mrb[11].mxu0  ;;  %v559_v21 = vpop.f32.mrb[11].mxu1 }
  0xfe   : > { %v940_v22 = vpack.c.bf16 %v493_v11, %v493_v11  ;;  %v956_v23 = vpack.c.bf16 %v557_v12, %v557_v12  ;;  %v496_v24 = vadd.f32 %v1195_v20, %v495_v19  ;;  %v560_v25 = vadd.f32 %v1195_v20, %v559_v21 }
  0xff   : > { %726 = vst.msk [vmem:[%s1204_s6 + $0x28] sm:$0xf] %vm715_vm1, %v942_v15  ;;  %742 = vst.msk [vmem:[%s1204_s6 + $0x68] sm:$0xf] %vm715_vm1, %v958_v16  ;;  %v943_v26 = vpack.c.bf16 %v504_v17, %v504_v17  ;;  %v959_v27 = vpack.c.bf16 %v568_v18, %v568_v18 }
 0x100   : > { %724 = vst.msk [vmem:[%s1204_s6 + $0x20] sm:$0xf] %vm715_vm1, %v940_v22  ;;  %740 = vst.msk [vmem:[%s1204_s6 + $0x60] sm:$0xf] %vm715_vm1, %v956_v23  ;;  %v941_v28 = vpack.c.bf16 %v496_v24, %v496_v24  ;;  %v957_v29 = vpack.c.bf16 %v560_v25, %v560_v25 }
 0x101   : > { %727 = vst.msk [vmem:[%s1204_s6 + $0x2c] sm:$0xf] %vm715_vm1, %v943_v26  ;;  %743 = vst.msk [vmem:[%s1204_s6 + $0x6c] sm:$0xf] %vm715_vm1, %v959_v27 }
 0x102   : > { %725 = vst.msk [vmem:[%s1204_s6 + $0x24] sm:$0xf] %vm715_vm1, %v941_v28  ;;  %741 = vst.msk [vmem:[%s1204_s6 + $0x64] sm:$0xf] %vm715_vm1, %v957_v29  ;;  %v1006_v30 = vpop.f32.mrb[12].mxu0  ;;  %v1022_v31 = vpop.f32.mrb[12].mxu1 }
 0x103   : > { %v517_v32 = vadd.f32 %v1006_v30, %v1195_v20  ;;  %v581_v33 = vadd.f32 %v1022_v31, %v1195_v20  ;;  %v508_v34 = vpop.f32.mrb[13].mxu0  ;;  %v572_v35 = vpop.f32.mrb[13].mxu1 }
 0x104   : > { %v509_v36 = vadd.f32 %v1195_v20, %v508_v34  ;;  %v573_v37 = vadd.f32 %v1195_v20, %v572_v35  ;;  %v1007_v38 = vpop.f32.mrb[14].mxu0  ;;  %v1023_v39 = vpop.f32.mrb[14].mxu1 }
 0x105   : > { %v946_v40 = vpack.c.bf16 %v517_v32, %v517_v32  ;;  %v962_v41 = vpack.c.bf16 %v581_v33, %v581_v33  ;;  %v520_v42 = vadd.f32 %v1007_v38, %v1195_v20  ;;  %v584_v43 = vadd.f32 %v1023_v39, %v1195_v20  ;;  %v511_v44 = vpop.f32.mrb[15].mxu0  ;;  %v575_v45 = vpop.f32.mrb[15].mxu1 }
 0x106   : > { %v944_v46 = vpack.c.bf16 %v509_v36, %v509_v36  ;;  %v960_v47 = vpack.c.bf16 %v573_v37, %v573_v37  ;;  %v512_v48 = vadd.f32 %v1195_v20, %v511_v44  ;;  %v576_v49 = vadd.f32 %v1195_v20, %v575_v45 }
 0x107   : > { %730 = vst.msk [vmem:[%s1204_s6 + $0x38] sm:$0xf] %vm715_vm1, %v946_v40  ;;  %746 = vst.msk [vmem:[%s1204_s6 + $0x78] sm:$0xf] %vm715_vm1, %v962_v41  ;;  %v947_v50 = vpack.c.bf16 %v520_v42, %v520_v42  ;;  %v963_v51 = vpack.c.bf16 %v584_v43, %v584_v43 }
 0x108   : > { %728 = vst.msk [vmem:[%s1204_s6 + $0x30] sm:$0xf] %vm715_vm1, %v944_v46  ;;  %744 = vst.msk [vmem:[%s1204_s6 + $0x70] sm:$0xf] %vm715_vm1, %v960_v47  ;;  %v945_v52 = vpack.c.bf16 %v512_v48, %v512_v48  ;;  %v961_v53 = vpack.c.bf16 %v576_v49, %v576_v49 }
 0x109   : > { %731 = vst.msk [vmem:[%s1204_s6 + $0x3c] sm:$0xf] %vm715_vm1, %v947_v50  ;;  %747 = vst.msk [vmem:[%s1204_s6 + $0x7c] sm:$0xf] %vm715_vm1, %v963_v51 }
 0x10a   : > { %729 = vst.msk [vmem:[%s1204_s6 + $0x34] sm:$0xf] %vm715_vm1, %v945_v52  ;;  %745 = vst.msk [vmem:[%s1204_s6 + $0x74] sm:$0xf] %vm715_vm1, %v961_v53 }
 0x10b PF: > { %s13_s14 = sadd.s32 1, %s1098_s14   ;;  %s1313_s12 = smov %s1094_s13 }
 0x10c   : > { %p10_p5 = scmp.ge.s32.totalorder %s13_s14, 4   ;;  %s1314_s13 = smov %s1316_s15 }
 0x10e   :  { %12 = sbr.rel (!%p10_p5) target bundleno = 2 (0x2), region = 68 }

// kernel: cgrnet_forward.19
= control target key start
LH: loop header
LB: loop body
LE: loop exit
PB: predicated region body
PF: predicated region fallthrough
CT: control target
= control target key end

     0   :  { %s2349_s12 = smov 0   ;;  %s2351_s13 = smov 0   ;;  %s2771_s0 = inlined_call_operand.vmem [shape: bf16[512,576], index: 0, kind: input, shape index: {}]   ;;  %s2772_s1 = inlined_call_operand.vmem [shape: bf16[576,64], index: 1, kind: input, shape index: {}]   ;;  %s2773_s2 = inlined_call_operand.vmem [shape: f32[1,64], index: 2, kind: input, shape index: {}]   ;;  %s2774_s3 = inlined_call_operand.vmem [shape: bf16[512,64], index: 3, kind: output, shape index: {}]  }
   0x1   :  { %s2353_s14 = smov 0  }
   0x2 LB: > { %s25_s15 = sadd.s32 1, %s2323_s13  ;;  %p1692_p0 = scmp.ge.s32.totalorder %s2327_s14, 1  ;;  %s2327_s14 = sphi %s2353_s14, %s13_s14   ;;  %s2323_s13 = sphi %s2351_s13, %s2776_s13   ;;  %s2319_s12 = sphi %s2349_s12, %s2775_s12  }
   0x3   : > { %p27_p1 = scmp.ge.s32.totalorder %s25_s15, 2  ;;  %p170_p2 = scmp.lt.s32.totalorder %s2327_s14, 3 }
   0x5   : > { %s2778_s15 = smov (%p27_p1, %s25_s15), 0  ;;  %p171_p3 = pnand %p1692_p0, %p170_p2 }
   0x6   : > { %v2157_v0 = vld [vmem:[%s2772_s1 + $0x40] sm:$0xff] (!%p171_p3)   ;;  %s1693_s18 = sshll.u32 (!%p171_p3), %s2319_s12, 5  ;;  %v2159_v2 = vld [vmem:[%s2772_s1 + $0x48] sm:$0xff] (!%p171_p3)   ;;  %v2161_v4 = vld [vmem:[%s2772_s1 + $0x50] sm:$0xff] (!%p171_p3)   ;;  %vm1020_vm0 = vcmask (!%p171_p3), 523264   ;;  %s1695_s27 = sshll.u32 (!%p171_p3), %s2319_s12, 4 }
   0x7   : > { %174 = sbr.rel (%p171_p3) target bundleno = 415 (0x19f), region = 32  ;;  %v2158_v1 = vld [vmem:[%s2772_s1] sm:$0xff] (!%p171_p3)   ;;  %1832 = vmatprep.subr.bf16.mxu0 (!%p171_p3), %v2157_v0  ;;  %2116 = vmatprep.subr.bf16.mxu1 (!%p171_p3), %v2157_v0  ;;  %p206_p4 = scmp.lt.s32.totalorder (!%p171_p3), %s1693_s18, 63  ;;  %v2160_v3 = vld [vmem:[%s2772_s1 + $0x8] sm:$0xff] (!%p171_p3)   ;;  %v2162_v5 = vld [vmem:[%s2772_s1 + $0x10] sm:$0xff] (!%p171_p3)  }
   0x8   : > { %1833 = vmatpush3.bf16.msra.mxu0 (!%p171_p3), %v2158_v1  ;;  %2124 = vmatpush3.bf16.msra.mxu1 (!%p171_p3), %v2158_v1  ;;  %v2163_v6 = vld [vmem:[%s2772_s1 + $0x58] sm:$0xff] (!%p171_p3)   ;;  %v2165_v8 = vld [vmem:[%s2772_s1 + $0x60] sm:$0xff] (!%p171_p3)   ;;  %v2167_v10 = vld [vmem:[%s2772_s1 + $0x68] sm:$0xff] (!%p171_p3)   ;;  %p220_p5 = scmp.lt.s32.totalorder (!%p171_p3), %s1695_s27, 31 }
   0x9   : > { %1834 = vmatprep.subr.bf16.mxu0 (!%p171_p3), %v2159_v2  ;;  %2117 = vmatprep.subr.bf16.mxu1 (!%p171_p3), %v2159_v2  ;;  %v2164_v7 = vld [vmem:[%s2772_s1 + $0x18] sm:$0xff] (!%p171_p3)   ;;  %v2166_v9 = vld [vmem:[%s2772_s1 + $0x20] sm:$0xff] (!%p171_p3)   ;;  %v2168_v13 = vld [vmem:[%s2772_s1 + $0x28] sm:$0xff] (!%p171_p3)  }
   0xa   : > { %v2169_v14 = vld [vmem:[%s2772_s1 + $0x70] sm:$0xff] (!%p171_p3)   ;;  %v2171_v16 = vld [vmem:[%s2772_s1 + $0x78] sm:$0xff] (!%p171_p3)   ;;  %v2179_v18 = vld [vmem:[%s2772_s1 + $0xc0] sm:$0xff] (!%p171_p3)  }
   0xb   : > { %v2170_v15 = vld [vmem:[%s2772_s1 + $0x30] sm:$0xff] (!%p171_p3)   ;;  %v2172_v17 = vld [vmem:[%s2772_s1 + $0x38] sm:$0xff] (!%p171_p3)   ;;  %v2182_v19 = vld [vmem:[%s2772_s1 + $0x100] sm:$0xff] (!%p171_p3)  }
   0xc   : > { %1835 = vmatpush3.bf16.msra.mxu0 (!%p171_p3), %v2160_v3  ;;  %2125 = vmatpush3.bf16.msra.mxu1 (!%p171_p3), %v2160_v3  ;;  %v2180_v22 = vld [vmem:[%s2772_s1 + $0x80] sm:$0xff] (!%p171_p3)   ;;  %v2181_v23 = vld [vmem:[%s2772_s1 + $0xc8] sm:$0xff] (!%p171_p3)   ;;  %v2190_v28 = vld [vmem:[%s2772_s1 + $0xd0] sm:$0xff] (!%p171_p3)  }
   0xd   : > { %1836 = vmatprep.subr.bf16.mxu0 (!%p171_p3), %v2161_v4  ;;  %2118 = vmatprep.subr.bf16.mxu1 (!%p171_p3), %v2161_v4  ;;  %v2183_v26 = vld [vmem:[%s2772_s1 + $0x88] sm:$0xff] (!%p171_p3)   ;;  %v2191_v30 = vld [vmem:[%s2772_s1 + $0x90] sm:$0xff] (!%p171_p3)   ;;  %v2192_v31 = vld [vmem:[%s2772_s1 + $0xd8] sm:$0xff] (!%p171_p3)  }
   0xe   : > { %s2780_s18 = smov (!%p206_p4, %s1693_s18), 63  ;;  %v2193_v34 = vld [vmem:[%s2772_s1 + $0x98] sm:$0xff]   ;;  %v2213_v35 = vld [vmem:[%s2772_s1 + $0x108] sm:$0xff]   ;;  %v2200_v37 = vld [vmem:[%s2772_s1 + $0xe0] sm:$0xff]   ;;  %s2782_s27 = smov (!%p220_p5, %s1695_s27), 31 }
   0xf   : > { %s2132_s4 = smul.u32 20, %s2780_s18  ;;  %v2201_v39 = vld [vmem:[%s2772_s1 + $0xa0] sm:$0xff]   ;;  %v2202_v40 = vld [vmem:[%s2772_s1 + $0xe8] sm:$0xff]   ;;  %v2210_v46 = vld [vmem:[%s2772_s1 + $0xf0] sm:$0xff]   ;;  %s1696_s12 = sshll.u32 %s2782_s27, 3 }
  0x10   : > { %1837 = vmatpush3.bf16.msra.mxu0 %v2162_v5  ;;  %2126 = vmatpush3.bf16.msra.mxu1 %v2162_v5  ;;  %v2203_v43 = vld [vmem:[%s2772_s1 + $0xa8] sm:$0xff]   ;;  %v2233_v47 = vld [vmem:[%s2772_s1 + $0x110] sm:$0xff]   ;;  %v2212_v49 = vld [vmem:[%s2772_s1 + $0xf8] sm:$0xff]   ;;  %s2681_s30 = scalar_lea.vmem %s2774_s3, %s1696_s12 }
  0x11   : > { %1838 = vmatprep.subr.bf16.mxu0 %v2163_v6  ;;  %2119 = vmatprep.subr.bf16.mxu1 %v2163_v6  ;;  %s2400_s11 = scalar_lea.vmem %s2771_s0, %s2132_s4  ;;  %v2211_v48 = vld [vmem:[%s2772_s1 + $0xb0] sm:$0xff]   ;;  %v2214_v52 = vld [vmem:[%s2772_s1 + $0xb8] sm:$0xff]  }
  0x12   : > { %v2175_v11 = vld [vmem:[%s2400_s11 + $0x4] ss:$20 sps:$4 sm:$0xff]   ;;  %v2173_v20 = vld [vmem:[%s2400_s11] ss:$20 sps:$4 sm:$0xff]   ;;  %v2188_v27 = vld [vmem:[%s2400_s11 + $0x28] ss:$20 sps:$4 sm:$0xff]  }
  0x13   : > { %v2178_v12 = vld [vmem:[%s2400_s11 + $0x1e4] ss:$20 sps:$4 sm:$0xff]   ;;  %1101 = vmatprep.mubr.bf16.mxu0 %v2175_v11  ;;  %v2176_v21 = vld [vmem:[%s2400_s11 + $0x1e0] ss:$20 sps:$4 sm:$0xff]   ;;  %v2189_v29 = vld [vmem:[%s2400_s11 + $0x208] ss:$20 sps:$4 sm:$0xff]  }
  0x14   : > { %1839 = vmatpush3.bf16.msra.mxu0 %v2164_v7  ;;  %2127 = vmatpush3.bf16.msra.mxu1 %v2164_v7  ;;  %v2184_v24 = vld [vmem:[%s2400_s11 + $0x2c] ss:$20 sps:$4 sm:$0xff]   ;;  %v2194_v32 = vld [vmem:[%s2400_s11 + $0x54] ss:$20 sps:$4 sm:$0xff]   ;;  %v2198_v36 = vld [vmem:[%s2400_s11 + $0x50] ss:$20 sps:$4 sm:$0xff]  }
  0x15   : > { %1840 = vmatprep.subr.bf16.mxu0 %v2165_v8  ;;  %2120 = vmatprep.subr.bf16.mxu1 %v2165_v8  ;;  %v2186_v25 = vld [vmem:[%s2400_s11 + $0x20c] ss:$20 sps:$4 sm:$0xff]   ;;  %v2196_v33 = vld [vmem:[%s2400_s11 + $0x234] ss:$20 sps:$4 sm:$0xff]   ;;  %v2199_v38 = vld [vmem:[%s2400_s11 + $0x230] ss:$20 sps:$4 sm:$0xff]  }
  0x16   : > { %1197 = vmatprep.mubr.bf16.mxu1 %v2178_v12  ;;  %v2204_v41 = vld [vmem:[%s2400_s11 + $0x7c] ss:$20 sps:$4 sm:$0xff]   ;;  %v2208_v44 = vld [vmem:[%s2400_s11 + $0x78] ss:$20 sps:$4 sm:$0xff]   ;;  %v2220_v54 = vld [vmem:[%s2400_s11 + $0xa0] ss:$20 sps:$4 sm:$0xff]  }
  0x17   : > { %v2206_v42 = vld [vmem:[%s2400_s11 + $0x25c] ss:$20 sps:$4 sm:$0xff]   ;;  %v2209_v45 = vld [vmem:[%s2400_s11 + $0x258] ss:$20 sps:$4 sm:$0xff]   ;;  %v2223_v57 = vld [vmem:[%s2400_s11 + $0x34] ss:$20 sps:$4 sm:$0xff]  }
  0x18   : > { %1841 = vmatpush3.bf16.msra.mxu0 %v2166_v9  ;;  %2128 = vmatpush3.bf16.msra.mxu1 %v2166_v9  ;;  %v2215_v50 = vld [vmem:[%s2400_s11 + $0xa4] ss:$20 sps:$4 sm:$0xff]   ;;  %v2219_v51 = vld [vmem:[%s2400_s11 + $0xc] ss:$20 sps:$4 sm:$0xff]   ;;  %v2217_v53 = vld [vmem:[%s2400_s11 + $0x8] ss:$20 sps:$4 sm:$0xff]  }
  0x19   : > { %1842 = vmatprep.subr.bf16.mxu0 %v2167_v10  ;;  %2121 = vmatprep.subr.bf16.mxu1 %v2167_v10  ;;  %v2221_v55 = vld [vmem:[%s2400_s11 + $0xcc] ss:$20 sps:$4 sm:$0xff]   ;;  %v2252_v56 = vld [vmem:[%s2772_s1 + $0x118] sm:$0xff]   ;;  %v2226_v59 = vld [vmem:[%s2400_s11 + $0x30] ss:$20 sps:$4 sm:$0xff]  }
  0x1a   : > { %v2225_v58 = vld [vmem:[%s2400_s11 + $0xc8] ss:$20 sps:$4 sm:$0xff]   ;;  %v2231_v62 = vld [vmem:[%s2400_s11 + $0xf0] ss:$20 sps:$4 sm:$0xff]   ;;  %v2232_v63 = vld [vmem:[%s2400_s11 + $0x58] ss:$20 sps:$4 sm:$0xff]  }
  0x1b   : > { %v2227_v60 = vld [vmem:[%s2400_s11 + $0xf4] ss:$20 sps:$4 sm:$0xff]   ;;  %v2229_v61 = vld [vmem:[%s2400_s11 + $0x5c] ss:$20 sps:$4 sm:$0xff]   ;;  %v2236_v1 = vld [vmem:[%s2400_s11 + $0x84] ss:$20 sps:$4 sm:$0xff]  }
  0x1c   : > { %1843 = vmatpush3.bf16.msra.mxu0 %v2168_v13  ;;  %2129 = vmatpush3.bf16.msra.mxu1 %v2168_v13  ;;  %v2234_v0 = vld [vmem:[%s2400_s11 + $0x11c] ss:$20 sps:$4 sm:$0xff]   ;;  %v2238_v2 = vld [vmem:[%s2400_s11 + $0x118] ss:$20 sps:$4 sm:$0xff]   ;;  %v2239_v3 = vld [vmem:[%s2400_s11 + $0x80] ss:$20 sps:$4 sm:$0xff]  }
  0x1d   : > { %1844 = vmatprep.subr.bf16.mxu0 %v2169_v14  ;;  %2122 = vmatprep.subr.bf16.mxu1 %v2169_v14  ;;  %v2240_v4 = vld [vmem:[%s2400_s11 + $0x144] ss:$20 sps:$4 sm:$0xff]   ;;  %v2242_v5 = vld [vmem:[%s2400_s11 + $0xac] ss:$20 sps:$4 sm:$0xff]   ;;  %v2245_v7 = vld [vmem:[%s2400_s11 + $0xa8] ss:$20 sps:$4 sm:$0xff]  }
  0x1e   : > { %v2244_v6 = vld [vmem:[%s2400_s11 + $0x140] ss:$20 sps:$4 sm:$0xff]   ;;  %v2250_v10 = vld [vmem:[%s2400_s11 + $0x168] ss:$20 sps:$4 sm:$0xff]   ;;  %v2251_v11 = vld [vmem:[%s2400_s11 + $0xd0] ss:$20 sps:$4 sm:$0xff]  }
  0x1f   : > { %v2246_v8 = vld [vmem:[%s2400_s11 + $0x16c] ss:$20 sps:$4 sm:$0xff]   ;;  %v2248_v9 = vld [vmem:[%s2400_s11 + $0xd4] ss:$20 sps:$4 sm:$0xff]   ;;  %v2255_v13 = vld [vmem:[%s2400_s11 + $0xfc] ss:$20 sps:$4 sm:$0xff]  }
  0x20   : > { %1845 = vmatpush3.bf16.msra.mxu0 %v2170_v15  ;;  %2130 = vmatpush3.bf16.msra.mxu1 %v2170_v15  ;;  %v2253_v12 = vld [vmem:[%s2400_s11 + $0x194] ss:$20 sps:$4 sm:$0xff]   ;;  %v2257_v14 = vld [vmem:[%s2400_s11 + $0x190] ss:$20 sps:$4 sm:$0xff]   ;;  %v2258_v15 = vld [vmem:[%s2400_s11 + $0xf8] ss:$20 sps:$4 sm:$0xff]  }
  0x21   : > { %1846 = vmatprep.subr.bf16.mxu0 %v2171_v16  ;;  %2123 = vmatprep.subr.bf16.mxu1 %v2171_v16  ;;  %v2259_v16 = vld [vmem:[%s2400_s11 + $0x1bc] ss:$20 sps:$4 sm:$0xff]  }
  0x24   : > { %1847 = vmatpush3.bf16.msra.mxu0 %v2172_v17  ;;  %2131 = vmatpush3.bf16.msra.mxu1 %v2172_v17  ;;  %v2261_v17 = vld [vmem:[%s2400_s11 + $0x124] ss:$20 sps:$4 sm:$0xff]  }
  0x25   : > { %1944 = vmatprep.subr.bf16.mxu1 %v2179_v18  ;;  %2076 = vmatprep.subr.bf16.mxu0 %v2182_v19  ;;  %v2263_v18 = vld [vmem:[%s2400_s11 + $0x1b8] ss:$20 sps:$4 sm:$0xff]  }
  0x27   : > { %1102 = vmatmul.mubr.bf16.vlgmr.msra.gmra.mrb[0].mxu0 %v2173_v20  ;;  %1198 = vmatmul.mubr.bf16.vlgmr.msra.gmra.mrb[0].mxu1 %v2176_v21  ;;  %v2265_v20 = vld [vmem:[%s2400_s11 + $0x14c] ss:$20 sps:$4 sm:$0xff]   ;;  %v2267_v21 = vld [vmem:[%s2400_s11 + $0x10] ss:$20 sps:$4 sm:$0xff]  }
  0x28   : > { %1945 = vmatpush3.bf16.msra.mxu1 %v2180_v22  ;;  %2077 = vmatpush3.bf16.msra.mxu0 %v2182_v19  ;;  %v2264_v19 = vld [vmem:[%s2400_s11 + $0x120] ss:$20 sps:$4 sm:$0xff]   ;;  %v2268_v22 = vld [vmem:[%s2400_s11 + $0x148] ss:$20 sps:$4 sm:$0xff]  }
  0x29   : > { %1946 = vmatprep.subr.bf16.mxu1 %v2181_v23  ;;  %1109 = vmatprep.mubr.bf16.mxu0 %v2184_v24  ;;  %v2269_v23 = vld [vmem:[%s2400_s11 + $0x38] ss:$20 sps:$4 sm:$0xff]   ;;  %v2270_v24 = vld [vmem:[%s2400_s11 + $0x174] ss:$20 sps:$4 sm:$0xff]  }
  0x2a   : > { %1205 = vmatprep.mubr.bf16.mxu1 %v2186_v25  ;;  %2078 = vmatprep.subr.bf16.mxu0 %v2213_v35  ;;  %v2272_v25 = vld [vmem:[%s2400_s11 + $0x60] ss:$20 sps:$4 sm:$0xff]  }
  0x2c   : > { %1947 = vmatpush3.bf16.msra.mxu1 %v2183_v26  ;;  %2079 = vmatpush3.bf16.msra.mxu0 %v2213_v35  ;;  %v2273_v26 = vld [vmem:[%s2400_s11 + $0x170] ss:$20 sps:$4 sm:$0xff]   ;;  %v2284_v35 = vld [vmem:[%s2400_s11 + $0x128] ss:$20 sps:$4 sm:$0xff]  }
  0x2d   : > { %1948 = vmatprep.subr.bf16.mxu1 %v2190_v28  ;;  %2080 = vmatprep.subr.bf16.mxu0 %v2233_v47  ;;  %v2275_v28 = vld [vmem:[%s2400_s11 + $0x19c] ss:$20 sps:$4 sm:$0xff]  }
  0x2f   : > { %1110 = vmatmul.mubr.bf16.gmra.mrb[4].mxu0 %v2188_v27  ;;  %1206 = vmatmul.mubr.bf16.gmra.mrb[4].mxu1 %v2189_v29  ;;  %v2274_v27 = vld [vmem:[%s2400_s11 + $0x88] ss:$20 sps:$4 sm:$0xff]   ;;  %v2277_v29 = vld [vmem:[%s2400_s11 + $0xb0] ss:$20 sps:$4 sm:$0xff]  }
  0x30   : > { %1949 = vmatpush3.bf16.msra.mxu1 %v2191_v30  ;;  %1117 = vmatprep.mubr.bf16.mxu0 %v2194_v32  ;;  %v2278_v30 = vld [vmem:[%s2400_s11 + $0x198] ss:$20 sps:$4 sm:$0xff]  }
  0x31   : > { %1950 = vmatprep.subr.bf16.mxu1 %v2192_v31  ;;  %1213 = vmatprep.mubr.bf16.mxu1 %v2196_v33  ;;  %v2279_v31 = vld [vmem:[%s2400_s11 + $0xd8] ss:$20 sps:$4 sm:$0xff]   ;;  %v2282_v33 = vld [vmem:[%s2400_s11 + $0x100] ss:$20 sps:$4 sm:$0xff]  }
  0x32   : > { %2081 = vmatpush3.bf16.msra.mxu0 %v2233_v47  ;;  %v2280_v32 = vld [vmem:[%s2400_s11 + $0x1c4] ss:$20 sps:$4 sm:$0xff]  }
  0x33   : > { %2082 = vmatprep.subr.bf16.mxu0 %v2252_v56  ;;  %v2299_v47 = vld [vmem:[%s2400_s11 + $0x218] ss:$20 sps:$4 sm:$0xff]  }
  0x34   : > { %1951 = vmatpush3.bf16.msra.mxu1 %v2193_v34  ;;  %v2283_v34 = vld [vmem:[%s2400_s11 + $0x1c0] ss:$20 sps:$4 sm:$0xff]  }
  0x35   : > { %1952 = vmatprep.subr.bf16.mxu1 %v2200_v37  ;;  %v2287_v37 = vld [vmem:[%s2400_s11 + $0x150] ss:$20 sps:$4 sm:$0xff]  }
  0x36   : > { %2083 = vmatpush3.bf16.msra.mxu0 %v2252_v56 }
  0x37   : > { %1118 = vmatmul.mubr.bf16.gmra.mrb[8].mxu0 %v2198_v36  ;;  %1214 = vmatmul.mubr.bf16.gmra.mrb[8].mxu1 %v2199_v38  ;;  %v2285_v36 = vld [vmem:[%s2400_s11 + $0x1ec] ss:$20 sps:$4 sm:$0xff]   ;;  %v2288_v38 = vld [vmem:[%s2400_s11 + $0x1e8] ss:$20 sps:$4 sm:$0xff]  }
  0x38   : > { %1953 = vmatpush3.bf16.msra.mxu1 %v2201_v39  ;;  %1125 = vmatprep.mubr.bf16.mxu0 %v2204_v41  ;;  %v2289_v39 = vld [vmem:[%s2400_s11 + $0x178] ss:$20 sps:$4 sm:$0xff]   ;;  %v2292_v41 = vld [vmem:[%s2400_s11 + $0x1a0] ss:$20 sps:$4 sm:$0xff]  }
  0x39   : > { %1954 = vmatprep.subr.bf16.mxu1 %v2202_v40  ;;  %1221 = vmatprep.mubr.bf16.mxu1 %v2206_v42  ;;  %v2290_v40 = vld [vmem:[%s2400_s11 + $0x214] ss:$20 sps:$4 sm:$0xff]   ;;  %v2293_v42 = vld [vmem:[%s2400_s11 + $0x210] ss:$20 sps:$4 sm:$0xff]  }
  0x3c   : > { %1955 = vmatpush3.bf16.msra.mxu1 %v2203_v43  ;;  %v2294_v43 = vld [vmem:[%s2400_s11 + $0x1c8] ss:$20 sps:$4 sm:$0xff]  }
  0x3d   : > { %1956 = vmatprep.subr.bf16.mxu1 %v2210_v46  ;;  %v2298_v46 = vld [vmem:[%s2400_s11 + $0x238] ss:$20 sps:$4 sm:$0xff]  }
  0x3f   : > { %1126 = vmatmul.mubr.bf16.gmra.mrb[12].mxu0 %v2208_v44  ;;  %1222 = vmatmul.mubr.bf16.gmra.mrb[12].mxu1 %v2209_v45  ;;  %v2295_v44 = vld [vmem:[%s2400_s11 + $0x23c] ss:$20 sps:$4 sm:$0xff]  }
  0x40   : > { %1957 = vmatpush3.bf16.msra.mxu1 %v2211_v48  ;;  %1133 = vmatprep.mubr.bf16.mxu0 %v2215_v50  ;;  %v2297_v45 = vld [vmem:[%s2400_s11 + $0x1f0] ss:$20 sps:$4 sm:$0xff]   ;;  %v2303_v50 = vld [vmem:[%s2400_s11 + $0x260] ss:$20 sps:$4 sm:$0xff]  }
  0x41   : > { %1958 = vmatprep.subr.bf16.mxu1 %v2212_v49  ;;  %1262 = vmatprep.mubr.bf16.mxu1 %v2219_v51  ;;  %v2300_v48 = vld [vmem:[%s2400_s11 + $0x264] ss:$20 sps:$4 sm:$0xff]   ;;  %v2302_v49 = vld [vmem:[%s2400_s11 + $0x240] ss:$20 sps:$4 sm:$0xff]   ;;  %v2304_v51 = vld [vmem:[%s2400_s11 + $0x268] ss:$20 sps:$4 sm:$0xff]  }
  0x44   : > { %1959 = vmatpush3.bf16.msra.mxu1 %v2214_v52 }
  0x47   : > { %1134 = vmatmul.mubr.bf16.gmra.mrb[16].mxu0 %v2220_v54  ;;  %1263 = vmatmul.mubr.bf16.vlgmr.msra.gmra.mrb[16].mxu1 %v2217_v53 }
  0x48   : > { %1141 = vmatprep.mubr.bf16.mxu0 %v2221_v55  ;;  %1270 = vmatprep.mubr.bf16.mxu1 %v2223_v57 }
  0x4f   : > { %1142 = vmatmul.mubr.bf16.gmra.mrb[20].mxu0 %v2225_v58  ;;  %1271 = vmatmul.mubr.bf16.gmra.mrb[20].mxu1 %v2226_v59 }
  0x50   : > { %1149 = vmatprep.mubr.bf16.mxu0 %v2227_v60  ;;  %1278 = vmatprep.mubr.bf16.mxu1 %v2229_v61 }
  0x57   : > { %1150 = vmatmul.mubr.bf16.gmra.mrb[24].mxu0 %v2231_v62  ;;  %1279 = vmatmul.mubr.bf16.gmra.mrb[24].mxu1 %v2232_v63 }
  0x58   : > { %1157 = vmatprep.mubr.bf16.mxu0 %v2234_v0  ;;  %1286 = vmatprep.mubr.bf16.mxu1 %v2236_v1 }
  0x5f   : > { %1158 = vmatmul.mubr.bf16.gmra.mrb[28].mxu0 %v2238_v2  ;;  %1287 = vmatmul.mubr.bf16.gmra.mrb[28].mxu1 %v2239_v3 }
  0x60   : > { %1165 = vmatprep.mubr.bf16.mxu0 %v2240_v4  ;;  %1294 = vmatprep.mubr.bf16.mxu1 %v2242_v5 }
  0x67   : > { %1166 = vmatmul.mubr.bf16.gmra.mrb[32].mxu0 %v2244_v6  ;;  %1295 = vmatmul.mubr.bf16.gmra.mrb[32].mxu1 %v2245_v7 }
  0x68   : > { %1173 = vmatprep.mubr.bf16.mxu0 %v2246_v8  ;;  %1302 = vmatprep.mubr.bf16.mxu1 %v2248_v9 }
  0x6f   : > { %1174 = vmatmul.mubr.bf16.gmra.mrb[36].mxu0 %v2250_v10  ;;  %1303 = vmatmul.mubr.bf16.gmra.mrb[36].mxu1 %v2251_v11 }
  0x70   : > { %1181 = vmatprep.mubr.bf16.mxu0 %v2253_v12  ;;  %1310 = vmatprep.mubr.bf16.mxu1 %v2255_v13 }
  0x77   : > { %1182 = vmatmul.mubr.bf16.gmra.mrb[40].mxu0 %v2257_v14  ;;  %1311 = vmatmul.mubr.bf16.gmra.mrb[40].mxu1 %v2258_v15 }
  0x78   : > { %1189 = vmatprep.mubr.bf16.mxu0 %v2259_v16  ;;  %1318 = vmatprep.mubr.bf16.mxu1 %v2261_v17 }
  0x7f   : > { %1190 = vmatmul.mubr.bf16.gmra.mrb[44].mxu0 %v2263_v18  ;;  %1319 = vmatmul.mubr.bf16.gmra.mrb[44].mxu1 %v2264_v19 }
  0x80   : > { %1326 = vmatprep.mubr.bf16.mxu1 %v2265_v20  ;;  %2084 = vmatprep.mubr.msk.bf16.mxu0 %vm1020_vm0, %v2267_v21 }
  0x87   : > { %1327 = vmatmul.mubr.bf16.gmra.mrb[48].mxu1 %v2268_v22  ;;  %2085 = vmatmul.mubr.msk.bf16.vlgmr.msra.gmra.mrb[48].mxu0 %vm1020_vm0, %v2269_v23 }
  0x88   : > { %1334 = vmatprep.mubr.bf16.mxu1 %v2270_v24  ;;  %2088 = vmatprep.mubr.msk.bf16.mxu0 %vm1020_vm0, %v2272_v25 }
  0x8f   : > { %1335 = vmatmul.mubr.bf16.gmra.mrb[52].mxu1 %v2273_v26  ;;  %2089 = vmatmul.mubr.msk.bf16.gmra.mrb[52].mxu0 %vm1020_vm0, %v2274_v27 }
  0x90   : > { %1342 = vmatprep.mubr.bf16.mxu1 %v2275_v28  ;;  %2092 = vmatprep.mubr.msk.bf16.mxu0 %vm1020_vm0, %v2277_v29 }
  0x97   : > { %1343 = vmatmul.mubr.bf16.gmra.mrb[56].mxu1 %v2278_v30  ;;  %2093 = vmatmul.mubr.msk.bf16.gmra.mrb[56].mxu0 %vm1020_vm0, %v2279_v31 }
  0x98   : > { %1350 = vmatprep.mubr.bf16.mxu1 %v2280_v32  ;;  %2096 = vmatprep.mubr.msk.bf16.mxu0 %vm1020_vm0, %v2282_v33 }
  0x9f   : > { %1351 = vmatmul.mubr.bf16.gmra.mrb[60].mxu1 %v2283_v34  ;;  %2097 = vmatmul.mubr.msk.bf16.gmra.mrb[60].mxu0 %vm1020_vm0, %v2284_v35 }
  0xa0   : > { %1358 = vmatprep.mubr.bf16.mxu1 %v2285_v36  ;;  %2100 = vmatprep.mubr.msk.bf16.mxu0 %vm1020_vm0, %v2287_v37 }
  0xa7   : > { %1359 = vmatmul.mubr.bf16.gmra.mrb[64].mxu1 %v2288_v38  ;;  %2101 = vmatmul.mubr.msk.bf16.gmra.mrb[64].mxu0 %vm1020_vm0, %v2289_v39  ;;  %v2598_v38 = vld [vmem:[%s2773_s2] ss:$0 sm:$0xff] }
  0xa8   : > { %1366 = vmatprep.mubr.bf16.mxu1 %v2290_v40  ;;  %2104 = vmatprep.mubr.msk.bf16.mxu0 %vm1020_vm0, %v2292_v41 }
  0xaf   : > { %1367 = vmatmul.mubr.bf16.gmra.mrb[68].mxu1 %v2293_v42  ;;  %2105 = vmatmul.mubr.msk.bf16.gmra.mrb[68].mxu0 %vm1020_vm0, %v2294_v43 }
  0xb0   : > { %1374 = vmatprep.mubr.bf16.mxu1 %v2295_v44  ;;  %2108 = vmatprep.mubr.msk.bf16.mxu0 %vm1020_vm0, %v2297_v45 }
  0xb7   : > { %1375 = vmatmul.mubr.bf16.gmra.mrb[72].mxu1 %v2298_v46  ;;  %2109 = vmatmul.mubr.msk.bf16.gmra.mrb[72].mxu0 %vm1020_vm0, %v2299_v47 }
  0xb8   : > { %1382 = vmatprep.mubr.bf16.mxu1 %v2300_v48  ;;  %2112 = vmatprep.mubr.msk.bf16.mxu0 %vm1020_vm0, %v2302_v49 }
  0xbf   : > { %1383 = vmatmul.mubr.bf16.gmra.mrb[76].mxu1 %v2303_v50  ;;  %2113 = vmatmul.mubr.msk.bf16.gmra.mrb[76].mxu0 %vm1020_vm0, %v2304_v51 }
  0xfa   : > { %v1920_v52 = vpop.f32.mrb[0].mxu1  ;;  %v1848_v53 = vpop.f32.mrb[0].mxu0 }
  0xfb   : > { %v1921_v54 = vpop.f32.mrb[1].mxu1  ;;  %v1849_v55 = vpop.f32.mrb[1].mxu0 }
  0xfc   : > { %v2579_v56 = vadd.f32 %v1921_v54, %v1920_v52  ;;  %v1923_v57 = vpop.f32.mrb[2].mxu1  ;;  %v1850_v58 = vadd.f32 %v1849_v55, %v1848_v53  ;;  %v1851_v59 = vpop.f32.mrb[2].mxu0 }
  0xfd   : > { %v1924_v60 = vpop.f32.mrb[3].mxu1  ;;  %v1852_v61 = vpop.f32.mrb[3].mxu0 }
  0xfe   : > { %v2581_v62 = vadd.f32 %v1924_v60, %v1923_v57  ;;  %v1853_v63 = vadd.f32 %v1852_v61, %v1851_v59  ;;  %v1104_v41 = vadd.f32 %v1850_v58, %v2598_v38 }
 0x100   : > { %v1107_v48 = vadd.f32 %v1853_v63, %v2598_v38 }
 0x102   : > { %v1926_v0 = vpop.f32.mrb[4].mxu1  ;;  %v1854_v1 = vpop.f32.mrb[4].mxu0 }
 0x103   : > { %v1927_v2 = vpop.f32.mrb[5].mxu1  ;;  %v1855_v3 = vpop.f32.mrb[5].mxu0 }
 0x104   : > { %v2583_v4 = vadd.f32 %v1927_v2, %v1926_v0  ;;  %v1929_v5 = vpop.f32.mrb[6].mxu1  ;;  %v1856_v6 = vadd.f32 %v1855_v3, %v1854_v1  ;;  %v1857_v7 = vpop.f32.mrb[6].mxu0 }
 0x105   : > { %v1930_v8 = vpop.f32.mrb[7].mxu1  ;;  %v1858_v9 = vpop.f32.mrb[7].mxu0 }
 0x106   : > { %v2585_v10 = vadd.f32 %v1930_v8, %v1929_v5  ;;  %v1859_v11 = vadd.f32 %v1858_v9, %v1857_v7  ;;  %v1112_v58 = vadd.f32 %v1856_v6, %v2598_v38 }
 0x108   : > { %v1115_v63 = vadd.f32 %v1859_v11, %v2598_v38 }
 0x10a   : > { %v1932_v12 = vpop.f32.mrb[8].mxu1  ;;  %v1860_v13 = vpop.f32.mrb[8].mxu0 }
 0x10b   : > { %v1933_v14 = vpop.f32.mrb[9].mxu1  ;;  %v1861_v15 = vpop.f32.mrb[9].mxu0 }
 0x10c   : > { %v2587_v16 = vadd.f32 %v1933_v14, %v1932_v12  ;;  %v1935_v17 = vpop.f32.mrb[10].mxu1  ;;  %v1862_v18 = vadd.f32 %v1861_v15, %v1860_v13  ;;  %v1863_v19 = vpop.f32.mrb[10].mxu0 }
 0x10d   : > { %v1936_v20 = vpop.f32.mrb[11].mxu1  ;;  %v1864_v21 = vpop.f32.mrb[11].mxu0 }
 0x10e   : > { %v2589_v22 = vadd.f32 %v1936_v20, %v1935_v17  ;;  %v1865_v23 = vadd.f32 %v1864_v21, %v1863_v19  ;;  %v1120_v6 = vadd.f32 %v1862_v18, %v2598_v38 }
 0x110   : > { %v1123_v11 = vadd.f32 %v1865_v23, %v2598_v38 }
 0x112   : > { %v1938_v24 = vpop.f32.mrb[12].mxu1  ;;  %v1866_v25 = vpop.f32.mrb[12].mxu0 }
 0x113   : > { %v1939_v26 = vpop.f32.mrb[13].mxu1  ;;  %v1867_v27 = vpop.f32.mrb[13].mxu0 }
 0x114   : > { %v2591_v28 = vadd.f32 %v1939_v26, %v1938_v24  ;;  %v1941_v29 = vpop.f32.mrb[14].mxu1  ;;  %v1868_v30 = vadd.f32 %v1867_v27, %v1866_v25  ;;  %v1869_v31 = vpop.f32.mrb[14].mxu0 }
 0x115   : > { %v1942_v32 = vpop.f32.mrb[15].mxu1  ;;  %v1870_v33 = vpop.f32.mrb[15].mxu0 }
 0x116   : > { %v2593_v34 = vadd.f32 %v1942_v32, %v1941_v29  ;;  %v1871_v35 = vadd.f32 %v1870_v33, %v1869_v31  ;;  %v1128_v18 = vadd.f32 %v1868_v30, %v2598_v38 }
 0x118   : > { %v1131_v23 = vadd.f32 %v1871_v35, %v2598_v38 }
 0x11a   : > { %v1960_v36 = vpop.f32.mrb[16].mxu1  ;;  %v1872_v37 = vpop.f32.mrb[16].mxu0 }
 0x11b   : > { %v1961_v39 = vpop.f32.mrb[17].mxu1  ;;  %v1873_v40 = vpop.f32.mrb[17].mxu0 }
 0x11c   : > { %v1962_v42 = vadd.f32 %v1961_v39, %v1960_v36  ;;  %v1963_v43 = vpop.f32.mrb[18].mxu1  ;;  %v1874_v44 = vadd.f32 %v1873_v40, %v1872_v37  ;;  %v1875_v45 = vpop.f32.mrb[18].mxu0 }
 0x11d   : > { %v1964_v46 = vpop.f32.mrb[19].mxu1  ;;  %v1876_v47 = vpop.f32.mrb[19].mxu0 }
 0x11e   : > { %v1965_v49 = vadd.f32 %v1964_v46, %v1963_v43  ;;  %v1877_v50 = vadd.f32 %v1876_v47, %v1875_v45  ;;  %v2602_v51 = vadd.f32 %v1962_v42, %v1104_v41 }
 0x120   : > { %v2604_v52 = vadd.f32 %v1965_v49, %v1107_v48 }
 0x122   : > { %v1966_v53 = vpop.f32.mrb[20].mxu1  ;;  %v1878_v54 = vpop.f32.mrb[20].mxu0 }
 0x123   : > { %v1967_v55 = vpop.f32.mrb[21].mxu1  ;;  %v1879_v57 = vpop.f32.mrb[21].mxu0 }
 0x124   : > { %v1968_v59 = vadd.f32 %v1967_v55, %v1966_v53  ;;  %v1969_v60 = vpop.f32.mrb[22].mxu1  ;;  %v1880_v61 = vadd.f32 %v1879_v57, %v1878_v54  ;;  %v1881_v0 = vpop.f32.mrb[22].mxu0  ;;  %v1136_v55 = vadd.f32 %v1874_v44, %v2598_v38 }
 0x125   : > { %v1970_v1 = vpop.f32.mrb[23].mxu1  ;;  %v1882_v2 = vpop.f32.mrb[23].mxu0 }
 0x126   : > { %v1971_v3 = vadd.f32 %v1970_v1, %v1969_v60  ;;  %v1883_v5 = vadd.f32 %v1882_v2, %v1881_v0  ;;  %v2608_v7 = vadd.f32 %v1968_v59, %v1112_v58  ;;  %v1139_v1 = vadd.f32 %v1877_v50, %v2598_v38 }
 0x128   : > { %v2610_v8 = vadd.f32 %v1971_v3, %v1115_v63 }
 0x12a   : > { %v1972_v9 = vpop.f32.mrb[24].mxu1  ;;  %v1884_v12 = vpop.f32.mrb[24].mxu0 }
 0x12b   : > { %v1973_v13 = vpop.f32.mrb[25].mxu1  ;;  %v1885_v14 = vpop.f32.mrb[25].mxu0 }
 0x12c   : > { %v1974_v15 = vadd.f32 %v1973_v13, %v1972_v9  ;;  %v1975_v17 = vpop.f32.mrb[26].mxu1  ;;  %v1886_v19 = vadd.f32 %v1885_v14, %v1884_v12  ;;  %v1887_v20 = vpop.f32.mrb[26].mxu0 }
 0x12d   : > { %v1976_v21 = vpop.f32.mrb[27].mxu1  ;;  %v1888_v24 = vpop.f32.mrb[27].mxu0 }
 0x12e   : > { %v1977_v25 = vadd.f32 %v1976_v21, %v1975_v17  ;;  %v1889_v26 = vadd.f32 %v1888_v24, %v1887_v20  ;;  %v2614_v27 = vadd.f32 %v1974_v15, %v1120_v6  ;;  %v1144_v6 = vadd.f32 %v1880_v61, %v2598_v38 }
 0x130   : > { %v2616_v29 = vadd.f32 %v1977_v25, %v1123_v11  ;;  %v1147_v11 = vadd.f32 %v1883_v5, %v2598_v38 }
 0x132   : > { %v1978_v31 = vpop.f32.mrb[28].mxu1  ;;  %v1890_v32 = vpop.f32.mrb[28].mxu0 }
 0x133   : > { %v1979_v33 = vpop.f32.mrb[29].mxu1  ;;  %v1891_v36 = vpop.f32.mrb[29].mxu0 }
 0x134   : > { %v1980_v37 = vadd.f32 %v1979_v33, %v1978_v31  ;;  %v1981_v39 = vpop.f32.mrb[30].mxu1  ;;  %v2619_v40 = vadd.f32 %v1891_v36, %v1890_v32  ;;  %v1893_v41 = vpop.f32.mrb[30].mxu0 }
 0x135   : > { %v1982_v42 = vpop.f32.mrb[31].mxu1  ;;  %v1894_v43 = vpop.f32.mrb[31].mxu0 }
 0x136   : > { %v1983_v45 = vadd.f32 %v1982_v42, %v1981_v39  ;;  %v2622_v46 = vadd.f32 %v1894_v43, %v1893_v41  ;;  %v2624_v47 = vadd.f32 %v1980_v37, %v1128_v18  ;;  %v1152_v39 = vadd.f32 %v1886_v19, %v2598_v38 }
 0x138   : > { %v2626_v48 = vadd.f32 %v1983_v45, %v1131_v23 }
 0x13a   : > { %v1984_v49 = vpop.f32.mrb[32].mxu1  ;;  %v1896_v53 = vpop.f32.mrb[32].mxu0 }
 0x13b   : > { %v1985_v54 = vpop.f32.mrb[33].mxu1  ;;  %v1897_v30 = vpop.f32.mrb[33].mxu0 }
 0x13c   : > { %v1986_v57 = vadd.f32 %v1985_v54, %v1984_v49  ;;  %v1987_v58 = vpop.f32.mrb[34].mxu1  ;;  %v2629_v59 = vadd.f32 %v1897_v30, %v1896_v53  ;;  %v1899_v60 = vpop.f32.mrb[34].mxu0  ;;  %v1155_v49 = vadd.f32 %v1889_v26, %v2598_v38 }
 0x13d   : > { %v1988_v0 = vpop.f32.mrb[35].mxu1  ;;  %v1900_v35 = vpop.f32.mrb[35].mxu0 }
 0x13e   : > { %v1989_v2 = vadd.f32 %v1988_v0, %v1987_v58  ;;  %v2632_v63 = vadd.f32 %v1900_v35, %v1899_v60  ;;  %v2634_v3 = vadd.f32 %v1986_v57, %v1136_v55  ;;  %v1160_v0 = vadd.f32 %v2619_v40, %v2598_v38 }
 0x140   : > { %v2636_v9 = vadd.f32 %v1989_v2, %v1139_v1 }
 0x142   : > { %v1990_v12 = vpop.f32.mrb[36].mxu1  ;;  %v1902_v13 = vpop.f32.mrb[36].mxu0 }
 0x143   : > { %v1991_v14 = vpop.f32.mrb[37].mxu1  ;;  %v1903_v44 = vpop.f32.mrb[37].mxu0 }
 0x144   : > { %v1992_v15 = vadd.f32 %v1991_v14, %v1990_v12  ;;  %v1993_v17 = vpop.f32.mrb[38].mxu1  ;;  %v2639_v20 = vadd.f32 %v1903_v44, %v1902_v13  ;;  %v1905_v21 = vpop.f32.mrb[38].mxu0  ;;  %v1163_v14 = vadd.f32 %v2622_v46, %v2598_v38 }
 0x145   : > { %v1994_v24 = vpop.f32.mrb[39].mxu1  ;;  %v1906_v50 = vpop.f32.mrb[39].mxu0 }
 0x146   : > { %v1995_v25 = vadd.f32 %v1994_v24, %v1993_v17  ;;  %v2642_v31 = vadd.f32 %v1906_v50, %v1905_v21  ;;  %v2644_v32 = vadd.f32 %v1992_v15, %v1144_v6 }
 0x148   : > { %v2646_v33 = vadd.f32 %v1995_v25, %v1147_v11  ;;  %v1168_v25 = vadd.f32 %v2629_v59, %v2598_v38 }
 0x14a   : > { %v1996_v36 = vpop.f32.mrb[40].mxu1  ;;  %v1908_v18 = vpop.f32.mrb[40].mxu0 }
 0x14b   : > { %v1997_v61 = vpop.f32.mrb[41].mxu1  ;;  %v1909_v37 = vpop.f32.mrb[41].mxu0 }
 0x14c   : > { %v1998_v41 = vadd.f32 %v1997_v61, %v1996_v36  ;;  %v1999_v42 = vpop.f32.mrb[42].mxu1  ;;  %v2649_v43 = vadd.f32 %v1909_v37, %v1908_v18  ;;  %v1911_v23 = vpop.f32.mrb[42].mxu0 }
 0x14d   : > { %v2000_v5 = vpop.f32.mrb[43].mxu1  ;;  %v1912_v45 = vpop.f32.mrb[43].mxu0 }
 0x14e   : > { %v2001_v53 = vadd.f32 %v2000_v5, %v1999_v42  ;;  %v2652_v54 = vadd.f32 %v1912_v45, %v1911_v23  ;;  %v2654_v30 = vadd.f32 %v1998_v41, %v1152_v39  ;;  %v1171_v42 = vadd.f32 %v2632_v63, %v2598_v38 }
 0x150   : > { %v2657_v55 = vadd.f32 %v2001_v53, %v1155_v49 }
 0x152   : > { %v2002_v57 = vpop.f32.mrb[44].mxu1  ;;  %v1914_v58 = vpop.f32.mrb[44].mxu0 }
 0x153   : > { %v2003_v19 = vpop.f32.mrb[45].mxu1  ;;  %v1915_v60 = vpop.f32.mrb[45].mxu0 }
 0x154   : > { %v2004_v35 = vadd.f32 %v2003_v19, %v2002_v57  ;;  %v2005_v1 = vpop.f32.mrb[46].mxu1  ;;  %v2661_v2 = vadd.f32 %v1915_v60, %v1914_v58  ;;  %v1917_v26 = vpop.f32.mrb[46].mxu0 }
 0x155   : > { %v2006_v12 = vpop.f32.mrb[47].mxu1  ;;  %v1918_v13 = vpop.f32.mrb[47].mxu0 }
 0x156   : > { %v2007_v44 = vadd.f32 %v2006_v12, %v2005_v1  ;;  %v2665_v6 = vadd.f32 %v1918_v13, %v1917_v26  ;;  %v2667_v15 = vadd.f32 %v2004_v35, %v1160_v0  ;;  %v1179_v12 = vadd.f32 %v2642_v31, %v2598_v38 }
 0x157   : > { %v1184_v31 = vadd.f32 %v2649_v43, %v2598_v38 }
 0x158   : > { %v2669_v17 = vadd.f32 %v2007_v44, %v1163_v14 }
 0x15a   : > { %v2008_v21 = vpop.f32.mrb[48].mxu1  ;;  %v2086_v40 = vpop.f32.mrb[48].mxu0 }
 0x15b   : > { %v1434_v24 = vadd.f32 %v2086_v40, %v2608_v7  ;;  %v2009_v50 = vpop.f32.mrb[49].mxu1  ;;  %v1425_v11 = vpop.f32.mrb[49].mxu0 }
 0x15c   : > { %v2010_v36 = vadd.f32 %v2009_v50, %v2008_v21  ;;  %v1426_v46 = vadd.f32 %v1425_v11, %v2602_v51  ;;  %v2011_v18 = vpop.f32.mrb[50].mxu1  ;;  %v2087_v61 = vpop.f32.mrb[50].mxu0 }
 0x15d   : > { %v1437_v37 = vadd.f32 %v2087_v61, %v2610_v8  ;;  %v2012_v39 = vpop.f32.mrb[51].mxu1  ;;  %v1428_v41 = vpop.f32.mrb[51].mxu0 }
 0x15e   : > { %v2013_v7 = vadd.f32 %v2012_v39, %v2011_v18  ;;  %v1429_v59 = vadd.f32 %v1428_v41, %v2604_v52  ;;  %v2684_v51 = vadd.f32 %v2010_v36, %v1168_v25  ;;  %v1176_v52 = vadd.f32 %v2639_v20, %v2598_v38 }
 0x15f   : > { %v1553_v23 = vpack.c.bf16 %v1437_v37, %v1434_v24  ;;  %v1187_v37 = vadd.f32 %v2652_v54, %v2598_v38  ;;  %v1192_v54 = vadd.f32 %v2661_v2, %v2598_v38 }
 0x160   : > { %v1552_v5 = vpack.c.bf16 %v1429_v59, %v1426_v46  ;;  %v2686_v8 = vadd.f32 %v2013_v7, %v1171_v42 }
 0x161   : > { %1569 = vst.msk [vmem:[%s2681_s30 + $0x8] sm:$0xff] %vm1020_vm0, %v1553_v23 }
 0x162   : > { %1568 = vst.msk [vmem:[%s2681_s30] sm:$0xff] %vm1020_vm0, %v1552_v5  ;;  %v2014_v63 = vpop.f32.mrb[52].mxu1  ;;  %v2090_v45 = vpop.f32.mrb[52].mxu0 }
 0x163   : > { %v1450_v49 = vadd.f32 %v2090_v45, %v2624_v47  ;;  %v2015_v53 = vpop.f32.mrb[53].mxu1  ;;  %v1441_v57 = vpop.f32.mrb[53].mxu0 }
 0x164   : > { %v2016_v58 = vadd.f32 %v2015_v53, %v2014_v63  ;;  %v1442_v19 = vadd.f32 %v1441_v57, %v2614_v27  ;;  %v2017_v60 = vpop.f32.mrb[54].mxu1  ;;  %v2091_v0 = vpop.f32.mrb[54].mxu0 }
 0x165   : > { %v1453_v35 = vadd.f32 %v2091_v0, %v2626_v48  ;;  %v2018_v1 = vpop.f32.mrb[55].mxu1  ;;  %v1444_v26 = vpop.f32.mrb[55].mxu0 }
 0x166   : > { %v2019_v47 = vadd.f32 %v2018_v1, %v2017_v60  ;;  %v1445_v13 = vadd.f32 %v1444_v26, %v2616_v29  ;;  %v1337_v14 = vadd.f32 %v2016_v58, %v1176_v52  ;;  %v1195_v58 = vadd.f32 %v2665_v6, %v2598_v38 }
 0x167   : > { %v1555_v44 = vpack.c.bf16 %v1453_v35, %v1450_v49  ;;  %v1200_v6 = vadd.f32 %v2579_v56, %v2598_v38 }
 0x168   : > { %v1554_v21 = vpack.c.bf16 %v1445_v13, %v1442_v19  ;;  %v1340_v20 = vadd.f32 %v2019_v47, %v1179_v12 }
 0x169   : > { %1571 = vst.msk [vmem:[%s2681_s30 + $0x18] sm:$0xff] %vm1020_vm0, %v1555_v44 }
 0x16a   : > { %1570 = vst.msk [vmem:[%s2681_s30 + $0x10] sm:$0xff] %vm1020_vm0, %v1554_v21  ;;  %v2020_v27 = vpop.f32.mrb[56].mxu1  ;;  %v2094_v40 = vpop.f32.mrb[56].mxu0 }
 0x16b   : > { %v1466_v48 = vadd.f32 %v2094_v40, %v2644_v32  ;;  %v2021_v24 = vpop.f32.mrb[57].mxu1  ;;  %v1457_v50 = vpop.f32.mrb[57].mxu0 }
 0x16c   : > { %v2022_v29 = vadd.f32 %v2021_v24, %v2020_v27  ;;  %v1458_v11 = vadd.f32 %v1457_v50, %v2634_v3  ;;  %v2023_v25 = vpop.f32.mrb[58].mxu1  ;;  %v2095_v36 = vpop.f32.mrb[58].mxu0 }
 0x16d   : > { %v1469_v46 = vadd.f32 %v2095_v36, %v2646_v33  ;;  %v2024_v18 = vpop.f32.mrb[59].mxu1  ;;  %v1460_v61 = vpop.f32.mrb[59].mxu0 }
 0x16e   : > { %v2025_v32 = vadd.f32 %v2024_v18, %v2023_v25  ;;  %v1461_v39 = vadd.f32 %v1460_v61, %v2636_v9  ;;  %v1345_v41 = vadd.f32 %v2022_v29, %v1184_v31 }
 0x16f   : > { %v1557_v42 = vpack.c.bf16 %v1469_v46, %v1466_v48  ;;  %v1203_v48 = vadd.f32 %v2581_v62, %v2598_v38  ;;  %v1208_v62 = vadd.f32 %v2583_v4, %v2598_v38 }
 0x170   : > { %v1556_v7 = vpack.c.bf16 %v1461_v39, %v1458_v11  ;;  %v1348_v43 = vadd.f32 %v2025_v32, %v1187_v37 }
 0x171   : > { %1573 = vst.msk [vmem:[%s2681_s30 + $0x28] sm:$0xff] %vm1020_vm0, %v1557_v42  ;;  %v1211_v42 = vadd.f32 %v2585_v10, %v2598_v38 }
 0x172   : > { %1572 = vst.msk [vmem:[%s2681_s30 + $0x20] sm:$0xff] %vm1020_vm0, %v1556_v7  ;;  %v2026_v3 = vpop.f32.mrb[60].mxu1  ;;  %v2098_v59 = vpop.f32.mrb[60].mxu0 }
 0x173   : > { %v1482_v33 = vadd.f32 %v2098_v59, %v2667_v15  ;;  %v2027_v23 = vpop.f32.mrb[61].mxu1  ;;  %v1473_v5 = vpop.f32.mrb[61].mxu0 }
 0x174   : > { %v2028_v9 = vadd.f32 %v2027_v23, %v2026_v3  ;;  %v1474_v63 = vadd.f32 %v1473_v5, %v2654_v30  ;;  %v2029_v45 = vpop.f32.mrb[62].mxu1  ;;  %v2099_v49 = vpop.f32.mrb[62].mxu0 }
 0x175   : > { %v1485_v53 = vadd.f32 %v2099_v49, %v2669_v17  ;;  %v2030_v57 = vpop.f32.mrb[63].mxu1  ;;  %v1476_v52 = vpop.f32.mrb[63].mxu0 }
 0x176   : > { %v2031_v15 = vadd.f32 %v2030_v57, %v2029_v45  ;;  %v1477_v19 = vadd.f32 %v1476_v52, %v2657_v55  ;;  %v1353_v60 = vadd.f32 %v2028_v9, %v1192_v54  ;;  %v1216_v45 = vadd.f32 %v2587_v16, %v2598_v38 }
 0x177   : > { %v1559_v0 = vpack.c.bf16 %v1485_v53, %v1482_v33 }
 0x178   : > { %v1558_v35 = vpack.c.bf16 %v1477_v19, %v1474_v63  ;;  %v1356_v2 = vadd.f32 %v2031_v15, %v1195_v58  ;;  %v1219_v15 = vadd.f32 %v2589_v22, %v2598_v38 }
 0x179   : > { %1575 = vst.msk [vmem:[%s2681_s30 + $0x38] sm:$0xff] %vm1020_vm0, %v1559_v0 }
 0x17a   : > { %1574 = vst.msk [vmem:[%s2681_s30 + $0x30] sm:$0xff] %vm1020_vm0, %v1558_v35  ;;  %v2032_v30 = vpop.f32.mrb[64].mxu1  ;;  %v2102_v1 = vpop.f32.mrb[64].mxu0 }
 0x17b   : > { %v1498_v26 = vadd.f32 %v2102_v1, %v1337_v14  ;;  %v2033_v17 = vpop.f32.mrb[65].mxu1  ;;  %v1489_v12 = vpop.f32.mrb[65].mxu0 }
 0x17c   : > { %v2034_v47 = vadd.f32 %v2033_v17, %v2032_v30  ;;  %v1490_v55 = vadd.f32 %v1489_v12, %v2684_v51  ;;  %v2035_v13 = vpop.f32.mrb[66].mxu1  ;;  %v2103_v44 = vpop.f32.mrb[66].mxu0  ;;  %v1224_v12 = vadd.f32 %v2591_v28, %v2598_v38 }
 0x17d   : > { %v1501_v21 = vadd.f32 %v2103_v44, %v1340_v20  ;;  %v2036_v27 = vpop.f32.mrb[67].mxu1  ;;  %v1492_v40 = vpop.f32.mrb[67].mxu0 }
 0x17e   : > { %v2037_v24 = vadd.f32 %v2036_v27, %v2035_v13  ;;  %v1493_v14 = vadd.f32 %v1492_v40, %v2686_v8  ;;  %v1361_v50 = vadd.f32 %v2034_v47, %v1200_v6 }
 0x17f   : > { %v1561_v31 = vpack.c.bf16 %v1501_v21, %v1498_v26  ;;  %v1227_v21 = vadd.f32 %v2593_v34, %v2598_v38 }
 0x180   : > { %v1560_v29 = vpack.c.bf16 %v1493_v14, %v1490_v55  ;;  %v1364_v11 = vadd.f32 %v2037_v24, %v1203_v48 }
 0x181   : > { %1577 = vst.msk [vmem:[%s2681_s30 + $0x48] sm:$0xff] %vm1020_vm0, %v1561_v31 }
 0x182   : > { %1576 = vst.msk [vmem:[%s2681_s30 + $0x40] sm:$0xff] %vm1020_vm0, %v1560_v29  ;;  %v2038_v56 = vpop.f32.mrb[68].mxu1  ;;  %v2106_v51 = vpop.f32.mrb[68].mxu0 }
 0x183   : > { %v1514_v25 = vadd.f32 %v2106_v51, %v1353_v60  ;;  %v2039_v20 = vpop.f32.mrb[69].mxu1  ;;  %v1505_v36 = vpop.f32.mrb[69].mxu0 }
 0x184   : > { %v2040_v46 = vadd.f32 %v2039_v20, %v2038_v56  ;;  %v1506_v8 = vadd.f32 %v1505_v36, %v1345_v41  ;;  %v2041_v18 = vpop.f32.mrb[70].mxu1  ;;  %v2107_v61 = vpop.f32.mrb[70].mxu0 }
 0x185   : > { %v1517_v37 = vadd.f32 %v2107_v61, %v1356_v2  ;;  %v2042_v32 = vpop.f32.mrb[71].mxu1  ;;  %v1508_v39 = vpop.f32.mrb[71].mxu0 }
 0x186   : > { %v2043_v7 = vadd.f32 %v2042_v32, %v2041_v18  ;;  %v1509_v3 = vadd.f32 %v1508_v39, %v1348_v43  ;;  %v1369_v59 = vadd.f32 %v2040_v46, %v1208_v62 }
 0x187   : > { %v1563_v33 = vpack.c.bf16 %v1517_v37, %v1514_v25 }
 0x188   : > { %v1562_v23 = vpack.c.bf16 %v1509_v3, %v1506_v8  ;;  %v1372_v5 = vadd.f32 %v2043_v7, %v1211_v42 }
 0x189   : > { %1579 = vst.msk [vmem:[%s2681_s30 + $0x58] sm:$0xff] %vm1020_vm0, %v1563_v33 }
 0x18a   : > { %1578 = vst.msk [vmem:[%s2681_s30 + $0x50] sm:$0xff] %vm1020_vm0, %v1562_v23  ;;  %v2044_v4 = vpop.f32.mrb[72].mxu1  ;;  %v2110_v41 = vpop.f32.mrb[72].mxu0 }
 0x18b   : > { %v1530_v54 = vadd.f32 %v2110_v41, %v1369_v59  ;;  %v2045_v9 = vpop.f32.mrb[73].mxu1  ;;  %v1521_v63 = vpop.f32.mrb[73].mxu0 }
 0x18c   : > { %v2046_v10 = vadd.f32 %v2045_v9, %v2044_v4  ;;  %v1522_v43 = vadd.f32 %v1521_v63, %v1361_v50  ;;  %v2047_v49 = vpop.f32.mrb[74].mxu1  ;;  %v2111_v53 = vpop.f32.mrb[74].mxu0 }
 0x18d   : > { %v1533_v57 = vadd.f32 %v2111_v53, %v1372_v5  ;;  %v2048_v52 = vpop.f32.mrb[75].mxu1  ;;  %v1524_v58 = vpop.f32.mrb[75].mxu0 }
 0x18e   : > { %v2049_v19 = vadd.f32 %v2048_v52, %v2047_v49  ;;  %v1525_v60 = vadd.f32 %v1524_v58, %v1364_v11  ;;  %v1377_v0 = vadd.f32 %v2046_v10, %v1216_v45 }
 0x18f   : > { %v1565_v35 = vpack.c.bf16 %v1533_v57, %v1530_v54 }
 0x190   : > { %v1564_v2 = vpack.c.bf16 %v1525_v60, %v1522_v43  ;;  %v1380_v30 = vadd.f32 %v2049_v19, %v1219_v15 }
 0x191   : > { %1581 = vst.msk [vmem:[%s2681_s30 + $0x68] sm:$0xff] %vm1020_vm0, %v1565_v35 }
 0x192   : > { %1580 = vst.msk [vmem:[%s2681_s30 + $0x60] sm:$0xff] %vm1020_vm0, %v1564_v2  ;;  %v2050_v16 = vpop.f32.mrb[76].mxu1  ;;  %v2114_v1 = vpop.f32.mrb[76].mxu0 }
 0x193   : > { %v2051_v26 = vpop.f32.mrb[77].mxu1  ;;  %v1537_v17 = vpop.f32.mrb[77].mxu0 }
 0x194   : > { %v2052_v6 = vadd.f32 %v2051_v26, %v2050_v16  ;;  %v1538_v22 = vadd.f32 %v1537_v17, %v1377_v0  ;;  %v2053_v47 = vpop.f32.mrb[78].mxu1  ;;  %v2115_v55 = vpop.f32.mrb[78].mxu0 }
 0x195   : > { %v2054_v13 = vpop.f32.mrb[79].mxu1  ;;  %v1540_v44 = vpop.f32.mrb[79].mxu0 }
 0x196   : > { %v1385_v27 = vadd.f32 %v2052_v6, %v1224_v12  ;;  %v2055_v40 = vadd.f32 %v2054_v13, %v2053_v47  ;;  %v1541_v48 = vadd.f32 %v1540_v44, %v1380_v30 }
 0x198   : > { %v1546_v24 = vadd.f32 %v2114_v1, %v1385_v27  ;;  %v1388_v14 = vadd.f32 %v2055_v40, %v1227_v21  ;;  %v1566_v50 = vpack.c.bf16 %v1541_v48, %v1538_v22 }
 0x19a   : > { %v1549_v31 = vadd.f32 %v2115_v55, %v1388_v14  ;;  %1582 = vst.msk [vmem:[%s2681_s30 + $0x70] sm:$0xff] %vm1020_vm0, %v1566_v50 }
 0x19c   : > { %v1567_v28 = vpack.c.bf16 %v1549_v31, %v1546_v24 }
 0x19e   : > { %1583 = vst.msk [vmem:[%s2681_s30 + $0x78] sm:$0xff] %vm1020_vm0, %v1567_v28 }
 0x19f PF: > { %s13_s14 = sadd.s32 1, %s2327_s14   ;;  %s2775_s12 = smov %s2323_s13 }
 0x1a0   : > { %p10_p6 = scmp.ge.s32.totalorder %s13_s14, 4   ;;  %s2776_s13 = smov %s2778_s15 }
 0x1a2   :  { %12 = sbr.rel (!%p10_p6) target bundleno = 2 (0x2), region = 68 }

// kernel: cgrnet_forward.22
= control target key start
LH: loop header
LB: loop body
LE: loop exit
PB: predicated region body
PF: predicated region fallthrough
CT: control target
= control target key end

     0   :  { %vm558_vm0 = vcmask 523264   ;;  %s1714_s1 = inlined_call_operand.vmem [shape: bf16[576,128], index: 1, kind: input, shape index: {}]   ;;  %s1715_s0 = inlined_call_operand.vmem [shape: bf16[128,576], index: 0, kind: input, shape index: {}]   ;;  %s1716_s2 = inlined_call_operand.vmem [shape: f32[1,128], index: 2, kind: input, shape index: {}]   ;;  %s1717_s3 = inlined_call_operand.vmem [shape: bf16[128,128], index: 3, kind: output, shape index: {}]  }
   0x1   :  { %v1294_v0 = vld [vmem:[%s1714_s1 + $0x40] sm:$0xff]   ;;  %v1298_v4 = vld [vmem:[%s1714_s1 + $0x48] sm:$0xff]   ;;  %v1302_v8 = vld [vmem:[%s1714_s1 + $0x50] sm:$0xff]  }
   0x2   :  { %v1295_v1 = vld [vmem:[%s1714_s1 + $0xc0] sm:$0xff]   ;;  %1122 = vmatprep.subr.bf16.mxu0 %v1294_v0  ;;  %v1299_v5 = vld [vmem:[%s1714_s1 + $0xc8] sm:$0xff]   ;;  %v1303_v9 = vld [vmem:[%s1714_s1 + $0xd0] sm:$0xff]  }
   0x3   :  { %v1296_v2 = vld [vmem:[%s1714_s1] sm:$0xff]   ;;  %1186 = vmatprep.subr.bf16.mxu1 %v1295_v1  ;;  %v1300_v6 = vld [vmem:[%s1714_s1 + $0x8] sm:$0xff]   ;;  %v1304_v10 = vld [vmem:[%s1714_s1 + $0x10] sm:$0xff]  }
   0x4   :  { %v1297_v3 = vld [vmem:[%s1714_s1 + $0x80] sm:$0xff]   ;;  %1123 = vmatpush3.bf16.msra.mxu0 %v1296_v2  ;;  %v1301_v7 = vld [vmem:[%s1714_s1 + $0x88] sm:$0xff]   ;;  %v1305_v11 = vld [vmem:[%s1714_s1 + $0x90] sm:$0xff]  }
   0x5   :  { %1187 = vmatpush3.bf16.msra.mxu1 %v1297_v3  ;;  %1124 = vmatprep.subr.bf16.mxu0 %v1298_v4  ;;  %v1306_v12 = vld [vmem:[%s1714_s1 + $0x58] sm:$0xff]   ;;  %v1310_v16 = vld [vmem:[%s1714_s1 + $0x60] sm:$0xff]   ;;  %v1314_v20 = vld [vmem:[%s1714_s1 + $0x68] sm:$0xff]  }
   0x6   :  { %1188 = vmatprep.subr.bf16.mxu1 %v1299_v5  ;;  %v1307_v13 = vld [vmem:[%s1714_s1 + $0xd8] sm:$0xff]   ;;  %v1311_v17 = vld [vmem:[%s1714_s1 + $0xe0] sm:$0xff]   ;;  %v1315_v21 = vld [vmem:[%s1714_s1 + $0xe8] sm:$0xff]  }
   0x7   :  { %v1308_v14 = vld [vmem:[%s1714_s1 + $0x18] sm:$0xff]   ;;  %v1312_v18 = vld [vmem:[%s1714_s1 + $0x20] sm:$0xff]   ;;  %v1316_v22 = vld [vmem:[%s1714_s1 + $0x28] sm:$0xff]  }
   0x8   :  { %1125 = vmatpush3.bf16.msra.mxu0 %v1300_v6  ;;  %v1309_v15 = vld [vmem:[%s1714_s1 + $0x98] sm:$0xff]   ;;  %v1313_v19 = vld [vmem:[%s1714_s1 + $0xa0] sm:$0xff]   ;;  %v1317_v23 = vld [vmem:[%s1714_s1 + $0xa8] sm:$0xff]  }
   0x9   :  { %1189 = vmatpush3.bf16.msra.mxu1 %v1301_v7  ;;  %1126 = vmatprep.subr.bf16.mxu0 %v1302_v8  ;;  %v1318_v24 = vld [vmem:[%s1714_s1 + $0x70] sm:$0xff]   ;;  %v1322_v28 = vld [vmem:[%s1714_s1 + $0x78] sm:$0xff]   ;;  %v1331_v35 = vld [vmem:[%s1715_s0 + $0xc] ss:$20 sps:$4 sm:$0xff]  }
   0xa   :  { %1190 = vmatprep.subr.bf16.mxu1 %v1303_v9  ;;  %v1319_v25 = vld [vmem:[%s1714_s1 + $0xf0] sm:$0xff]   ;;  %v1323_v29 = vld [vmem:[%s1714_s1 + $0xf8] sm:$0xff]   ;;  %v1332_v36 = vld [vmem:[%s1714_s1 + $0x100] sm:$0xff]   ;;  %712 = vmatprep.mubr.bf16.mxu1 %v1331_v35 }
   0xb   :  { %v1320_v26 = vld [vmem:[%s1714_s1 + $0x30] sm:$0xff]   ;;  %v1324_v30 = vld [vmem:[%s1714_s1 + $0x38] sm:$0xff]   ;;  %v1333_v37 = vld [vmem:[%s1715_s0 + $0x2c] ss:$20 sps:$4 sm:$0xff]  }
   0xc   :  { %1127 = vmatpush3.bf16.msra.mxu0 %v1304_v10  ;;  %v1321_v27 = vld [vmem:[%s1714_s1 + $0xb0] sm:$0xff]   ;;  %v1325_v31 = vld [vmem:[%s1714_s1 + $0xb8] sm:$0xff]   ;;  %v1345_v42 = vld [vmem:[%s1714_s1 + $0x108] sm:$0xff]  }
   0xd   :  { %1191 = vmatpush3.bf16.msra.mxu1 %v1305_v11  ;;  %1128 = vmatprep.subr.bf16.mxu0 %v1306_v12  ;;  %v1326_v32 = vld [vmem:[%s1715_s0] ss:$20 sps:$4 sm:$0xff]   ;;  %v1328_v33 = vld [vmem:[%s1715_s0 + $0x4] ss:$20 sps:$4 sm:$0xff]   ;;  %v1329_v34 = vld [vmem:[%s1715_s0 + $0x8] ss:$20 sps:$4 sm:$0xff]  }
   0xe   :  { %1192 = vmatprep.subr.bf16.mxu1 %v1307_v13  ;;  %615 = vmatprep.mubr.bf16.mxu0 %v1328_v33  ;;  %v1335_v38 = vld [vmem:[%s1715_s0 + $0x34] ss:$20 sps:$4 sm:$0xff]   ;;  %v1338_v40 = vld [vmem:[%s1715_s0 + $0x30] ss:$20 sps:$4 sm:$0xff]   ;;  %v1344_v45 = vld [vmem:[%s1715_s0 + $0x58] ss:$20 sps:$4 sm:$0xff]  }
   0xf   :  { %v1337_v39 = vld [vmem:[%s1715_s0 + $0x28] ss:$20 sps:$4 sm:$0xff]   ;;  %v1343_v44 = vld [vmem:[%s1715_s0 + $0x50] ss:$20 sps:$4 sm:$0xff]   ;;  %v1350_v50 = vld [vmem:[%s1715_s0 + $0x78] ss:$20 sps:$4 sm:$0xff]  }
  0x10   :  { %1129 = vmatpush3.bf16.msra.mxu0 %v1308_v14  ;;  %v1339_v41 = vld [vmem:[%s1715_s0 + $0x54] ss:$20 sps:$4 sm:$0xff]   ;;  %v1341_v43 = vld [vmem:[%s1715_s0 + $0x5c] ss:$20 sps:$4 sm:$0xff]   ;;  %v1348_v48 = vld [vmem:[%s1715_s0 + $0x84] ss:$20 sps:$4 sm:$0xff]  }
  0x11   :  { %1193 = vmatpush3.bf16.msra.mxu1 %v1309_v15  ;;  %1130 = vmatprep.subr.bf16.mxu0 %v1310_v16  ;;  %v1358_v46 = vld [vmem:[%s1714_s1 + $0x110] sm:$0xff]   ;;  %v1371_v49 = vld [vmem:[%s1714_s1 + $0x118] sm:$0xff]   ;;  %v1354_v53 = vld [vmem:[%s1715_s0 + $0xac] ss:$20 sps:$4 sm:$0xff]  }
  0x12   :  { %1194 = vmatprep.subr.bf16.mxu1 %v1311_v17  ;;  %v1346_v47 = vld [vmem:[%s1715_s0 + $0x7c] ss:$20 sps:$4 sm:$0xff]   ;;  %v1351_v51 = vld [vmem:[%s1715_s0 + $0x80] ss:$20 sps:$4 sm:$0xff]   ;;  %v1352_v52 = vld [vmem:[%s1715_s0 + $0xa4] ss:$20 sps:$4 sm:$0xff]  }
  0x13   :  { %v1356_v54 = vld [vmem:[%s1715_s0 + $0xa0] ss:$20 sps:$4 sm:$0xff]   ;;  %v1357_v55 = vld [vmem:[%s1715_s0 + $0xa8] ss:$20 sps:$4 sm:$0xff]   ;;  %v1364_v59 = vld [vmem:[%s1715_s0 + $0xd0] ss:$20 sps:$4 sm:$0xff]  }
  0x14   :  { %1131 = vmatpush3.bf16.msra.mxu0 %v1312_v18  ;;  %v1359_v56 = vld [vmem:[%s1715_s0 + $0xcc] ss:$20 sps:$4 sm:$0xff]   ;;  %v1361_v57 = vld [vmem:[%s1715_s0 + $0xd4] ss:$20 sps:$4 sm:$0xff]   ;;  %v1367_v61 = vld [vmem:[%s1715_s0 + $0xfc] ss:$20 sps:$4 sm:$0xff]  }
  0x15   :  { %1195 = vmatpush3.bf16.msra.mxu1 %v1313_v19  ;;  %1132 = vmatprep.subr.bf16.mxu0 %v1314_v20  ;;  %v1363_v58 = vld [vmem:[%s1715_s0 + $0xc8] ss:$20 sps:$4 sm:$0xff]   ;;  %v1369_v62 = vld [vmem:[%s1715_s0 + $0xf0] ss:$20 sps:$4 sm:$0xff]   ;;  %v1370_v63 = vld [vmem:[%s1715_s0 + $0xf8] ss:$20 sps:$4 sm:$0xff]  }
  0x16   :  { %1196 = vmatprep.subr.bf16.mxu1 %v1315_v21  ;;  %v1365_v60 = vld [vmem:[%s1715_s0 + $0xf4] ss:$20 sps:$4 sm:$0xff]   ;;  %v1372_v0 = vld [vmem:[%s1715_s0 + $0x11c] ss:$20 sps:$4 sm:$0xff]   ;;  %v1374_v1 = vld [vmem:[%s1715_s0 + $0x124] ss:$20 sps:$4 sm:$0xff]  }
  0x17   :  { %v1376_v2 = vld [vmem:[%s1715_s0 + $0x118] ss:$20 sps:$4 sm:$0xff]   ;;  %v1377_v3 = vld [vmem:[%s1715_s0 + $0x120] ss:$20 sps:$4 sm:$0xff]   ;;  %v1378_v4 = vld [vmem:[%s1715_s0 + $0x10] ss:$20 sps:$4 sm:$0xff]  }
  0x18   :  { %1133 = vmatpush3.bf16.msra.mxu0 %v1316_v22  ;;  %v1379_v5 = vld [vmem:[%s1715_s0 + $0xb0] ss:$20 sps:$4 sm:$0xff]   ;;  %v1380_v6 = vld [vmem:[%s1715_s0 + $0x38] ss:$20 sps:$4 sm:$0xff]   ;;  %v1382_v8 = vld [vmem:[%s1715_s0 + $0x60] ss:$20 sps:$4 sm:$0xff]  }
  0x19   :  { %1197 = vmatpush3.bf16.msra.mxu1 %v1317_v23  ;;  %1134 = vmatprep.subr.bf16.mxu0 %v1318_v24  ;;  %v1381_v7 = vld [vmem:[%s1715_s0 + $0xd8] ss:$20 sps:$4 sm:$0xff]   ;;  %v1383_v9 = vld [vmem:[%s1715_s0 + $0x100] ss:$20 sps:$4 sm:$0xff]   ;;  %v1384_v10 = vld [vmem:[%s1715_s0 + $0x88] ss:$20 sps:$4 sm:$0xff]  }
  0x1a   :  { %1198 = vmatprep.subr.bf16.mxu1 %v1319_v25  ;;  %v1385_v11 = vld [vmem:[%s1715_s0 + $0x128] ss:$20 sps:$4 sm:$0xff]   ;;  %v1645_v14 = vld [vmem:[%s1716_s2] ss:$0 sm:$0xff] }
  0x1c   :  { %1135 = vmatpush3.bf16.msra.mxu0 %v1320_v26 }
  0x1d   :  { %1199 = vmatpush3.bf16.msra.mxu1 %v1321_v27  ;;  %1136 = vmatprep.subr.bf16.mxu0 %v1322_v28 }
  0x1e   :  { %1200 = vmatprep.subr.bf16.mxu1 %v1323_v29 }
  0x20   :  { %1137 = vmatpush3.bf16.msra.mxu0 %v1324_v30 }
  0x21   :  { %1201 = vmatpush3.bf16.msra.mxu1 %v1325_v31  ;;  %1262 = vmatprep.subr.bf16.mxu0 %v1332_v36 }
  0x22   :  { %1286 = vmatprep.subr.bf16.mxu1 %v1332_v36 }
  0x23   :  { %616 = vmatmul.mubr.bf16.vlgmr.msra.gmra.mrb[0].mxu0 %v1326_v32 }
  0x24   :  { %713 = vmatmul.mubr.bf16.vlgmr.msra.gmra.mrb[0].mxu1 %v1329_v34  ;;  %1263 = vmatpush3.bf16.msra.mxu0 %v1332_v36 }
  0x25   :  { %1290 = vmatpush3.bf16.msra.mxu1 %v1332_v36  ;;  %623 = vmatprep.mubr.bf16.mxu0 %v1333_v37 }
  0x26   :  { %720 = vmatprep.mubr.bf16.mxu1 %v1335_v38  ;;  %1264 = vmatprep.subr.bf16.mxu0 %v1345_v42 }
  0x27   :  { %1287 = vmatprep.subr.bf16.mxu1 %v1345_v42 }
  0x28   :  { %1265 = vmatpush3.bf16.msra.mxu0 %v1345_v42 }
  0x29   :  { %1291 = vmatpush3.bf16.msra.mxu1 %v1345_v42  ;;  %1266 = vmatprep.subr.bf16.mxu0 %v1358_v46 }
  0x2a   :  { %1288 = vmatprep.subr.bf16.mxu1 %v1358_v46 }
  0x2b   :  { %624 = vmatmul.mubr.bf16.gmra.mrb[4].mxu0 %v1337_v39 }
  0x2c   :  { %721 = vmatmul.mubr.bf16.gmra.mrb[4].mxu1 %v1338_v40  ;;  %631 = vmatprep.mubr.bf16.mxu0 %v1339_v41 }
  0x2d   :  { %728 = vmatprep.mubr.bf16.mxu1 %v1341_v43  ;;  %1267 = vmatpush3.bf16.msra.mxu0 %v1358_v46 }
  0x2e   :  { %1292 = vmatpush3.bf16.msra.mxu1 %v1358_v46  ;;  %1268 = vmatprep.subr.bf16.mxu0 %v1371_v49 }
  0x2f   :  { %1289 = vmatprep.subr.bf16.mxu1 %v1371_v49 }
  0x31   :  { %1269 = vmatpush3.bf16.msra.mxu0 %v1371_v49 }
  0x32   :  { %1293 = vmatpush3.bf16.msra.mxu1 %v1371_v49 }
  0x33   :  { %632 = vmatmul.mubr.bf16.gmra.mrb[8].mxu0 %v1343_v44 }
  0x34   :  { %729 = vmatmul.mubr.bf16.gmra.mrb[8].mxu1 %v1344_v45  ;;  %639 = vmatprep.mubr.bf16.mxu0 %v1346_v47 }
  0x35   :  { %736 = vmatprep.mubr.bf16.mxu1 %v1348_v48 }
  0x3b   :  { %640 = vmatmul.mubr.bf16.gmra.mrb[12].mxu0 %v1350_v50 }
  0x3c   :  { %737 = vmatmul.mubr.bf16.gmra.mrb[12].mxu1 %v1351_v51  ;;  %647 = vmatprep.mubr.bf16.mxu0 %v1352_v52 }
  0x3d   :  { %744 = vmatprep.mubr.bf16.mxu1 %v1354_v53 }
  0x43   :  { %648 = vmatmul.mubr.bf16.gmra.mrb[16].mxu0 %v1356_v54 }
  0x44   :  { %745 = vmatmul.mubr.bf16.gmra.mrb[16].mxu1 %v1357_v55  ;;  %655 = vmatprep.mubr.bf16.mxu0 %v1359_v56 }
  0x45   :  { %752 = vmatprep.mubr.bf16.mxu1 %v1361_v57 }
  0x4b   :  { %656 = vmatmul.mubr.bf16.gmra.mrb[20].mxu0 %v1363_v58 }
  0x4c   :  { %753 = vmatmul.mubr.bf16.gmra.mrb[20].mxu1 %v1364_v59  ;;  %663 = vmatprep.mubr.bf16.mxu0 %v1365_v60 }
  0x4d   :  { %760 = vmatprep.mubr.bf16.mxu1 %v1367_v61 }
  0x53   :  { %664 = vmatmul.mubr.bf16.gmra.mrb[24].mxu0 %v1369_v62 }
  0x54   :  { %761 = vmatmul.mubr.bf16.gmra.mrb[24].mxu1 %v1370_v63  ;;  %671 = vmatprep.mubr.bf16.mxu0 %v1372_v0 }
  0x55   :  { %768 = vmatprep.mubr.bf16.mxu1 %v1374_v1 }
  0x5b   :  { %672 = vmatmul.mubr.bf16.gmra.mrb[28].mxu0 %v1376_v2 }
  0x5c   :  { %769 = vmatmul.mubr.bf16.gmra.mrb[28].mxu1 %v1377_v3  ;;  %1270 = vmatprep.mubr.msk.bf16.mxu0 %vm558_vm0, %v1378_v4 }
  0x5d   :  { %1278 = vmatprep.mubr.msk.bf16.mxu1 %vm558_vm0, %v1379_v5 }
  0x63   :  { %1271 = vmatmul.mubr.msk.bf16.vlgmr.msra.gmra.mrb[32].mxu0 %vm558_vm0, %v1380_v6 }
  0x64   :  { %1279 = vmatmul.mubr.msk.bf16.vlgmr.msra.gmra.mrb[32].mxu1 %vm558_vm0, %v1381_v7  ;;  %1274 = vmatprep.mubr.msk.bf16.mxu0 %vm558_vm0, %v1382_v8 }
  0x65   :  { %1282 = vmatprep.mubr.msk.bf16.mxu1 %vm558_vm0, %v1383_v9 }
  0x6b   :  { %1275 = vmatmul.mubr.msk.bf16.gmra.mrb[36].mxu0 %vm558_vm0, %v1384_v10 }
  0x6c   :  { %1283 = vmatmul.mubr.msk.bf16.gmra.mrb[36].mxu1 %vm558_vm0, %v1385_v11 }
  0xf6   :  { %v1138_v12 = vpop.f32.mrb[0].mxu0 }
  0xf7   :  { %v1202_v13 = vpop.f32.mrb[0].mxu1  ;;  %v1139_v15 = vpop.f32.mrb[1].mxu0 }
  0xf8   :  { %v1140_v16 = vadd.f32 %v1139_v15, %v1138_v12  ;;  %v1203_v17 = vpop.f32.mrb[1].mxu1  ;;  %v1141_v18 = vpop.f32.mrb[2].mxu0 }
  0xf9   :  { %v1204_v19 = vadd.f32 %v1203_v17, %v1202_v13  ;;  %v1205_v20 = vpop.f32.mrb[2].mxu1  ;;  %v1142_v21 = vpop.f32.mrb[3].mxu0 }
  0xfa   :  { %v618_v22 = vadd.f32 %v1140_v16, %v1645_v14  ;;  %v1143_v23 = vadd.f32 %v1142_v21, %v1141_v18  ;;  %v1206_v24 = vpop.f32.mrb[3].mxu1 }
  0xfb   :  { %v1207_v25 = vadd.f32 %v1206_v24, %v1205_v20 }
  0xfc   :  { %v621_v26 = vadd.f32 %v1143_v23, %v1645_v14  ;;  %v1649_v27 = vadd.f32 %v1204_v19, %v618_v22 }
  0xfe   :  { %v1144_v28 = vpop.f32.mrb[4].mxu0  ;;  %v1651_v29 = vadd.f32 %v1207_v25, %v621_v26 }
  0xff   :  { %v1208_v30 = vpop.f32.mrb[4].mxu1  ;;  %v1145_v31 = vpop.f32.mrb[5].mxu0 }
 0x100   :  { %v1146_v32 = vadd.f32 %v1145_v31, %v1144_v28  ;;  %v1209_v33 = vpop.f32.mrb[5].mxu1  ;;  %v1147_v34 = vpop.f32.mrb[6].mxu0 }
 0x101   :  { %v1210_v35 = vadd.f32 %v1209_v33, %v1208_v30  ;;  %v1211_v36 = vpop.f32.mrb[6].mxu1  ;;  %v1148_v37 = vpop.f32.mrb[7].mxu0 }
 0x102   :  { %v626_v38 = vadd.f32 %v1146_v32, %v1645_v14  ;;  %v1149_v39 = vadd.f32 %v1148_v37, %v1147_v34  ;;  %v1212_v40 = vpop.f32.mrb[7].mxu1 }
 0x103   :  { %v1213_v41 = vadd.f32 %v1212_v40, %v1211_v36 }
 0x104   :  { %v629_v42 = vadd.f32 %v1149_v39, %v1645_v14  ;;  %v1655_v43 = vadd.f32 %v1210_v35, %v626_v38 }
 0x106   :  { %v1150_v44 = vpop.f32.mrb[8].mxu0  ;;  %v1657_v45 = vadd.f32 %v1213_v41, %v629_v42 }
 0x107   :  { %v1214_v46 = vpop.f32.mrb[8].mxu1  ;;  %v1151_v47 = vpop.f32.mrb[9].mxu0 }
 0x108   :  { %v1152_v48 = vadd.f32 %v1151_v47, %v1150_v44  ;;  %v1215_v49 = vpop.f32.mrb[9].mxu1  ;;  %v1153_v50 = vpop.f32.mrb[10].mxu0 }
 0x109   :  { %v1216_v51 = vadd.f32 %v1215_v49, %v1214_v46  ;;  %v1217_v52 = vpop.f32.mrb[10].mxu1  ;;  %v1154_v53 = vpop.f32.mrb[11].mxu0 }
 0x10a   :  { %v634_v54 = vadd.f32 %v1152_v48, %v1645_v14  ;;  %v1155_v55 = vadd.f32 %v1154_v53, %v1153_v50  ;;  %v1218_v56 = vpop.f32.mrb[11].mxu1 }
 0x10b   :  { %v1219_v57 = vadd.f32 %v1218_v56, %v1217_v52 }
 0x10c   :  { %v637_v58 = vadd.f32 %v1155_v55, %v1645_v14  ;;  %v1661_v59 = vadd.f32 %v1216_v51, %v634_v54 }
 0x10e   :  { %v1156_v60 = vpop.f32.mrb[12].mxu0  ;;  %v1663_v61 = vadd.f32 %v1219_v57, %v637_v58 }
 0x10f   :  { %v1220_v62 = vpop.f32.mrb[12].mxu1  ;;  %v1157_v63 = vpop.f32.mrb[13].mxu0 }
 0x110   :  { %v1158_v0 = vadd.f32 %v1157_v63, %v1156_v60  ;;  %v1221_v1 = vpop.f32.mrb[13].mxu1  ;;  %v1159_v2 = vpop.f32.mrb[14].mxu0 }
 0x111   :  { %v1222_v3 = vadd.f32 %v1221_v1, %v1220_v62  ;;  %v1223_v4 = vpop.f32.mrb[14].mxu1  ;;  %v1160_v5 = vpop.f32.mrb[15].mxu0 }
 0x112   :  { %v642_v6 = vadd.f32 %v1158_v0, %v1645_v14  ;;  %v1161_v7 = vadd.f32 %v1160_v5, %v1159_v2  ;;  %v1224_v8 = vpop.f32.mrb[15].mxu1 }
 0x113   :  { %v1225_v9 = vadd.f32 %v1224_v8, %v1223_v4 }
 0x114   :  { %v645_v10 = vadd.f32 %v1161_v7, %v1645_v14  ;;  %v1667_v11 = vadd.f32 %v1222_v3, %v642_v6 }
 0x116   :  { %v1162_v12 = vpop.f32.mrb[16].mxu0  ;;  %v1669_v13 = vadd.f32 %v1225_v9, %v645_v10 }
 0x117   :  { %v1226_v15 = vpop.f32.mrb[16].mxu1  ;;  %v1163_v16 = vpop.f32.mrb[17].mxu0 }
 0x118   :  { %v1164_v17 = vadd.f32 %v1163_v16, %v1162_v12  ;;  %v1227_v18 = vpop.f32.mrb[17].mxu1  ;;  %v1165_v19 = vpop.f32.mrb[18].mxu0 }
 0x119   :  { %v1228_v20 = vadd.f32 %v1227_v18, %v1226_v15  ;;  %v1229_v21 = vpop.f32.mrb[18].mxu1  ;;  %v1166_v22 = vpop.f32.mrb[19].mxu0 }
 0x11a   :  { %v650_v23 = vadd.f32 %v1164_v17, %v1645_v14  ;;  %v1167_v24 = vadd.f32 %v1166_v22, %v1165_v19  ;;  %v1230_v25 = vpop.f32.mrb[19].mxu1 }
 0x11b   :  { %v1231_v26 = vadd.f32 %v1230_v25, %v1229_v21 }
 0x11c   :  { %v653_v28 = vadd.f32 %v1167_v24, %v1645_v14  ;;  %v747_v30 = vadd.f32 %v1228_v20, %v650_v23 }
 0x11e   :  { %v1168_v31 = vpop.f32.mrb[20].mxu0  ;;  %v1673_v32 = vadd.f32 %v1231_v26, %v653_v28 }
 0x11f   :  { %v1232_v33 = vpop.f32.mrb[20].mxu1  ;;  %v1169_v34 = vpop.f32.mrb[21].mxu0 }
 0x120   :  { %v1170_v35 = vadd.f32 %v1169_v34, %v1168_v31  ;;  %v1233_v36 = vpop.f32.mrb[21].mxu1  ;;  %v1171_v37 = vpop.f32.mrb[22].mxu0 }
 0x121   :  { %v1234_v38 = vadd.f32 %v1233_v36, %v1232_v33  ;;  %v1235_v39 = vpop.f32.mrb[22].mxu1  ;;  %v1172_v40 = vpop.f32.mrb[23].mxu0 }
 0x122   :  { %v658_v41 = vadd.f32 %v1170_v35, %v1645_v14  ;;  %v1173_v42 = vadd.f32 %v1172_v40, %v1171_v37  ;;  %v1236_v44 = vpop.f32.mrb[23].mxu1 }
 0x123   :  { %v1237_v46 = vadd.f32 %v1236_v44, %v1235_v39 }
 0x124   :  { %v661_v47 = vadd.f32 %v1173_v42, %v1645_v14  ;;  %v755_v48 = vadd.f32 %v1234_v38, %v658_v41 }
 0x126   :  { %v1174_v49 = vpop.f32.mrb[24].mxu0  ;;  %v758_v50 = vadd.f32 %v1237_v46, %v661_v47 }
 0x127   :  { %v1238_v51 = vpop.f32.mrb[24].mxu1  ;;  %v1175_v52 = vpop.f32.mrb[25].mxu0 }
 0x128   :  { %v1176_v53 = vadd.f32 %v1175_v52, %v1174_v49  ;;  %v1239_v54 = vpop.f32.mrb[25].mxu1  ;;  %v1177_v55 = vpop.f32.mrb[26].mxu0 }
 0x129   :  { %v1240_v56 = vadd.f32 %v1239_v54, %v1238_v51  ;;  %v1241_v57 = vpop.f32.mrb[26].mxu1  ;;  %v1178_v58 = vpop.f32.mrb[27].mxu0 }
 0x12a   :  { %v666_v60 = vadd.f32 %v1176_v53, %v1645_v14  ;;  %v1179_v62 = vadd.f32 %v1178_v58, %v1177_v55  ;;  %v1242_v63 = vpop.f32.mrb[27].mxu1 }
 0x12b   :  { %v1243_v0 = vadd.f32 %v1242_v63, %v1241_v57 }
 0x12c   :  { %v669_v1 = vadd.f32 %v1179_v62, %v1645_v14  ;;  %v763_v2 = vadd.f32 %v1240_v56, %v666_v60 }
 0x12e   :  { %v1180_v3 = vpop.f32.mrb[28].mxu0  ;;  %v766_v4 = vadd.f32 %v1243_v0, %v669_v1 }
 0x12f   :  { %v1244_v5 = vpop.f32.mrb[28].mxu1  ;;  %v1181_v6 = vpop.f32.mrb[29].mxu0 }
 0x130   :  { %v1182_v7 = vadd.f32 %v1181_v6, %v1180_v3  ;;  %v1245_v8 = vpop.f32.mrb[29].mxu1  ;;  %v1183_v9 = vpop.f32.mrb[30].mxu0 }
 0x131   :  { %v1246_v10 = vadd.f32 %v1245_v8, %v1244_v5  ;;  %v1247_v12 = vpop.f32.mrb[30].mxu1  ;;  %v1184_v15 = vpop.f32.mrb[31].mxu0 }
 0x132   :  { %v674_v16 = vadd.f32 %v1182_v7, %v1645_v14  ;;  %v1185_v17 = vadd.f32 %v1184_v15, %v1183_v9  ;;  %v1248_v18 = vpop.f32.mrb[31].mxu1 }
 0x133   :  { %v1249_v19 = vadd.f32 %v1248_v18, %v1247_v12 }
 0x134   :  { %v677_v20 = vadd.f32 %v1185_v17, %v1645_v14  ;;  %v771_v21 = vadd.f32 %v1246_v10, %v674_v16 }
 0x136   :  { %v1272_v22 = vpop.f32.mrb[32].mxu0  ;;  %v774_v23 = vadd.f32 %v1249_v19, %v677_v20 }
 0x137   :  { %v820_v24 = vadd.f32 %v1272_v22, %v1655_v43  ;;  %v1280_v25 = vpop.f32.mrb[32].mxu1  ;;  %v811_v26 = vpop.f32.mrb[33].mxu0 }
 0x138   :  { %v852_v28 = vadd.f32 %v1280_v25, %v755_v48  ;;  %v812_v31 = vadd.f32 %v811_v26, %v1649_v27  ;;  %v843_v33 = vpop.f32.mrb[33].mxu1  ;;  %v1273_v34 = vpop.f32.mrb[34].mxu0 }
 0x139   :  { %v844_v35 = vadd.f32 %v843_v33, %v747_v30  ;;  %v823_v36 = vadd.f32 %v1273_v34, %v1657_v45  ;;  %v1281_v37 = vpop.f32.mrb[34].mxu1  ;;  %v814_v38 = vpop.f32.mrb[35].mxu0 }
 0x13a   :  { %v855_v39 = vadd.f32 %v1281_v37, %v758_v50  ;;  %v815_v14 = vadd.f32 %v814_v38, %v1651_v29  ;;  %v846_v40 = vpop.f32.mrb[35].mxu1 }
 0x13b   :  { %v1083_v41 = vpack.c.bf16 %v823_v36, %v820_v24  ;;  %v847_v42 = vadd.f32 %v846_v40, %v1673_v32 }
 0x13c   :  { %v1103_v43 = vpack.c.bf16 %v855_v39, %v852_v28  ;;  %v1078_v44 = vpack.c.bf16 %v815_v14, %v812_v31 }
 0x13d   :  { %1115 = vst [vmem:[%s1717_s3 + $0x8] sm:$0xff] %v1083_v41   ;;  %v1098_v27 = vpack.c.bf16 %v847_v42, %v844_v35 }
 0x13e   :  { %1119 = vst [vmem:[%s1717_s3 + $0x28] sm:$0xff] %v1103_v43   ;;  %1079 = vst [vmem:[%s1717_s3] sm:$0xff] %v1078_v44   ;;  %v1276_v29 = vpop.f32.mrb[36].mxu0 }
 0x13f   :  { %1118 = vst [vmem:[%s1717_s3 + $0x20] sm:$0xff] %v1098_v27   ;;  %v836_v45 = vadd.f32 %v1276_v29, %v1667_v11  ;;  %v1284_v30 = vpop.f32.mrb[36].mxu1  ;;  %v827_v32 = vpop.f32.mrb[37].mxu0 }
 0x140   :  { %v868_v46 = vadd.f32 %v1284_v30, %v771_v21  ;;  %v828_v47 = vadd.f32 %v827_v32, %v1661_v59  ;;  %v859_v48 = vpop.f32.mrb[37].mxu1  ;;  %v1277_v49 = vpop.f32.mrb[38].mxu0 }
 0x141   :  { %v860_v50 = vadd.f32 %v859_v48, %v763_v2  ;;  %v839_v51 = vadd.f32 %v1277_v49, %v1669_v13  ;;  %v1285_v52 = vpop.f32.mrb[38].mxu1  ;;  %v830_v53 = vpop.f32.mrb[39].mxu0 }
 0x142   :  { %v871_v54 = vadd.f32 %v1285_v52, %v774_v23  ;;  %v831_v55 = vadd.f32 %v830_v53, %v1663_v61  ;;  %v862_v56 = vpop.f32.mrb[39].mxu1 }
 0x143   :  { %v1093_v57 = vpack.c.bf16 %v839_v51, %v836_v45  ;;  %v863_v58 = vadd.f32 %v862_v56, %v766_v4 }
 0x144   :  { %v1113_v60 = vpack.c.bf16 %v871_v54, %v868_v46  ;;  %v1088_v11 = vpack.c.bf16 %v831_v55, %v828_v47 }
 0x145   :  { %1117 = vst [vmem:[%s1717_s3 + $0x18] sm:$0xff] %v1093_v57   ;;  %v1108_v59 = vpack.c.bf16 %v863_v58, %v860_v50 }
 0x146   :  { %1121 = vst [vmem:[%s1717_s3 + $0x38] sm:$0xff] %v1113_v60   ;;  %1116 = vst [vmem:[%s1717_s3 + $0x10] sm:$0xff] %v1088_v11  }
 0x147   :  { %1120 = vst [vmem:[%s1717_s3 + $0x30] sm:$0xff] %v1108_v59  }

// kernel: cgrnet_forward.24
= control target key start
LH: loop header
LB: loop body
LE: loop exit
PB: predicated region body
PF: predicated region fallthrough
CT: control target
= control target key end

     0   :  { %vm110_vm0 = vcmask 523264   ;;  %s563_s1 = inlined_call_operand.vmem [shape: bf16[64,128], index: 1, kind: input, shape index: {}]   ;;  %s564_s0 = inlined_call_operand.vmem [shape: bf16[128,64], index: 0, kind: input, shape index: {}]   ;;  %s565_s2 = inlined_call_operand.vmem [shape: f32[1,128], index: 2, kind: input, shape index: {}]   ;;  %s566_s3 = inlined_call_operand.vmem [shape: bf16[128,128], index: 3, kind: output, shape index: {}]  }
   0x1   :  { %v460_v0 = vld [vmem:[%s563_s1] sm:$0xff]   ;;  %v461_v1 = vld [vmem:[%s563_s1 + $0x8] sm:$0xff]   ;;  %v462_v2 = vld [vmem:[%s563_s1 + $0x10] sm:$0xff]  }
   0x2   :  { %428 = vmatprep.subr.bf16.mxu0 %v460_v0  ;;  %452 = vmatprep.subr.bf16.mxu1 %v460_v0  ;;  %v464_v3 = vld [vmem:[%s564_s0] sm:$0xff]   ;;  %v463_v5 = vld [vmem:[%s563_s1 + $0x18] sm:$0xff]   ;;  %v466_v6 = vld [vmem:[%s564_s0 + $0x8] sm:$0xff]  }
   0x3   :  { %429 = vmatpush3.bf16.msra.mxu0 %v460_v0  ;;  %456 = vmatpush3.bf16.msra.mxu1 %v460_v0  ;;  %v465_v4 = vld [vmem:[%s564_s0 + $0x20] sm:$0xff]   ;;  %v467_v7 = vld [vmem:[%s564_s0 + $0x28] sm:$0xff]   ;;  %v468_v8 = vld [vmem:[%s564_s0 + $0x10] sm:$0xff]  }
   0x4   :  { %430 = vmatprep.subr.bf16.mxu0 %v461_v1  ;;  %453 = vmatprep.subr.bf16.mxu1 %v461_v1  ;;  %v469_v9 = vld [vmem:[%s564_s0 + $0x30] sm:$0xff]   ;;  %v470_v10 = vld [vmem:[%s564_s0 + $0x18] sm:$0xff]   ;;  %v316_v13 = vld [vmem:[%s565_s2] ss:$0 sm:$0xff] }
   0x5   :  { %436 = vmatprep.mubr.msk.bf16.mxu0 %vm110_vm0, %v464_v3  ;;  %444 = vmatprep.mubr.msk.bf16.mxu1 %vm110_vm0, %v465_v4  ;;  %v471_v11 = vld [vmem:[%s564_s0 + $0x38] sm:$0xff]  }
   0x7   :  { %431 = vmatpush3.bf16.msra.mxu0 %v461_v1  ;;  %457 = vmatpush3.bf16.msra.mxu1 %v461_v1 }
   0x8   :  { %432 = vmatprep.subr.bf16.mxu0 %v462_v2  ;;  %454 = vmatprep.subr.bf16.mxu1 %v462_v2 }
   0xb   :  { %433 = vmatpush3.bf16.msra.mxu0 %v462_v2  ;;  %458 = vmatpush3.bf16.msra.mxu1 %v462_v2 }
   0xc   :  { %434 = vmatprep.subr.bf16.mxu0 %v463_v5  ;;  %455 = vmatprep.subr.bf16.mxu1 %v463_v5 }
   0xf   :  { %435 = vmatpush3.bf16.msra.mxu0 %v463_v5  ;;  %459 = vmatpush3.bf16.msra.mxu1 %v463_v5 }
  0x12   :  { %437 = vmatmul.mubr.msk.bf16.vlgmr.msra.gmra.mrb[0].mxu0 %vm110_vm0, %v466_v6  ;;  %445 = vmatmul.mubr.msk.bf16.vlgmr.msra.gmra.mrb[0].mxu1 %vm110_vm0, %v467_v7 }
  0x13   :  { %440 = vmatprep.mubr.msk.bf16.mxu0 %vm110_vm0, %v468_v8  ;;  %448 = vmatprep.mubr.msk.bf16.mxu1 %vm110_vm0, %v469_v9 }
  0x1a   :  { %441 = vmatmul.mubr.msk.bf16.gmra.mrb[4].mxu0 %vm110_vm0, %v470_v10  ;;  %449 = vmatmul.mubr.msk.bf16.gmra.mrb[4].mxu1 %vm110_vm0, %v471_v11 }
  0xe5   :  { %v438_v12 = vpop.f32.mrb[0].mxu0  ;;  %v446_v14 = vpop.f32.mrb[0].mxu1 }
  0xe6   :  { %v169_v15 = vpop.f32.mrb[1].mxu0  ;;  %v201_v16 = vpop.f32.mrb[1].mxu1  ;;  %v178_v19 = vadd.f32 %v438_v12, %v316_v13  ;;  %v210_v20 = vadd.f32 %v446_v14, %v316_v13 }
  0xe7   :  { %v439_v17 = vpop.f32.mrb[2].mxu0  ;;  %v447_v18 = vpop.f32.mrb[2].mxu1  ;;  %v170_v25 = vadd.f32 %v316_v13, %v169_v15  ;;  %v202_v26 = vadd.f32 %v316_v13, %v201_v16 }
  0xe8   :  { %v181_v21 = vadd.f32 %v439_v17, %v316_v13  ;;  %v213_v22 = vadd.f32 %v447_v18, %v316_v13  ;;  %v172_v23 = vpop.f32.mrb[3].mxu0  ;;  %v204_v24 = vpop.f32.mrb[3].mxu1 }
  0xe9   :  { %v173_v27 = vadd.f32 %v316_v13, %v172_v23  ;;  %v205_v28 = vadd.f32 %v316_v13, %v204_v24 }
  0xea   :  { %v377_v29 = vpack.c.bf16 %v181_v21, %v178_v19  ;;  %v397_v30 = vpack.c.bf16 %v213_v22, %v210_v20 }
  0xeb   :  { %v372_v31 = vpack.c.bf16 %v173_v27, %v170_v25  ;;  %v392_v32 = vpack.c.bf16 %v205_v28, %v202_v26 }
  0xec   :  { %409 = vst [vmem:[%s566_s3 + $0x8] sm:$0xff] %v377_v29   ;;  %413 = vst [vmem:[%s566_s3 + $0x28] sm:$0xff] %v397_v30  }
  0xed   :  { %373 = vst [vmem:[%s566_s3] sm:$0xff] %v372_v31   ;;  %412 = vst [vmem:[%s566_s3 + $0x20] sm:$0xff] %v392_v32   ;;  %v442_v33 = vpop.f32.mrb[4].mxu0  ;;  %v450_v34 = vpop.f32.mrb[4].mxu1 }
  0xee   :  { %v185_v35 = vpop.f32.mrb[5].mxu0  ;;  %v217_v36 = vpop.f32.mrb[5].mxu1  ;;  %v194_v39 = vadd.f32 %v442_v33, %v316_v13  ;;  %v226_v40 = vadd.f32 %v450_v34, %v316_v13 }
  0xef   :  { %v443_v37 = vpop.f32.mrb[6].mxu0  ;;  %v451_v38 = vpop.f32.mrb[6].mxu1  ;;  %v186_v45 = vadd.f32 %v316_v13, %v185_v35  ;;  %v218_v46 = vadd.f32 %v316_v13, %v217_v36 }
  0xf0   :  { %v197_v41 = vadd.f32 %v443_v37, %v316_v13  ;;  %v229_v42 = vadd.f32 %v451_v38, %v316_v13  ;;  %v188_v43 = vpop.f32.mrb[7].mxu0  ;;  %v220_v44 = vpop.f32.mrb[7].mxu1 }
  0xf1   :  { %v189_v47 = vadd.f32 %v316_v13, %v188_v43  ;;  %v221_v48 = vadd.f32 %v316_v13, %v220_v44 }
  0xf2   :  { %v387_v49 = vpack.c.bf16 %v197_v41, %v194_v39  ;;  %v407_v50 = vpack.c.bf16 %v229_v42, %v226_v40 }
  0xf3   :  { %v382_v51 = vpack.c.bf16 %v189_v47, %v186_v45  ;;  %v402_v52 = vpack.c.bf16 %v221_v48, %v218_v46 }
  0xf4   :  { %411 = vst [vmem:[%s566_s3 + $0x18] sm:$0xff] %v387_v49   ;;  %415 = vst [vmem:[%s566_s3 + $0x38] sm:$0xff] %v407_v50  }
  0xf5   :  { %410 = vst [vmem:[%s566_s3 + $0x10] sm:$0xff] %v382_v51   ;;  %414 = vst [vmem:[%s566_s3 + $0x30] sm:$0xff] %v402_v52  }

// kernel: cgrnet_forward.23
= control target key start
LH: loop header
LB: loop body
LE: loop exit
PB: predicated region body
PF: predicated region fallthrough
CT: control target
= control target key end

     0   :  { %s2907_s1 = inlined_call_operand.vmem [shape: bf16[1152,128], index: 1, kind: input, shape index: {}]   ;;  %s2908_s0 = inlined_call_operand.vmem [shape: bf16[128,1152], index: 0, kind: input, shape index: {}]   ;;  %s2909_s2 = inlined_call_operand.vmem [shape: f32[1,128], index: 2, kind: input, shape index: {}]   ;;  %s2910_s3 = inlined_call_operand.vmem [shape: bf16[128,128], index: 3, kind: output, shape index: {}]  }
   0x1   :  { %v2159_v0 = vld [vmem:[%s2907_s1 + $0x40] sm:$0xff]   ;;  %v2163_v4 = vld [vmem:[%s2907_s1 + $0x48] sm:$0xff]   ;;  %v2167_v8 = vld [vmem:[%s2907_s1 + $0x50] sm:$0xff]  }
   0x2   :  { %v2160_v1 = vld [vmem:[%s2907_s1 + $0xc0] sm:$0xff]   ;;  %1839 = vmatprep.subr.bf16.mxu0 %v2159_v0  ;;  %v2164_v5 = vld [vmem:[%s2907_s1 + $0xc8] sm:$0xff]   ;;  %v2168_v9 = vld [vmem:[%s2907_s1 + $0xd0] sm:$0xff]  }
   0x3   :  { %v2161_v2 = vld [vmem:[%s2907_s1] sm:$0xff]   ;;  %1903 = vmatprep.subr.bf16.mxu1 %v2160_v1  ;;  %v2165_v6 = vld [vmem:[%s2907_s1 + $0x8] sm:$0xff]   ;;  %v2169_v10 = vld [vmem:[%s2907_s1 + $0x10] sm:$0xff]  }
   0x4   :  { %v2162_v3 = vld [vmem:[%s2907_s1 + $0x80] sm:$0xff]   ;;  %1840 = vmatpush3.bf16.msra.mxu0 %v2161_v2  ;;  %v2166_v7 = vld [vmem:[%s2907_s1 + $0x88] sm:$0xff]   ;;  %v2170_v11 = vld [vmem:[%s2907_s1 + $0x90] sm:$0xff]  }
   0x5   :  { %1904 = vmatpush3.bf16.msra.mxu1 %v2162_v3  ;;  %1841 = vmatprep.subr.bf16.mxu0 %v2163_v4  ;;  %v2171_v12 = vld [vmem:[%s2907_s1 + $0x58] sm:$0xff]   ;;  %v2175_v16 = vld [vmem:[%s2907_s1 + $0x60] sm:$0xff]   ;;  %v2179_v20 = vld [vmem:[%s2907_s1 + $0x68] sm:$0xff]  }
   0x6   :  { %1905 = vmatprep.subr.bf16.mxu1 %v2164_v5  ;;  %v2172_v13 = vld [vmem:[%s2907_s1 + $0xd8] sm:$0xff]   ;;  %v2176_v17 = vld [vmem:[%s2907_s1 + $0xe0] sm:$0xff]   ;;  %v2180_v21 = vld [vmem:[%s2907_s1 + $0xe8] sm:$0xff]  }
   0x7   :  { %v2173_v14 = vld [vmem:[%s2907_s1 + $0x18] sm:$0xff]   ;;  %v2177_v18 = vld [vmem:[%s2907_s1 + $0x20] sm:$0xff]   ;;  %v2181_v22 = vld [vmem:[%s2907_s1 + $0x28] sm:$0xff]  }
   0x8   :  { %1842 = vmatpush3.bf16.msra.mxu0 %v2165_v6  ;;  %v2174_v15 = vld [vmem:[%s2907_s1 + $0x98] sm:$0xff]   ;;  %v2178_v19 = vld [vmem:[%s2907_s1 + $0xa0] sm:$0xff]   ;;  %v2182_v23 = vld [vmem:[%s2907_s1 + $0xa8] sm:$0xff]  }
   0x9   :  { %1906 = vmatpush3.bf16.msra.mxu1 %v2166_v7  ;;  %1843 = vmatprep.subr.bf16.mxu0 %v2167_v8  ;;  %v2183_v24 = vld [vmem:[%s2907_s1 + $0x70] sm:$0xff]   ;;  %v2187_v28 = vld [vmem:[%s2907_s1 + $0x78] sm:$0xff]   ;;  %v2191_v32 = vld [vmem:[%s2908_s0] ss:$36 sps:$4 sm:$0xff]  }
   0xa   :  { %1907 = vmatprep.subr.bf16.mxu1 %v2168_v9  ;;  %v2184_v25 = vld [vmem:[%s2907_s1 + $0xf0] sm:$0xff]   ;;  %v2188_v29 = vld [vmem:[%s2907_s1 + $0xf8] sm:$0xff]   ;;  %v2193_v33 = vld [vmem:[%s2908_s0 + $0x4] ss:$36 sps:$4 sm:$0xff]  }
   0xb   :  { %v2185_v26 = vld [vmem:[%s2907_s1 + $0x30] sm:$0xff]   ;;  %v2189_v30 = vld [vmem:[%s2907_s1 + $0x38] sm:$0xff]   ;;  %v2194_v34 = vld [vmem:[%s2908_s0 + $0x8] ss:$36 sps:$4 sm:$0xff]   ;;  %1078 = vmatprep.mubr.bf16.mxu0 %v2193_v33 }
   0xc   :  { %1844 = vmatpush3.bf16.msra.mxu0 %v2169_v10  ;;  %v2186_v27 = vld [vmem:[%s2907_s1 + $0xb0] sm:$0xff]   ;;  %v2190_v31 = vld [vmem:[%s2907_s1 + $0xb8] sm:$0xff]   ;;  %v2197_v36 = vld [vmem:[%s2907_s1 + $0x140] sm:$0xff]  }
   0xd   :  { %1908 = vmatpush3.bf16.msra.mxu1 %v2170_v11  ;;  %1845 = vmatprep.subr.bf16.mxu0 %v2171_v12  ;;  %v2196_v35 = vld [vmem:[%s2908_s0 + $0xc] ss:$36 sps:$4 sm:$0xff]   ;;  %v2198_v37 = vld [vmem:[%s2907_s1 + $0x1c0] sm:$0xff]   ;;  %v2203_v41 = vld [vmem:[%s2908_s0 + $0x54] ss:$36 sps:$4 sm:$0xff]  }
   0xe   :  { %1909 = vmatprep.subr.bf16.mxu1 %v2172_v13  ;;  %1175 = vmatprep.mubr.bf16.mxu1 %v2196_v35  ;;  %v2199_v38 = vld [vmem:[%s2907_s1 + $0x100] sm:$0xff]   ;;  %v2201_v40 = vld [vmem:[%s2908_s0 + $0x4c] ss:$36 sps:$4 sm:$0xff]   ;;  %v2211_v48 = vld [vmem:[%s2908_s0 + $0x94] ss:$36 sps:$4 sm:$0xff]  }
   0xf   :  { %v2200_v39 = vld [vmem:[%s2907_s1 + $0x180] sm:$0xff]   ;;  %v2205_v42 = vld [vmem:[%s2908_s0 + $0x48] ss:$36 sps:$4 sm:$0xff]   ;;  %v2206_v43 = vld [vmem:[%s2908_s0 + $0x50] ss:$36 sps:$4 sm:$0xff]  }
  0x10   :  { %1846 = vmatpush3.bf16.msra.mxu0 %v2173_v14  ;;  %v2207_v44 = vld [vmem:[%s2907_s1 + $0x148] sm:$0xff]   ;;  %v2213_v49 = vld [vmem:[%s2908_s0 + $0x9c] ss:$36 sps:$4 sm:$0xff]   ;;  %v2215_v50 = vld [vmem:[%s2908_s0 + $0x90] ss:$36 sps:$4 sm:$0xff]  }
  0x11   :  { %1910 = vmatpush3.bf16.msra.mxu1 %v2174_v15  ;;  %1847 = vmatprep.subr.bf16.mxu0 %v2175_v16  ;;  %v2208_v45 = vld [vmem:[%s2907_s1 + $0x1c8] sm:$0xff]   ;;  %v2216_v51 = vld [vmem:[%s2908_s0 + $0x98] ss:$36 sps:$4 sm:$0xff]   ;;  %v2217_v52 = vld [vmem:[%s2907_s1 + $0x150] sm:$0xff]  }
  0x12   :  { %1911 = vmatprep.subr.bf16.mxu1 %v2176_v17  ;;  %v2209_v46 = vld [vmem:[%s2907_s1 + $0x108] sm:$0xff]   ;;  %v2218_v53 = vld [vmem:[%s2907_s1 + $0x1d0] sm:$0xff]   ;;  %v2221_v56 = vld [vmem:[%s2908_s0 + $0xdc] ss:$36 sps:$4 sm:$0xff]  }
  0x13   :  { %v2210_v47 = vld [vmem:[%s2907_s1 + $0x188] sm:$0xff]   ;;  %v2219_v54 = vld [vmem:[%s2907_s1 + $0x110] sm:$0xff]   ;;  %v2225_v58 = vld [vmem:[%s2908_s0 + $0xd8] ss:$36 sps:$4 sm:$0xff]  }
  0x14   :  { %1848 = vmatpush3.bf16.msra.mxu0 %v2177_v18  ;;  %v2220_v55 = vld [vmem:[%s2907_s1 + $0x190] sm:$0xff]   ;;  %v2223_v57 = vld [vmem:[%s2908_s0 + $0xe4] ss:$36 sps:$4 sm:$0xff]   ;;  %v2227_v60 = vld [vmem:[%s2907_s1 + $0x158] sm:$0xff]  }
  0x15   :  { %1912 = vmatpush3.bf16.msra.mxu1 %v2178_v19  ;;  %1849 = vmatprep.subr.bf16.mxu0 %v2179_v20  ;;  %v2226_v59 = vld [vmem:[%s2908_s0 + $0xe0] ss:$36 sps:$4 sm:$0xff]   ;;  %v2228_v61 = vld [vmem:[%s2907_s1 + $0x1d8] sm:$0xff]   ;;  %v2233_v1 = vld [vmem:[%s2908_s0 + $0x12c] ss:$36 sps:$4 sm:$0xff]  }
  0x16   :  { %1913 = vmatprep.subr.bf16.mxu1 %v2180_v21  ;;  %v2229_v62 = vld [vmem:[%s2907_s1 + $0x118] sm:$0xff]   ;;  %v2231_v0 = vld [vmem:[%s2908_s0 + $0x124] ss:$36 sps:$4 sm:$0xff]   ;;  %v2241_v8 = vld [vmem:[%s2908_s0 + $0x16c] ss:$36 sps:$4 sm:$0xff]  }
  0x17   :  { %v2230_v63 = vld [vmem:[%s2907_s1 + $0x198] sm:$0xff]   ;;  %v2235_v2 = vld [vmem:[%s2908_s0 + $0x120] ss:$36 sps:$4 sm:$0xff]   ;;  %v2236_v4 = vld [vmem:[%s2908_s0 + $0x128] ss:$36 sps:$4 sm:$0xff]  }
  0x18   :  { %1850 = vmatpush3.bf16.msra.mxu0 %v2181_v22  ;;  %v2237_v3 = vld [vmem:[%s2907_s1 + $0x160] sm:$0xff]   ;;  %v2243_v9 = vld [vmem:[%s2908_s0 + $0x174] ss:$36 sps:$4 sm:$0xff]   ;;  %v2247_v10 = vld [vmem:[%s2907_s1 + $0x168] sm:$0xff]  }
  0x19   :  { %1914 = vmatpush3.bf16.msra.mxu1 %v2182_v23  ;;  %1851 = vmatprep.subr.bf16.mxu0 %v2183_v24  ;;  %v2238_v5 = vld [vmem:[%s2907_s1 + $0x1e0] sm:$0xff]   ;;  %v2248_v11 = vld [vmem:[%s2907_s1 + $0x1e8] sm:$0xff]   ;;  %v2246_v15 = vld [vmem:[%s2908_s0 + $0x170] ss:$36 sps:$4 sm:$0xff]  }
  0x1a   :  { %1915 = vmatprep.subr.bf16.mxu1 %v2184_v25  ;;  %v2239_v6 = vld [vmem:[%s2907_s1 + $0x120] sm:$0xff]   ;;  %v2245_v12 = vld [vmem:[%s2908_s0 + $0x168] ss:$36 sps:$4 sm:$0xff]   ;;  %v2251_v16 = vld [vmem:[%s2908_s0 + $0x1b4] ss:$36 sps:$4 sm:$0xff]  }
  0x1b   :  { %v2240_v7 = vld [vmem:[%s2907_s1 + $0x1a0] sm:$0xff]   ;;  %v2249_v13 = vld [vmem:[%s2907_s1 + $0x128] sm:$0xff]   ;;  %v2257_v18 = vld [vmem:[%s2907_s1 + $0x170] sm:$0xff]  }
  0x1c   :  { %1852 = vmatpush3.bf16.msra.mxu0 %v2185_v26  ;;  %v2250_v14 = vld [vmem:[%s2907_s1 + $0x1a8] sm:$0xff]   ;;  %v2253_v17 = vld [vmem:[%s2908_s0 + $0x1bc] ss:$36 sps:$4 sm:$0xff]   ;;  %v2258_v19 = vld [vmem:[%s2907_s1 + $0x1f0] sm:$0xff]  }
  0x1d   :  { %1916 = vmatpush3.bf16.msra.mxu1 %v2186_v27  ;;  %1853 = vmatprep.subr.bf16.mxu0 %v2187_v28  ;;  %v2259_v20 = vld [vmem:[%s2907_s1 + $0x130] sm:$0xff]   ;;  %v2256_v23 = vld [vmem:[%s2908_s0 + $0x1b8] ss:$36 sps:$4 sm:$0xff]   ;;  %v2263_v25 = vld [vmem:[%s2908_s0 + $0x204] ss:$36 sps:$4 sm:$0xff]  }
  0x1e   :  { %1917 = vmatprep.subr.bf16.mxu1 %v2188_v29  ;;  %v2260_v21 = vld [vmem:[%s2907_s1 + $0x1b0] sm:$0xff]   ;;  %v2261_v24 = vld [vmem:[%s2908_s0 + $0x1fc] ss:$36 sps:$4 sm:$0xff]  }
  0x1f   :  { %v2255_v22 = vld [vmem:[%s2908_s0 + $0x1b0] ss:$36 sps:$4 sm:$0xff]   ;;  %v2267_v26 = vld [vmem:[%s2907_s1 + $0x178] sm:$0xff]  }
  0x20   :  { %1854 = vmatpush3.bf16.msra.mxu0 %v2189_v30  ;;  %v2268_v27 = vld [vmem:[%s2907_s1 + $0x1f8] sm:$0xff]   ;;  %v2271_v35 = vld [vmem:[%s2908_s0 + $0x10] ss:$36 sps:$4 sm:$0xff]  }
  0x21   :  { %1918 = vmatpush3.bf16.msra.mxu1 %v2190_v31  ;;  %1967 = vmatprep.subr.bf16.mxu0 %v2197_v36  ;;  %v2269_v28 = vld [vmem:[%s2907_s1 + $0x138] sm:$0xff]   ;;  %v2266_v31 = vld [vmem:[%s2908_s0 + $0x200] ss:$36 sps:$4 sm:$0xff]  }
  0x22   :  { %2031 = vmatprep.subr.bf16.mxu1 %v2198_v37  ;;  %v2270_v29 = vld [vmem:[%s2907_s1 + $0x1b8] sm:$0xff]  }
  0x23   :  { %1079 = vmatmul.mubr.bf16.vlgmr.msra.gmra.mrb[0].mxu0 %v2191_v32  ;;  %v2265_v30 = vld [vmem:[%s2908_s0 + $0x1f8] ss:$36 sps:$4 sm:$0xff]   ;;  %v2277_v32 = vld [vmem:[%s2907_s1 + $0x200] sm:$0xff]  }
  0x24   :  { %1176 = vmatmul.mubr.bf16.vlgmr.msra.gmra.mrb[0].mxu1 %v2194_v34  ;;  %1968 = vmatpush3.bf16.msra.mxu0 %v2199_v38  ;;  %v2273_v33 = vld [vmem:[%s2908_s0 + $0x14] ss:$36 sps:$4 sm:$0xff]   ;;  %v2276_v34 = vld [vmem:[%s2908_s0 + $0x1c] ss:$36 sps:$4 sm:$0xff]   ;;  %v2280_v38 = vld [vmem:[%s2908_s0 + $0x64] ss:$36 sps:$4 sm:$0xff]  }
  0x25   :  { %2032 = vmatpush3.bf16.msra.mxu1 %v2200_v39  ;;  %1086 = vmatprep.mubr.bf16.mxu0 %v2201_v40  ;;  %v2274_v36 = vld [vmem:[%s2908_s0 + $0x18] ss:$36 sps:$4 sm:$0xff]   ;;  %v2284_v39 = vld [vmem:[%s2907_s1 + $0x208] sm:$0xff]   ;;  %v2291_v40 = vld [vmem:[%s2907_s1 + $0x210] sm:$0xff]  }
  0x26   :  { %1183 = vmatprep.mubr.bf16.mxu1 %v2203_v41  ;;  %1969 = vmatprep.subr.bf16.mxu0 %v2207_v44  ;;  %v2278_v37 = vld [vmem:[%s2908_s0 + $0x5c] ss:$36 sps:$4 sm:$0xff]   ;;  %v2287_v44 = vld [vmem:[%s2908_s0 + $0xac] ss:$36 sps:$4 sm:$0xff]  }
  0x27   :  { %2033 = vmatprep.subr.bf16.mxu1 %v2208_v45  ;;  %v2282_v41 = vld [vmem:[%s2908_s0 + $0x58] ss:$36 sps:$4 sm:$0xff]  }
  0x28   :  { %1970 = vmatpush3.bf16.msra.mxu0 %v2209_v46  ;;  %v2298_v45 = vld [vmem:[%s2907_s1 + $0x218] sm:$0xff]   ;;  %v2305_v46 = vld [vmem:[%s2907_s1 + $0x220] sm:$0xff]  }
  0x29   :  { %2034 = vmatpush3.bf16.msra.mxu1 %v2210_v47  ;;  %1971 = vmatprep.subr.bf16.mxu0 %v2217_v52  ;;  %v2289_v47 = vld [vmem:[%s2908_s0 + $0xa0] ss:$36 sps:$4 sm:$0xff]   ;;  %v2296_v52 = vld [vmem:[%s2908_s0 + $0xe8] ss:$36 sps:$4 sm:$0xff]  }
  0x2a   :  { %2035 = vmatprep.subr.bf16.mxu1 %v2218_v53  ;;  %v2319_v53 = vld [vmem:[%s2907_s1 + $0x230] sm:$0xff]  }
  0x2b   :  { %1087 = vmatmul.mubr.bf16.gmra.mrb[4].mxu0 %v2205_v42  ;;  %v2283_v42 = vld [vmem:[%s2908_s0 + $0x60] ss:$36 sps:$4 sm:$0xff]  }
  0x2c   :  { %1184 = vmatmul.mubr.bf16.gmra.mrb[4].mxu1 %v2206_v43  ;;  %1094 = vmatprep.mubr.bf16.mxu0 %v2211_v48  ;;  %v2285_v43 = vld [vmem:[%s2908_s0 + $0xa4] ss:$36 sps:$4 sm:$0xff]  }
  0x2d   :  { %1191 = vmatprep.mubr.bf16.mxu1 %v2213_v49  ;;  %1972 = vmatpush3.bf16.msra.mxu0 %v2219_v54  ;;  %v2290_v48 = vld [vmem:[%s2908_s0 + $0xa8] ss:$36 sps:$4 sm:$0xff]   ;;  %v2297_v54 = vld [vmem:[%s2908_s0 + $0xf0] ss:$36 sps:$4 sm:$0xff]  }
  0x2e   :  { %2036 = vmatpush3.bf16.msra.mxu1 %v2220_v55  ;;  %1973 = vmatprep.subr.bf16.mxu0 %v2227_v60  ;;  %v2292_v49 = vld [vmem:[%s2908_s0 + $0xec] ss:$36 sps:$4 sm:$0xff]   ;;  %v2299_v55 = vld [vmem:[%s2908_s0 + $0x134] ss:$36 sps:$4 sm:$0xff]   ;;  %v2306_v60 = vld [vmem:[%s2908_s0 + $0x17c] ss:$36 sps:$4 sm:$0xff]  }
  0x2f   :  { %2037 = vmatprep.subr.bf16.mxu1 %v2228_v61  ;;  %v2308_v61 = vld [vmem:[%s2908_s0 + $0x184] ss:$36 sps:$4 sm:$0xff]  }
  0x31   :  { %1974 = vmatpush3.bf16.msra.mxu0 %v2229_v62  ;;  %v2310_v62 = vld [vmem:[%s2908_s0 + $0x178] ss:$36 sps:$4 sm:$0xff]  }
  0x32   :  { %2038 = vmatpush3.bf16.msra.mxu1 %v2230_v63  ;;  %1975 = vmatprep.subr.bf16.mxu0 %v2237_v3  ;;  %v2311_v63 = vld [vmem:[%s2908_s0 + $0x180] ss:$36 sps:$4 sm:$0xff]   ;;  %v2318_v3 = vld [vmem:[%s2908_s0 + $0x1c8] ss:$36 sps:$4 sm:$0xff]  }
  0x33   :  { %1095 = vmatmul.mubr.bf16.gmra.mrb[8].mxu0 %v2215_v50  ;;  %2039 = vmatprep.subr.bf16.mxu1 %v2238_v5  ;;  %v2294_v50 = vld [vmem:[%s2908_s0 + $0xf4] ss:$36 sps:$4 sm:$0xff]  }
  0x34   :  { %1192 = vmatmul.mubr.bf16.gmra.mrb[8].mxu1 %v2216_v51  ;;  %1102 = vmatprep.mubr.bf16.mxu0 %v2221_v56  ;;  %v2312_v51 = vld [vmem:[%s2907_s1 + $0x228] sm:$0xff]   ;;  %v2301_v56 = vld [vmem:[%s2908_s0 + $0x13c] ss:$36 sps:$4 sm:$0xff]   ;;  %v2322_v5 = vld [vmem:[%s2908_s0 + $0x214] ss:$36 sps:$4 sm:$0xff]  }
  0x35   :  { %1199 = vmatprep.mubr.bf16.mxu1 %v2223_v57  ;;  %1976 = vmatpush3.bf16.msra.mxu0 %v2239_v6  ;;  %v2326_v57 = vld [vmem:[%s2907_s1 + $0x238] sm:$0xff]   ;;  %v2324_v6 = vld [vmem:[%s2908_s0 + $0x208] ss:$36 sps:$4 sm:$0xff]  }
  0x36   :  { %2040 = vmatpush3.bf16.msra.mxu1 %v2240_v7  ;;  %1977 = vmatprep.subr.bf16.mxu0 %v2247_v10  ;;  %v2325_v7 = vld [vmem:[%s2908_s0 + $0x210] ss:$36 sps:$4 sm:$0xff]   ;;  %v2329_v10 = vld [vmem:[%s2908_s0 + $0x68] ss:$36 sps:$4 sm:$0xff]  }
  0x37   :  { %2041 = vmatprep.subr.bf16.mxu1 %v2248_v11  ;;  %v2330_v11 = vld [vmem:[%s2908_s0 + $0x188] ss:$36 sps:$4 sm:$0xff]  }
  0x39   :  { %1978 = vmatpush3.bf16.msra.mxu0 %v2249_v13  ;;  %v2332_v13 = vld [vmem:[%s2908_s0 + $0x1d0] ss:$36 sps:$4 sm:$0xff]  }
  0x3a   :  { %2042 = vmatpush3.bf16.msra.mxu1 %v2250_v14  ;;  %1979 = vmatprep.subr.bf16.mxu0 %v2257_v18  ;;  %v2333_v14 = vld [vmem:[%s2908_s0 + $0xf8] ss:$36 sps:$4 sm:$0xff]   ;;  %v2790_v18 = vld [vmem:[%s2909_s2] ss:$0 sm:$0xff] }
  0x3b   :  { %1103 = vmatmul.mubr.bf16.gmra.mrb[12].mxu0 %v2225_v58  ;;  %2043 = vmatprep.subr.bf16.mxu1 %v2258_v19  ;;  %v2303_v58 = vld [vmem:[%s2908_s0 + $0x130] ss:$36 sps:$4 sm:$0xff]  }
  0x3c   :  { %1200 = vmatmul.mubr.bf16.gmra.mrb[12].mxu1 %v2226_v59  ;;  %1110 = vmatprep.mubr.bf16.mxu0 %v2231_v0  ;;  %v2304_v59 = vld [vmem:[%s2908_s0 + $0x138] ss:$36 sps:$4 sm:$0xff]   ;;  %v2313_v0 = vld [vmem:[%s2908_s0 + $0x1c4] ss:$36 sps:$4 sm:$0xff]  }
  0x3d   :  { %1207 = vmatprep.mubr.bf16.mxu1 %v2233_v1  ;;  %1980 = vmatpush3.bf16.msra.mxu0 %v2259_v20  ;;  %v2315_v1 = vld [vmem:[%s2908_s0 + $0x1cc] ss:$36 sps:$4 sm:$0xff]  }
  0x3e   :  { %2044 = vmatpush3.bf16.msra.mxu1 %v2260_v21  ;;  %1981 = vmatprep.subr.bf16.mxu0 %v2267_v26 }
  0x3f   :  { %2045 = vmatprep.subr.bf16.mxu1 %v2268_v27 }
  0x41   :  { %1982 = vmatpush3.bf16.msra.mxu0 %v2269_v28 }
  0x42   :  { %2046 = vmatpush3.bf16.msra.mxu1 %v2270_v29  ;;  %2111 = vmatprep.subr.bf16.mxu0 %v2277_v32 }
  0x43   :  { %1111 = vmatmul.mubr.bf16.gmra.mrb[16].mxu0 %v2235_v2  ;;  %2143 = vmatprep.subr.bf16.mxu1 %v2277_v32  ;;  %v2317_v2 = vld [vmem:[%s2908_s0 + $0x1c0] ss:$36 sps:$4 sm:$0xff]  }
  0x44   :  { %1208 = vmatmul.mubr.bf16.gmra.mrb[16].mxu1 %v2236_v4  ;;  %1118 = vmatprep.mubr.bf16.mxu0 %v2241_v8  ;;  %v2320_v4 = vld [vmem:[%s2908_s0 + $0x20c] ss:$36 sps:$4 sm:$0xff]   ;;  %v2327_v8 = vld [vmem:[%s2908_s0 + $0x20] ss:$36 sps:$4 sm:$0xff]  }
  0x45   :  { %1215 = vmatprep.mubr.bf16.mxu1 %v2243_v9  ;;  %v2328_v9 = vld [vmem:[%s2908_s0 + $0x140] ss:$36 sps:$4 sm:$0xff]  }
  0x4b   :  { %1119 = vmatmul.mubr.bf16.gmra.mrb[20].mxu0 %v2245_v12  ;;  %v2331_v12 = vld [vmem:[%s2908_s0 + $0xb0] ss:$36 sps:$4 sm:$0xff]  }
  0x4c   :  { %1216 = vmatmul.mubr.bf16.gmra.mrb[20].mxu1 %v2246_v15  ;;  %1126 = vmatprep.mubr.bf16.mxu0 %v2251_v16  ;;  %v2334_v15 = vld [vmem:[%s2908_s0 + $0x218] ss:$36 sps:$4 sm:$0xff]  }
  0x4d   :  { %1223 = vmatprep.mubr.bf16.mxu1 %v2253_v17 }
  0x53   :  { %1127 = vmatmul.mubr.bf16.gmra.mrb[24].mxu0 %v2255_v22 }
  0x54   :  { %1224 = vmatmul.mubr.bf16.gmra.mrb[24].mxu1 %v2256_v23  ;;  %1134 = vmatprep.mubr.bf16.mxu0 %v2261_v24 }
  0x55   :  { %1231 = vmatprep.mubr.bf16.mxu1 %v2263_v25 }
  0x5b   :  { %1135 = vmatmul.mubr.bf16.gmra.mrb[28].mxu0 %v2265_v30 }
  0x5c   :  { %1232 = vmatmul.mubr.bf16.gmra.mrb[28].mxu1 %v2266_v31  ;;  %1272 = vmatprep.mubr.bf16.mxu0 %v2273_v33 }
  0x5d   :  { %1369 = vmatprep.mubr.bf16.mxu1 %v2276_v34 }
  0x63   :  { %1273 = vmatmul.mubr.bf16.vlgmr.msra.gmra.mrb[32].mxu0 %v2271_v35 }
  0x64   :  { %1370 = vmatmul.mubr.bf16.vlgmr.msra.gmra.mrb[32].mxu1 %v2274_v36  ;;  %2112 = vmatpush3.bf16.msra.mxu0 %v2277_v32 }
  0x65   :  { %2151 = vmatpush3.bf16.msra.mxu1 %v2277_v32  ;;  %1280 = vmatprep.mubr.bf16.mxu0 %v2278_v37 }
  0x66   :  { %1377 = vmatprep.mubr.bf16.mxu1 %v2280_v38  ;;  %2113 = vmatprep.subr.bf16.mxu0 %v2284_v39 }
  0x67   :  { %2144 = vmatprep.subr.bf16.mxu1 %v2284_v39 }
  0x68   :  { %2114 = vmatpush3.bf16.msra.mxu0 %v2284_v39 }
  0x69   :  { %2152 = vmatpush3.bf16.msra.mxu1 %v2284_v39  ;;  %2115 = vmatprep.subr.bf16.mxu0 %v2291_v40 }
  0x6a   :  { %2145 = vmatprep.subr.bf16.mxu1 %v2291_v40 }
  0x6b   :  { %1281 = vmatmul.mubr.bf16.gmra.mrb[36].mxu0 %v2282_v41 }
  0x6c   :  { %1378 = vmatmul.mubr.bf16.gmra.mrb[36].mxu1 %v2283_v42  ;;  %1288 = vmatprep.mubr.bf16.mxu0 %v2285_v43 }
  0x6d   :  { %1385 = vmatprep.mubr.bf16.mxu1 %v2287_v44  ;;  %2116 = vmatpush3.bf16.msra.mxu0 %v2291_v40 }
  0x6e   :  { %2153 = vmatpush3.bf16.msra.mxu1 %v2291_v40  ;;  %2117 = vmatprep.subr.bf16.mxu0 %v2298_v45 }
  0x6f   :  { %2146 = vmatprep.subr.bf16.mxu1 %v2298_v45 }
  0x71   :  { %2118 = vmatpush3.bf16.msra.mxu0 %v2298_v45 }
  0x72   :  { %2154 = vmatpush3.bf16.msra.mxu1 %v2298_v45  ;;  %2119 = vmatprep.subr.bf16.mxu0 %v2305_v46 }
  0x73   :  { %1289 = vmatmul.mubr.bf16.gmra.mrb[40].mxu0 %v2289_v47  ;;  %2147 = vmatprep.subr.bf16.mxu1 %v2305_v46 }
  0x74   :  { %1386 = vmatmul.mubr.bf16.gmra.mrb[40].mxu1 %v2290_v48  ;;  %1296 = vmatprep.mubr.bf16.mxu0 %v2292_v49 }
  0x75   :  { %1393 = vmatprep.mubr.bf16.mxu1 %v2294_v50  ;;  %2120 = vmatpush3.bf16.msra.mxu0 %v2305_v46 }
  0x76   :  { %2155 = vmatpush3.bf16.msra.mxu1 %v2305_v46  ;;  %2121 = vmatprep.subr.bf16.mxu0 %v2312_v51 }
  0x77   :  { %2148 = vmatprep.subr.bf16.mxu1 %v2312_v51 }
  0x79   :  { %2122 = vmatpush3.bf16.msra.mxu0 %v2312_v51 }
  0x7a   :  { %2156 = vmatpush3.bf16.msra.mxu1 %v2312_v51  ;;  %2123 = vmatprep.subr.bf16.mxu0 %v2319_v53 }
  0x7b   :  { %1297 = vmatmul.mubr.bf16.gmra.mrb[44].mxu0 %v2296_v52  ;;  %2149 = vmatprep.subr.bf16.mxu1 %v2319_v53 }
  0x7c   :  { %1394 = vmatmul.mubr.bf16.gmra.mrb[44].mxu1 %v2297_v54  ;;  %1304 = vmatprep.mubr.bf16.mxu0 %v2299_v55 }
  0x7d   :  { %1401 = vmatprep.mubr.bf16.mxu1 %v2301_v56  ;;  %2124 = vmatpush3.bf16.msra.mxu0 %v2319_v53 }
  0x7e   :  { %2157 = vmatpush3.bf16.msra.mxu1 %v2319_v53  ;;  %2125 = vmatprep.subr.bf16.mxu0 %v2326_v57 }
  0x7f   :  { %2150 = vmatprep.subr.bf16.mxu1 %v2326_v57 }
  0x81   :  { %2126 = vmatpush3.bf16.msra.mxu0 %v2326_v57 }
  0x82   :  { %2158 = vmatpush3.bf16.msra.mxu1 %v2326_v57 }
  0x83   :  { %1305 = vmatmul.mubr.bf16.gmra.mrb[48].mxu0 %v2303_v58 }
  0x84   :  { %1402 = vmatmul.mubr.bf16.gmra.mrb[48].mxu1 %v2304_v59  ;;  %1312 = vmatprep.mubr.bf16.mxu0 %v2306_v60 }
  0x85   :  { %1409 = vmatprep.mubr.bf16.mxu1 %v2308_v61 }
  0x8b   :  { %1313 = vmatmul.mubr.bf16.gmra.mrb[52].mxu0 %v2310_v62 }
  0x8c   :  { %1410 = vmatmul.mubr.bf16.gmra.mrb[52].mxu1 %v2311_v63  ;;  %1320 = vmatprep.mubr.bf16.mxu0 %v2313_v0 }
  0x8d   :  { %1417 = vmatprep.mubr.bf16.mxu1 %v2315_v1 }
  0x93   :  { %1321 = vmatmul.mubr.bf16.gmra.mrb[56].mxu0 %v2317_v2 }
  0x94   :  { %1418 = vmatmul.mubr.bf16.gmra.mrb[56].mxu1 %v2318_v3  ;;  %1328 = vmatprep.mubr.bf16.mxu0 %v2320_v4 }
  0x95   :  { %1425 = vmatprep.mubr.bf16.mxu1 %v2322_v5 }
  0x9b   :  { %1329 = vmatmul.mubr.bf16.gmra.mrb[60].mxu0 %v2324_v6 }
  0x9c   :  { %1426 = vmatmul.mubr.bf16.gmra.mrb[60].mxu1 %v2325_v7  ;;  %2127 = vmatprep.mubr.bf16.mxu0 %v2327_v8 }
  0x9d   :  { %2135 = vmatprep.mubr.bf16.mxu1 %v2328_v9 }
  0xa3   :  { %2128 = vmatmul.mubr.bf16.vlgmr.msra.gmra.mrb[64].mxu0 %v2329_v10 }
  0xa4   :  { %2136 = vmatmul.mubr.bf16.vlgmr.msra.gmra.mrb[64].mxu1 %v2330_v11  ;;  %2131 = vmatprep.mubr.bf16.mxu0 %v2331_v12 }
  0xa5   :  { %2139 = vmatprep.mubr.bf16.mxu1 %v2332_v13 }
  0xab   :  { %2132 = vmatmul.mubr.bf16.gmra.mrb[68].mxu0 %v2333_v14 }
  0xac   :  { %2140 = vmatmul.mubr.bf16.gmra.mrb[68].mxu1 %v2334_v15 }
  0xf6   :  { %v1855_v16 = vpop.f32.mrb[0].mxu0 }
  0xf7   :  { %v1919_v17 = vpop.f32.mrb[0].mxu1  ;;  %v1856_v19 = vpop.f32.mrb[1].mxu0 }
  0xf8   :  { %v1857_v20 = vadd.f32 %v1856_v19, %v1855_v16  ;;  %v1920_v21 = vpop.f32.mrb[1].mxu1  ;;  %v1858_v22 = vpop.f32.mrb[2].mxu0 }
  0xf9   :  { %v1921_v23 = vadd.f32 %v1920_v21, %v1919_v17  ;;  %v1922_v24 = vpop.f32.mrb[2].mxu1  ;;  %v1859_v25 = vpop.f32.mrb[3].mxu0 }
  0xfa   :  { %v1081_v26 = vadd.f32 %v1857_v20, %v2790_v18  ;;  %v1860_v27 = vadd.f32 %v1859_v25, %v1858_v22  ;;  %v1923_v28 = vpop.f32.mrb[3].mxu1 }
  0xfb   :  { %v1924_v29 = vadd.f32 %v1923_v28, %v1922_v24 }
  0xfc   :  { %v2793_v30 = vadd.f32 %v1921_v23, %v1081_v26  ;;  %v1084_v31 = vadd.f32 %v1860_v27, %v2790_v18 }
  0xfe   :  { %v2796_v32 = vadd.f32 %v1924_v29, %v1084_v31  ;;  %v1861_v33 = vpop.f32.mrb[4].mxu0 }
  0xff   :  { %v1925_v34 = vpop.f32.mrb[4].mxu1  ;;  %v1862_v35 = vpop.f32.mrb[5].mxu0 }
 0x100   :  { %v1863_v36 = vadd.f32 %v1862_v35, %v1861_v33  ;;  %v1926_v37 = vpop.f32.mrb[5].mxu1  ;;  %v1864_v38 = vpop.f32.mrb[6].mxu0 }
 0x101   :  { %v1927_v39 = vadd.f32 %v1926_v37, %v1925_v34  ;;  %v1928_v40 = vpop.f32.mrb[6].mxu1  ;;  %v1865_v41 = vpop.f32.mrb[7].mxu0 }
 0x102   :  { %v1089_v42 = vadd.f32 %v1863_v36, %v2790_v18  ;;  %v1866_v43 = vadd.f32 %v1865_v41, %v1864_v38  ;;  %v1929_v44 = vpop.f32.mrb[7].mxu1 }
 0x103   :  { %v1930_v45 = vadd.f32 %v1929_v44, %v1928_v40 }
 0x104   :  { %v2799_v46 = vadd.f32 %v1927_v39, %v1089_v42  ;;  %v1092_v47 = vadd.f32 %v1866_v43, %v2790_v18 }
 0x106   :  { %v2802_v48 = vadd.f32 %v1930_v45, %v1092_v47  ;;  %v1867_v49 = vpop.f32.mrb[8].mxu0 }
 0x107   :  { %v1931_v50 = vpop.f32.mrb[8].mxu1  ;;  %v1868_v51 = vpop.f32.mrb[9].mxu0 }
 0x108   :  { %v1869_v52 = vadd.f32 %v1868_v51, %v1867_v49  ;;  %v1932_v53 = vpop.f32.mrb[9].mxu1  ;;  %v1870_v54 = vpop.f32.mrb[10].mxu0 }
 0x109   :  { %v1933_v55 = vadd.f32 %v1932_v53, %v1931_v50  ;;  %v1934_v56 = vpop.f32.mrb[10].mxu1  ;;  %v1871_v57 = vpop.f32.mrb[11].mxu0 }
 0x10a   :  { %v1097_v58 = vadd.f32 %v1869_v52, %v2790_v18  ;;  %v1872_v59 = vadd.f32 %v1871_v57, %v1870_v54  ;;  %v1935_v60 = vpop.f32.mrb[11].mxu1 }
 0x10b   :  { %v1936_v61 = vadd.f32 %v1935_v60, %v1934_v56 }
 0x10c   :  { %v2805_v62 = vadd.f32 %v1933_v55, %v1097_v58  ;;  %v1100_v63 = vadd.f32 %v1872_v59, %v2790_v18 }
 0x10e   :  { %v2808_v0 = vadd.f32 %v1936_v61, %v1100_v63  ;;  %v1873_v1 = vpop.f32.mrb[12].mxu0 }
 0x10f   :  { %v1937_v2 = vpop.f32.mrb[12].mxu1  ;;  %v1874_v3 = vpop.f32.mrb[13].mxu0 }
 0x110   :  { %v1875_v4 = vadd.f32 %v1874_v3, %v1873_v1  ;;  %v1938_v5 = vpop.f32.mrb[13].mxu1  ;;  %v1876_v6 = vpop.f32.mrb[14].mxu0 }
 0x111   :  { %v1939_v7 = vadd.f32 %v1938_v5, %v1937_v2  ;;  %v1940_v8 = vpop.f32.mrb[14].mxu1  ;;  %v1877_v9 = vpop.f32.mrb[15].mxu0 }
 0x112   :  { %v1105_v10 = vadd.f32 %v1875_v4, %v2790_v18  ;;  %v1878_v11 = vadd.f32 %v1877_v9, %v1876_v6  ;;  %v1941_v12 = vpop.f32.mrb[15].mxu1 }
 0x113   :  { %v1942_v13 = vadd.f32 %v1941_v12, %v1940_v8 }
 0x114   :  { %v2811_v14 = vadd.f32 %v1939_v7, %v1105_v10  ;;  %v1108_v15 = vadd.f32 %v1878_v11, %v2790_v18 }
 0x116   :  { %v2814_v16 = vadd.f32 %v1942_v13, %v1108_v15  ;;  %v1879_v17 = vpop.f32.mrb[16].mxu0 }
 0x117   :  { %v1943_v19 = vpop.f32.mrb[16].mxu1  ;;  %v1880_v20 = vpop.f32.mrb[17].mxu0 }
 0x118   :  { %v1881_v21 = vadd.f32 %v1880_v20, %v1879_v17  ;;  %v1944_v22 = vpop.f32.mrb[17].mxu1  ;;  %v1882_v23 = vpop.f32.mrb[18].mxu0 }
 0x119   :  { %v1945_v24 = vadd.f32 %v1944_v22, %v1943_v19  ;;  %v1946_v25 = vpop.f32.mrb[18].mxu1  ;;  %v1883_v26 = vpop.f32.mrb[19].mxu0 }
 0x11a   :  { %v1113_v27 = vadd.f32 %v1881_v21, %v2790_v18  ;;  %v1884_v28 = vadd.f32 %v1883_v26, %v1882_v23  ;;  %v1947_v29 = vpop.f32.mrb[19].mxu1 }
 0x11b   :  { %v1948_v31 = vadd.f32 %v1947_v29, %v1946_v25 }
 0x11c   :  { %v2817_v33 = vadd.f32 %v1945_v24, %v1113_v27  ;;  %v1116_v34 = vadd.f32 %v1884_v28, %v2790_v18 }
 0x11e   :  { %v2820_v35 = vadd.f32 %v1948_v31, %v1116_v34  ;;  %v1885_v36 = vpop.f32.mrb[20].mxu0 }
 0x11f   :  { %v1949_v37 = vpop.f32.mrb[20].mxu1  ;;  %v1886_v38 = vpop.f32.mrb[21].mxu0 }
 0x120   :  { %v1887_v39 = vadd.f32 %v1886_v38, %v1885_v36  ;;  %v1950_v40 = vpop.f32.mrb[21].mxu1  ;;  %v1888_v41 = vpop.f32.mrb[22].mxu0 }
 0x121   :  { %v1951_v42 = vadd.f32 %v1950_v40, %v1949_v37  ;;  %v1952_v43 = vpop.f32.mrb[22].mxu1  ;;  %v1889_v44 = vpop.f32.mrb[23].mxu0 }
 0x122   :  { %v1121_v45 = vadd.f32 %v1887_v39, %v2790_v18  ;;  %v1890_v47 = vadd.f32 %v1889_v44, %v1888_v41  ;;  %v1953_v49 = vpop.f32.mrb[23].mxu1 }
 0x123   :  { %v1954_v50 = vadd.f32 %v1953_v49, %v1952_v43 }
 0x124   :  { %v2823_v51 = vadd.f32 %v1951_v42, %v1121_v45  ;;  %v1124_v52 = vadd.f32 %v1890_v47, %v2790_v18 }
 0x126   :  { %v2826_v53 = vadd.f32 %v1954_v50, %v1124_v52  ;;  %v1891_v54 = vpop.f32.mrb[24].mxu0 }
 0x127   :  { %v1955_v55 = vpop.f32.mrb[24].mxu1  ;;  %v1892_v56 = vpop.f32.mrb[25].mxu0 }
 0x128   :  { %v1893_v57 = vadd.f32 %v1892_v56, %v1891_v54  ;;  %v1956_v58 = vpop.f32.mrb[25].mxu1  ;;  %v1894_v59 = vpop.f32.mrb[26].mxu0 }
 0x129   :  { %v1957_v60 = vadd.f32 %v1956_v58, %v1955_v55  ;;  %v1958_v61 = vpop.f32.mrb[26].mxu1  ;;  %v1895_v63 = vpop.f32.mrb[27].mxu0 }
 0x12a   :  { %v1129_v1 = vadd.f32 %v1893_v57, %v2790_v18  ;;  %v1896_v2 = vadd.f32 %v1895_v63, %v1894_v59  ;;  %v1959_v3 = vpop.f32.mrb[27].mxu1 }
 0x12b   :  { %v1960_v4 = vadd.f32 %v1959_v3, %v1958_v61 }
 0x12c   :  { %v2829_v5 = vadd.f32 %v1957_v60, %v1129_v1  ;;  %v1132_v6 = vadd.f32 %v1896_v2, %v2790_v18 }
 0x12e   :  { %v2832_v7 = vadd.f32 %v1960_v4, %v1132_v6  ;;  %v1897_v8 = vpop.f32.mrb[28].mxu0 }
 0x12f   :  { %v1961_v9 = vpop.f32.mrb[28].mxu1  ;;  %v1898_v10 = vpop.f32.mrb[29].mxu0 }
 0x130   :  { %v1899_v11 = vadd.f32 %v1898_v10, %v1897_v8  ;;  %v1962_v12 = vpop.f32.mrb[29].mxu1  ;;  %v1900_v13 = vpop.f32.mrb[30].mxu0 }
 0x131   :  { %v1963_v15 = vadd.f32 %v1962_v12, %v1961_v9  ;;  %v1964_v17 = vpop.f32.mrb[30].mxu1  ;;  %v1901_v19 = vpop.f32.mrb[31].mxu0 }
 0x132   :  { %v1137_v20 = vadd.f32 %v1899_v11, %v2790_v18  ;;  %v1902_v21 = vadd.f32 %v1901_v19, %v1900_v13  ;;  %v1965_v22 = vpop.f32.mrb[31].mxu1 }
 0x133   :  { %v1966_v23 = vadd.f32 %v1965_v22, %v1964_v17 }
 0x134   :  { %v2835_v24 = vadd.f32 %v1963_v15, %v1137_v20  ;;  %v1140_v25 = vadd.f32 %v1902_v21, %v2790_v18 }
 0x136   :  { %v2838_v26 = vadd.f32 %v1966_v23, %v1140_v25  ;;  %v1983_v27 = vpop.f32.mrb[32].mxu0 }
 0x137   :  { %v2047_v28 = vpop.f32.mrb[32].mxu1  ;;  %v1984_v29 = vpop.f32.mrb[33].mxu0 }
 0x138   :  { %v1985_v31 = vadd.f32 %v1984_v29, %v1983_v27  ;;  %v2048_v34 = vpop.f32.mrb[33].mxu1  ;;  %v1986_v36 = vpop.f32.mrb[34].mxu0 }
 0x139   :  { %v2049_v37 = vadd.f32 %v2048_v34, %v2047_v28  ;;  %v2050_v38 = vpop.f32.mrb[34].mxu1  ;;  %v1987_v39 = vpop.f32.mrb[35].mxu0 }
 0x13a   :  { %v1275_v40 = vadd.f32 %v1985_v31, %v2793_v30  ;;  %v1988_v41 = vadd.f32 %v1987_v39, %v1986_v36  ;;  %v2051_v42 = vpop.f32.mrb[35].mxu1 }
 0x13b   :  { %v2052_v43 = vadd.f32 %v2051_v42, %v2050_v38 }
 0x13c   :  { %v1278_v44 = vadd.f32 %v1988_v41, %v2796_v32  ;;  %v2842_v45 = vadd.f32 %v2049_v37, %v1275_v40 }
 0x13e   :  { %v1989_v18 = vpop.f32.mrb[36].mxu0  ;;  %v2844_v47 = vadd.f32 %v2052_v43, %v1278_v44 }
 0x13f   :  { %v2053_v49 = vpop.f32.mrb[36].mxu1  ;;  %v1990_v50 = vpop.f32.mrb[37].mxu0 }
 0x140   :  { %v1991_v52 = vadd.f32 %v1990_v50, %v1989_v18  ;;  %v2054_v54 = vpop.f32.mrb[37].mxu1  ;;  %v1992_v55 = vpop.f32.mrb[38].mxu0 }
 0x141   :  { %v2055_v56 = vadd.f32 %v2054_v54, %v2053_v49  ;;  %v2056_v57 = vpop.f32.mrb[38].mxu1  ;;  %v1993_v58 = vpop.f32.mrb[39].mxu0 }
 0x142   :  { %v1283_v30 = vadd.f32 %v1991_v52, %v2799_v46  ;;  %v1994_v59 = vadd.f32 %v1993_v58, %v1992_v55  ;;  %v2057_v60 = vpop.f32.mrb[39].mxu1 }
 0x143   :  { %v2058_v61 = vadd.f32 %v2057_v60, %v2056_v57 }
 0x144   :  { %v1286_v32 = vadd.f32 %v1994_v59, %v2802_v48  ;;  %v2848_v63 = vadd.f32 %v2055_v56, %v1283_v30 }
 0x146   :  { %v1995_v1 = vpop.f32.mrb[40].mxu0  ;;  %v2850_v2 = vadd.f32 %v2058_v61, %v1286_v32 }
 0x147   :  { %v2059_v3 = vpop.f32.mrb[40].mxu1  ;;  %v1996_v4 = vpop.f32.mrb[41].mxu0 }
 0x148   :  { %v1997_v6 = vadd.f32 %v1996_v4, %v1995_v1  ;;  %v2060_v8 = vpop.f32.mrb[41].mxu1  ;;  %v1998_v9 = vpop.f32.mrb[42].mxu0 }
 0x149   :  { %v2061_v10 = vadd.f32 %v2060_v8, %v2059_v3  ;;  %v2062_v11 = vpop.f32.mrb[42].mxu1  ;;  %v1999_v12 = vpop.f32.mrb[43].mxu0 }
 0x14a   :  { %v1291_v46 = vadd.f32 %v1997_v6, %v2805_v62  ;;  %v2000_v13 = vadd.f32 %v1999_v12, %v1998_v9  ;;  %v2063_v15 = vpop.f32.mrb[43].mxu1 }
 0x14b   :  { %v2064_v17 = vadd.f32 %v2063_v15, %v2062_v11 }
 0x14c   :  { %v1294_v48 = vadd.f32 %v2000_v13, %v2808_v0  ;;  %v2854_v19 = vadd.f32 %v2061_v10, %v1291_v46 }
 0x14e   :  { %v2001_v20 = vpop.f32.mrb[44].mxu0  ;;  %v2856_v21 = vadd.f32 %v2064_v17, %v1294_v48 }
 0x14f   :  { %v2065_v22 = vpop.f32.mrb[44].mxu1  ;;  %v2002_v23 = vpop.f32.mrb[45].mxu0 }
 0x150   :  { %v2003_v25 = vadd.f32 %v2002_v23, %v2001_v20  ;;  %v2066_v27 = vpop.f32.mrb[45].mxu1  ;;  %v2004_v28 = vpop.f32.mrb[46].mxu0 }
 0x151   :  { %v2067_v29 = vadd.f32 %v2066_v27, %v2065_v22  ;;  %v2068_v31 = vpop.f32.mrb[46].mxu1  ;;  %v2005_v34 = vpop.f32.mrb[47].mxu0 }
 0x152   :  { %v1299_v62 = vadd.f32 %v2003_v25, %v2811_v14  ;;  %v2006_v36 = vadd.f32 %v2005_v34, %v2004_v28  ;;  %v2069_v37 = vpop.f32.mrb[47].mxu1 }
 0x153   :  { %v2070_v38 = vadd.f32 %v2069_v37, %v2068_v31 }
 0x154   :  { %v1302_v0 = vadd.f32 %v2006_v36, %v2814_v16  ;;  %v2860_v39 = vadd.f32 %v2067_v29, %v1299_v62 }
 0x156   :  { %v2007_v40 = vpop.f32.mrb[48].mxu0  ;;  %v2862_v41 = vadd.f32 %v2070_v38, %v1302_v0 }
 0x157   :  { %v2071_v42 = vpop.f32.mrb[48].mxu1  ;;  %v2008_v43 = vpop.f32.mrb[49].mxu0 }
 0x158   :  { %v2009_v44 = vadd.f32 %v2008_v43, %v2007_v40  ;;  %v2072_v18 = vpop.f32.mrb[49].mxu1  ;;  %v2010_v49 = vpop.f32.mrb[50].mxu0 }
 0x159   :  { %v2073_v50 = vadd.f32 %v2072_v18, %v2071_v42  ;;  %v2074_v52 = vpop.f32.mrb[50].mxu1  ;;  %v2011_v54 = vpop.f32.mrb[51].mxu0 }
 0x15a   :  { %v1307_v14 = vadd.f32 %v2009_v44, %v2817_v33  ;;  %v2012_v55 = vadd.f32 %v2011_v54, %v2010_v49  ;;  %v2075_v56 = vpop.f32.mrb[51].mxu1 }
 0x15b   :  { %v2076_v57 = vadd.f32 %v2075_v56, %v2074_v52 }
 0x15c   :  { %v1310_v16 = vadd.f32 %v2012_v55, %v2820_v35  ;;  %v1404_v58 = vadd.f32 %v2073_v50, %v1307_v14 }
 0x15e   :  { %v2013_v30 = vpop.f32.mrb[52].mxu0  ;;  %v2866_v59 = vadd.f32 %v2076_v57, %v1310_v16 }
 0x15f   :  { %v2077_v60 = vpop.f32.mrb[52].mxu1  ;;  %v2014_v61 = vpop.f32.mrb[53].mxu0 }
 0x160   :  { %v2015_v32 = vadd.f32 %v2014_v61, %v2013_v30  ;;  %v2078_v1 = vpop.f32.mrb[53].mxu1  ;;  %v2016_v3 = vpop.f32.mrb[54].mxu0 }
 0x161   :  { %v2079_v4 = vadd.f32 %v2078_v1, %v2077_v60  ;;  %v2080_v6 = vpop.f32.mrb[54].mxu1  ;;  %v2017_v8 = vpop.f32.mrb[55].mxu0 }
 0x162   :  { %v1315_v9 = vadd.f32 %v2015_v32, %v2823_v51  ;;  %v2018_v33 = vadd.f32 %v2017_v8, %v2016_v3  ;;  %v2081_v10 = vpop.f32.mrb[55].mxu1 }
 0x163   :  { %v2082_v11 = vadd.f32 %v2081_v10, %v2080_v6 }
 0x164   :  { %v1318_v12 = vadd.f32 %v2018_v33, %v2826_v53  ;;  %v1412_v35 = vadd.f32 %v2079_v4, %v1315_v9 }
 0x166   :  { %v2019_v46 = vpop.f32.mrb[56].mxu0  ;;  %v1415_v13 = vadd.f32 %v2082_v11, %v1318_v12 }
 0x167   :  { %v2083_v15 = vpop.f32.mrb[56].mxu1  ;;  %v2020_v17 = vpop.f32.mrb[57].mxu0 }
 0x168   :  { %v2021_v48 = vadd.f32 %v2020_v17, %v2019_v46  ;;  %v2084_v20 = vpop.f32.mrb[57].mxu1  ;;  %v2022_v22 = vpop.f32.mrb[58].mxu0 }
 0x169   :  { %v2085_v23 = vadd.f32 %v2084_v20, %v2083_v15  ;;  %v2086_v25 = vpop.f32.mrb[58].mxu1  ;;  %v2023_v27 = vpop.f32.mrb[59].mxu0 }
 0x16a   :  { %v1323_v28 = vadd.f32 %v2021_v48, %v2829_v5  ;;  %v2024_v29 = vadd.f32 %v2023_v27, %v2022_v22  ;;  %v2087_v51 = vpop.f32.mrb[59].mxu1 }
 0x16b   :  { %v2088_v31 = vadd.f32 %v2087_v51, %v2086_v25 }
 0x16c   :  { %v1326_v34 = vadd.f32 %v2024_v29, %v2832_v7  ;;  %v1420_v62 = vadd.f32 %v2085_v23, %v1323_v28 }
 0x16e   :  { %v2025_v53 = vpop.f32.mrb[60].mxu0  ;;  %v1423_v36 = vadd.f32 %v2088_v31, %v1326_v34 }
 0x16f   :  { %v2089_v37 = vpop.f32.mrb[60].mxu1  ;;  %v2026_v38 = vpop.f32.mrb[61].mxu0 }
 0x170   :  { %v2027_v0 = vadd.f32 %v2026_v38, %v2025_v53  ;;  %v2090_v40 = vpop.f32.mrb[61].mxu1  ;;  %v2028_v42 = vpop.f32.mrb[62].mxu0 }
 0x171   :  { %v2091_v43 = vadd.f32 %v2090_v40, %v2089_v37  ;;  %v2092_v44 = vpop.f32.mrb[62].mxu1  ;;  %v2029_v18 = vpop.f32.mrb[63].mxu0 }
 0x172   :  { %v1331_v49 = vadd.f32 %v2027_v0, %v2835_v24  ;;  %v2030_v50 = vadd.f32 %v2029_v18, %v2028_v42  ;;  %v2093_v5 = vpop.f32.mrb[63].mxu1 }
 0x173   :  { %v2094_v52 = vadd.f32 %v2093_v5, %v2092_v44 }
 0x174   :  { %v1334_v54 = vadd.f32 %v2030_v50, %v2838_v26  ;;  %v1428_v14 = vadd.f32 %v2091_v43, %v1331_v49 }
 0x176   :  { %v2129_v7 = vpop.f32.mrb[64].mxu0  ;;  %v1431_v55 = vadd.f32 %v2094_v52, %v1334_v54 }
 0x177   :  { %v1477_v56 = vadd.f32 %v2129_v7, %v2848_v63  ;;  %v2137_v57 = vpop.f32.mrb[64].mxu1  ;;  %v1468_v16 = vpop.f32.mrb[65].mxu0 }
 0x178   :  { %v1509_v30 = vadd.f32 %v2137_v57, %v1412_v35  ;;  %v1469_v60 = vadd.f32 %v1468_v16, %v2842_v45  ;;  %v1500_v61 = vpop.f32.mrb[65].mxu1  ;;  %v2130_v32 = vpop.f32.mrb[66].mxu0 }
 0x179   :  { %v1501_v1 = vadd.f32 %v1500_v61, %v1404_v58  ;;  %v1480_v24 = vadd.f32 %v2130_v32, %v2850_v2  ;;  %v2138_v3 = vpop.f32.mrb[66].mxu1  ;;  %v1471_v4 = vpop.f32.mrb[67].mxu0 }
 0x17a   :  { %v1512_v6 = vadd.f32 %v2138_v3, %v1415_v13  ;;  %v1472_v26 = vadd.f32 %v1471_v4, %v2844_v47  ;;  %v1503_v8 = vpop.f32.mrb[67].mxu1 }
 0x17b   :  { %v1800_v9 = vpack.c.bf16 %v1480_v24, %v1477_v56  ;;  %v1504_v33 = vadd.f32 %v1503_v8, %v2866_v59 }
 0x17c   :  { %v1820_v63 = vpack.c.bf16 %v1512_v6, %v1509_v30  ;;  %v1795_v10 = vpack.c.bf16 %v1472_v26, %v1469_v60 }
 0x17d   :  { %1832 = vst [vmem:[%s2910_s3 + $0x8] sm:$0xff] %v1800_v9   ;;  %v1815_v45 = vpack.c.bf16 %v1504_v33, %v1501_v1 }
 0x17e   :  { %1836 = vst [vmem:[%s2910_s3 + $0x28] sm:$0xff] %v1820_v63   ;;  %1796 = vst [vmem:[%s2910_s3] sm:$0xff] %v1795_v10   ;;  %v2133_v47 = vpop.f32.mrb[68].mxu0 }
 0x17f   :  { %1835 = vst [vmem:[%s2910_s3 + $0x20] sm:$0xff] %v1815_v45   ;;  %v1493_v2 = vadd.f32 %v2133_v47, %v2860_v39  ;;  %v2141_v58 = vpop.f32.mrb[68].mxu1  ;;  %v1484_v59 = vpop.f32.mrb[69].mxu0 }
 0x180   :  { %v1525_v11 = vadd.f32 %v2141_v58, %v1428_v14  ;;  %v1485_v12 = vadd.f32 %v1484_v59, %v2854_v19  ;;  %v1516_v35 = vpop.f32.mrb[69].mxu1  ;;  %v2134_v46 = vpop.f32.mrb[70].mxu0 }
 0x181   :  { %v1517_v13 = vadd.f32 %v1516_v35, %v1420_v62  ;;  %v1496_v15 = vadd.f32 %v2134_v46, %v2862_v41  ;;  %v2142_v17 = vpop.f32.mrb[70].mxu1  ;;  %v1487_v48 = vpop.f32.mrb[71].mxu0 }
 0x182   :  { %v1528_v20 = vadd.f32 %v2142_v17, %v1431_v55  ;;  %v1488_v22 = vadd.f32 %v1487_v48, %v2856_v21  ;;  %v1519_v23 = vpop.f32.mrb[71].mxu1 }
 0x183   :  { %v1810_v25 = vpack.c.bf16 %v1496_v15, %v1493_v2  ;;  %v1520_v27 = vadd.f32 %v1519_v23, %v1423_v36 }
 0x184   :  { %v1830_v28 = vpack.c.bf16 %v1528_v20, %v1525_v11  ;;  %v1805_v39 = vpack.c.bf16 %v1488_v22, %v1485_v12 }
 0x185   :  { %1834 = vst [vmem:[%s2910_s3 + $0x18] sm:$0xff] %v1810_v25   ;;  %v1825_v19 = vpack.c.bf16 %v1520_v27, %v1517_v13 }
 0x186   :  { %1838 = vst [vmem:[%s2910_s3 + $0x38] sm:$0xff] %v1830_v28   ;;  %1833 = vst [vmem:[%s2910_s3 + $0x10] sm:$0xff] %v1805_v39  }
 0x187   :  { %1837 = vst [vmem:[%s2910_s3 + $0x30] sm:$0xff] %v1825_v19  }

// kernel: cgrnet_forward.28
= control target key start
LH: loop header
LB: loop body
LE: loop exit
PB: predicated region body
PF: predicated region fallthrough
CT: control target
= control target key end

     0   :  { %vm311_vm0 = vcmask 519168   ;;  %s596_s1 = inlined_call_operand.vmem [shape: bf16[128,64], index: 1, kind: input, shape index: {}]   ;;  %s597_s0 = inlined_call_operand.vmem [shape: bf16[128,128], index: 0, kind: input, shape index: {}]   ;;  %s598_s2 = inlined_call_operand.vmem [shape: f32[1,64], index: 2, kind: input, shape index: {}]   ;;  %s599_s3 = inlined_call_operand.vmem [shape: bf16[128,64], index: 3, kind: output, shape index: {}]  }
   0x1   :  { %v445_v0 = vld [vmem:[%s596_s1] sm:$0xff]   ;;  %v446_v1 = vld [vmem:[%s596_s1 + $0x8] sm:$0xff]   ;;  %v447_v2 = vld [vmem:[%s596_s1 + $0x10] sm:$0xff]  }
   0x2   :  { %397 = vmatprep.subr.bf16.mxu0 %v445_v0  ;;  %429 = vmatprep.subr.bf16.mxu1 %v445_v0  ;;  %v448_v3 = vld [vmem:[%s596_s1 + $0x18] sm:$0xff]   ;;  %v453_v4 = vld [vmem:[%s597_s0] sm:$0xff]   ;;  %v450_v7 = vld [vmem:[%s596_s1 + $0x28] sm:$0xff]  }
   0x3   :  { %398 = vmatpush3.bf16.msra.mxu0 %v445_v0  ;;  %437 = vmatpush3.bf16.msra.mxu1 %v445_v0  ;;  %v454_v5 = vld [vmem:[%s597_s0 + $0x20] sm:$0xff]   ;;  %v451_v8 = vld [vmem:[%s596_s1 + $0x30] sm:$0xff]   ;;  %v452_v9 = vld [vmem:[%s596_s1 + $0x38] sm:$0xff]  }
   0x4   :  { %399 = vmatprep.subr.bf16.mxu0 %v446_v1  ;;  %430 = vmatprep.subr.bf16.mxu1 %v446_v1  ;;  %v449_v6 = vld [vmem:[%s596_s1 + $0x20] sm:$0xff]   ;;  %v455_v10 = vld [vmem:[%s597_s0 + $0x8] sm:$0xff]   ;;  %v457_v12 = vld [vmem:[%s597_s0 + $0x10] sm:$0xff]  }
   0x5   :  { %413 = vmatprep.mubr.bf16.mxu0 %v453_v4  ;;  %421 = vmatprep.mubr.bf16.mxu1 %v454_v5  ;;  %v456_v11 = vld [vmem:[%s597_s0 + $0x28] sm:$0xff]   ;;  %v458_v13 = vld [vmem:[%s597_s0 + $0x30] sm:$0xff]   ;;  %v459_v14 = vld [vmem:[%s597_s0 + $0x18] sm:$0xff]  }
   0x6   :  { %v460_v15 = vld [vmem:[%s597_s0 + $0x38] sm:$0xff]   ;;  %v332_v16 = vld [vmem:[%s598_s2] ss:$0 sm:$0xff] }
   0x7   :  { %400 = vmatpush3.bf16.msra.mxu0 %v446_v1  ;;  %438 = vmatpush3.bf16.msra.mxu1 %v446_v1 }
   0x8   :  { %401 = vmatprep.subr.bf16.mxu0 %v447_v2  ;;  %431 = vmatprep.subr.bf16.mxu1 %v447_v2 }
   0xb   :  { %402 = vmatpush3.bf16.msra.mxu0 %v447_v2  ;;  %439 = vmatpush3.bf16.msra.mxu1 %v447_v2 }
   0xc   :  { %403 = vmatprep.subr.bf16.mxu0 %v448_v3  ;;  %432 = vmatprep.subr.bf16.mxu1 %v448_v3 }
   0xf   :  { %404 = vmatpush3.bf16.msra.mxu0 %v448_v3  ;;  %440 = vmatpush3.bf16.msra.mxu1 %v448_v3 }
  0x10   :  { %405 = vmatprep.subr.bf16.mxu0 %v449_v6  ;;  %433 = vmatprep.subr.bf16.mxu1 %v449_v6 }
  0x13   :  { %406 = vmatpush3.bf16.msra.mxu0 %v449_v6  ;;  %441 = vmatpush3.bf16.msra.mxu1 %v449_v6 }
  0x14   :  { %407 = vmatprep.subr.bf16.mxu0 %v450_v7  ;;  %434 = vmatprep.subr.bf16.mxu1 %v450_v7 }
  0x17   :  { %408 = vmatpush3.bf16.msra.mxu0 %v450_v7  ;;  %442 = vmatpush3.bf16.msra.mxu1 %v450_v7 }
  0x18   :  { %409 = vmatprep.subr.bf16.mxu0 %v451_v8  ;;  %435 = vmatprep.subr.bf16.mxu1 %v451_v8 }
  0x1b   :  { %410 = vmatpush3.bf16.msra.mxu0 %v451_v8  ;;  %443 = vmatpush3.bf16.msra.mxu1 %v451_v8 }
  0x1c   :  { %411 = vmatprep.subr.bf16.mxu0 %v452_v9  ;;  %436 = vmatprep.subr.bf16.mxu1 %v452_v9 }
  0x1f   :  { %412 = vmatpush3.bf16.msra.mxu0 %v452_v9  ;;  %444 = vmatpush3.bf16.msra.mxu1 %v452_v9 }
  0x22   :  { %414 = vmatmul.mubr.bf16.vlgmr.msra.gmra.mrb[0].mxu0 %v455_v10  ;;  %422 = vmatmul.mubr.bf16.vlgmr.msra.gmra.mrb[0].mxu1 %v456_v11 }
  0x23   :  { %417 = vmatprep.mubr.bf16.mxu0 %v457_v12  ;;  %425 = vmatprep.mubr.bf16.mxu1 %v458_v13 }
  0x2a   :  { %418 = vmatmul.mubr.bf16.gmra.mrb[4].mxu0 %v459_v14  ;;  %426 = vmatmul.mubr.bf16.gmra.mrb[4].mxu1 %v460_v15 }
  0xf5   :  { %v415_v17 = vpop.f32.mrb[0].mxu0  ;;  %v423_v18 = vpop.f32.mrb[0].mxu1 }
  0xf6   :  { %v193_v19 = vadd.f32 %v415_v17, %v332_v16  ;;  %v225_v20 = vadd.f32 %v423_v18, %v332_v16  ;;  %v184_v21 = vpop.f32.mrb[1].mxu0  ;;  %v216_v22 = vpop.f32.mrb[1].mxu1 }
  0xf7   :  { %v185_v23 = vadd.f32 %v332_v16, %v184_v21  ;;  %v217_v24 = vadd.f32 %v332_v16, %v216_v22  ;;  %v416_v25 = vpop.f32.mrb[2].mxu0  ;;  %v424_v26 = vpop.f32.mrb[2].mxu1 }
  0xf8   :  { %v367_v27 = vpack.c.bf16 %v193_v19, %v193_v19  ;;  %v375_v28 = vpack.c.bf16 %v225_v20, %v225_v20  ;;  %v196_v29 = vadd.f32 %v416_v25, %v332_v16  ;;  %v228_v30 = vadd.f32 %v424_v26, %v332_v16  ;;  %v187_v31 = vpop.f32.mrb[3].mxu0  ;;  %v219_v32 = vpop.f32.mrb[3].mxu1 }
  0xf9   :  { %v365_v33 = vpack.c.bf16 %v185_v23, %v185_v23  ;;  %v373_v34 = vpack.c.bf16 %v217_v24, %v217_v24  ;;  %v188_v35 = vadd.f32 %v332_v16, %v187_v31  ;;  %v220_v36 = vadd.f32 %v332_v16, %v219_v32 }
  0xfa   :  { %314 = vst.msk [vmem:[%s599_s3 + $0x8] sm:$0xf] %vm311_vm0, %v367_v27  ;;  %322 = vst.msk [vmem:[%s599_s3 + $0x28] sm:$0xf] %vm311_vm0, %v375_v28  ;;  %v368_v37 = vpack.c.bf16 %v196_v29, %v196_v29  ;;  %v376_v38 = vpack.c.bf16 %v228_v30, %v228_v30 }
  0xfb   :  { %312 = vst.msk [vmem:[%s599_s3] sm:$0xf] %vm311_vm0, %v365_v33  ;;  %320 = vst.msk [vmem:[%s599_s3 + $0x20] sm:$0xf] %vm311_vm0, %v373_v34  ;;  %v366_v39 = vpack.c.bf16 %v188_v35, %v188_v35  ;;  %v374_v40 = vpack.c.bf16 %v220_v36, %v220_v36 }
  0xfc   :  { %315 = vst.msk [vmem:[%s599_s3 + $0xc] sm:$0xf] %vm311_vm0, %v368_v37  ;;  %323 = vst.msk [vmem:[%s599_s3 + $0x2c] sm:$0xf] %vm311_vm0, %v376_v38 }
  0xfd   :  { %313 = vst.msk [vmem:[%s599_s3 + $0x4] sm:$0xf] %vm311_vm0, %v366_v39  ;;  %321 = vst.msk [vmem:[%s599_s3 + $0x24] sm:$0xf] %vm311_vm0, %v374_v40  ;;  %v419_v41 = vpop.f32.mrb[4].mxu0  ;;  %v427_v42 = vpop.f32.mrb[4].mxu1 }
  0xfe   :  { %v209_v43 = vadd.f32 %v419_v41, %v332_v16  ;;  %v241_v44 = vadd.f32 %v427_v42, %v332_v16  ;;  %v200_v45 = vpop.f32.mrb[5].mxu0  ;;  %v232_v46 = vpop.f32.mrb[5].mxu1 }
  0xff   :  { %v201_v47 = vadd.f32 %v332_v16, %v200_v45  ;;  %v233_v48 = vadd.f32 %v332_v16, %v232_v46  ;;  %v420_v49 = vpop.f32.mrb[6].mxu0  ;;  %v428_v50 = vpop.f32.mrb[6].mxu1 }
 0x100   :  { %v371_v51 = vpack.c.bf16 %v209_v43, %v209_v43  ;;  %v379_v52 = vpack.c.bf16 %v241_v44, %v241_v44  ;;  %v212_v53 = vadd.f32 %v420_v49, %v332_v16  ;;  %v244_v54 = vadd.f32 %v428_v50, %v332_v16  ;;  %v203_v55 = vpop.f32.mrb[7].mxu0  ;;  %v235_v56 = vpop.f32.mrb[7].mxu1 }
 0x101   :  { %v369_v57 = vpack.c.bf16 %v201_v47, %v201_v47  ;;  %v377_v58 = vpack.c.bf16 %v233_v48, %v233_v48  ;;  %v204_v59 = vadd.f32 %v332_v16, %v203_v55  ;;  %v236_v60 = vadd.f32 %v332_v16, %v235_v56 }
 0x102   :  { %318 = vst.msk [vmem:[%s599_s3 + $0x18] sm:$0xf] %vm311_vm0, %v371_v51  ;;  %326 = vst.msk [vmem:[%s599_s3 + $0x38] sm:$0xf] %vm311_vm0, %v379_v52  ;;  %v372_v61 = vpack.c.bf16 %v212_v53, %v212_v53  ;;  %v380_v62 = vpack.c.bf16 %v244_v54, %v244_v54 }
 0x103   :  { %316 = vst.msk [vmem:[%s599_s3 + $0x10] sm:$0xf] %vm311_vm0, %v369_v57  ;;  %324 = vst.msk [vmem:[%s599_s3 + $0x30] sm:$0xf] %vm311_vm0, %v377_v58  ;;  %v370_v63 = vpack.c.bf16 %v204_v59, %v204_v59  ;;  %v378_v0 = vpack.c.bf16 %v236_v60, %v236_v60 }
 0x104   :  { %319 = vst.msk [vmem:[%s599_s3 + $0x1c] sm:$0xf] %vm311_vm0, %v372_v61  ;;  %327 = vst.msk [vmem:[%s599_s3 + $0x3c] sm:$0xf] %vm311_vm0, %v380_v62 }
 0x105   :  { %317 = vst.msk [vmem:[%s599_s3 + $0x14] sm:$0xf] %vm311_vm0, %v370_v63  ;;  %325 = vst.msk [vmem:[%s599_s3 + $0x34] sm:$0xf] %vm311_vm0, %v378_v0 }

// kernel: div.255
= control target key start
LH: loop header
LB: loop body
LE: loop exit
PB: predicated region body
PF: predicated region fallthrough
CT: control target
= control target key end

     0   :  { %s66_s8 = smov 80   ;;  %vm7_vm0 = vcmask 130048   ;;  %s67_s11 = smov 96   ;;  %s117_s0 = inlined_call_operand.vmem [shape: f32[512], index: 0, kind: input, shape index: {}]   ;;  %s118_s1 = inlined_call_operand.vmem [shape: f32[2,16,16], index: 1, kind: output, shape index: {}]  }
   0x1   :  { %v4_v0 = vld [vmem:[%s117_s0] sm:$0xf]  ;;  %s65_s0 = smov 112   ;;  %s68_s12 = smov 64  }
   0x2   :  { %5 = vst [vmem:[#allocation0] sm:$0xf] %v4_v0  ;;  %s69_s13 = smov 48   ;;  %s70_s14 = smov 32  }
   0x3   :  { %s71_s15 = smov 16  }
   0x9   :  { %v9_v1 = vld [vmem:[#allocation0] sm:$0xf]  }
   0xa   :  { %v21_v2 = vld [vmem:[#allocation0] sm:$0xf]   ;;  %10 = vrot.lane.b32.xlu0 %v9_v1, %s65_s0 }
   0xb   :  { %22 = vrot.lane.b32.xlu1 %v21_v2, %s66_s8  ;;  %v15_v3 = vld [vmem:[#allocation0] sm:$0xf]  }
   0xc   :  { %v27_v4 = vld [vmem:[#allocation0] sm:$0xf]  }
   0xd   :  { %v6_v5 = vld [vmem:[#allocation0] sm:$0xf]  }
   0xe   :  { %8 = vst.msk [vmem:[%s118_s1] ss:$8 sm:$0xf] %vm7_vm0, %v6_v5   ;;  %16 = vrot.lane.b32.xlu0 %v15_v3, %s67_s11  ;;  %v33_v6 = vld [vmem:[#allocation0] sm:$0xf]  }
   0xf   :  { %28 = vrot.lane.b32.xlu1 %v27_v4, %s68_s12  ;;  %v39_v7 = vld [vmem:[#allocation0] sm:$0xf]  }
  0x10   :  { %v45_v8 = vld [vmem:[#allocation0] sm:$0xf]  }
  0x12   :  { %34 = vrot.lane.b32.xlu0 %v33_v6, %s69_s13 }
  0x13   :  { %40 = vrot.lane.b32.xlu1 %v39_v7, %s70_s14 }
  0x16   :  { %46 = vrot.lane.b32.xlu0 %v45_v8, %s71_s15 }
  0x7c   :  { %v11_v9 = vpop.permute.xlu0 %10  }
  0x7d   :  { %v23_v10 = vpop.permute.xlu1 %22   ;;  %51 = vst.msk [vmem:[%s118_s1 + $0x1] ss:$8 sm:$0xf] %vm7_vm0, %v11_v9  }
  0x7e   :  { %53 = vst.msk [vmem:[%s118_s1 + $0x3] ss:$8 sm:$0xf] %vm7_vm0, %v23_v10  }
  0x80   :  { %v17_v11 = vpop.permute.xlu0 %16  }
  0x81   :  { %v29_v12 = vpop.permute.xlu1 %28   ;;  %52 = vst.msk [vmem:[%s118_s1 + $0x2] ss:$8 sm:$0xf] %vm7_vm0, %v17_v11  }
  0x82   :  { %54 = vst.msk [vmem:[%s118_s1 + $0x4] ss:$8 sm:$0xf] %vm7_vm0, %v29_v12  }
  0x84   :  { %v35_v13 = vpop.permute.xlu0 %34  }
  0x85   :  { %v41_v14 = vpop.permute.xlu1 %40   ;;  %55 = vst.msk [vmem:[%s118_s1 + $0x5] ss:$8 sm:$0xf] %vm7_vm0, %v35_v13  }
  0x86   :  { %56 = vst.msk [vmem:[%s118_s1 + $0x6] ss:$8 sm:$0xf] %vm7_vm0, %v41_v14  }
  0x88   :  { %v47_v15 = vpop.permute.xlu0 %46  }
  0x89   :  { %57 = vst.msk [vmem:[%s118_s1 + $0x7] ss:$8 sm:$0xf] %vm7_vm0, %v47_v15  }

// kernel: cgrnet_forward.30
= control target key start
LH: loop header
LB: loop body
LE: loop exit
PB: predicated region body
PF: predicated region fallthrough
CT: control target
= control target key end

     0   :  { %s927_s12 = smov 0   ;;  %s929_s13 = smov 0   ;;  %s1081_s0 = inlined_call_operand.vmem [shape: bf16[512,64], index: 0, kind: input, shape index: {}]   ;;  %s1082_s1 = inlined_call_operand.vmem [shape: bf16[64,64], index: 1, kind: input, shape index: {}]   ;;  %s1083_s2 = inlined_call_operand.vmem [shape: f32[1,64], index: 2, kind: input, shape index: {}]   ;;  %s1084_s3 = inlined_call_operand.vmem [shape: bf16[512,64], index: 3, kind: output, shape index: {}]  }
   0x1   :  { %s931_s14 = smov 0  }
   0x2 LB: > { %s25_s15 = sadd.s32 1, %s901_s13  ;;  %p727_p0 = scmp.ge.s32.totalorder %s905_s14, 1  ;;  %s905_s14 = sphi %s931_s14, %s13_s14   ;;  %s901_s13 = sphi %s929_s13, %s1086_s13   ;;  %s897_s12 = sphi %s927_s12, %s1085_s12  }
   0x3   : > { %p27_p1 = scmp.ge.s32.totalorder %s25_s15, 2  ;;  %p169_p2 = scmp.lt.s32.totalorder %s905_s14, 3 }
   0x5   : > { %s1088_s15 = smov (%p27_p1, %s25_s15), 0  ;;  %p170_p3 = pnand %p727_p0, %p169_p2 }
   0x6   : > { %v863_v0 = vld [vmem:[%s1082_s1] sm:$0xff] (!%p170_p3)   ;;  %s728_s18 = sshll.u32 (!%p170_p3), %s897_s12, 5  ;;  %v864_v1 = vld [vmem:[%s1082_s1 + $0x8] sm:$0xff] (!%p170_p3)   ;;  %v865_v2 = vld [vmem:[%s1082_s1 + $0x10] sm:$0xff] (!%p170_p3)   ;;  %vm377_vm0 = vcmask (!%p170_p3), 523264   ;;  %s730_s29 = sshll.u32 (!%p170_p3), %s897_s12, 4 }
   0x7   : > { %173 = sbr.rel (%p170_p3) target bundleno = 267 (0x10b), region = 32  ;;  %p204_p4 = scmp.lt.s32.totalorder (!%p170_p3), %s728_s18, 63  ;;  %791 = vmatprep.subr.bf16.mxu0 (!%p170_p3), %v863_v0  ;;  %831 = vmatprep.subr.bf16.mxu1 (!%p170_p3), %v863_v0  ;;  %v866_v3 = vld [vmem:[%s1082_s1 + $0x18] sm:$0xff] (!%p170_p3)   ;;  %v1001_v21 = vld [vmem:[%s1083_s2] ss:$0 sm:$0xff] (!%p170_p3) }
   0x8   : > { %792 = vmatpush3.bf16.msra.mxu0 (!%p170_p3), %v863_v0  ;;  %835 = vmatpush3.bf16.msra.mxu1 (!%p170_p3), %v863_v0  ;;  %p217_p5 = scmp.lt.s32.totalorder (!%p170_p3), %s730_s29, 31 }
   0x9   : > { %793 = vmatprep.subr.bf16.mxu0 (!%p170_p3), %v864_v1  ;;  %832 = vmatprep.subr.bf16.mxu1 (!%p170_p3), %v864_v1 }
   0xc   : > { %794 = vmatpush3.bf16.msra.mxu0 (!%p170_p3), %v864_v1  ;;  %836 = vmatpush3.bf16.msra.mxu1 (!%p170_p3), %v864_v1 }
   0xd   : > { %795 = vmatprep.subr.bf16.mxu0 (!%p170_p3), %v865_v2  ;;  %833 = vmatprep.subr.bf16.mxu1 (!%p170_p3), %v865_v2 }
   0xe   : > { %s1090_s18 = smov (!%p204_p4, %s728_s18), 63  ;;  %s1092_s29 = smov (!%p217_p5, %s730_s29), 31 }
   0xf   : > { %s729_s23 = sshll.u32 %s1090_s18, 2  ;;  %s731_s5 = sshll.u32 %s1092_s29, 3 }
  0x10   : > { %s963_s28 = scalar_lea.vmem %s1081_s0, %s729_s23  ;;  %796 = vmatpush3.bf16.msra.mxu0 %v865_v2  ;;  %837 = vmatpush3.bf16.msra.mxu1 %v865_v2  ;;  %s1012_s8 = scalar_lea.vmem %s1084_s3, %s731_s5 }
  0x11   : > { %v867_v4 = vld [vmem:[%s963_s28] sm:$0xff]   ;;  %797 = vmatprep.subr.bf16.mxu0 %v866_v3  ;;  %834 = vmatprep.subr.bf16.mxu1 %v866_v3  ;;  %v869_v6 = vld [vmem:[%s963_s28 + $0x8] sm:$0xff]   ;;  %v871_v8 = vld [vmem:[%s963_s28 + $0x10] sm:$0xff]  }
  0x12   : > { %v868_v5 = vld [vmem:[%s963_s28 + $0x40] sm:$0xff]   ;;  %799 = vmatprep.mubr.msk.bf16.mxu0 %vm377_vm0, %v867_v4  ;;  %v870_v7 = vld [vmem:[%s963_s28 + $0x48] sm:$0xff]   ;;  %v872_v9 = vld [vmem:[%s963_s28 + $0x50] sm:$0xff]  }
  0x13   : > { %815 = vmatprep.mubr.msk.bf16.mxu1 %vm377_vm0, %v868_v5  ;;  %v873_v10 = vld [vmem:[%s963_s28 + $0x18] sm:$0xff]   ;;  %v875_v12 = vld [vmem:[%s963_s28 + $0x20] sm:$0xff]   ;;  %v877_v14 = vld [vmem:[%s963_s28 + $0x28] sm:$0xff]  }
  0x14   : > { %798 = vmatpush3.bf16.msra.mxu0 %v866_v3  ;;  %838 = vmatpush3.bf16.msra.mxu1 %v866_v3  ;;  %v874_v11 = vld [vmem:[%s963_s28 + $0x58] sm:$0xff]   ;;  %v876_v13 = vld [vmem:[%s963_s28 + $0x60] sm:$0xff]   ;;  %v878_v15 = vld [vmem:[%s963_s28 + $0x68] sm:$0xff]  }
  0x15   : > { %v879_v16 = vld [vmem:[%s963_s28 + $0x30] sm:$0xff]   ;;  %v881_v18 = vld [vmem:[%s963_s28 + $0x38] sm:$0xff]  }
  0x16   : > { %v880_v17 = vld [vmem:[%s963_s28 + $0x70] sm:$0xff]   ;;  %v882_v19 = vld [vmem:[%s963_s28 + $0x78] sm:$0xff]  }
  0x17   : > { %800 = vmatmul.mubr.msk.bf16.vlgmr.msra.gmra.mrb[0].mxu0 %vm377_vm0, %v869_v6  ;;  %816 = vmatmul.mubr.msk.bf16.vlgmr.msra.gmra.mrb[0].mxu1 %vm377_vm0, %v870_v7 }
  0x18   : > { %803 = vmatprep.mubr.msk.bf16.mxu0 %vm377_vm0, %v871_v8  ;;  %819 = vmatprep.mubr.msk.bf16.mxu1 %vm377_vm0, %v872_v9 }
  0x1f   : > { %804 = vmatmul.mubr.msk.bf16.gmra.mrb[4].mxu0 %vm377_vm0, %v873_v10  ;;  %820 = vmatmul.mubr.msk.bf16.gmra.mrb[4].mxu1 %vm377_vm0, %v874_v11 }
  0x20   : > { %807 = vmatprep.mubr.msk.bf16.mxu0 %vm377_vm0, %v875_v12  ;;  %823 = vmatprep.mubr.msk.bf16.mxu1 %vm377_vm0, %v876_v13 }
  0x27   : > { %808 = vmatmul.mubr.msk.bf16.gmra.mrb[8].mxu0 %vm377_vm0, %v877_v14  ;;  %824 = vmatmul.mubr.msk.bf16.gmra.mrb[8].mxu1 %vm377_vm0, %v878_v15 }
  0x28   : > { %811 = vmatprep.mubr.msk.bf16.mxu0 %vm377_vm0, %v879_v16  ;;  %827 = vmatprep.mubr.msk.bf16.mxu1 %vm377_vm0, %v880_v17 }
  0x2f   : > { %812 = vmatmul.mubr.msk.bf16.gmra.mrb[12].mxu0 %vm377_vm0, %v881_v18  ;;  %828 = vmatmul.mubr.msk.bf16.gmra.mrb[12].mxu1 %vm377_vm0, %v882_v19 }
  0xea   : > { %v801_v20 = vpop.f32.mrb[0].mxu0  ;;  %v817_v22 = vpop.f32.mrb[0].mxu1 }
  0xeb   : > { %v460_v23 = vpop.f32.mrb[1].mxu0  ;;  %v524_v24 = vpop.f32.mrb[1].mxu1  ;;  %v469_v27 = vadd.f32 %v801_v20, %v1001_v21  ;;  %v533_v28 = vadd.f32 %v817_v22, %v1001_v21 }
  0xec   : > { %v802_v25 = vpop.f32.mrb[2].mxu0  ;;  %v818_v26 = vpop.f32.mrb[2].mxu1  ;;  %v461_v33 = vadd.f32 %v1001_v21, %v460_v23  ;;  %v525_v34 = vadd.f32 %v1001_v21, %v524_v24 }
  0xed   : > { %v472_v29 = vadd.f32 %v802_v25, %v1001_v21  ;;  %v536_v30 = vadd.f32 %v818_v26, %v1001_v21  ;;  %v463_v31 = vpop.f32.mrb[3].mxu0  ;;  %v527_v32 = vpop.f32.mrb[3].mxu1 }
  0xee   : > { %v464_v35 = vadd.f32 %v1001_v21, %v463_v31  ;;  %v528_v36 = vadd.f32 %v1001_v21, %v527_v32 }
  0xef   : > { %v588_v37 = vpack.c.bf16 %v472_v29, %v469_v27  ;;  %v596_v38 = vpack.c.bf16 %v536_v30, %v533_v28 }
  0xf0   : > { %v587_v39 = vpack.c.bf16 %v464_v35, %v461_v33  ;;  %v595_v40 = vpack.c.bf16 %v528_v36, %v525_v34 }
  0xf1   : > { %604 = vst.msk [vmem:[%s1012_s8 + $0x8] sm:$0xff] %vm377_vm0, %v588_v37  ;;  %612 = vst.msk [vmem:[%s1012_s8 + $0x48] sm:$0xff] %vm377_vm0, %v596_v38 }
  0xf2   : > { %603 = vst.msk [vmem:[%s1012_s8] sm:$0xff] %vm377_vm0, %v587_v39  ;;  %611 = vst.msk [vmem:[%s1012_s8 + $0x40] sm:$0xff] %vm377_vm0, %v595_v40  ;;  %v805_v41 = vpop.f32.mrb[4].mxu0  ;;  %v821_v42 = vpop.f32.mrb[4].mxu1 }
  0xf3   : > { %v476_v43 = vpop.f32.mrb[5].mxu0  ;;  %v540_v44 = vpop.f32.mrb[5].mxu1  ;;  %v485_v47 = vadd.f32 %v805_v41, %v1001_v21  ;;  %v549_v48 = vadd.f32 %v821_v42, %v1001_v21 }
  0xf4   : > { %v806_v45 = vpop.f32.mrb[6].mxu0  ;;  %v822_v46 = vpop.f32.mrb[6].mxu1  ;;  %v477_v53 = vadd.f32 %v1001_v21, %v476_v43  ;;  %v541_v54 = vadd.f32 %v1001_v21, %v540_v44 }
  0xf5   : > { %v488_v49 = vadd.f32 %v806_v45, %v1001_v21  ;;  %v552_v50 = vadd.f32 %v822_v46, %v1001_v21  ;;  %v479_v51 = vpop.f32.mrb[7].mxu0  ;;  %v543_v52 = vpop.f32.mrb[7].mxu1 }
  0xf6   : > { %v480_v55 = vadd.f32 %v1001_v21, %v479_v51  ;;  %v544_v56 = vadd.f32 %v1001_v21, %v543_v52 }
  0xf7   : > { %v590_v57 = vpack.c.bf16 %v488_v49, %v485_v47  ;;  %v598_v58 = vpack.c.bf16 %v552_v50, %v549_v48 }
  0xf8   : > { %v589_v59 = vpack.c.bf16 %v480_v55, %v477_v53  ;;  %v597_v60 = vpack.c.bf16 %v544_v56, %v541_v54 }
  0xf9   : > { %606 = vst.msk [vmem:[%s1012_s8 + $0x18] sm:$0xff] %vm377_vm0, %v590_v57  ;;  %614 = vst.msk [vmem:[%s1012_s8 + $0x58] sm:$0xff] %vm377_vm0, %v598_v58 }
  0xfa   : > { %605 = vst.msk [vmem:[%s1012_s8 + $0x10] sm:$0xff] %vm377_vm0, %v589_v59  ;;  %613 = vst.msk [vmem:[%s1012_s8 + $0x50] sm:$0xff] %vm377_vm0, %v597_v60  ;;  %v809_v61 = vpop.f32.mrb[8].mxu0  ;;  %v825_v62 = vpop.f32.mrb[8].mxu1 }
  0xfb   : > { %v492_v63 = vpop.f32.mrb[9].mxu0  ;;  %v556_v0 = vpop.f32.mrb[9].mxu1  ;;  %v501_v3 = vadd.f32 %v809_v61, %v1001_v21  ;;  %v565_v4 = vadd.f32 %v825_v62, %v1001_v21 }
  0xfc   : > { %v810_v1 = vpop.f32.mrb[10].mxu0  ;;  %v826_v2 = vpop.f32.mrb[10].mxu1  ;;  %v493_v9 = vadd.f32 %v1001_v21, %v492_v63  ;;  %v557_v10 = vadd.f32 %v1001_v21, %v556_v0 }
  0xfd   : > { %v504_v5 = vadd.f32 %v810_v1, %v1001_v21  ;;  %v568_v6 = vadd.f32 %v826_v2, %v1001_v21  ;;  %v495_v7 = vpop.f32.mrb[11].mxu0  ;;  %v559_v8 = vpop.f32.mrb[11].mxu1 }
  0xfe   : > { %v496_v11 = vadd.f32 %v1001_v21, %v495_v7  ;;  %v560_v12 = vadd.f32 %v1001_v21, %v559_v8 }
  0xff   : > { %v592_v13 = vpack.c.bf16 %v504_v5, %v501_v3  ;;  %v600_v14 = vpack.c.bf16 %v568_v6, %v565_v4 }
 0x100   : > { %v591_v15 = vpack.c.bf16 %v496_v11, %v493_v9  ;;  %v599_v16 = vpack.c.bf16 %v560_v12, %v557_v10 }
 0x101   : > { %608 = vst.msk [vmem:[%s1012_s8 + $0x28] sm:$0xff] %vm377_vm0, %v592_v13  ;;  %616 = vst.msk [vmem:[%s1012_s8 + $0x68] sm:$0xff] %vm377_vm0, %v600_v14 }
 0x102   : > { %607 = vst.msk [vmem:[%s1012_s8 + $0x20] sm:$0xff] %vm377_vm0, %v591_v15  ;;  %615 = vst.msk [vmem:[%s1012_s8 + $0x60] sm:$0xff] %vm377_vm0, %v599_v16  ;;  %v813_v17 = vpop.f32.mrb[12].mxu0  ;;  %v829_v18 = vpop.f32.mrb[12].mxu1 }
 0x103   : > { %v508_v19 = vpop.f32.mrb[13].mxu0  ;;  %v572_v20 = vpop.f32.mrb[13].mxu1  ;;  %v517_v24 = vadd.f32 %v813_v17, %v1001_v21  ;;  %v581_v25 = vadd.f32 %v829_v18, %v1001_v21 }
 0x104   : > { %v814_v22 = vpop.f32.mrb[14].mxu0  ;;  %v830_v23 = vpop.f32.mrb[14].mxu1  ;;  %v509_v30 = vadd.f32 %v1001_v21, %v508_v19  ;;  %v573_v31 = vadd.f32 %v1001_v21, %v572_v20 }
 0x105   : > { %v520_v26 = vadd.f32 %v814_v22, %v1001_v21  ;;  %v584_v27 = vadd.f32 %v830_v23, %v1001_v21  ;;  %v511_v28 = vpop.f32.mrb[15].mxu0  ;;  %v575_v29 = vpop.f32.mrb[15].mxu1 }
 0x106   : > { %v512_v32 = vadd.f32 %v1001_v21, %v511_v28  ;;  %v576_v33 = vadd.f32 %v1001_v21, %v575_v29 }
 0x107   : > { %v594_v34 = vpack.c.bf16 %v520_v26, %v517_v24  ;;  %v602_v35 = vpack.c.bf16 %v584_v27, %v581_v25 }
 0x108   : > { %v593_v36 = vpack.c.bf16 %v512_v32, %v509_v30  ;;  %v601_v37 = vpack.c.bf16 %v576_v33, %v573_v31 }
 0x109   : > { %610 = vst.msk [vmem:[%s1012_s8 + $0x38] sm:$0xff] %vm377_vm0, %v594_v34  ;;  %618 = vst.msk [vmem:[%s1012_s8 + $0x78] sm:$0xff] %vm377_vm0, %v602_v35 }
 0x10a   : > { %609 = vst.msk [vmem:[%s1012_s8 + $0x30] sm:$0xff] %vm377_vm0, %v593_v36  ;;  %617 = vst.msk [vmem:[%s1012_s8 + $0x70] sm:$0xff] %vm377_vm0, %v601_v37 }
 0x10b PF: > { %s13_s14 = sadd.s32 1, %s905_s14   ;;  %s1085_s12 = smov %s901_s13 }
 0x10c   : > { %p10_p6 = scmp.ge.s32.totalorder %s13_s14, 4   ;;  %s1086_s13 = smov %s1088_s15 }
 0x10e   :  { %12 = sbr.rel (!%p10_p6) target bundleno = 2 (0x2), region = 68 }

// kernel: cgrnet_forward.33
= control target key start
LH: loop header
LB: loop body
LE: loop exit
PB: predicated region body
PF: predicated region fallthrough
CT: control target
= control target key end

     0   :  { %s2567_s12 = smov 0   ;;  %s2569_s13 = smov 0   ;;  %s3188_s0 = inlined_call_operand.vmem [shape: bf16[512,256], index: 0, kind: input, shape index: {}]   ;;  %s3189_s1 = inlined_call_operand.vmem [shape: bf16[256,256], index: 1, kind: input, shape index: {}]   ;;  %s3190_s2 = inlined_call_operand.vmem [shape: f32[1,256], index: 2, kind: input, shape index: {}]   ;;  %s3191_s3 = inlined_call_operand.vmem [shape: bf16[512,256], index: 3, kind: output, shape index: {}]  }
   0x1   :  { %s2571_s14 = smov 0   ;;  %s2573_s15 = smov 0  }
   0x2   :  { %s2575_s16 = smov 0  }
   0x3 LB: > { %s22_s17 = sadd.s32 1, %s2540_s15  ;;  %s1907_s18 = sadd.s32 4294967295, %s2544_s16   ;;  %s2544_s16 = sphi %s2575_s16, %s13_s16   ;;  %s2540_s15 = sphi %s2573_s15, %s3196_s15   ;;  %s2536_s14 = sphi %s2571_s14, %s3195_s14   ;;  %s2532_s13 = sphi %s2569_s13, %s3194_s13   ;;  %s2528_s12 = sphi %s2567_s12, %s3193_s12  }
   0x4   : > { %p23_p0 = scmp.ge.s32.totalorder %s22_s17, 2  ;;  %p65_p1 = scmp.ne.s32.totalorder %s2532_s13, %s2528_s12 }
   0x5   : > { %p66_p2 = scmp.eq.s32.totalorder %s2544_s16, 0  ;;  %p123_p4 = scmp.eq.s32.totalorder %s1907_s18, 1 }
   0x6   : > { %s3198_s17 = smov (%p23_p0, %s22_s17), 0  ;;  %s58_s20 = sadd.s32 1, %s2532_s13 }
   0x7   : > { %p67_p3 = por %p66_p2, %p65_p1  ;;  %s55_s19 = ssub.s32 %s2540_s15, %s3198_s17 }
   0x8   : > { %p56_p5 = scmp.eq.s32.totalorder %s55_s19, 0  ;;  %p2602_p6 = por %p123_p4, %p65_p1 }
   0x9   : > { %p1911_p7 = scmp.ge.s32.totalorder %s2544_s16, 2 }
   0xa   : > { %s2607_s22 = scalar_select %p56_p5, %s2532_s13, %s58_s20  }
   0xb   : > { %155 = sbr.rel (%p1911_p7) target bundleno = 43 (0x2b), region = 20 }
  0x12   : > { %158 = sbr.rel (!%p67_p3) target bundleno = 43 (0x2b), region = 24  ;;  %s160_s23 = sand.u32 (%p67_p3), 1, %s2532_s13  }
  0x13   : > { %s1913_s24 = sshll.u32 (%p67_p3), %s2540_s15, 2  ;;  %s1912_s25 = sshll.u32 (%p67_p3), %s160_s23, 7 }
  0x14   : > { %s2615_s28 = scalar_lea.vmem (%p67_p3), %s3189_s1, %s1913_s24  ;;  %s2619_s29 = scalar_lea.vmem (%p67_p3), [#allocation2], %s1912_s25 }
  0x15   : > { %v180_v0 = vld [vmem:[%s2615_s28] sm:$0xf] (%p67_p3)  ;;  %v182_v1 = vld [vmem:[%s2615_s28 + $0x8] sm:$0xf] (%p67_p3)  ;;  %v184_v2 = vld [vmem:[%s2615_s28 + $0x10] sm:$0xf] (%p67_p3) }
  0x16   : > { %181 = vst [vmem:[%s2619_s29] sm:$0xf] (%p67_p3), %v180_v0  ;;  %183 = vst [vmem:[%s2619_s29 + $0x4] sm:$0xf] (%p67_p3), %v182_v1  ;;  %v186_v3 = vld [vmem:[%s2615_s28 + $0x18] sm:$0xf] (%p67_p3) }
  0x17   : > { %v188_v4 = vld [vmem:[%s2615_s28 + $0x20] sm:$0xf] (%p67_p3)  ;;  %185 = vst [vmem:[%s2619_s29 + $0x8] sm:$0xf] (%p67_p3), %v184_v2  ;;  %187 = vst [vmem:[%s2619_s29 + $0xc] sm:$0xf] (%p67_p3), %v186_v3 }
  0x18   : > { %189 = vst [vmem:[%s2619_s29 + $0x10] sm:$0xf] (%p67_p3), %v188_v4  ;;  %v190_v5 = vld [vmem:[%s2615_s28 + $0x28] sm:$0xf] (%p67_p3)  ;;  %v192_v6 = vld [vmem:[%s2615_s28 + $0x30] sm:$0xf] (%p67_p3) }
  0x19   : > { %v194_v7 = vld [vmem:[%s2615_s28 + $0x38] sm:$0xf]  ;;  %191 = vst [vmem:[%s2619_s29 + $0x14] sm:$0xf] %v190_v5  ;;  %193 = vst [vmem:[%s2619_s29 + $0x18] sm:$0xf] %v192_v6 }
  0x1a   : > { %195 = vst [vmem:[%s2619_s29 + $0x1c] sm:$0xf] %v194_v7  ;;  %v196_v8 = vld [vmem:[%s2615_s28 + $0x40] sm:$0xf]  ;;  %v198_v9 = vld [vmem:[%s2615_s28 + $0x48] sm:$0xf] }
  0x1b   : > { %v200_v10 = vld [vmem:[%s2615_s28 + $0x50] sm:$0xf]  ;;  %197 = vst [vmem:[%s2619_s29 + $0x20] sm:$0xf] %v196_v8  ;;  %199 = vst [vmem:[%s2619_s29 + $0x24] sm:$0xf] %v198_v9 }
  0x1c   : > { %201 = vst [vmem:[%s2619_s29 + $0x28] sm:$0xf] %v200_v10  ;;  %v202_v11 = vld [vmem:[%s2615_s28 + $0x58] sm:$0xf]  ;;  %v204_v12 = vld [vmem:[%s2615_s28 + $0x60] sm:$0xf] }
  0x1d   : > { %v206_v13 = vld [vmem:[%s2615_s28 + $0x68] sm:$0xf]  ;;  %203 = vst [vmem:[%s2619_s29 + $0x2c] sm:$0xf] %v202_v11  ;;  %205 = vst [vmem:[%s2619_s29 + $0x30] sm:$0xf] %v204_v12 }
  0x1e   : > { %207 = vst [vmem:[%s2619_s29 + $0x34] sm:$0xf] %v206_v13  ;;  %v208_v14 = vld [vmem:[%s2615_s28 + $0x70] sm:$0xf]  ;;  %v210_v15 = vld [vmem:[%s2615_s28 + $0x78] sm:$0xf] }
  0x1f   : > { %v212_v16 = vld [vmem:[%s2615_s28 + $0x80] sm:$0xf]  ;;  %209 = vst [vmem:[%s2619_s29 + $0x38] sm:$0xf] %v208_v14  ;;  %211 = vst [vmem:[%s2619_s29 + $0x3c] sm:$0xf] %v210_v15 }
  0x20   : > { %213 = vst [vmem:[%s2619_s29 + $0x40] sm:$0xf] %v212_v16  ;;  %v214_v17 = vld [vmem:[%s2615_s28 + $0x88] sm:$0xf]  ;;  %v216_v18 = vld [vmem:[%s2615_s28 + $0x90] sm:$0xf] }
  0x21   : > { %v218_v19 = vld [vmem:[%s2615_s28 + $0x98] sm:$0xf]  ;;  %215 = vst [vmem:[%s2619_s29 + $0x44] sm:$0xf] %v214_v17  ;;  %217 = vst [vmem:[%s2619_s29 + $0x48] sm:$0xf] %v216_v18 }
  0x22   : > { %219 = vst [vmem:[%s2619_s29 + $0x4c] sm:$0xf] %v218_v19  ;;  %v220_v20 = vld [vmem:[%s2615_s28 + $0xa0] sm:$0xf]  ;;  %v222_v21 = vld [vmem:[%s2615_s28 + $0xa8] sm:$0xf] }
  0x23   : > { %v224_v22 = vld [vmem:[%s2615_s28 + $0xb0] sm:$0xf]  ;;  %221 = vst [vmem:[%s2619_s29 + $0x50] sm:$0xf] %v220_v20  ;;  %223 = vst [vmem:[%s2619_s29 + $0x54] sm:$0xf] %v222_v21 }
  0x24   : > { %225 = vst [vmem:[%s2619_s29 + $0x58] sm:$0xf] %v224_v22  ;;  %v226_v23 = vld [vmem:[%s2615_s28 + $0xb8] sm:$0xf]  ;;  %v228_v24 = vld [vmem:[%s2615_s28 + $0xc0] sm:$0xf] }
  0x25   : > { %v230_v25 = vld [vmem:[%s2615_s28 + $0xc8] sm:$0xf]  ;;  %227 = vst [vmem:[%s2619_s29 + $0x5c] sm:$0xf] %v226_v23  ;;  %229 = vst [vmem:[%s2619_s29 + $0x60] sm:$0xf] %v228_v24 }
  0x26   : > { %231 = vst [vmem:[%s2619_s29 + $0x64] sm:$0xf] %v230_v25  ;;  %v232_v26 = vld [vmem:[%s2615_s28 + $0xd0] sm:$0xf]  ;;  %v234_v27 = vld [vmem:[%s2615_s28 + $0xd8] sm:$0xf] }
  0x27   : > { %v236_v28 = vld [vmem:[%s2615_s28 + $0xe0] sm:$0xf]  ;;  %233 = vst [vmem:[%s2619_s29 + $0x68] sm:$0xf] %v232_v26  ;;  %235 = vst [vmem:[%s2619_s29 + $0x6c] sm:$0xf] %v234_v27 }
  0x28   : > { %237 = vst [vmem:[%s2619_s29 + $0x70] sm:$0xf] %v236_v28  ;;  %v238_v29 = vld [vmem:[%s2615_s28 + $0xe8] sm:$0xf]  ;;  %v240_v30 = vld [vmem:[%s2615_s28 + $0xf0] sm:$0xf] }
  0x29   : > { %v242_v31 = vld [vmem:[%s2615_s28 + $0xf8] sm:$0xf]  ;;  %239 = vst [vmem:[%s2619_s29 + $0x74] sm:$0xf] %v238_v29  ;;  %241 = vst [vmem:[%s2619_s29 + $0x78] sm:$0xf] %v240_v30 }
  0x2a   : > { %243 = vst [vmem:[%s2619_s29 + $0x7c] sm:$0xf] %v242_v31 }
  0x2b PF: > { %p1914_p8 = scmp.ge.s32.totalorder %s2544_s16, 1  ;;  %p335_p9 = scmp.lt.s32.totalorder %s2544_s16, 3 }
  0x2d   : > { %p336_p10 = pnand %p1914_p8, %p335_p9 }
  0x2e   : > { %s342_s30 = sand.u32 (!%p336_p10), 1, %s2528_s12   ;;  %v2546_v32 = vmov (!%p336_p10), 0   ;;  %v2412_v33 = vld [vmem:[%s3188_s0 + $0x4] ss:$8 sps:$4 sm:$0xff] (!%p336_p10)   ;;  %v2410_v51 = vld [vmem:[%s3188_s0] ss:$8 sps:$4 sm:$0xff] (!%p336_p10)  }
  0x2f   : > { %339 = sbr.rel (%p336_p10) target bundleno = 467 (0x1d3), region = 69  ;;  %904 = vmatprep.subr.bf16.mxu0 (!%p336_p10), %v2546_v32  ;;  %2321 = vmatprep.subr.bf16.mxu1 (!%p336_p10), %v2546_v32  ;;  %s1915_s4 = sshll.u32 (!%p336_p10), %s342_s30, 7  ;;  %v2415_v34 = vld [vmem:[%s3188_s0 + $0x104] ss:$8 sps:$4 sm:$0xff] (!%p336_p10)   ;;  %v2413_v52 = vld [vmem:[%s3188_s0 + $0x100] ss:$8 sps:$4 sm:$0xff] (!%p336_p10)  }
  0x30   : > { %s2696_s9 = scalar_lea.vmem (!%p336_p10), [#allocation2], %s1915_s4  ;;  %936 = vmatprep.mubr.bf16.mxu0 (!%p336_p10), %v2412_v33  ;;  %1064 = vmatprep.mubr.bf16.mxu1 (!%p336_p10), %v2415_v34  ;;  %v2416_v53 = vld [vmem:[%s3188_s0 + $0x14] ss:$8 sps:$4 sm:$0xff] (!%p336_p10)   ;;  %v2420_v55 = vld [vmem:[%s3188_s0 + $0x10] ss:$8 sps:$4 sm:$0xff] (!%p336_p10)   ;;  %p380_p11 = scmp.lt.s32.totalorder (!%p336_p10), %s2536_s14, 1 }
  0x31   : > { %v2394_v35 = vld [vmem:[%s2696_s9] sm:$0xff] (!%p336_p10)   ;;  %v2395_v36 = vld [vmem:[%s2696_s9 + $0x8] sm:$0xff] (!%p336_p10)   ;;  %v2396_v37 = vld [vmem:[%s2696_s9 + $0x10] sm:$0xff] (!%p336_p10)   ;;  %s1916_s18 = sshll.u32 (!%p336_p10), %s342_s30, 8 }
  0x32   : > { %905 = vmatpush1.bf16.msra.mxu0 (!%p336_p10), %v2394_v35  ;;  %2337 = vmatpush1.bf16.msra.mxu1 (!%p336_p10), %v2394_v35  ;;  %v2397_v38 = vld [vmem:[%s2696_s9 + $0x18] sm:$0xff] (!%p336_p10)   ;;  %v2398_v39 = vld [vmem:[%s2696_s9 + $0x20] sm:$0xff] (!%p336_p10)   ;;  %v2399_v40 = vld [vmem:[%s2696_s9 + $0x28] sm:$0xff] (!%p336_p10)   ;;  %s2943_s19 = scalar_lea.vmem (!%p336_p10), [#allocation3], %s1916_s18 }
  0x33   : > { %906 = vmatprep.subr.bf16.mxu0 (!%p336_p10), %v2546_v32  ;;  %2322 = vmatprep.subr.bf16.mxu1 (!%p336_p10), %v2546_v32  ;;  %v2400_v41 = vld [vmem:[%s2696_s9 + $0x30] sm:$0xff] (!%p336_p10)   ;;  %v2401_v42 = vld [vmem:[%s2696_s9 + $0x38] sm:$0xff] (!%p336_p10)   ;;  %v2402_v43 = vld [vmem:[%s2696_s9 + $0x40] sm:$0xff] (!%p336_p10)  }
  0x34   : > { %v2403_v44 = vld [vmem:[%s2696_s9 + $0x48] sm:$0xff] (!%p336_p10)   ;;  %v2404_v45 = vld [vmem:[%s2696_s9 + $0x50] sm:$0xff] (!%p336_p10)   ;;  %v2405_v46 = vld [vmem:[%s2696_s9 + $0x58] sm:$0xff] (!%p336_p10)  }
  0x35   : > { %v2406_v47 = vld [vmem:[%s2696_s9 + $0x60] sm:$0xff] (!%p336_p10)   ;;  %v2407_v48 = vld [vmem:[%s2696_s9 + $0x68] sm:$0xff] (!%p336_p10)   ;;  %v2408_v49 = vld [vmem:[%s2696_s9 + $0x70] sm:$0xff] (!%p336_p10)  }
  0x36   : > { %907 = vmatpush1.bf16.msra.mxu0 %v2395_v36  ;;  %2338 = vmatpush1.bf16.msra.mxu1 %v2395_v36  ;;  %v2409_v50 = vld [vmem:[%s2696_s9 + $0x78] sm:$0xff]   ;;  %v2422_v57 = vld [vmem:[%s3188_s0 + $0x24] ss:$8 sps:$4 sm:$0xff]   ;;  %v2426_v59 = vld [vmem:[%s3188_s0 + $0x20] ss:$8 sps:$4 sm:$0xff]   ;;  %s381_s8 = scalar_select %p380_p11, %s2536_s14, 1 }
  0x37   : > { %908 = vmatprep.subr.bf16.mxu0 %v2546_v32  ;;  %2323 = vmatprep.subr.bf16.mxu1 %v2546_v32  ;;  %v2418_v54 = vld [vmem:[%s3188_s0 + $0x114] ss:$8 sps:$4 sm:$0xff]   ;;  %v2421_v56 = vld [vmem:[%s3188_s0 + $0x110] ss:$8 sps:$4 sm:$0xff]   ;;  %v2424_v58 = vld [vmem:[%s3188_s0 + $0x124] ss:$8 sps:$4 sm:$0xff]  }
  0x38   : > { %v2427_v60 = vld [vmem:[%s3188_s0 + $0x120] ss:$8 sps:$4 sm:$0xff]   ;;  %v2428_v61 = vld [vmem:[%s3188_s0 + $0x34] ss:$8 sps:$4 sm:$0xff]   ;;  %v2432_v63 = vld [vmem:[%s3188_s0 + $0x30] ss:$8 sps:$4 sm:$0xff]   ;;  %s382_s11 = scalar_lea.vmem %s3190_s2, %s381_s8 }
  0x39   : > { %v2430_v62 = vld [vmem:[%s3188_s0 + $0x134] ss:$8 sps:$4 sm:$0xff]   ;;  %v2433_v0 = vld [vmem:[%s3188_s0 + $0x130] ss:$8 sps:$4 sm:$0xff]   ;;  %v2434_v1 = vld [vmem:[%s3188_s0 + $0x44] ss:$8 sps:$4 sm:$0xff]  }
  0x3a   : > { %909 = vmatpush1.bf16.msra.mxu0 %v2396_v37  ;;  %2339 = vmatpush1.bf16.msra.mxu1 %v2396_v37  ;;  %v2436_v2 = vld [vmem:[%s3188_s0 + $0x144] ss:$8 sps:$4 sm:$0xff]   ;;  %v2438_v3 = vld [vmem:[%s3188_s0 + $0x40] ss:$8 sps:$4 sm:$0xff]   ;;  %v2440_v5 = vld [vmem:[%s3188_s0 + $0x54] ss:$8 sps:$4 sm:$0xff]  }
  0x3b   : > { %910 = vmatprep.subr.bf16.mxu0 %v2546_v32  ;;  %2324 = vmatprep.subr.bf16.mxu1 %v2546_v32  ;;  %v2439_v4 = vld [vmem:[%s3188_s0 + $0x140] ss:$8 sps:$4 sm:$0xff]   ;;  %v2442_v6 = vld [vmem:[%s3188_s0 + $0x154] ss:$8 sps:$4 sm:$0xff]   ;;  %v2444_v7 = vld [vmem:[%s3188_s0 + $0x50] ss:$8 sps:$4 sm:$0xff]  }
  0x3c   : > { %v2445_v8 = vld [vmem:[%s3188_s0 + $0x150] ss:$8 sps:$4 sm:$0xff]   ;;  %v2446_v9 = vld [vmem:[%s3188_s0 + $0x64] ss:$8 sps:$4 sm:$0xff]   ;;  %v2450_v11 = vld [vmem:[%s3188_s0 + $0x60] ss:$8 sps:$4 sm:$0xff]  }
  0x3d   : > { %v2448_v10 = vld [vmem:[%s3188_s0 + $0x164] ss:$8 sps:$4 sm:$0xff]   ;;  %v2451_v12 = vld [vmem:[%s3188_s0 + $0x160] ss:$8 sps:$4 sm:$0xff]   ;;  %v2452_v13 = vld [vmem:[%s3188_s0 + $0x74] ss:$8 sps:$4 sm:$0xff]  }
  0x3e   : > { %911 = vmatpush1.bf16.msra.mxu0 %v2397_v38  ;;  %2340 = vmatpush1.bf16.msra.mxu1 %v2397_v38  ;;  %v2454_v14 = vld [vmem:[%s3188_s0 + $0x174] ss:$8 sps:$4 sm:$0xff]   ;;  %v2456_v15 = vld [vmem:[%s3188_s0 + $0x70] ss:$8 sps:$4 sm:$0xff]   ;;  %v2458_v17 = vld [vmem:[%s3188_s0 + $0x84] ss:$8 sps:$4 sm:$0xff]  }
  0x3f   : > { %912 = vmatprep.subr.bf16.mxu0 %v2546_v32  ;;  %2325 = vmatprep.subr.bf16.mxu1 %v2546_v32  ;;  %v2457_v16 = vld [vmem:[%s3188_s0 + $0x170] ss:$8 sps:$4 sm:$0xff]   ;;  %v2460_v18 = vld [vmem:[%s3188_s0 + $0x184] ss:$8 sps:$4 sm:$0xff]   ;;  %v2462_v19 = vld [vmem:[%s3188_s0 + $0x80] ss:$8 sps:$4 sm:$0xff]  }
  0x40   : > { %v2463_v20 = vld [vmem:[%s3188_s0 + $0x180] ss:$8 sps:$4 sm:$0xff]   ;;  %v2464_v21 = vld [vmem:[%s3188_s0 + $0x94] ss:$8 sps:$4 sm:$0xff]   ;;  %v2468_v23 = vld [vmem:[%s3188_s0 + $0x90] ss:$8 sps:$4 sm:$0xff]  }
  0x41   : > { %v2466_v22 = vld [vmem:[%s3188_s0 + $0x194] ss:$8 sps:$4 sm:$0xff]   ;;  %v2469_v24 = vld [vmem:[%s3188_s0 + $0x190] ss:$8 sps:$4 sm:$0xff]   ;;  %v2470_v25 = vld [vmem:[%s3188_s0 + $0xa4] ss:$8 sps:$4 sm:$0xff]  }
  0x42   : > { %913 = vmatpush1.bf16.msra.mxu0 %v2398_v39  ;;  %2341 = vmatpush1.bf16.msra.mxu1 %v2398_v39  ;;  %v2472_v26 = vld [vmem:[%s3188_s0 + $0x1a4] ss:$8 sps:$4 sm:$0xff]   ;;  %v2474_v27 = vld [vmem:[%s3188_s0 + $0xa0] ss:$8 sps:$4 sm:$0xff]   ;;  %v2476_v29 = vld [vmem:[%s3188_s0 + $0xb4] ss:$8 sps:$4 sm:$0xff]  }
  0x43   : > { %914 = vmatprep.subr.bf16.mxu0 %v2546_v32  ;;  %2326 = vmatprep.subr.bf16.mxu1 %v2546_v32  ;;  %v2475_v28 = vld [vmem:[%s3188_s0 + $0x1a0] ss:$8 sps:$4 sm:$0xff]   ;;  %v2478_v30 = vld [vmem:[%s3188_s0 + $0x1b4] ss:$8 sps:$4 sm:$0xff]   ;;  %v2480_v31 = vld [vmem:[%s3188_s0 + $0xb0] ss:$8 sps:$4 sm:$0xff]  }
  0x44   : > { %v2482_v33 = vld [vmem:[%s3188_s0 + $0xc4] ss:$8 sps:$4 sm:$0xff]   ;;  %v2486_v35 = vld [vmem:[%s3188_s0 + $0xc0] ss:$8 sps:$4 sm:$0xff]   ;;  %v2488_v37 = vld [vmem:[%s3188_s0 + $0xd4] ss:$8 sps:$4 sm:$0xff]  }
  0x45   : > { %v2484_v34 = vld [vmem:[%s3188_s0 + $0x1c4] ss:$8 sps:$4 sm:$0xff]   ;;  %v2487_v36 = vld [vmem:[%s3188_s0 + $0x1c0] ss:$8 sps:$4 sm:$0xff]   ;;  %v2490_v38 = vld [vmem:[%s3188_s0 + $0x1d4] ss:$8 sps:$4 sm:$0xff]  }
  0x46   : > { %915 = vmatpush1.bf16.msra.mxu0 %v2399_v40  ;;  %2342 = vmatpush1.bf16.msra.mxu1 %v2399_v40  ;;  %v2492_v39 = vld [vmem:[%s3188_s0 + $0xd0] ss:$8 sps:$4 sm:$0xff]   ;;  %s2063_s12 = sshll.u32 (%p2602_p6), %s2536_s14, 2 }
  0x47   : > { %916 = vmatprep.subr.bf16.mxu0 %v2546_v32  ;;  %2327 = vmatprep.subr.bf16.mxu1 %v2546_v32  ;;  %v2493_v40 = vld [vmem:[%s3188_s0 + $0x1d0] ss:$8 sps:$4 sm:$0xff]   ;;  %s3045_s23 = scalar_lea.vmem (%p2602_p6), %s3191_s3, %s2063_s12 }
  0x4a   : > { %917 = vmatpush1.bf16.msra.mxu0 %v2400_v41  ;;  %2343 = vmatpush1.bf16.msra.mxu1 %v2400_v41  ;;  %v2494_v41 = vld [vmem:[%s3188_s0 + $0xe4] ss:$8 sps:$4 sm:$0xff]  }
  0x4b   : > { %918 = vmatprep.subr.bf16.mxu0 %v2546_v32  ;;  %2328 = vmatprep.subr.bf16.mxu1 %v2546_v32 }
  0x4e   : > { %919 = vmatpush1.bf16.msra.mxu0 %v2401_v42  ;;  %2344 = vmatpush1.bf16.msra.mxu1 %v2401_v42  ;;  %v2496_v42 = vld [vmem:[%s3188_s0 + $0x1e4] ss:$8 sps:$4 sm:$0xff]  }
  0x4f   : > { %920 = vmatprep.subr.bf16.mxu0 %v2546_v32  ;;  %2329 = vmatprep.subr.bf16.mxu1 %v2546_v32 }
  0x52   : > { %921 = vmatpush1.bf16.msra.mxu0 %v2402_v43  ;;  %2345 = vmatpush1.bf16.msra.mxu1 %v2402_v43  ;;  %v2498_v43 = vld [vmem:[%s3188_s0 + $0xe0] ss:$8 sps:$4 sm:$0xff]  }
  0x53   : > { %922 = vmatprep.subr.bf16.mxu0 %v2546_v32  ;;  %2330 = vmatprep.subr.bf16.mxu1 %v2546_v32 }
  0x56   : > { %923 = vmatpush1.bf16.msra.mxu0 %v2403_v44  ;;  %2346 = vmatpush1.bf16.msra.mxu1 %v2403_v44  ;;  %v2499_v44 = vld [vmem:[%s3188_s0 + $0x1e0] ss:$8 sps:$4 sm:$0xff]  }
  0x57   : > { %924 = vmatprep.subr.bf16.mxu0 %v2546_v32  ;;  %2331 = vmatprep.subr.bf16.mxu1 %v2546_v32 }
  0x5a   : > { %925 = vmatpush1.bf16.msra.mxu0 %v2404_v45  ;;  %2347 = vmatpush1.bf16.msra.mxu1 %v2404_v45  ;;  %v2500_v45 = vld [vmem:[%s3188_s0 + $0xf4] ss:$8 sps:$4 sm:$0xff]  }
  0x5b   : > { %926 = vmatprep.subr.bf16.mxu0 %v2546_v32  ;;  %2332 = vmatprep.subr.bf16.mxu1 %v2546_v32 }
  0x5e   : > { %927 = vmatpush1.bf16.msra.mxu0 %v2405_v46  ;;  %2348 = vmatpush1.bf16.msra.mxu1 %v2405_v46  ;;  %v2502_v46 = vld [vmem:[%s3188_s0 + $0x1f4] ss:$8 sps:$4 sm:$0xff]  }
  0x5f   : > { %928 = vmatprep.subr.bf16.mxu0 %v2546_v32  ;;  %2333 = vmatprep.subr.bf16.mxu1 %v2546_v32 }
  0x62   : > { %929 = vmatpush1.bf16.msra.mxu0 %v2406_v47  ;;  %2349 = vmatpush1.bf16.msra.mxu1 %v2406_v47  ;;  %v2504_v47 = vld [vmem:[%s3188_s0 + $0xf0] ss:$8 sps:$4 sm:$0xff]  }
  0x63   : > { %930 = vmatprep.subr.bf16.mxu0 %v2546_v32  ;;  %2334 = vmatprep.subr.bf16.mxu1 %v2546_v32 }
  0x66   : > { %931 = vmatpush1.bf16.msra.mxu0 %v2407_v48  ;;  %2350 = vmatpush1.bf16.msra.mxu1 %v2407_v48  ;;  %v2505_v48 = vld [vmem:[%s3188_s0 + $0x1f0] ss:$8 sps:$4 sm:$0xff]  }
  0x67   : > { %932 = vmatprep.subr.bf16.mxu0 %v2546_v32  ;;  %2335 = vmatprep.subr.bf16.mxu1 %v2546_v32 }
  0x6a   : > { %933 = vmatpush1.bf16.msra.mxu0 %v2408_v49  ;;  %2351 = vmatpush1.bf16.msra.mxu1 %v2408_v49  ;;  %v2935_v49 = vld [vmem:[%s382_s11] ss:$0 sm:$0xff] }
  0x6b   : > { %934 = vmatprep.subr.bf16.mxu0 %v2546_v32  ;;  %2336 = vmatprep.subr.bf16.mxu1 %v2546_v32  ;;  %v2481_v32 = vld [vmem:[%s3188_s0 + $0x1b0] ss:$8 sps:$4 sm:$0xff]  }
  0x6e   : > { %935 = vmatpush1.bf16.msra.mxu0 %v2409_v50  ;;  %2352 = vmatpush1.bf16.msra.mxu1 %v2409_v50 }
  0x71   : > { %937 = vmatmul.mubr.bf16.vlgmr.msra.gmra.mrb[0].mxu0 %v2410_v51  ;;  %1065 = vmatmul.mubr.bf16.vlgmr.msra.gmra.mrb[0].mxu1 %v2413_v52 }
  0x72   : > { %944 = vmatprep.mubr.bf16.mxu0 %v2416_v53  ;;  %1072 = vmatprep.mubr.bf16.mxu1 %v2418_v54 }
  0x79   : > { %945 = vmatmul.mubr.bf16.gmra.mrb[4].mxu0 %v2420_v55  ;;  %1073 = vmatmul.mubr.bf16.gmra.mrb[4].mxu1 %v2421_v56 }
  0x7a   : > { %952 = vmatprep.mubr.bf16.mxu0 %v2422_v57  ;;  %1080 = vmatprep.mubr.bf16.mxu1 %v2424_v58 }
  0x81   : > { %953 = vmatmul.mubr.bf16.gmra.mrb[8].mxu0 %v2426_v59  ;;  %1081 = vmatmul.mubr.bf16.gmra.mrb[8].mxu1 %v2427_v60 }
  0x82   : > { %960 = vmatprep.mubr.bf16.mxu0 %v2428_v61  ;;  %1088 = vmatprep.mubr.bf16.mxu1 %v2430_v62 }
  0x89   : > { %961 = vmatmul.mubr.bf16.gmra.mrb[12].mxu0 %v2432_v63  ;;  %1089 = vmatmul.mubr.bf16.gmra.mrb[12].mxu1 %v2433_v0 }
  0x8a   : > { %968 = vmatprep.mubr.bf16.mxu0 %v2434_v1  ;;  %1096 = vmatprep.mubr.bf16.mxu1 %v2436_v2 }
  0x91   : > { %969 = vmatmul.mubr.bf16.gmra.mrb[16].mxu0 %v2438_v3  ;;  %1097 = vmatmul.mubr.bf16.gmra.mrb[16].mxu1 %v2439_v4 }
  0x92   : > { %976 = vmatprep.mubr.bf16.mxu0 %v2440_v5  ;;  %1104 = vmatprep.mubr.bf16.mxu1 %v2442_v6 }
  0x99   : > { %977 = vmatmul.mubr.bf16.gmra.mrb[20].mxu0 %v2444_v7  ;;  %1105 = vmatmul.mubr.bf16.gmra.mrb[20].mxu1 %v2445_v8 }
  0x9a   : > { %984 = vmatprep.mubr.bf16.mxu0 %v2446_v9  ;;  %1112 = vmatprep.mubr.bf16.mxu1 %v2448_v10 }
  0xa1   : > { %985 = vmatmul.mubr.bf16.gmra.mrb[24].mxu0 %v2450_v11  ;;  %1113 = vmatmul.mubr.bf16.gmra.mrb[24].mxu1 %v2451_v12 }
  0xa2   : > { %992 = vmatprep.mubr.bf16.mxu0 %v2452_v13  ;;  %1120 = vmatprep.mubr.bf16.mxu1 %v2454_v14 }
  0xa9   : > { %993 = vmatmul.mubr.bf16.gmra.mrb[28].mxu0 %v2456_v15  ;;  %1121 = vmatmul.mubr.bf16.gmra.mrb[28].mxu1 %v2457_v16 }
  0xaa   : > { %1000 = vmatprep.mubr.bf16.mxu0 %v2458_v17  ;;  %1128 = vmatprep.mubr.bf16.mxu1 %v2460_v18 }
  0xb1   : > { %1001 = vmatmul.mubr.bf16.gmra.mrb[32].mxu0 %v2462_v19  ;;  %1129 = vmatmul.mubr.bf16.gmra.mrb[32].mxu1 %v2463_v20 }
  0xb2   : > { %1008 = vmatprep.mubr.bf16.mxu0 %v2464_v21  ;;  %1136 = vmatprep.mubr.bf16.mxu1 %v2466_v22 }
  0xb9   : > { %1009 = vmatmul.mubr.bf16.gmra.mrb[36].mxu0 %v2468_v23  ;;  %1137 = vmatmul.mubr.bf16.gmra.mrb[36].mxu1 %v2469_v24 }
  0xba   : > { %1016 = vmatprep.mubr.bf16.mxu0 %v2470_v25  ;;  %1144 = vmatprep.mubr.bf16.mxu1 %v2472_v26 }
  0xc1   : > { %1017 = vmatmul.mubr.bf16.gmra.mrb[40].mxu0 %v2474_v27  ;;  %1145 = vmatmul.mubr.bf16.gmra.mrb[40].mxu1 %v2475_v28 }
  0xc2   : > { %1024 = vmatprep.mubr.bf16.mxu0 %v2476_v29  ;;  %1152 = vmatprep.mubr.bf16.mxu1 %v2478_v30 }
  0xc9   : > { %1025 = vmatmul.mubr.bf16.gmra.mrb[44].mxu0 %v2480_v31  ;;  %1153 = vmatmul.mubr.bf16.gmra.mrb[44].mxu1 %v2481_v32 }
  0xca   : > { %1032 = vmatprep.mubr.bf16.mxu0 %v2482_v33  ;;  %1160 = vmatprep.mubr.bf16.mxu1 %v2484_v34 }
  0xd1   : > { %1033 = vmatmul.mubr.bf16.gmra.mrb[48].mxu0 %v2486_v35  ;;  %1161 = vmatmul.mubr.bf16.gmra.mrb[48].mxu1 %v2487_v36 }
  0xd2   : > { %1040 = vmatprep.mubr.bf16.mxu0 %v2488_v37  ;;  %1168 = vmatprep.mubr.bf16.mxu1 %v2490_v38 }
  0xd9   : > { %1041 = vmatmul.mubr.bf16.gmra.mrb[52].mxu0 %v2492_v39  ;;  %1169 = vmatmul.mubr.bf16.gmra.mrb[52].mxu1 %v2493_v40 }
  0xda   : > { %1048 = vmatprep.mubr.bf16.mxu0 %v2494_v41  ;;  %1176 = vmatprep.mubr.bf16.mxu1 %v2496_v42 }
  0xe1   : > { %1049 = vmatmul.mubr.bf16.gmra.mrb[56].mxu0 %v2498_v43  ;;  %1177 = vmatmul.mubr.bf16.gmra.mrb[56].mxu1 %v2499_v44 }
  0xe2   : > { %1056 = vmatprep.mubr.bf16.mxu0 %v2500_v45  ;;  %1184 = vmatprep.mubr.bf16.mxu1 %v2502_v46 }
  0xe9   : > { %1057 = vmatmul.mubr.bf16.gmra.mrb[60].mxu0 %v2504_v47  ;;  %1185 = vmatmul.mubr.bf16.gmra.mrb[60].mxu1 %v2505_v48 }
 0x144   : > { %v938_v50 = vpop.f32.mrb[0].mxu0  ;;  %v1066_v51 = vpop.f32.mrb[0].mxu1 }
 0x145   : > { %v940_v52 = vpop.f32.mrb[1].mxu0  ;;  %v1068_v53 = vpop.f32.mrb[1].mxu1  ;;  %v939_v56 = vadd.f32 %v2935_v49, %v938_v50  ;;  %v1067_v57 = vadd.f32 %v2935_v49, %v1066_v51 }
 0x146   : > { %v941_v54 = vpop.f32.mrb[2].mxu0  ;;  %v1069_v55 = vpop.f32.mrb[2].mxu1 }
 0x147   : > { %v942_v58 = vadd.f32 %v2935_v49, %v941_v54  ;;  %v1070_v59 = vadd.f32 %v2935_v49, %v1069_v55  ;;  %v943_v60 = vpop.f32.mrb[3].mxu0  ;;  %v1071_v61 = vpop.f32.mrb[3].mxu1 }
 0x149   : > { %v2133_v62 = vpack.c.bf16 %v942_v58, %v939_v56  ;;  %v2213_v63 = vpack.c.bf16 %v1070_v59, %v1067_v57 }
 0x14b   : > { %2134 = vst [vmem:[%s2943_s19] sm:$0xff] %v2133_v62   ;;  %2305 = vst [vmem:[%s2943_s19 + $0x80] sm:$0xff] %v2213_v63  }
 0x14c   : > { %v946_v0 = vpop.f32.mrb[4].mxu0  ;;  %v1074_v1 = vpop.f32.mrb[4].mxu1 }
 0x14d   : > { %v948_v2 = vpop.f32.mrb[5].mxu0  ;;  %v1076_v3 = vpop.f32.mrb[5].mxu1  ;;  %v947_v6 = vadd.f32 %v2935_v49, %v946_v0  ;;  %v1075_v7 = vadd.f32 %v2935_v49, %v1074_v1 }
 0x14e   : > { %v949_v4 = vpop.f32.mrb[6].mxu0  ;;  %v1077_v5 = vpop.f32.mrb[6].mxu1 }
 0x14f   : > { %v950_v8 = vadd.f32 %v2935_v49, %v949_v4  ;;  %v1078_v9 = vadd.f32 %v2935_v49, %v1077_v5  ;;  %v951_v10 = vpop.f32.mrb[7].mxu0  ;;  %v1079_v11 = vpop.f32.mrb[7].mxu1 }
 0x151   : > { %v2138_v12 = vpack.c.bf16 %v950_v8, %v947_v6  ;;  %v2218_v13 = vpack.c.bf16 %v1078_v9, %v1075_v7 }
 0x153   : > { %2290 = vst [vmem:[%s2943_s19 + $0x8] sm:$0xff] %v2138_v12   ;;  %2306 = vst [vmem:[%s2943_s19 + $0x88] sm:$0xff] %v2218_v13  }
 0x154   : > { %v954_v14 = vpop.f32.mrb[8].mxu0  ;;  %v1082_v15 = vpop.f32.mrb[8].mxu1 }
 0x155   : > { %v956_v16 = vpop.f32.mrb[9].mxu0  ;;  %v1084_v17 = vpop.f32.mrb[9].mxu1  ;;  %v955_v20 = vadd.f32 %v2935_v49, %v954_v14  ;;  %v1083_v21 = vadd.f32 %v2935_v49, %v1082_v15 }
 0x156   : > { %v957_v18 = vpop.f32.mrb[10].mxu0  ;;  %v1085_v19 = vpop.f32.mrb[10].mxu1 }
 0x157   : > { %v958_v22 = vadd.f32 %v2935_v49, %v957_v18  ;;  %v1086_v23 = vadd.f32 %v2935_v49, %v1085_v19  ;;  %v959_v24 = vpop.f32.mrb[11].mxu0  ;;  %v1087_v25 = vpop.f32.mrb[11].mxu1 }
 0x159   : > { %v2143_v26 = vpack.c.bf16 %v958_v22, %v955_v20  ;;  %v2223_v27 = vpack.c.bf16 %v1086_v23, %v1083_v21 }
 0x15b   : > { %2291 = vst [vmem:[%s2943_s19 + $0x10] sm:$0xff] %v2143_v26   ;;  %2307 = vst [vmem:[%s2943_s19 + $0x90] sm:$0xff] %v2223_v27  }
 0x15c   : > { %v962_v28 = vpop.f32.mrb[12].mxu0  ;;  %v1090_v29 = vpop.f32.mrb[12].mxu1 }
 0x15d   : > { %v964_v30 = vpop.f32.mrb[13].mxu0  ;;  %v1092_v31 = vpop.f32.mrb[13].mxu1  ;;  %v963_v34 = vadd.f32 %v2935_v49, %v962_v28  ;;  %v1091_v35 = vadd.f32 %v2935_v49, %v1090_v29 }
 0x15e   : > { %v965_v32 = vpop.f32.mrb[14].mxu0  ;;  %v1093_v33 = vpop.f32.mrb[14].mxu1 }
 0x15f   : > { %v966_v36 = vadd.f32 %v2935_v49, %v965_v32  ;;  %v1094_v37 = vadd.f32 %v2935_v49, %v1093_v33  ;;  %v967_v38 = vpop.f32.mrb[15].mxu0  ;;  %v1095_v39 = vpop.f32.mrb[15].mxu1 }
 0x161   : > { %v2148_v40 = vpack.c.bf16 %v966_v36, %v963_v34  ;;  %v2228_v41 = vpack.c.bf16 %v1094_v37, %v1091_v35 }
 0x163   : > { %2292 = vst [vmem:[%s2943_s19 + $0x18] sm:$0xff] %v2148_v40   ;;  %2308 = vst [vmem:[%s2943_s19 + $0x98] sm:$0xff] %v2228_v41  }
 0x164   : > { %v970_v42 = vpop.f32.mrb[16].mxu0  ;;  %v1098_v43 = vpop.f32.mrb[16].mxu1 }
 0x165   : > { %v972_v44 = vpop.f32.mrb[17].mxu0  ;;  %v1100_v45 = vpop.f32.mrb[17].mxu1  ;;  %v971_v48 = vadd.f32 %v2935_v49, %v970_v42  ;;  %v1099_v50 = vadd.f32 %v2935_v49, %v1098_v43 }
 0x166   : > { %v973_v46 = vpop.f32.mrb[18].mxu0  ;;  %v1101_v47 = vpop.f32.mrb[18].mxu1 }
 0x167   : > { %v974_v51 = vadd.f32 %v2935_v49, %v973_v46  ;;  %v1102_v52 = vadd.f32 %v2935_v49, %v1101_v47  ;;  %v975_v53 = vpop.f32.mrb[19].mxu0  ;;  %v1103_v54 = vpop.f32.mrb[19].mxu1 }
 0x169   : > { %v2153_v55 = vpack.c.bf16 %v974_v51, %v971_v48  ;;  %v2233_v56 = vpack.c.bf16 %v1102_v52, %v1099_v50 }
 0x16b   : > { %2293 = vst [vmem:[%s2943_s19 + $0x20] sm:$0xff] %v2153_v55   ;;  %2309 = vst [vmem:[%s2943_s19 + $0xa0] sm:$0xff] %v2233_v56  }
 0x16c   : > { %v978_v57 = vpop.f32.mrb[20].mxu0  ;;  %v1106_v58 = vpop.f32.mrb[20].mxu1 }
 0x16d   : > { %v980_v59 = vpop.f32.mrb[21].mxu0  ;;  %v1108_v60 = vpop.f32.mrb[21].mxu1  ;;  %v979_v63 = vadd.f32 %v2935_v49, %v978_v57  ;;  %v1107_v0 = vadd.f32 %v2935_v49, %v1106_v58 }
 0x16e   : > { %v981_v61 = vpop.f32.mrb[22].mxu0  ;;  %v1109_v62 = vpop.f32.mrb[22].mxu1 }
 0x16f   : > { %v982_v1 = vadd.f32 %v2935_v49, %v981_v61  ;;  %v1110_v2 = vadd.f32 %v2935_v49, %v1109_v62  ;;  %v983_v3 = vpop.f32.mrb[23].mxu0  ;;  %v1111_v4 = vpop.f32.mrb[23].mxu1 }
 0x171   : > { %v2158_v5 = vpack.c.bf16 %v982_v1, %v979_v63  ;;  %v2238_v6 = vpack.c.bf16 %v1110_v2, %v1107_v0 }
 0x173   : > { %2294 = vst [vmem:[%s2943_s19 + $0x28] sm:$0xff] %v2158_v5   ;;  %2310 = vst [vmem:[%s2943_s19 + $0xa8] sm:$0xff] %v2238_v6  }
 0x174   : > { %v986_v7 = vpop.f32.mrb[24].mxu0  ;;  %v1114_v8 = vpop.f32.mrb[24].mxu1 }
 0x175   : > { %v988_v9 = vpop.f32.mrb[25].mxu0  ;;  %v1116_v10 = vpop.f32.mrb[25].mxu1  ;;  %v987_v13 = vadd.f32 %v2935_v49, %v986_v7  ;;  %v1115_v14 = vadd.f32 %v2935_v49, %v1114_v8 }
 0x176   : > { %v989_v11 = vpop.f32.mrb[26].mxu0  ;;  %v1117_v12 = vpop.f32.mrb[26].mxu1 }
 0x177   : > { %v990_v15 = vadd.f32 %v2935_v49, %v989_v11  ;;  %v1118_v16 = vadd.f32 %v2935_v49, %v1117_v12  ;;  %v991_v17 = vpop.f32.mrb[27].mxu0  ;;  %v1119_v18 = vpop.f32.mrb[27].mxu1 }
 0x179   : > { %v2163_v19 = vpack.c.bf16 %v990_v15, %v987_v13  ;;  %v2243_v20 = vpack.c.bf16 %v1118_v16, %v1115_v14 }
 0x17b   : > { %2295 = vst [vmem:[%s2943_s19 + $0x30] sm:$0xff] %v2163_v19   ;;  %2311 = vst [vmem:[%s2943_s19 + $0xb0] sm:$0xff] %v2243_v20  }
 0x17c   : > { %v994_v21 = vpop.f32.mrb[28].mxu0  ;;  %v1122_v22 = vpop.f32.mrb[28].mxu1 }
 0x17d   : > { %v996_v23 = vpop.f32.mrb[29].mxu0  ;;  %v1124_v24 = vpop.f32.mrb[29].mxu1  ;;  %v995_v27 = vadd.f32 %v2935_v49, %v994_v21  ;;  %v1123_v28 = vadd.f32 %v2935_v49, %v1122_v22 }
 0x17e   : > { %v997_v25 = vpop.f32.mrb[30].mxu0  ;;  %v1125_v26 = vpop.f32.mrb[30].mxu1 }
 0x17f   : > { %v998_v29 = vadd.f32 %v2935_v49, %v997_v25  ;;  %v1126_v30 = vadd.f32 %v2935_v49, %v1125_v26  ;;  %v999_v31 = vpop.f32.mrb[31].mxu0  ;;  %v1127_v32 = vpop.f32.mrb[31].mxu1 }
 0x181   : > { %v2168_v33 = vpack.c.bf16 %v998_v29, %v995_v27  ;;  %v2248_v34 = vpack.c.bf16 %v1126_v30, %v1123_v28 }
 0x183   : > { %2296 = vst [vmem:[%s2943_s19 + $0x38] sm:$0xff] %v2168_v33   ;;  %2312 = vst [vmem:[%s2943_s19 + $0xb8] sm:$0xff] %v2248_v34  }
 0x184   : > { %v1002_v35 = vpop.f32.mrb[32].mxu0  ;;  %v1130_v36 = vpop.f32.mrb[32].mxu1 }
 0x185   : > { %v1004_v37 = vpop.f32.mrb[33].mxu0  ;;  %v1132_v38 = vpop.f32.mrb[33].mxu1  ;;  %v1003_v41 = vadd.f32 %v2935_v49, %v1002_v35  ;;  %v1131_v42 = vadd.f32 %v2935_v49, %v1130_v36 }
 0x186   : > { %v1005_v39 = vpop.f32.mrb[34].mxu0  ;;  %v1133_v40 = vpop.f32.mrb[34].mxu1 }
 0x187   : > { %v1006_v43 = vadd.f32 %v2935_v49, %v1005_v39  ;;  %v1134_v44 = vadd.f32 %v2935_v49, %v1133_v40  ;;  %v1007_v45 = vpop.f32.mrb[35].mxu0  ;;  %v1135_v46 = vpop.f32.mrb[35].mxu1 }
 0x189   : > { %v2173_v47 = vpack.c.bf16 %v1006_v43, %v1003_v41  ;;  %v2253_v48 = vpack.c.bf16 %v1134_v44, %v1131_v42 }
 0x18b   : > { %2297 = vst [vmem:[%s2943_s19 + $0x40] sm:$0xff] %v2173_v47   ;;  %2313 = vst [vmem:[%s2943_s19 + $0xc0] sm:$0xff] %v2253_v48  }
 0x18c   : > { %v1010_v50 = vpop.f32.mrb[36].mxu0  ;;  %v1138_v51 = vpop.f32.mrb[36].mxu1 }
 0x18d   : > { %v1012_v52 = vpop.f32.mrb[37].mxu0  ;;  %v1140_v53 = vpop.f32.mrb[37].mxu1  ;;  %v1011_v56 = vadd.f32 %v2935_v49, %v1010_v50  ;;  %v1139_v57 = vadd.f32 %v2935_v49, %v1138_v51 }
 0x18e   : > { %v1013_v54 = vpop.f32.mrb[38].mxu0  ;;  %v1141_v55 = vpop.f32.mrb[38].mxu1 }
 0x18f   : > { %v1014_v58 = vadd.f32 %v2935_v49, %v1013_v54  ;;  %v1142_v59 = vadd.f32 %v2935_v49, %v1141_v55  ;;  %v1015_v60 = vpop.f32.mrb[39].mxu0  ;;  %v1143_v61 = vpop.f32.mrb[39].mxu1 }
 0x191   : > { %v2178_v62 = vpack.c.bf16 %v1014_v58, %v1011_v56  ;;  %v2258_v63 = vpack.c.bf16 %v1142_v59, %v1139_v57 }
 0x193   : > { %2298 = vst [vmem:[%s2943_s19 + $0x48] sm:$0xff] %v2178_v62   ;;  %2314 = vst [vmem:[%s2943_s19 + $0xc8] sm:$0xff] %v2258_v63  }
 0x194   : > { %v1018_v0 = vpop.f32.mrb[40].mxu0  ;;  %v1146_v1 = vpop.f32.mrb[40].mxu1 }
 0x195   : > { %v1020_v2 = vpop.f32.mrb[41].mxu0  ;;  %v1148_v3 = vpop.f32.mrb[41].mxu1  ;;  %v1019_v6 = vadd.f32 %v2935_v49, %v1018_v0  ;;  %v1147_v7 = vadd.f32 %v2935_v49, %v1146_v1 }
 0x196   : > { %v1021_v4 = vpop.f32.mrb[42].mxu0  ;;  %v1149_v5 = vpop.f32.mrb[42].mxu1 }
 0x197   : > { %v1022_v8 = vadd.f32 %v2935_v49, %v1021_v4  ;;  %v1150_v9 = vadd.f32 %v2935_v49, %v1149_v5  ;;  %v1023_v10 = vpop.f32.mrb[43].mxu0  ;;  %v1151_v11 = vpop.f32.mrb[43].mxu1 }
 0x199   : > { %v2183_v12 = vpack.c.bf16 %v1022_v8, %v1019_v6  ;;  %v2263_v13 = vpack.c.bf16 %v1150_v9, %v1147_v7 }
 0x19b   : > { %2299 = vst [vmem:[%s2943_s19 + $0x50] sm:$0xff] %v2183_v12   ;;  %2315 = vst [vmem:[%s2943_s19 + $0xd0] sm:$0xff] %v2263_v13  }
 0x19c   : > { %v1026_v14 = vpop.f32.mrb[44].mxu0  ;;  %v1154_v15 = vpop.f32.mrb[44].mxu1 }
 0x19d   : > { %v1028_v16 = vpop.f32.mrb[45].mxu0  ;;  %v1156_v17 = vpop.f32.mrb[45].mxu1  ;;  %v1027_v20 = vadd.f32 %v2935_v49, %v1026_v14  ;;  %v1155_v21 = vadd.f32 %v2935_v49, %v1154_v15 }
 0x19e   : > { %v1029_v18 = vpop.f32.mrb[46].mxu0  ;;  %v1157_v19 = vpop.f32.mrb[46].mxu1 }
 0x19f   : > { %v1030_v22 = vadd.f32 %v2935_v49, %v1029_v18  ;;  %v1158_v23 = vadd.f32 %v2935_v49, %v1157_v19  ;;  %v1031_v24 = vpop.f32.mrb[47].mxu0  ;;  %v1159_v25 = vpop.f32.mrb[47].mxu1 }
 0x1a0   : > { %v1548_v24 = vld [vmem:[%s2943_s19 + $0x10] sm:$0xf] (%p2602_p6)  ;;  %v1550_v25 = vld [vmem:[%s2943_s19 + $0x14] sm:$0xf] (%p2602_p6) }
 0x1a1   : > { %v2188_v26 = vpack.c.bf16 %v1030_v22, %v1027_v20  ;;  %v2268_v27 = vpack.c.bf16 %v1158_v23, %v1155_v21  ;;  %v1542_v21 = vld [vmem:[%s2943_s19 + $0x4] sm:$0xf] (%p2602_p6)  ;;  %v1544_v22 = vld [vmem:[%s2943_s19 + $0x8] sm:$0xf] (%p2602_p6)  ;;  %v1546_v23 = vld [vmem:[%s2943_s19 + $0xc] sm:$0xf] (%p2602_p6) }
 0x1a2   : > { %1543 = vst [vmem:[%s3045_s23 + $0x8] sm:$0xf] (%p2602_p6), %v1542_v21  ;;  %1545 = vst [vmem:[%s3045_s23 + $0x10] sm:$0xf] (%p2602_p6), %v1544_v22 }
 0x1a3   : > { %2300 = vst [vmem:[%s2943_s19 + $0x58] sm:$0xff] %v2188_v26   ;;  %2316 = vst [vmem:[%s2943_s19 + $0xd8] sm:$0xff] %v2268_v27   ;;  %v1552_v26 = vld [vmem:[%s2943_s19 + $0x18] sm:$0xf] (%p2602_p6)  ;;  %v1554_v27 = vld [vmem:[%s2943_s19 + $0x1c] sm:$0xf] (%p2602_p6) }
 0x1a4   : > { %v1034_v28 = vpop.f32.mrb[48].mxu0  ;;  %v1162_v29 = vpop.f32.mrb[48].mxu1  ;;  %1547 = vst [vmem:[%s3045_s23 + $0x18] sm:$0xf] (%p2602_p6), %v1546_v23  ;;  %1549 = vst [vmem:[%s3045_s23 + $0x20] sm:$0xf] (%p2602_p6), %v1548_v24 }
 0x1a5   : > { %v1036_v30 = vpop.f32.mrb[49].mxu0  ;;  %v1164_v31 = vpop.f32.mrb[49].mxu1  ;;  %v1035_v34 = vadd.f32 %v2935_v49, %v1034_v28  ;;  %v1163_v35 = vadd.f32 %v2935_v49, %v1162_v29  ;;  %1551 = vst [vmem:[%s3045_s23 + $0x28] sm:$0xf] (%p2602_p6), %v1550_v25  ;;  %1553 = vst [vmem:[%s3045_s23 + $0x30] sm:$0xf] (%p2602_p6), %v1552_v26 }
 0x1a6   : > { %v1037_v32 = vpop.f32.mrb[50].mxu0  ;;  %v1165_v33 = vpop.f32.mrb[50].mxu1  ;;  %1555 = vst [vmem:[%s3045_s23 + $0x38] sm:$0xf] (%p2602_p6), %v1554_v27  ;;  %v1556_v28 = vld [vmem:[%s2943_s19 + $0x20] sm:$0xf] (%p2602_p6) }
 0x1a7   : > { %v1038_v36 = vadd.f32 %v2935_v49, %v1037_v32  ;;  %v1166_v37 = vadd.f32 %v2935_v49, %v1165_v33  ;;  %v1039_v38 = vpop.f32.mrb[51].mxu0  ;;  %v1167_v39 = vpop.f32.mrb[51].mxu1  ;;  %v1558_v29 = vld [vmem:[%s2943_s19 + $0x24] sm:$0xf] (%p2602_p6)  ;;  %v1560_v30 = vld [vmem:[%s2943_s19 + $0x28] sm:$0xf] (%p2602_p6) }
 0x1a8   : > { %1557 = vst [vmem:[%s3045_s23 + $0x40] sm:$0xf] (%p2602_p6), %v1556_v28  ;;  %1559 = vst [vmem:[%s3045_s23 + $0x48] sm:$0xf] (%p2602_p6), %v1558_v29  ;;  %v1562_v31 = vld [vmem:[%s2943_s19 + $0x2c] sm:$0xf] (%p2602_p6) }
 0x1a9   : > { %v2193_v40 = vpack.c.bf16 %v1038_v36, %v1035_v34  ;;  %v2273_v41 = vpack.c.bf16 %v1166_v37, %v1163_v35  ;;  %1561 = vst [vmem:[%s3045_s23 + $0x50] sm:$0xf] (%p2602_p6), %v1560_v30  ;;  %v1564_v32 = vld [vmem:[%s2943_s19 + $0x30] sm:$0xf] (%p2602_p6)  ;;  %v1566_v33 = vld [vmem:[%s2943_s19 + $0x34] sm:$0xf] (%p2602_p6) }
 0x1aa   : > { %1563 = vst [vmem:[%s3045_s23 + $0x58] sm:$0xf] (%p2602_p6), %v1562_v31  ;;  %1565 = vst [vmem:[%s3045_s23 + $0x60] sm:$0xf] (%p2602_p6), %v1564_v32  ;;  %v1568_v34 = vld [vmem:[%s2943_s19 + $0x38] sm:$0xf] (%p2602_p6) }
 0x1ab   : > { %2301 = vst [vmem:[%s2943_s19 + $0x60] sm:$0xff] %v2193_v40   ;;  %2317 = vst [vmem:[%s2943_s19 + $0xe0] sm:$0xff] %v2273_v41   ;;  %v1570_v35 = vld [vmem:[%s2943_s19 + $0x3c] sm:$0xf] (%p2602_p6)  ;;  %v1572_v36 = vld [vmem:[%s2943_s19 + $0x40] sm:$0xf] (%p2602_p6) }
 0x1ac   : > { %v1042_v42 = vpop.f32.mrb[52].mxu0  ;;  %v1170_v43 = vpop.f32.mrb[52].mxu1  ;;  %1567 = vst [vmem:[%s3045_s23 + $0x68] sm:$0xf] (%p2602_p6), %v1566_v33  ;;  %1569 = vst [vmem:[%s3045_s23 + $0x70] sm:$0xf] (%p2602_p6), %v1568_v34 }
 0x1ad   : > { %v1044_v44 = vpop.f32.mrb[53].mxu0  ;;  %v1172_v45 = vpop.f32.mrb[53].mxu1  ;;  %v1043_v48 = vadd.f32 %v2935_v49, %v1042_v42  ;;  %v1171_v50 = vadd.f32 %v2935_v49, %v1170_v43  ;;  %1571 = vst [vmem:[%s3045_s23 + $0x78] sm:$0xf] (%p2602_p6), %v1570_v35  ;;  %1573 = vst [vmem:[%s3045_s23 + $0x80] sm:$0xf] (%p2602_p6), %v1572_v36 }
 0x1ae   : > { %v1045_v46 = vpop.f32.mrb[54].mxu0  ;;  %v1173_v47 = vpop.f32.mrb[54].mxu1  ;;  %v1574_v37 = vld [vmem:[%s2943_s19 + $0x44] sm:$0xf] (%p2602_p6)  ;;  %v1576_v38 = vld [vmem:[%s2943_s19 + $0x48] sm:$0xf] (%p2602_p6) }
 0x1af   : > { %v1046_v51 = vadd.f32 %v2935_v49, %v1045_v46  ;;  %v1174_v52 = vadd.f32 %v2935_v49, %v1173_v47  ;;  %v1047_v53 = vpop.f32.mrb[55].mxu0  ;;  %v1175_v54 = vpop.f32.mrb[55].mxu1  ;;  %v1578_v39 = vld [vmem:[%s2943_s19 + $0x4c] sm:$0xf] (%p2602_p6)  ;;  %1575 = vst [vmem:[%s3045_s23 + $0x88] sm:$0xf] (%p2602_p6), %v1574_v37 }
 0x1b0   : > { %1577 = vst [vmem:[%s3045_s23 + $0x90] sm:$0xf] (%p2602_p6), %v1576_v38  ;;  %1579 = vst [vmem:[%s3045_s23 + $0x98] sm:$0xf] (%p2602_p6), %v1578_v39  ;;  %v1580_v40 = vld [vmem:[%s2943_s19 + $0x50] sm:$0xf] (%p2602_p6) }
 0x1b1   : > { %v2198_v55 = vpack.c.bf16 %v1046_v51, %v1043_v48  ;;  %v2278_v56 = vpack.c.bf16 %v1174_v52, %v1171_v50  ;;  %v1582_v41 = vld [vmem:[%s2943_s19 + $0x54] sm:$0xf] (%p2602_p6)  ;;  %v1584_v42 = vld [vmem:[%s2943_s19 + $0x58] sm:$0xf] (%p2602_p6)  ;;  %1581 = vst [vmem:[%s3045_s23 + $0xa0] sm:$0xf] (%p2602_p6), %v1580_v40 }
 0x1b2   : > { %1583 = vst [vmem:[%s3045_s23 + $0xa8] sm:$0xf] (%p2602_p6), %v1582_v41  ;;  %1585 = vst [vmem:[%s3045_s23 + $0xb0] sm:$0xf] (%p2602_p6), %v1584_v42  ;;  %v1586_v43 = vld [vmem:[%s2943_s19 + $0x5c] sm:$0xf] (%p2602_p6) }
 0x1b3   : > { %2302 = vst [vmem:[%s2943_s19 + $0x68] sm:$0xff] %v2198_v55   ;;  %2318 = vst [vmem:[%s2943_s19 + $0xe8] sm:$0xff] %v2278_v56   ;;  %v1588_v44 = vld [vmem:[%s2943_s19 + $0x60] sm:$0xf] (%p2602_p6)  ;;  %v1590_v45 = vld [vmem:[%s2943_s19 + $0x64] sm:$0xf] (%p2602_p6) }
 0x1b4   : > { %v1050_v57 = vpop.f32.mrb[56].mxu0  ;;  %v1178_v58 = vpop.f32.mrb[56].mxu1  ;;  %1587 = vst [vmem:[%s3045_s23 + $0xb8] sm:$0xf] (%p2602_p6), %v1586_v43  ;;  %1589 = vst [vmem:[%s3045_s23 + $0xc0] sm:$0xf] (%p2602_p6), %v1588_v44 }
 0x1b5   : > { %v1052_v59 = vpop.f32.mrb[57].mxu0  ;;  %v1180_v60 = vpop.f32.mrb[57].mxu1  ;;  %v1051_v63 = vadd.f32 %v2935_v49, %v1050_v57  ;;  %v1179_v0 = vadd.f32 %v2935_v49, %v1178_v58  ;;  %1591 = vst [vmem:[%s3045_s23 + $0xc8] sm:$0xf] (%p2602_p6), %v1590_v45  ;;  %v1604_v53 = vld [vmem:[%s2943_s19 + $0x80] sm:$0xf] (%p2602_p6) }
 0x1b6   : > { %v1053_v61 = vpop.f32.mrb[58].mxu0  ;;  %v1181_v62 = vpop.f32.mrb[58].mxu1  ;;  %v1606_v54 = vld [vmem:[%s2943_s19 + $0x84] sm:$0xf] (%p2602_p6)  ;;  %v1608_v55 = vld [vmem:[%s2943_s19 + $0x88] sm:$0xf] (%p2602_p6) }
 0x1b7   : > { %v1054_v1 = vadd.f32 %v2935_v49, %v1053_v61  ;;  %v1182_v2 = vadd.f32 %v2935_v49, %v1181_v62  ;;  %v1055_v3 = vpop.f32.mrb[59].mxu0  ;;  %v1183_v4 = vpop.f32.mrb[59].mxu1  ;;  %1605 = vst [vmem:[%s3045_s23 + $0x100] sm:$0xf] (%p2602_p6), %v1604_v53  ;;  %1607 = vst [vmem:[%s3045_s23 + $0x108] sm:$0xf] (%p2602_p6), %v1606_v54 }
 0x1b8   : > { %1609 = vst [vmem:[%s3045_s23 + $0x110] sm:$0xf] (%p2602_p6), %v1608_v55  ;;  %v1610_v56 = vld [vmem:[%s2943_s19 + $0x8c] sm:$0xf] (%p2602_p6)  ;;  %v1612_v57 = vld [vmem:[%s2943_s19 + $0x90] sm:$0xf] (%p2602_p6) }
 0x1b9   : > { %v2203_v5 = vpack.c.bf16 %v1054_v1, %v1051_v63  ;;  %v2283_v6 = vpack.c.bf16 %v1182_v2, %v1179_v0  ;;  %v1614_v58 = vld [vmem:[%s2943_s19 + $0x94] sm:$0xf] (%p2602_p6)  ;;  %1611 = vst [vmem:[%s3045_s23 + $0x118] sm:$0xf] (%p2602_p6), %v1610_v56  ;;  %1613 = vst [vmem:[%s3045_s23 + $0x120] sm:$0xf] (%p2602_p6), %v1612_v57 }
 0x1ba   : > { %v1592_v46 = vld [vmem:[%s2943_s19 + $0x68] sm:$0xf] (%p2602_p6)  ;;  %v1594_v47 = vld [vmem:[%s2943_s19 + $0x6c] sm:$0xf] (%p2602_p6)  ;;  %1615 = vst [vmem:[%s3045_s23 + $0x128] sm:$0xf] (%p2602_p6), %v1614_v58 }
 0x1bb   : > { %2303 = vst [vmem:[%s2943_s19 + $0x70] sm:$0xff] %v2203_v5   ;;  %2319 = vst [vmem:[%s2943_s19 + $0xf0] sm:$0xff] %v2283_v6   ;;  %v1616_v59 = vld [vmem:[%s2943_s19 + $0x98] sm:$0xf] (%p2602_p6)  ;;  %v1618_v60 = vld [vmem:[%s2943_s19 + $0x9c] sm:$0xf] (%p2602_p6) }
 0x1bc   : > { %v1058_v7 = vpop.f32.mrb[60].mxu0  ;;  %v1186_v8 = vpop.f32.mrb[60].mxu1  ;;  %1593 = vst [vmem:[%s3045_s23 + $0xd0] sm:$0xf] (%p2602_p6), %v1592_v46  ;;  %1595 = vst [vmem:[%s3045_s23 + $0xd8] sm:$0xf] (%p2602_p6), %v1594_v47 }
 0x1bd   : > { %v1060_v9 = vpop.f32.mrb[61].mxu0  ;;  %v1188_v10 = vpop.f32.mrb[61].mxu1  ;;  %v1059_v13 = vadd.f32 %v2935_v49, %v1058_v7  ;;  %v1187_v14 = vadd.f32 %v2935_v49, %v1186_v8  ;;  %1519 = sbr.rel (!%p2602_p6) target bundleno = 467 (0x1d3), region = 77  ;;  %v1620_v61 = vld [vmem:[%s2943_s19 + $0xa0] sm:$0xf] (%p2602_p6) }
 0x1be   : > { %v1061_v11 = vpop.f32.mrb[62].mxu0  ;;  %v1189_v12 = vpop.f32.mrb[62].mxu1  ;;  %1617 = vst [vmem:[%s3045_s23 + $0x130] sm:$0xf] (%p2602_p6), %v1616_v59  ;;  %1619 = vst [vmem:[%s3045_s23 + $0x138] sm:$0xf] (%p2602_p6), %v1618_v60 }
 0x1bf   : > { %v1062_v15 = vadd.f32 %v2935_v49, %v1061_v11  ;;  %v1190_v16 = vadd.f32 %v2935_v49, %v1189_v12  ;;  %v1063_v17 = vpop.f32.mrb[63].mxu0  ;;  %v1191_v18 = vpop.f32.mrb[63].mxu1  ;;  %v1540_v49 = vld [vmem:[%s2943_s19] sm:$0xf] (%p2602_p6)  ;;  %1621 = vst [vmem:[%s3045_s23 + $0x140] sm:$0xf] (%p2602_p6), %v1620_v61 }
 0x1c0   : > { %1541 = vst [vmem:[%s3045_s23] sm:$0xf] (%p2602_p6), %v1540_v49  ;;  %v1622_v62 = vld [vmem:[%s2943_s19 + $0xa4] sm:$0xf] (%p2602_p6)  ;;  %v1624_v63 = vld [vmem:[%s2943_s19 + $0xa8] sm:$0xf] (%p2602_p6) }
 0x1c1   : > { %v2208_v19 = vpack.c.bf16 %v1062_v15, %v1059_v13  ;;  %v2288_v20 = vpack.c.bf16 %v1190_v16, %v1187_v14  ;;  %v1626_v0 = vld [vmem:[%s2943_s19 + $0xac] sm:$0xf] (%p2602_p6)  ;;  %1623 = vst [vmem:[%s3045_s23 + $0x148] sm:$0xf] (%p2602_p6), %v1622_v62  ;;  %1625 = vst [vmem:[%s3045_s23 + $0x150] sm:$0xf] (%p2602_p6), %v1624_v63 }
 0x1c2   : > { %v1596_v48 = vld [vmem:[%s2943_s19 + $0x70] sm:$0xf] (%p2602_p6)  ;;  %v1598_v50 = vld [vmem:[%s2943_s19 + $0x74] sm:$0xf] (%p2602_p6)  ;;  %1627 = vst [vmem:[%s3045_s23 + $0x158] sm:$0xf] (%p2602_p6), %v1626_v0 }
 0x1c3   : > { %2304 = vst [vmem:[%s2943_s19 + $0x78] sm:$0xff] %v2208_v19   ;;  %2320 = vst [vmem:[%s2943_s19 + $0xf8] sm:$0xff] %v2288_v20   ;;  %v1628_v1 = vld [vmem:[%s2943_s19 + $0xb0] sm:$0xf] (%p2602_p6)  ;;  %v1630_v2 = vld [vmem:[%s2943_s19 + $0xb4] sm:$0xf] (%p2602_p6) }
 0x1c4   : > { %1597 = vst [vmem:[%s3045_s23 + $0xe0] sm:$0xf] %v1596_v48  ;;  %1599 = vst [vmem:[%s3045_s23 + $0xe8] sm:$0xf] %v1598_v50  ;;  %v1632_v3 = vld [vmem:[%s2943_s19 + $0xb8] sm:$0xf] }
 0x1c5   : > { %1629 = vst [vmem:[%s3045_s23 + $0x160] sm:$0xf] %v1628_v1  ;;  %1631 = vst [vmem:[%s3045_s23 + $0x168] sm:$0xf] %v1630_v2  ;;  %v1634_v4 = vld [vmem:[%s2943_s19 + $0xbc] sm:$0xf] }
 0x1c6   : > { %1633 = vst [vmem:[%s3045_s23 + $0x170] sm:$0xf] %v1632_v3  ;;  %v1636_v5 = vld [vmem:[%s2943_s19 + $0xc0] sm:$0xf]  ;;  %v1638_v6 = vld [vmem:[%s2943_s19 + $0xc4] sm:$0xf] }
 0x1c7   : > { %1635 = vst [vmem:[%s3045_s23 + $0x178] sm:$0xf] %v1634_v4  ;;  %1637 = vst [vmem:[%s3045_s23 + $0x180] sm:$0xf] %v1636_v5  ;;  %v1640_v7 = vld [vmem:[%s2943_s19 + $0xc8] sm:$0xf] }
 0x1c8   : > { %1639 = vst [vmem:[%s3045_s23 + $0x188] sm:$0xf] %v1638_v6  ;;  %v1642_v8 = vld [vmem:[%s2943_s19 + $0xcc] sm:$0xf]  ;;  %v1644_v9 = vld [vmem:[%s2943_s19 + $0xd0] sm:$0xf] }
 0x1c9   : > { %1641 = vst [vmem:[%s3045_s23 + $0x190] sm:$0xf] %v1640_v7  ;;  %1643 = vst [vmem:[%s3045_s23 + $0x198] sm:$0xf] %v1642_v8  ;;  %v1646_v10 = vld [vmem:[%s2943_s19 + $0xd4] sm:$0xf] }
 0x1ca   : > { %v1600_v51 = vld [vmem:[%s2943_s19 + $0x78] sm:$0xf]  ;;  %v1602_v52 = vld [vmem:[%s2943_s19 + $0x7c] sm:$0xf]  ;;  %1645 = vst [vmem:[%s3045_s23 + $0x1a0] sm:$0xf] %v1644_v9 }
 0x1cb   : > { %1601 = vst [vmem:[%s3045_s23 + $0xf0] sm:$0xf] %v1600_v51  ;;  %1603 = vst [vmem:[%s3045_s23 + $0xf8] sm:$0xf] %v1602_v52  ;;  %v1648_v11 = vld [vmem:[%s2943_s19 + $0xd8] sm:$0xf] }
 0x1cc   : > { %v1650_v12 = vld [vmem:[%s2943_s19 + $0xdc] sm:$0xf]  ;;  %1647 = vst [vmem:[%s3045_s23 + $0x1a8] sm:$0xf] %v1646_v10  ;;  %1649 = vst [vmem:[%s3045_s23 + $0x1b0] sm:$0xf] %v1648_v11 }
 0x1cd   : > { %1651 = vst [vmem:[%s3045_s23 + $0x1b8] sm:$0xf] %v1650_v12  ;;  %v1652_v13 = vld [vmem:[%s2943_s19 + $0xe0] sm:$0xf]  ;;  %v1654_v14 = vld [vmem:[%s2943_s19 + $0xe4] sm:$0xf] }
 0x1ce   : > { %v1656_v15 = vld [vmem:[%s2943_s19 + $0xe8] sm:$0xf]  ;;  %1653 = vst [vmem:[%s3045_s23 + $0x1c0] sm:$0xf] %v1652_v13  ;;  %1655 = vst [vmem:[%s3045_s23 + $0x1c8] sm:$0xf] %v1654_v14 }
 0x1cf   : > { %1657 = vst [vmem:[%s3045_s23 + $0x1d0] sm:$0xf] %v1656_v15  ;;  %v1658_v16 = vld [vmem:[%s2943_s19 + $0xec] sm:$0xf]  ;;  %v1660_v17 = vld [vmem:[%s2943_s19 + $0xf0] sm:$0xf] }
 0x1d0   : > { %v1662_v18 = vld [vmem:[%s2943_s19 + $0xf4] sm:$0xf]  ;;  %1659 = vst [vmem:[%s3045_s23 + $0x1d8] sm:$0xf] %v1658_v16  ;;  %1661 = vst [vmem:[%s3045_s23 + $0x1e0] sm:$0xf] %v1660_v17 }
 0x1d1   : > { %1663 = vst [vmem:[%s3045_s23 + $0x1e8] sm:$0xf] %v1662_v18  ;;  %v1664_v19 = vld [vmem:[%s2943_s19 + $0xf8] sm:$0xf]  ;;  %v1666_v20 = vld [vmem:[%s2943_s19 + $0xfc] sm:$0xf] }
 0x1d2   : > { %1665 = vst [vmem:[%s3045_s23 + $0x1f0] sm:$0xf] %v1664_v19  ;;  %1667 = vst [vmem:[%s3045_s23 + $0x1f8] sm:$0xf] %v1666_v20 }
 0x1d3 PF: > { %s13_s16 = sadd.s32 1, %s2544_s16   ;;  %s3193_s12 = smov %s2532_s13 }
 0x1d4   : > { %p10_p12 = scmp.ge.s32.totalorder %s13_s16, 4   ;;  %s3194_s13 = smov %s2607_s22 }
 0x1d5   : > { %s3195_s14 = smov %s2540_s15  ;;  %s3196_s15 = smov %s3198_s17 }
 0x1d6   :  { %12 = sbr.rel (!%p10_p12) target bundleno = 3 (0x3), region = 155 }

// kernel: cgrnet_forward.32
= control target key start
LH: loop header
LB: loop body
LE: loop exit
PB: predicated region body
PF: predicated region fallthrough
CT: control target
= control target key end

     0   :  { %s3432_s12 = smov 0   ;;  %s3434_s13 = smov 0   ;;  %s4310_s0 = inlined_call_operand.vmem [shape: bf16[512,304], index: 0, kind: input, shape index: {}]   ;;  %s4311_s1 = inlined_call_operand.vmem [shape: bf16[304,256], index: 1, kind: input, shape index: {}]   ;;  %s4312_s2 = inlined_call_operand.vmem [shape: f32[1,256], index: 2, kind: input, shape index: {}]   ;;  %s4313_s3 = inlined_call_operand.vmem [shape: bf16[512,256], index: 3, kind: output, shape index: {}]  }
   0x1   :  { %s3436_s14 = smov 0   ;;  %s3438_s15 = smov 0  }
   0x2   :  { %s3440_s16 = smov 0  }
   0x3 LB: > { %s22_s17 = sadd.s32 1, %s3405_s15  ;;  %s2565_s18 = sadd.s32 4294967295, %s3409_s16   ;;  %s3409_s16 = sphi %s3440_s16, %s13_s16   ;;  %s3405_s15 = sphi %s3438_s15, %s4318_s15   ;;  %s3401_s14 = sphi %s3436_s14, %s4317_s14   ;;  %s3397_s13 = sphi %s3434_s13, %s4316_s13   ;;  %s3393_s12 = sphi %s3432_s12, %s4315_s12  }
   0x4   : > { %p23_p0 = scmp.ge.s32.totalorder %s22_s17, 2  ;;  %p65_p1 = scmp.ne.s32.totalorder %s3397_s13, %s3393_s12 }
   0x5   : > { %p66_p2 = scmp.eq.s32.totalorder %s3409_s16, 0  ;;  %p123_p4 = scmp.eq.s32.totalorder %s2565_s18, 1 }
   0x6   : > { %s4320_s17 = smov (%p23_p0, %s22_s17), 0  ;;  %s58_s20 = sadd.s32 1, %s3397_s13 }
   0x7   : > { %p67_p3 = por %p66_p2, %p65_p1  ;;  %s55_s19 = ssub.s32 %s3405_s15, %s4320_s17 }
   0x8   : > { %p56_p5 = scmp.eq.s32.totalorder %s55_s19, 0  ;;  %p3467_p6 = por %p123_p4, %p65_p1 }
   0x9   : > { %p2569_p7 = scmp.ge.s32.totalorder %s3409_s16, 2 }
   0xa   : > { %s3472_s22 = scalar_select %p56_p5, %s3397_s13, %s58_s20  }
   0xb   : > { %155 = sbr.rel (%p2569_p7) target bundleno = 47 (0x2f), region = 20 }
  0x12   : > { %158 = sbr.rel (!%p67_p3) target bundleno = 47 (0x2f), region = 24  ;;  %s160_s23 = sand.u32 (%p67_p3), 1, %s3397_s13  }
  0x13   : > { %s2570_s24 = sshll.u32 (%p67_p3), %s3405_s15, 2  ;;  %s3181_s25 = smul.u32 (%p67_p3), 152, %s160_s23 }
  0x14   : > { %s3480_s28 = scalar_lea.vmem (%p67_p3), %s4311_s1, %s2570_s24 }
  0x15   : > { %v180_v0 = vld [vmem:[%s3480_s28] sm:$0xf] (%p67_p3)  ;;  %v182_v1 = vld [vmem:[%s3480_s28 + $0x8] sm:$0xf] (%p67_p3)  ;;  %v184_v2 = vld [vmem:[%s3480_s28 + $0x10] sm:$0xf] (%p67_p3) }
  0x16   : > { %v186_v3 = vld [vmem:[%s3480_s28 + $0x18] sm:$0xf] (%p67_p3)  ;;  %v188_v4 = vld [vmem:[%s3480_s28 + $0x20] sm:$0xf] (%p67_p3)  ;;  %s3487_s29 = scalar_lea.vmem (%p67_p3), [#allocation2], %s3181_s25 }
  0x17   : > { %181 = vst [vmem:[%s3487_s29] sm:$0xf] (%p67_p3), %v180_v0  ;;  %183 = vst [vmem:[%s3487_s29 + $0x4] sm:$0xf] (%p67_p3), %v182_v1  ;;  %v190_v5 = vld [vmem:[%s3480_s28 + $0x28] sm:$0xf] (%p67_p3) }
  0x18   : > { %185 = vst [vmem:[%s3487_s29 + $0x8] sm:$0xf] (%p67_p3), %v184_v2  ;;  %187 = vst [vmem:[%s3487_s29 + $0xc] sm:$0xf] (%p67_p3), %v186_v3  ;;  %v192_v6 = vld [vmem:[%s3480_s28 + $0x30] sm:$0xf] (%p67_p3) }
  0x19   : > { %189 = vst [vmem:[%s3487_s29 + $0x10] sm:$0xf] %v188_v4  ;;  %v194_v7 = vld [vmem:[%s3480_s28 + $0x38] sm:$0xf]  ;;  %191 = vst [vmem:[%s3487_s29 + $0x14] sm:$0xf] %v190_v5 }
  0x1a   : > { %193 = vst [vmem:[%s3487_s29 + $0x18] sm:$0xf] %v192_v6  ;;  %195 = vst [vmem:[%s3487_s29 + $0x1c] sm:$0xf] %v194_v7  ;;  %v196_v8 = vld [vmem:[%s3480_s28 + $0x40] sm:$0xf] }
  0x1b   : > { %v198_v9 = vld [vmem:[%s3480_s28 + $0x48] sm:$0xf]  ;;  %v200_v10 = vld [vmem:[%s3480_s28 + $0x50] sm:$0xf]  ;;  %197 = vst [vmem:[%s3487_s29 + $0x20] sm:$0xf] %v196_v8 }
  0x1c   : > { %199 = vst [vmem:[%s3487_s29 + $0x24] sm:$0xf] %v198_v9  ;;  %201 = vst [vmem:[%s3487_s29 + $0x28] sm:$0xf] %v200_v10  ;;  %v202_v11 = vld [vmem:[%s3480_s28 + $0x58] sm:$0xf] }
  0x1d   : > { %v204_v12 = vld [vmem:[%s3480_s28 + $0x60] sm:$0xf]  ;;  %v206_v13 = vld [vmem:[%s3480_s28 + $0x68] sm:$0xf]  ;;  %203 = vst [vmem:[%s3487_s29 + $0x2c] sm:$0xf] %v202_v11 }
  0x1e   : > { %205 = vst [vmem:[%s3487_s29 + $0x30] sm:$0xf] %v204_v12  ;;  %207 = vst [vmem:[%s3487_s29 + $0x34] sm:$0xf] %v206_v13  ;;  %v208_v14 = vld [vmem:[%s3480_s28 + $0x70] sm:$0xf] }
  0x1f   : > { %v210_v15 = vld [vmem:[%s3480_s28 + $0x78] sm:$0xf]  ;;  %v212_v16 = vld [vmem:[%s3480_s28 + $0x80] sm:$0xf]  ;;  %209 = vst [vmem:[%s3487_s29 + $0x38] sm:$0xf] %v208_v14 }
  0x20   : > { %211 = vst [vmem:[%s3487_s29 + $0x3c] sm:$0xf] %v210_v15  ;;  %213 = vst [vmem:[%s3487_s29 + $0x40] sm:$0xf] %v212_v16  ;;  %v214_v17 = vld [vmem:[%s3480_s28 + $0x88] sm:$0xf] }
  0x21   : > { %v216_v18 = vld [vmem:[%s3480_s28 + $0x90] sm:$0xf]  ;;  %v218_v19 = vld [vmem:[%s3480_s28 + $0x98] sm:$0xf]  ;;  %215 = vst [vmem:[%s3487_s29 + $0x44] sm:$0xf] %v214_v17 }
  0x22   : > { %217 = vst [vmem:[%s3487_s29 + $0x48] sm:$0xf] %v216_v18  ;;  %219 = vst [vmem:[%s3487_s29 + $0x4c] sm:$0xf] %v218_v19  ;;  %v220_v20 = vld [vmem:[%s3480_s28 + $0xa0] sm:$0xf] }
  0x23   : > { %v222_v21 = vld [vmem:[%s3480_s28 + $0xa8] sm:$0xf]  ;;  %v224_v22 = vld [vmem:[%s3480_s28 + $0xb0] sm:$0xf]  ;;  %221 = vst [vmem:[%s3487_s29 + $0x50] sm:$0xf] %v220_v20 }
  0x24   : > { %223 = vst [vmem:[%s3487_s29 + $0x54] sm:$0xf] %v222_v21  ;;  %225 = vst [vmem:[%s3487_s29 + $0x58] sm:$0xf] %v224_v22  ;;  %v226_v23 = vld [vmem:[%s3480_s28 + $0xb8] sm:$0xf] }
  0x25   : > { %v228_v24 = vld [vmem:[%s3480_s28 + $0xc0] sm:$0xf]  ;;  %v230_v25 = vld [vmem:[%s3480_s28 + $0xc8] sm:$0xf]  ;;  %227 = vst [vmem:[%s3487_s29 + $0x5c] sm:$0xf] %v226_v23 }
  0x26   : > { %229 = vst [vmem:[%s3487_s29 + $0x60] sm:$0xf] %v228_v24  ;;  %231 = vst [vmem:[%s3487_s29 + $0x64] sm:$0xf] %v230_v25  ;;  %v232_v26 = vld [vmem:[%s3480_s28 + $0xd0] sm:$0xf] }
  0x27   : > { %v234_v27 = vld [vmem:[%s3480_s28 + $0xd8] sm:$0xf]  ;;  %v236_v28 = vld [vmem:[%s3480_s28 + $0xe0] sm:$0xf]  ;;  %233 = vst [vmem:[%s3487_s29 + $0x68] sm:$0xf] %v232_v26 }
  0x28   : > { %235 = vst [vmem:[%s3487_s29 + $0x6c] sm:$0xf] %v234_v27  ;;  %237 = vst [vmem:[%s3487_s29 + $0x70] sm:$0xf] %v236_v28  ;;  %v238_v29 = vld [vmem:[%s3480_s28 + $0xe8] sm:$0xf] }
  0x29   : > { %v240_v30 = vld [vmem:[%s3480_s28 + $0xf0] sm:$0xf]  ;;  %v242_v31 = vld [vmem:[%s3480_s28 + $0xf8] sm:$0xf]  ;;  %239 = vst [vmem:[%s3487_s29 + $0x74] sm:$0xf] %v238_v29 }
  0x2a   : > { %241 = vst [vmem:[%s3487_s29 + $0x78] sm:$0xf] %v240_v30  ;;  %243 = vst [vmem:[%s3487_s29 + $0x7c] sm:$0xf] %v242_v31  ;;  %v244_v32 = vld [vmem:[%s3480_s28 + $0x100] sm:$0xf] }
  0x2b   : > { %v246_v33 = vld [vmem:[%s3480_s28 + $0x108] sm:$0xf]  ;;  %v248_v34 = vld [vmem:[%s3480_s28 + $0x110] sm:$0xf]  ;;  %245 = vst [vmem:[%s3487_s29 + $0x80] sm:$0xf] %v244_v32 }
  0x2c   : > { %247 = vst [vmem:[%s3487_s29 + $0x84] sm:$0xf] %v246_v33  ;;  %249 = vst [vmem:[%s3487_s29 + $0x88] sm:$0xf] %v248_v34  ;;  %v250_v35 = vld [vmem:[%s3480_s28 + $0x118] sm:$0xf] }
  0x2d   : > { %v252_v36 = vld [vmem:[%s3480_s28 + $0x120] sm:$0xf]  ;;  %v254_v37 = vld [vmem:[%s3480_s28 + $0x128] sm:$0xf]  ;;  %251 = vst [vmem:[%s3487_s29 + $0x8c] sm:$0xf] %v250_v35 }
  0x2e   : > { %253 = vst [vmem:[%s3487_s29 + $0x90] sm:$0xf] %v252_v36  ;;  %255 = vst [vmem:[%s3487_s29 + $0x94] sm:$0xf] %v254_v37 }
  0x2f PF: > { %p2571_p8 = scmp.ge.s32.totalorder %s3409_s16, 1  ;;  %p359_p9 = scmp.lt.s32.totalorder %s3409_s16, 3 }
  0x31   : > { %p360_p10 = pnand %p2571_p8, %p359_p9 }
  0x32   : > { %s366_s30 = sand.u32 (!%p360_p10), 1, %s3393_s12   ;;  %v3411_v38 = vmov (!%p360_p10), 0   ;;  %v3242_v39 = vld [vmem:[%s4310_s0 + $0x4] ss:$12 sps:$4 sm:$0xff] (!%p360_p10)   ;;  %v3240_v58 = vld [vmem:[%s4310_s0] ss:$12 sps:$4 sm:$0xff] (!%p360_p10)  }
  0x33   : > { %363 = sbr.rel (%p360_p10) target bundleno = 550 (0x226), region = 69  ;;  %1273 = vmatprep.subr.bf16.mxu0 (!%p360_p10), %v3411_v38  ;;  %3149 = vmatprep.subr.bf16.mxu1 (!%p360_p10), %v3411_v38  ;;  %v3245_v40 = vld [vmem:[%s4310_s0 + $0x244] ss:$12 sps:$4 sm:$0xff] (!%p360_p10)   ;;  %v3243_v59 = vld [vmem:[%s4310_s0 + $0x240] ss:$12 sps:$4 sm:$0xff] (!%p360_p10)   ;;  %vm1176_vm0 = vcmask (!%p360_p10), 392192  }
  0x34   : > { %s3182_s4 = smul.u32 (!%p360_p10), 152, %s366_s30  ;;  %1305 = vmatprep.mubr.bf16.mxu0 (!%p360_p10), %v3242_v39  ;;  %1497 = vmatprep.mubr.bf16.mxu1 (!%p360_p10), %v3245_v40  ;;  %v3247_v60 = vld [vmem:[%s4310_s0 + $0x1c] ss:$12 sps:$4 sm:$0xff] (!%p360_p10)   ;;  %v3251_v63 = vld [vmem:[%s4310_s0 + $0x18] ss:$12 sps:$4 sm:$0xff] (!%p360_p10)   ;;  %p404_p11 = scmp.lt.s32.totalorder (!%p360_p10), %s3401_s14, 1 }
  0x35   : > { %v3249_v61 = vld [vmem:[%s4310_s0 + $0x25c] ss:$12 sps:$4 sm:$0xff] (!%p360_p10)   ;;  %v3252_v0 = vld [vmem:[%s4310_s0 + $0x258] ss:$12 sps:$4 sm:$0xff] (!%p360_p10)   ;;  %v3253_v2 = vld [vmem:[%s4310_s0 + $0x34] ss:$12 sps:$4 sm:$0xff] (!%p360_p10)  }
  0x36   : > { %s3573_s9 = scalar_lea.vmem (!%p360_p10), [#allocation2], %s3182_s4  ;;  %v3255_v3 = vld [vmem:[%s4310_s0 + $0x274] ss:$12 sps:$4 sm:$0xff] (!%p360_p10)   ;;  %v3257_v4 = vld [vmem:[%s4310_s0 + $0x30] ss:$12 sps:$4 sm:$0xff] (!%p360_p10)   ;;  %s2572_s4 = sshll.u32 (!%p360_p10), %s366_s30, 8 }
  0x37   : > { %v3224_v41 = vld [vmem:[%s3573_s9] sm:$0xff] (!%p360_p10)   ;;  %v3225_v42 = vld [vmem:[%s3573_s9 + $0x8] sm:$0xff] (!%p360_p10)   ;;  %v3226_v43 = vld [vmem:[%s3573_s9 + $0x10] sm:$0xff] (!%p360_p10)   ;;  %s4019_s5 = scalar_lea.vmem (!%p360_p10), [#allocation3], %s2572_s4 }
  0x38   : > { %1274 = vmatpush1.bf16.msra.mxu0 (!%p360_p10), %v3224_v41  ;;  %3165 = vmatpush1.bf16.msra.mxu1 (!%p360_p10), %v3224_v41  ;;  %v3227_v44 = vld [vmem:[%s3573_s9 + $0x18] sm:$0xff] (!%p360_p10)   ;;  %v3228_v45 = vld [vmem:[%s3573_s9 + $0x20] sm:$0xff] (!%p360_p10)   ;;  %v3229_v46 = vld [vmem:[%s3573_s9 + $0x28] sm:$0xff] (!%p360_p10)  }
  0x39   : > { %1275 = vmatprep.subr.bf16.mxu0 (!%p360_p10), %v3411_v38  ;;  %3150 = vmatprep.subr.bf16.mxu1 (!%p360_p10), %v3411_v38  ;;  %v3230_v47 = vld [vmem:[%s3573_s9 + $0x30] sm:$0xff] (!%p360_p10)   ;;  %v3231_v48 = vld [vmem:[%s3573_s9 + $0x38] sm:$0xff] (!%p360_p10)   ;;  %v3232_v49 = vld [vmem:[%s3573_s9 + $0x40] sm:$0xff] (!%p360_p10)  }
  0x3a   : > { %v3233_v50 = vld [vmem:[%s3573_s9 + $0x48] sm:$0xff]   ;;  %v3234_v51 = vld [vmem:[%s3573_s9 + $0x50] sm:$0xff]   ;;  %v3235_v52 = vld [vmem:[%s3573_s9 + $0x58] sm:$0xff]   ;;  %s405_s26 = scalar_select %p404_p11, %s3401_s14, 1 }
  0x3b   : > { %v3236_v53 = vld [vmem:[%s3573_s9 + $0x60] sm:$0xff]   ;;  %v3237_v54 = vld [vmem:[%s3573_s9 + $0x68] sm:$0xff]   ;;  %v3238_v55 = vld [vmem:[%s3573_s9 + $0x70] sm:$0xff]   ;;  %s2786_s12 = sshll.u32 (%p3467_p6), %s3401_s14, 2 }
  0x3c   : > { %1276 = vmatpush1.bf16.msra.mxu0 %v3225_v42  ;;  %3166 = vmatpush1.bf16.msra.mxu1 %v3225_v42  ;;  %v3239_v56 = vld [vmem:[%s3573_s9 + $0x78] sm:$0xff]   ;;  %v3246_v57 = vld [vmem:[%s3573_s9 + $0x80] sm:$0xff]   ;;  %v3259_v62 = vld [vmem:[%s3573_s9 + $0x88] sm:$0xff]   ;;  %s406_s29 = scalar_lea.vmem %s4312_s2, %s405_s26  ;;  %s4167_s7 = scalar_lea.vmem (%p3467_p6), %s4313_s3, %s2786_s12 }
  0x3d   : > { %1277 = vmatprep.subr.bf16.mxu0 %v3411_v38  ;;  %3151 = vmatprep.subr.bf16.mxu1 %v3411_v38  ;;  %v3278_v1 = vld [vmem:[%s3573_s9 + $0x90] sm:$0xff]   ;;  %v3276_v16 = vld [vmem:[%s4310_s0 + $0x78] ss:$12 sps:$4 sm:$0xff]  }
  0x3e   : > { %v3258_v5 = vld [vmem:[%s4310_s0 + $0x270] ss:$12 sps:$4 sm:$0xff]   ;;  %v3260_v6 = vld [vmem:[%s4310_s0 + $0x4c] ss:$12 sps:$4 sm:$0xff]   ;;  %v3264_v8 = vld [vmem:[%s4310_s0 + $0x48] ss:$12 sps:$4 sm:$0xff]  }
  0x3f   : > { %v3262_v7 = vld [vmem:[%s4310_s0 + $0x28c] ss:$12 sps:$4 sm:$0xff]   ;;  %v3265_v9 = vld [vmem:[%s4310_s0 + $0x288] ss:$12 sps:$4 sm:$0xff]   ;;  %v3266_v10 = vld [vmem:[%s4310_s0 + $0x64] ss:$12 sps:$4 sm:$0xff]  }
  0x40   : > { %1278 = vmatpush1.bf16.msra.mxu0 %v3226_v43  ;;  %3167 = vmatpush1.bf16.msra.mxu1 %v3226_v43  ;;  %v3268_v11 = vld [vmem:[%s4310_s0 + $0x2a4] ss:$12 sps:$4 sm:$0xff]   ;;  %v3270_v12 = vld [vmem:[%s4310_s0 + $0x60] ss:$12 sps:$4 sm:$0xff]   ;;  %v3272_v14 = vld [vmem:[%s4310_s0 + $0x7c] ss:$12 sps:$4 sm:$0xff]  }
  0x41   : > { %1279 = vmatprep.subr.bf16.mxu0 %v3411_v38  ;;  %3152 = vmatprep.subr.bf16.mxu1 %v3411_v38  ;;  %v3271_v13 = vld [vmem:[%s4310_s0 + $0x2a0] ss:$12 sps:$4 sm:$0xff]   ;;  %v3274_v15 = vld [vmem:[%s4310_s0 + $0x2bc] ss:$12 sps:$4 sm:$0xff]   ;;  %v3277_v17 = vld [vmem:[%s4310_s0 + $0x2b8] ss:$12 sps:$4 sm:$0xff]  }
  0x42   : > { %v3279_v18 = vld [vmem:[%s4310_s0 + $0x94] ss:$12 sps:$4 sm:$0xff]   ;;  %v3283_v20 = vld [vmem:[%s4310_s0 + $0x90] ss:$12 sps:$4 sm:$0xff]   ;;  %v3285_v22 = vld [vmem:[%s4310_s0 + $0xac] ss:$12 sps:$4 sm:$0xff]  }
  0x43   : > { %v3281_v19 = vld [vmem:[%s4310_s0 + $0x2d4] ss:$12 sps:$4 sm:$0xff]   ;;  %v3284_v21 = vld [vmem:[%s4310_s0 + $0x2d0] ss:$12 sps:$4 sm:$0xff]   ;;  %v3287_v23 = vld [vmem:[%s4310_s0 + $0x2ec] ss:$12 sps:$4 sm:$0xff]  }
  0x44   : > { %1280 = vmatpush1.bf16.msra.mxu0 %v3227_v44  ;;  %3168 = vmatpush1.bf16.msra.mxu1 %v3227_v44  ;;  %v3289_v24 = vld [vmem:[%s4310_s0 + $0xa8] ss:$12 sps:$4 sm:$0xff]   ;;  %v3291_v26 = vld [vmem:[%s4310_s0 + $0xc4] ss:$12 sps:$4 sm:$0xff]   ;;  %v3294_v28 = vld [vmem:[%s4310_s0 + $0xc0] ss:$12 sps:$4 sm:$0xff]  }
  0x45   : > { %1281 = vmatprep.subr.bf16.mxu0 %v3411_v38  ;;  %3153 = vmatprep.subr.bf16.mxu1 %v3411_v38  ;;  %v3290_v25 = vld [vmem:[%s4310_s0 + $0x2e8] ss:$12 sps:$4 sm:$0xff]   ;;  %v3295_v29 = vld [vmem:[%s4310_s0 + $0x20] ss:$12 sps:$4 sm:$0xff]   ;;  %v3298_v31 = vld [vmem:[%s4310_s0 + $0x38] ss:$12 sps:$4 sm:$0xff]  }
  0x46   : > { %v3293_v27 = vld [vmem:[%s4310_s0 + $0x8] ss:$12 sps:$4 sm:$0xff]   ;;  %v3299_v32 = vld [vmem:[%s4310_s0 + $0xd8] ss:$12 sps:$4 sm:$0xff]   ;;  %v3300_v33 = vld [vmem:[%s4310_s0 + $0x50] ss:$12 sps:$4 sm:$0xff]  }
  0x47   : > { %v3296_v30 = vld [vmem:[%s4310_s0 + $0xdc] ss:$12 sps:$4 sm:$0xff]   ;;  %v3301_v34 = vld [vmem:[%s4310_s0 + $0xf4] ss:$12 sps:$4 sm:$0xff]   ;;  %v3308_v39 = vld [vmem:[%s4310_s0 + $0x98] ss:$12 sps:$4 sm:$0xff]  }
  0x48   : > { %1282 = vmatpush1.bf16.msra.mxu0 %v3228_v45  ;;  %3169 = vmatpush1.bf16.msra.mxu1 %v3228_v45  ;;  %v3303_v35 = vld [vmem:[%s4310_s0 + $0x68] ss:$12 sps:$4 sm:$0xff]   ;;  %v3304_v36 = vld [vmem:[%s4310_s0 + $0xf0] ss:$12 sps:$4 sm:$0xff]   ;;  %v3305_v37 = vld [vmem:[%s4310_s0 + $0x80] ss:$12 sps:$4 sm:$0xff]  }
  0x49   : > { %1283 = vmatprep.subr.bf16.mxu0 %v3411_v38  ;;  %3154 = vmatprep.subr.bf16.mxu1 %v3411_v38  ;;  %v3309_v40 = vld [vmem:[%s4310_s0 + $0x108] ss:$12 sps:$4 sm:$0xff]   ;;  %v3310_v41 = vld [vmem:[%s4310_s0 + $0xb0] ss:$12 sps:$4 sm:$0xff]   ;;  %v3314_v44 = vld [vmem:[%s4310_s0 + $0x120] ss:$12 sps:$4 sm:$0xff]  }
  0x4a   : > { %v3311_v42 = vld [vmem:[%s4310_s0 + $0x124] ss:$12 sps:$4 sm:$0xff]   ;;  %v3313_v43 = vld [vmem:[%s4310_s0 + $0xc8] ss:$12 sps:$4 sm:$0xff]   ;;  %v3315_v45 = vld [vmem:[%s4310_s0 + $0xe0] ss:$12 sps:$4 sm:$0xff]  }
  0x4c   : > { %1284 = vmatpush1.bf16.msra.mxu0 %v3229_v46  ;;  %3170 = vmatpush1.bf16.msra.mxu1 %v3229_v46  ;;  %v3316_v46 = vld [vmem:[%s4310_s0 + $0x13c] ss:$12 sps:$4 sm:$0xff]  }
  0x4d   : > { %1285 = vmatprep.subr.bf16.mxu0 %v3411_v38  ;;  %3155 = vmatprep.subr.bf16.mxu1 %v3411_v38 }
  0x50   : > { %1286 = vmatpush1.bf16.msra.mxu0 %v3230_v47  ;;  %3171 = vmatpush1.bf16.msra.mxu1 %v3230_v47  ;;  %v3318_v47 = vld [vmem:[%s4310_s0 + $0xf8] ss:$12 sps:$4 sm:$0xff]  }
  0x51   : > { %1287 = vmatprep.subr.bf16.mxu0 %v3411_v38  ;;  %3156 = vmatprep.subr.bf16.mxu1 %v3411_v38 }
  0x54   : > { %1288 = vmatpush1.bf16.msra.mxu0 %v3231_v48  ;;  %3172 = vmatpush1.bf16.msra.mxu1 %v3231_v48  ;;  %v3319_v48 = vld [vmem:[%s4310_s0 + $0x138] ss:$12 sps:$4 sm:$0xff]  }
  0x55   : > { %1289 = vmatprep.subr.bf16.mxu0 %v3411_v38  ;;  %3157 = vmatprep.subr.bf16.mxu1 %v3411_v38 }
  0x58   : > { %1290 = vmatpush1.bf16.msra.mxu0 %v3232_v49  ;;  %3173 = vmatpush1.bf16.msra.mxu1 %v3232_v49  ;;  %v3320_v49 = vld [vmem:[%s4310_s0 + $0x110] ss:$12 sps:$4 sm:$0xff]  }
  0x59   : > { %1291 = vmatprep.subr.bf16.mxu0 %v3411_v38  ;;  %3158 = vmatprep.subr.bf16.mxu1 %v3411_v38 }
  0x5c   : > { %1292 = vmatpush1.bf16.msra.mxu0 %v3233_v50  ;;  %3174 = vmatpush1.bf16.msra.mxu1 %v3233_v50  ;;  %v3321_v50 = vld [vmem:[%s4310_s0 + $0x154] ss:$12 sps:$4 sm:$0xff]  }
  0x5d   : > { %1293 = vmatprep.subr.bf16.mxu0 %v3411_v38  ;;  %3159 = vmatprep.subr.bf16.mxu1 %v3411_v38 }
  0x60   : > { %1294 = vmatpush1.bf16.msra.mxu0 %v3234_v51  ;;  %3175 = vmatpush1.bf16.msra.mxu1 %v3234_v51  ;;  %v3323_v51 = vld [vmem:[%s4310_s0 + $0x128] ss:$12 sps:$4 sm:$0xff]  }
  0x61   : > { %1295 = vmatprep.subr.bf16.mxu0 %v3411_v38  ;;  %3160 = vmatprep.subr.bf16.mxu1 %v3411_v38 }
  0x64   : > { %1296 = vmatpush1.bf16.msra.mxu0 %v3235_v52  ;;  %3176 = vmatpush1.bf16.msra.mxu1 %v3235_v52  ;;  %v3324_v52 = vld [vmem:[%s4310_s0 + $0x150] ss:$12 sps:$4 sm:$0xff]  }
  0x65   : > { %1297 = vmatprep.subr.bf16.mxu0 %v3411_v38  ;;  %3161 = vmatprep.subr.bf16.mxu1 %v3411_v38 }
  0x68   : > { %1298 = vmatpush1.bf16.msra.mxu0 %v3236_v53  ;;  %3177 = vmatpush1.bf16.msra.mxu1 %v3236_v53  ;;  %v3325_v53 = vld [vmem:[%s4310_s0 + $0x140] ss:$12 sps:$4 sm:$0xff]  }
  0x69   : > { %1299 = vmatprep.subr.bf16.mxu0 %v3411_v38  ;;  %3162 = vmatprep.subr.bf16.mxu1 %v3411_v38 }
  0x6c   : > { %1300 = vmatpush1.bf16.msra.mxu0 %v3237_v54  ;;  %3178 = vmatpush1.bf16.msra.mxu1 %v3237_v54  ;;  %v3326_v54 = vld [vmem:[%s4310_s0 + $0x16c] ss:$12 sps:$4 sm:$0xff]  }
  0x6d   : > { %1301 = vmatprep.subr.bf16.mxu0 %v3411_v38  ;;  %3163 = vmatprep.subr.bf16.mxu1 %v3411_v38 }
  0x70   : > { %1302 = vmatpush1.bf16.msra.mxu0 %v3238_v55  ;;  %3179 = vmatpush1.bf16.msra.mxu1 %v3238_v55  ;;  %v3328_v55 = vld [vmem:[%s4310_s0 + $0x158] ss:$12 sps:$4 sm:$0xff]  }
  0x71   : > { %1303 = vmatprep.subr.bf16.mxu0 %v3411_v38  ;;  %3164 = vmatprep.subr.bf16.mxu1 %v3411_v38  ;;  %v3306_v38 = vld [vmem:[%s4310_s0 + $0x10c] ss:$12 sps:$4 sm:$0xff]  }
  0x74   : > { %1304 = vmatpush1.bf16.msra.mxu0 %v3239_v56  ;;  %3180 = vmatpush1.bf16.msra.mxu1 %v3239_v56  ;;  %v3329_v56 = vld [vmem:[%s4310_s0 + $0x168] ss:$12 sps:$4 sm:$0xff]  }
  0x75   : > { %3079 = vmatprep.subr.bf16.mxu1 %v3246_v57 }
  0x77   : > { %1306 = vmatmul.mubr.bf16.vlgmr.msra.gmra.mrb[0].mxu0 %v3240_v58  ;;  %1498 = vmatmul.mubr.bf16.vlgmr.msra.gmra.mrb[0].mxu1 %v3243_v59  ;;  %v3331_v58 = vld [vmem:[%s4310_s0 + $0x184] ss:$12 sps:$4 sm:$0xff]   ;;  %v3333_v59 = vld [vmem:[%s4310_s0 + $0x188] ss:$12 sps:$4 sm:$0xff]  }
  0x78   : > { %3080 = vmatpush3.bf16.msra.mxu1 %v3246_v57  ;;  %1313 = vmatprep.mubr.bf16.mxu0 %v3247_v60  ;;  %v3330_v57 = vld [vmem:[%s4310_s0 + $0x170] ss:$12 sps:$4 sm:$0xff]   ;;  %v3334_v60 = vld [vmem:[%s4310_s0 + $0x180] ss:$12 sps:$4 sm:$0xff]  }
  0x79   : > { %1505 = vmatprep.mubr.bf16.mxu1 %v3249_v61  ;;  %3081 = vmatprep.subr.bf16.mxu1 %v3259_v62  ;;  %v3335_v61 = vld [vmem:[%s4310_s0 + $0x1a0] ss:$12 sps:$4 sm:$0xff]  }
  0x7c   : > { %3082 = vmatpush3.bf16.msra.mxu1 %v3259_v62  ;;  %v3336_v62 = vld [vmem:[%s4310_s0 + $0x19c] ss:$12 sps:$4 sm:$0xff]  }
  0x7d   : > { %3083 = vmatprep.subr.bf16.mxu1 %v3278_v1 }
  0x7f   : > { %1314 = vmatmul.mubr.bf16.gmra.mrb[4].mxu0 %v3251_v63  ;;  %1506 = vmatmul.mubr.bf16.gmra.mrb[4].mxu1 %v3252_v0  ;;  %v3338_v63 = vld [vmem:[%s4310_s0 + $0x1b8] ss:$12 sps:$4 sm:$0xff]  }
  0x80   : > { %1321 = vmatprep.mubr.bf16.mxu0 %v3253_v2  ;;  %1513 = vmatprep.mubr.bf16.mxu1 %v3255_v3  ;;  %v3339_v0 = vld [vmem:[%s4310_s0 + $0x198] ss:$12 sps:$4 sm:$0xff]   ;;  %v3341_v2 = vld [vmem:[%s4310_s0 + $0x1b4] ss:$12 sps:$4 sm:$0xff]  }
  0x81   : > { %3084 = vmatpush3.bf16.msra.mxu1 %v3278_v1  ;;  %v3340_v1 = vld [vmem:[%s4310_s0 + $0x1d0] ss:$12 sps:$4 sm:$0xff]   ;;  %v3343_v3 = vld [vmem:[%s4310_s0 + $0x1e8] ss:$12 sps:$4 sm:$0xff]  }
  0x87   : > { %1322 = vmatmul.mubr.bf16.gmra.mrb[8].mxu0 %v3257_v4  ;;  %1514 = vmatmul.mubr.bf16.gmra.mrb[8].mxu1 %v3258_v5  ;;  %v3344_v4 = vld [vmem:[%s4310_s0 + $0x1b0] ss:$12 sps:$4 sm:$0xff]   ;;  %v3345_v5 = vld [vmem:[%s4310_s0 + $0x200] ss:$12 sps:$4 sm:$0xff]  }
  0x88   : > { %1329 = vmatprep.mubr.bf16.mxu0 %v3260_v6  ;;  %1521 = vmatprep.mubr.bf16.mxu1 %v3262_v7  ;;  %v3346_v6 = vld [vmem:[%s4310_s0 + $0x1cc] ss:$12 sps:$4 sm:$0xff]  }
  0x89   : > { %v3348_v7 = vld [vmem:[%s4310_s0 + $0x218] ss:$12 sps:$4 sm:$0xff]  }
  0x8f   : > { %1330 = vmatmul.mubr.bf16.gmra.mrb[12].mxu0 %v3264_v8  ;;  %1522 = vmatmul.mubr.bf16.gmra.mrb[12].mxu1 %v3265_v9  ;;  %v3349_v8 = vld [vmem:[%s4310_s0 + $0x1c8] ss:$12 sps:$4 sm:$0xff]   ;;  %v3350_v9 = vld [vmem:[%s4310_s0 + $0x230] ss:$12 sps:$4 sm:$0xff]  }
  0x90   : > { %1337 = vmatprep.mubr.bf16.mxu0 %v3266_v10  ;;  %1529 = vmatprep.mubr.bf16.mxu1 %v3268_v11  ;;  %v3351_v10 = vld [vmem:[%s4310_s0 + $0x1e4] ss:$12 sps:$4 sm:$0xff]   ;;  %v3353_v11 = vld [vmem:[%s4310_s0 + $0x248] ss:$12 sps:$4 sm:$0xff]  }
  0x97   : > { %1338 = vmatmul.mubr.bf16.gmra.mrb[16].mxu0 %v3270_v12  ;;  %1530 = vmatmul.mubr.bf16.gmra.mrb[16].mxu1 %v3271_v13  ;;  %v3354_v12 = vld [vmem:[%s4310_s0 + $0x1e0] ss:$12 sps:$4 sm:$0xff]  }
  0x98   : > { %1345 = vmatprep.mubr.bf16.mxu0 %v3272_v14  ;;  %1537 = vmatprep.mubr.bf16.mxu1 %v3274_v15  ;;  %v3355_v13 = vld [vmem:[%s4310_s0 + $0x260] ss:$12 sps:$4 sm:$0xff]   ;;  %v3356_v14 = vld [vmem:[%s4310_s0 + $0x1fc] ss:$12 sps:$4 sm:$0xff]   ;;  %v3358_v15 = vld [vmem:[%s4310_s0 + $0x278] ss:$12 sps:$4 sm:$0xff]  }
  0x9f   : > { %1346 = vmatmul.mubr.bf16.gmra.mrb[20].mxu0 %v3276_v16  ;;  %1538 = vmatmul.mubr.bf16.gmra.mrb[20].mxu1 %v3277_v17  ;;  %v3359_v16 = vld [vmem:[%s4310_s0 + $0x1f8] ss:$12 sps:$4 sm:$0xff]   ;;  %v3360_v17 = vld [vmem:[%s4310_s0 + $0x290] ss:$12 sps:$4 sm:$0xff]  }
  0xa0   : > { %1353 = vmatprep.mubr.bf16.mxu0 %v3279_v18  ;;  %1545 = vmatprep.mubr.bf16.mxu1 %v3281_v19  ;;  %v3361_v18 = vld [vmem:[%s4310_s0 + $0x214] ss:$12 sps:$4 sm:$0xff]  }
  0xa1   : > { %v3363_v19 = vld [vmem:[%s4310_s0 + $0x2a8] ss:$12 sps:$4 sm:$0xff]  }
  0xa7   : > { %1354 = vmatmul.mubr.bf16.gmra.mrb[24].mxu0 %v3283_v20  ;;  %1546 = vmatmul.mubr.bf16.gmra.mrb[24].mxu1 %v3284_v21  ;;  %v3364_v20 = vld [vmem:[%s4310_s0 + $0x210] ss:$12 sps:$4 sm:$0xff]   ;;  %v3365_v21 = vld [vmem:[%s4310_s0 + $0x2c0] ss:$12 sps:$4 sm:$0xff]  }
  0xa8   : > { %1361 = vmatprep.mubr.bf16.mxu0 %v3285_v22  ;;  %1553 = vmatprep.mubr.bf16.mxu1 %v3287_v23  ;;  %v3366_v22 = vld [vmem:[%s4310_s0 + $0x22c] ss:$12 sps:$4 sm:$0xff]  }
  0xa9   : > { %v3368_v23 = vld [vmem:[%s4310_s0 + $0x2d8] ss:$12 sps:$4 sm:$0xff]  }
  0xaf   : > { %1362 = vmatmul.mubr.bf16.gmra.mrb[28].mxu0 %v3289_v24  ;;  %1554 = vmatmul.mubr.bf16.gmra.mrb[28].mxu1 %v3290_v25  ;;  %v3369_v24 = vld [vmem:[%s4310_s0 + $0x228] ss:$12 sps:$4 sm:$0xff]   ;;  %v3370_v25 = vld [vmem:[%s4310_s0 + $0x2f0] ss:$12 sps:$4 sm:$0xff]  }
  0xb0   : > { %1369 = vmatprep.mubr.bf16.mxu0 %v3291_v26  ;;  %3085 = vmatprep.mubr.msk.bf16.mxu1 %vm1176_vm0, %v3293_v27 }
  0xb7   : > { %1370 = vmatmul.mubr.bf16.gmra.mrb[32].mxu0 %v3294_v28  ;;  %3086 = vmatmul.mubr.msk.bf16.vlgmr.msra.gmra.mrb[32].mxu1 %vm1176_vm0, %v3295_v29 }
  0xb8   : > { %1377 = vmatprep.mubr.bf16.mxu0 %v3296_v30  ;;  %3089 = vmatprep.mubr.msk.bf16.mxu1 %vm1176_vm0, %v3298_v31 }
  0xbf   : > { %1378 = vmatmul.mubr.bf16.gmra.mrb[36].mxu0 %v3299_v32  ;;  %3090 = vmatmul.mubr.msk.bf16.gmra.mrb[36].mxu1 %vm1176_vm0, %v3300_v33 }
  0xc0   : > { %1385 = vmatprep.mubr.bf16.mxu0 %v3301_v34  ;;  %3093 = vmatprep.mubr.msk.bf16.mxu1 %vm1176_vm0, %v3303_v35 }
  0xc7   : > { %1386 = vmatmul.mubr.bf16.gmra.mrb[40].mxu0 %v3304_v36  ;;  %3094 = vmatmul.mubr.msk.bf16.gmra.mrb[40].mxu1 %vm1176_vm0, %v3305_v37 }
  0xc8   : > { %1393 = vmatprep.mubr.bf16.mxu0 %v3306_v38  ;;  %3097 = vmatprep.mubr.msk.bf16.mxu1 %vm1176_vm0, %v3308_v39 }
  0xcf   : > { %1394 = vmatmul.mubr.bf16.gmra.mrb[44].mxu0 %v3309_v40  ;;  %3098 = vmatmul.mubr.msk.bf16.gmra.mrb[44].mxu1 %vm1176_vm0, %v3310_v41 }
  0xd0   : > { %1401 = vmatprep.mubr.bf16.mxu0 %v3311_v42  ;;  %3101 = vmatprep.mubr.msk.bf16.mxu1 %vm1176_vm0, %v3313_v43 }
  0xd7   : > { %1402 = vmatmul.mubr.bf16.gmra.mrb[48].mxu0 %v3314_v44  ;;  %3102 = vmatmul.mubr.msk.bf16.gmra.mrb[48].mxu1 %vm1176_vm0, %v3315_v45 }
  0xd8   : > { %1409 = vmatprep.mubr.bf16.mxu0 %v3316_v46  ;;  %3105 = vmatprep.mubr.msk.bf16.mxu1 %vm1176_vm0, %v3318_v47 }
  0xdf   : > { %1410 = vmatmul.mubr.bf16.gmra.mrb[52].mxu0 %v3319_v48  ;;  %3106 = vmatmul.mubr.msk.bf16.gmra.mrb[52].mxu1 %vm1176_vm0, %v3320_v49 }
  0xe0   : > { %1417 = vmatprep.mubr.bf16.mxu0 %v3321_v50  ;;  %3109 = vmatprep.mubr.msk.bf16.mxu1 %vm1176_vm0, %v3323_v51 }
  0xe7   : > { %1418 = vmatmul.mubr.bf16.gmra.mrb[56].mxu0 %v3324_v52  ;;  %3110 = vmatmul.mubr.msk.bf16.gmra.mrb[56].mxu1 %vm1176_vm0, %v3325_v53 }
  0xe8   : > { %1425 = vmatprep.mubr.bf16.mxu0 %v3326_v54  ;;  %3113 = vmatprep.mubr.msk.bf16.mxu1 %vm1176_vm0, %v3328_v55 }
  0xef   : > { %1426 = vmatmul.mubr.bf16.gmra.mrb[60].mxu0 %v3329_v56  ;;  %3114 = vmatmul.mubr.msk.bf16.gmra.mrb[60].mxu1 %vm1176_vm0, %v3330_v57 }
  0xf0   : > { %1433 = vmatprep.mubr.bf16.mxu0 %v3331_v58  ;;  %3117 = vmatprep.mubr.msk.bf16.mxu1 %vm1176_vm0, %v3333_v59 }
  0xf7   : > { %1434 = vmatmul.mubr.bf16.gmra.mrb[64].mxu0 %v3334_v60  ;;  %3118 = vmatmul.mubr.msk.bf16.gmra.mrb[64].mxu1 %vm1176_vm0, %v3335_v61 }
  0xf8   : > { %1441 = vmatprep.mubr.bf16.mxu0 %v3336_v62  ;;  %3121 = vmatprep.mubr.msk.bf16.mxu1 %vm1176_vm0, %v3338_v63 }
  0xff   : > { %1442 = vmatmul.mubr.bf16.gmra.mrb[68].mxu0 %v3339_v0  ;;  %3122 = vmatmul.mubr.msk.bf16.gmra.mrb[68].mxu1 %vm1176_vm0, %v3340_v1 }
 0x100   : > { %1449 = vmatprep.mubr.bf16.mxu0 %v3341_v2  ;;  %3125 = vmatprep.mubr.msk.bf16.mxu1 %vm1176_vm0, %v3343_v3 }
 0x107   : > { %1450 = vmatmul.mubr.bf16.gmra.mrb[72].mxu0 %v3344_v4  ;;  %3126 = vmatmul.mubr.msk.bf16.gmra.mrb[72].mxu1 %vm1176_vm0, %v3345_v5 }
 0x108   : > { %1457 = vmatprep.mubr.bf16.mxu0 %v3346_v6  ;;  %3129 = vmatprep.mubr.msk.bf16.mxu1 %vm1176_vm0, %v3348_v7 }
 0x10f   : > { %1458 = vmatmul.mubr.bf16.gmra.mrb[76].mxu0 %v3349_v8  ;;  %3130 = vmatmul.mubr.msk.bf16.gmra.mrb[76].mxu1 %vm1176_vm0, %v3350_v9 }
 0x110   : > { %1465 = vmatprep.mubr.bf16.mxu0 %v3351_v10  ;;  %3133 = vmatprep.mubr.msk.bf16.mxu1 %vm1176_vm0, %v3353_v11 }
 0x117   : > { %1466 = vmatmul.mubr.bf16.gmra.mrb[80].mxu0 %v3354_v12  ;;  %3134 = vmatmul.mubr.msk.bf16.gmra.mrb[80].mxu1 %vm1176_vm0, %v3355_v13 }
 0x118   : > { %1473 = vmatprep.mubr.bf16.mxu0 %v3356_v14  ;;  %3137 = vmatprep.mubr.msk.bf16.mxu1 %vm1176_vm0, %v3358_v15 }
 0x11f   : > { %1474 = vmatmul.mubr.bf16.gmra.mrb[84].mxu0 %v3359_v16  ;;  %3138 = vmatmul.mubr.msk.bf16.gmra.mrb[84].mxu1 %vm1176_vm0, %v3360_v17 }
 0x120   : > { %1481 = vmatprep.mubr.bf16.mxu0 %v3361_v18  ;;  %3141 = vmatprep.mubr.msk.bf16.mxu1 %vm1176_vm0, %v3363_v19 }
 0x127   : > { %1482 = vmatmul.mubr.bf16.gmra.mrb[88].mxu0 %v3364_v20  ;;  %3142 = vmatmul.mubr.msk.bf16.gmra.mrb[88].mxu1 %vm1176_vm0, %v3365_v21 }
 0x128   : > { %1489 = vmatprep.mubr.bf16.mxu0 %v3366_v22  ;;  %3145 = vmatprep.mubr.msk.bf16.mxu1 %vm1176_vm0, %v3368_v23 }
 0x12f   : > { %1490 = vmatmul.mubr.bf16.gmra.mrb[92].mxu0 %v3369_v24  ;;  %3146 = vmatmul.mubr.msk.bf16.gmra.mrb[92].mxu1 %vm1176_vm0, %v3370_v25 }
 0x14a   : > { %v3938_v26 = vpop.f32.mrb[0].mxu0  ;;  %v3940_v27 = vpop.f32.mrb[0].mxu1 }
 0x14b   : > { %v1309_v28 = vpop.f32.mrb[1].mxu0  ;;  %v1501_v29 = vpop.f32.mrb[1].mxu1 }
 0x14c   : > { %v3942_v30 = vpop.f32.mrb[2].mxu0  ;;  %v3944_v31 = vpop.f32.mrb[2].mxu1  ;;  %v4003_v28 = vld [vmem:[%s406_s29] ss:$0 sm:$0xff] }
 0x14d   : > { %v1312_v32 = vpop.f32.mrb[3].mxu0  ;;  %v1504_v33 = vpop.f32.mrb[3].mxu1 }
 0x14e   : > { %v1308_v32 = vadd.f32 %v4003_v28, %v3938_v26 }
 0x152   : > { %v1315_v34 = vpop.f32.mrb[4].mxu0  ;;  %v3946_v35 = vpop.f32.mrb[4].mxu1 }
 0x153   : > { %v1317_v36 = vpop.f32.mrb[5].mxu0  ;;  %v1509_v37 = vpop.f32.mrb[5].mxu1  ;;  %v1316_v29 = vadd.f32 %v4003_v28, %v1315_v34 }
 0x154   : > { %v1318_v38 = vpop.f32.mrb[6].mxu0  ;;  %v3948_v39 = vpop.f32.mrb[6].mxu1 }
 0x155   : > { %v1320_v40 = vpop.f32.mrb[7].mxu0  ;;  %v1512_v41 = vpop.f32.mrb[7].mxu1  ;;  %v1319_v37 = vadd.f32 %v4003_v28, %v1318_v38 }
 0x15a   : > { %v3950_v42 = vpop.f32.mrb[8].mxu0  ;;  %v3952_v43 = vpop.f32.mrb[8].mxu1 }
 0x15b   : > { %v1325_v44 = vpop.f32.mrb[9].mxu0  ;;  %v1517_v45 = vpop.f32.mrb[9].mxu1 }
 0x15c   : > { %v3954_v46 = vpop.f32.mrb[10].mxu0  ;;  %v3956_v47 = vpop.f32.mrb[10].mxu1  ;;  %v1311_v45 = vadd.f32 %v4003_v28, %v3942_v30  ;;  %v1324_v30 = vadd.f32 %v4003_v28, %v3950_v42 }
 0x15d   : > { %v1328_v48 = vpop.f32.mrb[11].mxu0  ;;  %v1520_v49 = vpop.f32.mrb[11].mxu1 }
 0x162   : > { %v3958_v50 = vpop.f32.mrb[12].mxu0  ;;  %v3960_v51 = vpop.f32.mrb[12].mxu1 }
 0x163   : > { %v1333_v52 = vpop.f32.mrb[13].mxu0  ;;  %v1525_v53 = vpop.f32.mrb[13].mxu1  ;;  %v1332_v38 = vadd.f32 %v4003_v28, %v3958_v50  ;;  %v1327_v50 = vadd.f32 %v4003_v28, %v3954_v46 }
 0x164   : > { %v3962_v54 = vpop.f32.mrb[14].mxu0  ;;  %v3964_v55 = vpop.f32.mrb[14].mxu1 }
 0x165   : > { %v1336_v56 = vpop.f32.mrb[15].mxu0  ;;  %v1528_v57 = vpop.f32.mrb[15].mxu1 }
 0x16a   : > { %v3966_v58 = vpop.f32.mrb[16].mxu0  ;;  %v3968_v59 = vpop.f32.mrb[16].mxu1 }
 0x16b   : > { %v1341_v60 = vpop.f32.mrb[17].mxu0  ;;  %v1533_v61 = vpop.f32.mrb[17].mxu1 }
 0x16c   : > { %v3970_v62 = vpop.f32.mrb[18].mxu0  ;;  %v3972_v63 = vpop.f32.mrb[18].mxu1 }
 0x16d   : > { %v1344_v0 = vpop.f32.mrb[19].mxu0  ;;  %v1536_v1 = vpop.f32.mrb[19].mxu1 }
 0x16e   : > { %v1335_v1 = vadd.f32 %v4003_v28, %v3962_v54  ;;  %v1340_v54 = vadd.f32 %v4003_v28, %v3966_v58 }
 0x172   : > { %v3974_v2 = vpop.f32.mrb[20].mxu0  ;;  %v3976_v3 = vpop.f32.mrb[20].mxu1 }
 0x173   : > { %v1349_v4 = vpop.f32.mrb[21].mxu0  ;;  %v1541_v5 = vpop.f32.mrb[21].mxu1 }
 0x174   : > { %v3978_v6 = vpop.f32.mrb[22].mxu0  ;;  %v3980_v7 = vpop.f32.mrb[22].mxu1 }
 0x175   : > { %v1352_v8 = vpop.f32.mrb[23].mxu0  ;;  %v1544_v9 = vpop.f32.mrb[23].mxu1  ;;  %v1351_v46 = vadd.f32 %v4003_v28, %v3978_v6 }
 0x17a   : > { %v3982_v10 = vpop.f32.mrb[24].mxu0  ;;  %v3984_v11 = vpop.f32.mrb[24].mxu1 }
 0x17b   : > { %v1357_v12 = vpop.f32.mrb[25].mxu0  ;;  %v1549_v13 = vpop.f32.mrb[25].mxu1  ;;  %v1356_v6 = vadd.f32 %v4003_v28, %v3982_v10 }
 0x17c   : > { %v3987_v14 = vpop.f32.mrb[26].mxu0  ;;  %v3989_v15 = vpop.f32.mrb[26].mxu1 }
 0x17d   : > { %v1360_v16 = vpop.f32.mrb[27].mxu0  ;;  %v1552_v17 = vpop.f32.mrb[27].mxu1 }
 0x182   : > { %v3992_v18 = vpop.f32.mrb[28].mxu0  ;;  %v3994_v19 = vpop.f32.mrb[28].mxu1 }
 0x183   : > { %v1365_v20 = vpop.f32.mrb[29].mxu0  ;;  %v1557_v21 = vpop.f32.mrb[29].mxu1 }
 0x184   : > { %v3999_v22 = vpop.f32.mrb[30].mxu0  ;;  %v4001_v23 = vpop.f32.mrb[30].mxu1 }
 0x185   : > { %v1368_v24 = vpop.f32.mrb[31].mxu0  ;;  %v1560_v25 = vpop.f32.mrb[31].mxu1 }
 0x186   : > { %v1348_v25 = vadd.f32 %v4003_v28, %v3974_v2 }
 0x18a   : > { %v4008_v33 = vpop.f32.mrb[32].mxu0  ;;  %v3087_v36 = vpop.f32.mrb[32].mxu1 }
 0x18b   : > { %v1605_v40 = vadd.f32 %v3087_v36, %v1316_v29  ;;  %v1373_v41 = vpop.f32.mrb[33].mxu0  ;;  %v1596_v44 = vpop.f32.mrb[33].mxu1 }
 0x18c   : > { %v1597_v48 = vadd.f32 %v1596_v44, %v1308_v32  ;;  %v4015_v49 = vpop.f32.mrb[34].mxu0  ;;  %v3088_v34 = vpop.f32.mrb[34].mxu1  ;;  %v1343_v41 = vadd.f32 %v4003_v28, %v3970_v62  ;;  %v1367_v62 = vadd.f32 %v4003_v28, %v3999_v22  ;;  %v1372_v22 = vadd.f32 %v4003_v28, %v4008_v33 }
 0x18d   : > { %v1608_v52 = vadd.f32 %v3088_v34, %v1319_v37  ;;  %v1376_v53 = vpop.f32.mrb[35].mxu0  ;;  %v1599_v26 = vpop.f32.mrb[35].mxu1 }
 0x18e   : > { %v1600_v56 = vadd.f32 %v1599_v26, %v1311_v45 }
 0x18f   : > { %v2861_v57 = vpack.c.bf16 %v1608_v52, %v1605_v40 }
 0x190   : > { %v2856_v60 = vpack.c.bf16 %v1600_v56, %v1597_v48  ;;  %v1364_v56 = vadd.f32 %v4003_v28, %v3992_v18 }
 0x191   : > { %3013 = vst [vmem:[%s4019_s5 + $0x8] sm:$0xff] %v2861_v57  }
 0x192   : > { %2857 = vst [vmem:[%s4019_s5] sm:$0xff] %v2856_v60   ;;  %v1379_v61 = vpop.f32.mrb[36].mxu0  ;;  %v3091_v0 = vpop.f32.mrb[36].mxu1 }
 0x193   : > { %v1621_v4 = vadd.f32 %v3091_v0, %v1332_v38  ;;  %v1381_v5 = vpop.f32.mrb[37].mxu0  ;;  %v1612_v8 = vpop.f32.mrb[37].mxu1 }
 0x194   : > { %v1613_v9 = vadd.f32 %v1612_v8, %v1324_v30  ;;  %v1382_v12 = vpop.f32.mrb[38].mxu0  ;;  %v3092_v13 = vpop.f32.mrb[38].mxu1 }
 0x195   : > { %v1624_v16 = vadd.f32 %v3092_v13, %v1335_v1  ;;  %v1384_v17 = vpop.f32.mrb[39].mxu0  ;;  %v1615_v42 = vpop.f32.mrb[39].mxu1  ;;  %v1359_v1 = vadd.f32 %v4003_v28, %v3987_v14  ;;  %v1383_v14 = vadd.f32 %v4003_v28, %v1382_v12 }
 0x196   : > { %v1616_v20 = vadd.f32 %v1615_v42, %v1327_v50  ;;  %v1380_v17 = vadd.f32 %v4003_v28, %v1379_v61 }
 0x197   : > { %v2871_v21 = vpack.c.bf16 %v1624_v16, %v1621_v4 }
 0x198   : > { %v2866_v24 = vpack.c.bf16 %v1616_v20, %v1613_v9 }
 0x199   : > { %3015 = vst [vmem:[%s4019_s5 + $0x18] sm:$0xff] %v2871_v21  }
 0x19a   : > { %3014 = vst [vmem:[%s4019_s5 + $0x10] sm:$0xff] %v2866_v24   ;;  %v1387_v29 = vpop.f32.mrb[40].mxu0  ;;  %v3095_v32 = vpop.f32.mrb[40].mxu1 }
 0x19b   : > { %v1637_v36 = vadd.f32 %v3095_v32, %v1348_v25  ;;  %v1389_v37 = vpop.f32.mrb[41].mxu0  ;;  %v1628_v40 = vpop.f32.mrb[41].mxu1  ;;  %v1388_v12 = vadd.f32 %v4003_v28, %v1387_v29 }
 0x19c   : > { %v1629_v44 = vadd.f32 %v1628_v40, %v1340_v54  ;;  %v1390_v2 = vpop.f32.mrb[42].mxu0  ;;  %v3096_v45 = vpop.f32.mrb[42].mxu1  ;;  %v1375_v54 = vadd.f32 %v4003_v28, %v4015_v49 }
 0x19d   : > { %v1640_v48 = vadd.f32 %v3096_v45, %v1351_v46  ;;  %v1392_v34 = vpop.f32.mrb[43].mxu0  ;;  %v1631_v58 = vpop.f32.mrb[43].mxu1 }
 0x19e   : > { %v1632_v52 = vadd.f32 %v1631_v58, %v1343_v41 }
 0x19f   : > { %v2881_v53 = vpack.c.bf16 %v1640_v48, %v1637_v36 }
 0x1a0   : > { %v2876_v26 = vpack.c.bf16 %v1632_v52, %v1629_v44 }
 0x1a1   : > { %3017 = vst [vmem:[%s4019_s5 + $0x28] sm:$0xff] %v2881_v53  }
 0x1a2   : > { %3016 = vst [vmem:[%s4019_s5 + $0x20] sm:$0xff] %v2876_v26   ;;  %v1395_v57 = vpop.f32.mrb[44].mxu0  ;;  %v3099_v60 = vpop.f32.mrb[44].mxu1  ;;  %v1391_v26 = vadd.f32 %v4003_v28, %v1390_v2 }
 0x1a3   : > { %v1653_v38 = vadd.f32 %v3099_v60, %v1364_v56  ;;  %v1397_v30 = vpop.f32.mrb[45].mxu0  ;;  %v1644_v0 = vpop.f32.mrb[45].mxu1  ;;  %v1396_v45 = vadd.f32 %v4003_v28, %v1395_v57 }
 0x1a4   : > { %v1645_v4 = vadd.f32 %v1644_v0, %v1356_v6  ;;  %v1398_v18 = vpop.f32.mrb[46].mxu0  ;;  %v3100_v5 = vpop.f32.mrb[46].mxu1 }
 0x1a5   : > { %v1656_v8 = vadd.f32 %v3100_v5, %v1367_v62  ;;  %v1400_v50 = vpop.f32.mrb[47].mxu0  ;;  %v1647_v10 = vpop.f32.mrb[47].mxu1  ;;  %v1399_v49 = vadd.f32 %v4003_v28, %v1398_v18 }
 0x1a6   : > { %v1648_v9 = vadd.f32 %v1647_v10, %v1359_v1 }
 0x1a7   : > { %v2891_v13 = vpack.c.bf16 %v1656_v8, %v1653_v38 }
 0x1a8   : > { %v2886_v16 = vpack.c.bf16 %v1648_v9, %v1645_v4 }
 0x1a9   : > { %3019 = vst [vmem:[%s4019_s5 + $0x38] sm:$0xff] %v2891_v13  }
 0x1aa   : > { %3018 = vst [vmem:[%s4019_s5 + $0x30] sm:$0xff] %v2886_v16   ;;  %v1403_v42 = vpop.f32.mrb[48].mxu0  ;;  %v3103_v20 = vpop.f32.mrb[48].mxu1 }
 0x1ab   : > { %v1669_v21 = vadd.f32 %v3103_v20, %v1380_v17  ;;  %v1405_v24 = vpop.f32.mrb[49].mxu0  ;;  %v1660_v25 = vpop.f32.mrb[49].mxu1  ;;  %v1404_v4 = vadd.f32 %v4003_v28, %v1403_v42 }
 0x1ac   : > { %v1661_v32 = vadd.f32 %v1660_v25, %v1372_v22  ;;  %v1406_v46 = vpop.f32.mrb[50].mxu0  ;;  %v3104_v61 = vpop.f32.mrb[50].mxu1 }
 0x1ad   : > { %v1672_v36 = vadd.f32 %v3104_v61, %v1383_v14  ;;  %v1408_v37 = vpop.f32.mrb[51].mxu0  ;;  %v1663_v40 = vpop.f32.mrb[51].mxu1  ;;  %v1407_v9 = vadd.f32 %v4003_v28, %v1406_v46 }
 0x1ae   : > { %v1664_v33 = vadd.f32 %v1663_v40, %v1375_v54 }
 0x1af   : > { %v2901_v41 = vpack.c.bf16 %v1672_v36, %v1669_v21 }
 0x1b0   : > { %v2896_v44 = vpack.c.bf16 %v1664_v33, %v1661_v32 }
 0x1b1   : > { %3021 = vst [vmem:[%s4019_s5 + $0x48] sm:$0xff] %v2901_v41  }
 0x1b2   : > { %3020 = vst [vmem:[%s4019_s5 + $0x40] sm:$0xff] %v2896_v44   ;;  %v1411_v48 = vpop.f32.mrb[52].mxu0  ;;  %v3107_v34 = vpop.f32.mrb[52].mxu1 }
 0x1b3   : > { %v1685_v58 = vadd.f32 %v3107_v34, %v1396_v45  ;;  %v1413_v52 = vpop.f32.mrb[53].mxu0  ;;  %v1676_v53 = vpop.f32.mrb[53].mxu1  ;;  %v1412_v1 = vadd.f32 %v4003_v28, %v1411_v48 }
 0x1b4   : > { %v1677_v56 = vadd.f32 %v1676_v53, %v1388_v12  ;;  %v1414_v6 = vpop.f32.mrb[54].mxu0  ;;  %v3108_v60 = vpop.f32.mrb[54].mxu1 }
 0x1b5   : > { %v1688_v62 = vadd.f32 %v3108_v60, %v1399_v49  ;;  %v1416_v57 = vpop.f32.mrb[55].mxu0  ;;  %v1679_v38 = vpop.f32.mrb[55].mxu1  ;;  %v1415_v2 = vadd.f32 %v4003_v28, %v1414_v6 }
 0x1b6   : > { %v1680_v30 = vadd.f32 %v1679_v38, %v1391_v26 }
 0x1b7   : > { %v2911_v29 = vpack.c.bf16 %v1688_v62, %v1685_v58 }
 0x1b8   : > { %v2906_v0 = vpack.c.bf16 %v1680_v30, %v1677_v56 }
 0x1b9   : > { %3023 = vst [vmem:[%s4019_s5 + $0x58] sm:$0xff] %v2911_v29  }
 0x1ba   : > { %3022 = vst [vmem:[%s4019_s5 + $0x50] sm:$0xff] %v2906_v0   ;;  %v1419_v18 = vpop.f32.mrb[56].mxu0  ;;  %v3111_v5 = vpop.f32.mrb[56].mxu1 }
 0x1bb   : > { %v1701_v8 = vadd.f32 %v3111_v5, %v1412_v1  ;;  %v1421_v50 = vpop.f32.mrb[57].mxu0  ;;  %v1692_v10 = vpop.f32.mrb[57].mxu1  ;;  %v1420_v25 = vadd.f32 %v4003_v28, %v1419_v18 }
 0x1bc   : > { %v1693_v13 = vadd.f32 %v1692_v10, %v1404_v4  ;;  %v1422_v16 = vpop.f32.mrb[58].mxu0  ;;  %v3112_v17 = vpop.f32.mrb[58].mxu1 }
 0x1bd   : > { %v1704_v22 = vadd.f32 %v3112_v17, %v1415_v2  ;;  %v1424_v20 = vpop.f32.mrb[59].mxu0  ;;  %v1695_v14 = vpop.f32.mrb[59].mxu1  ;;  %v1423_v37 = vadd.f32 %v4003_v28, %v1422_v16 }
 0x1be   : > { %v1696_v21 = vadd.f32 %v1695_v14, %v1407_v9 }
 0x1bf   : > { %v2921_v42 = vpack.c.bf16 %v1704_v22, %v1701_v8 }
 0x1c0   : > { %v2916_v24 = vpack.c.bf16 %v1696_v21, %v1693_v13 }
 0x1c1   : > { %3025 = vst [vmem:[%s4019_s5 + $0x68] sm:$0xff] %v2921_v42  }
 0x1c2   : > { %3024 = vst [vmem:[%s4019_s5 + $0x60] sm:$0xff] %v2916_v24   ;;  %v1427_v54 = vpop.f32.mrb[60].mxu0  ;;  %v3115_v32 = vpop.f32.mrb[60].mxu1 }
 0x1c3   : > { %v1428_v61 = vadd.f32 %v4003_v28, %v1427_v54  ;;  %v1429_v36 = vpop.f32.mrb[61].mxu0  ;;  %v1708_v46 = vpop.f32.mrb[61].mxu1 }
 0x1c4   : > { %v1709_v40 = vadd.f32 %v1708_v46, %v1420_v25  ;;  %v1430_v33 = vpop.f32.mrb[62].mxu0  ;;  %v3116_v41 = vpop.f32.mrb[62].mxu1 }
 0x1c5   : > { %v1717_v44 = vadd.f32 %v3115_v32, %v1428_v61  ;;  %v1431_v45 = vadd.f32 %v4003_v28, %v1430_v33  ;;  %v1432_v12 = vpop.f32.mrb[63].mxu0  ;;  %v1711_v48 = vpop.f32.mrb[63].mxu1 }
 0x1c6   : > { %v1712_v34 = vadd.f32 %v1711_v48, %v1423_v37 }
 0x1c7   : > { %v1720_v49 = vadd.f32 %v3116_v41, %v1431_v45 }
 0x1c8   : > { %v2926_v58 = vpack.c.bf16 %v1712_v34, %v1709_v40 }
 0x1c9   : > { %v2931_v52 = vpack.c.bf16 %v1720_v49, %v1717_v44 }
 0x1ca   : > { %3026 = vst [vmem:[%s4019_s5 + $0x70] sm:$0xff] %v2926_v58   ;;  %v1435_v53 = vpop.f32.mrb[64].mxu0  ;;  %v3119_v26 = vpop.f32.mrb[64].mxu1 }
 0x1cb   : > { %3027 = vst [vmem:[%s4019_s5 + $0x78] sm:$0xff] %v2931_v52   ;;  %v1436_v56 = vadd.f32 %v4003_v28, %v1435_v53  ;;  %v1437_v6 = vpop.f32.mrb[65].mxu0  ;;  %v1724_v60 = vpop.f32.mrb[65].mxu1 }
 0x1cc   : > { %v1438_v62 = vpop.f32.mrb[66].mxu0  ;;  %v3120_v57 = vpop.f32.mrb[66].mxu1 }
 0x1cd   : > { %v1725_v38 = vadd.f32 %v1724_v60, %v1436_v56  ;;  %v1439_v30 = vadd.f32 %v4003_v28, %v1438_v62  ;;  %v1440_v29 = vpop.f32.mrb[67].mxu0  ;;  %v1727_v0 = vpop.f32.mrb[67].mxu1  ;;  %v1508_v60 = vadd.f32 %v4003_v28, %v3946_v35 }
 0x1ce   : > { %v1511_v29 = vadd.f32 %v4003_v28, %v3948_v39 }
 0x1cf   : > { %v1728_v1 = vadd.f32 %v1727_v0, %v1439_v30 }
 0x1d1   : > { %v2936_v4 = vpack.c.bf16 %v1728_v1, %v1725_v38 }
 0x1d2   : > { %v1443_v18 = vpop.f32.mrb[68].mxu0  ;;  %v3123_v5 = vpop.f32.mrb[68].mxu1 }
 0x1d3   : > { %3028 = vst [vmem:[%s4019_s5 + $0x80] sm:$0xff] %v2936_v4   ;;  %v1444_v2 = vadd.f32 %v4003_v28, %v1443_v18  ;;  %v1445_v8 = vpop.f32.mrb[69].mxu0  ;;  %v1740_v50 = vpop.f32.mrb[69].mxu1 }
 0x1d4   : > { %v1446_v10 = vpop.f32.mrb[70].mxu0  ;;  %v3124_v9 = vpop.f32.mrb[70].mxu1 }
 0x1d5   : > { %v1733_v13 = vadd.f32 %v3119_v26, %v1444_v2  ;;  %v1447_v16 = vadd.f32 %v4003_v28, %v1446_v10  ;;  %v1448_v17 = vpop.f32.mrb[71].mxu0  ;;  %v1743_v22 = vpop.f32.mrb[71].mxu1 }
 0x1d7   : > { %v1736_v20 = vadd.f32 %v3120_v57, %v1447_v16  ;;  %v1500_v57 = vadd.f32 %v4003_v28, %v3940_v27 }
 0x1d9   : > { %v2941_v14 = vpack.c.bf16 %v1736_v20, %v1733_v13  ;;  %v1524_v20 = vadd.f32 %v4003_v28, %v3960_v51  ;;  %v1519_v51 = vadd.f32 %v4003_v28, %v3956_v47  ;;  %v1540_v47 = vadd.f32 %v4003_v28, %v3976_v3 }
 0x1da   : > { %v1451_v21 = vpop.f32.mrb[72].mxu0  ;;  %v4082_v42 = vpop.f32.mrb[72].mxu1  ;;  %v1535_v3 = vadd.f32 %v4003_v28, %v3972_v63  ;;  %v1556_v63 = vadd.f32 %v4003_v28, %v3994_v19  ;;  %v1551_v19 = vadd.f32 %v4003_v28, %v3989_v15  ;;  %v2198_v15 = vld [vmem:[%s4019_s5] sm:$0xf] (%p3467_p6) }
 0x1db   : > { %3029 = vst [vmem:[%s4019_s5 + $0x88] sm:$0xff] %v2941_v14   ;;  %v1452_v24 = vadd.f32 %v4003_v28, %v1451_v21  ;;  %v1453_v25 = vpop.f32.mrb[73].mxu0  ;;  %v1756_v54 = vpop.f32.mrb[73].mxu1  ;;  %2199 = vst [vmem:[%s4167_s7] sm:$0xf] (%p3467_p6), %v2198_v15 }
 0x1dc   : > { %v1454_v32 = vpop.f32.mrb[74].mxu0  ;;  %v4086_v61 = vpop.f32.mrb[74].mxu1  ;;  %v1527_v25 = vadd.f32 %v4003_v28, %v3964_v55 }
 0x1dd   : > { %v1741_v36 = vadd.f32 %v1740_v50, %v1452_v24  ;;  %v1455_v46 = vadd.f32 %v4003_v28, %v1454_v32  ;;  %v1456_v37 = vpop.f32.mrb[75].mxu0  ;;  %v1759_v40 = vpop.f32.mrb[75].mxu1 }
 0x1df   : > { %v1744_v33 = vadd.f32 %v1743_v22, %v1455_v46 }
 0x1e1   : > { %v2946_v41 = vpack.c.bf16 %v1744_v33, %v1741_v36 }
 0x1e2   : > { %v1459_v44 = vpop.f32.mrb[76].mxu0  ;;  %v4089_v45 = vpop.f32.mrb[76].mxu1 }
 0x1e3   : > { %3030 = vst [vmem:[%s4019_s5 + $0x90] sm:$0xff] %v2946_v41   ;;  %v1460_v12 = vadd.f32 %v4003_v28, %v1459_v44  ;;  %v1461_v48 = vpop.f32.mrb[77].mxu0  ;;  %v4093_v34 = vpop.f32.mrb[77].mxu1 }
 0x1e4   : > { %v1462_v49 = vpop.f32.mrb[78].mxu0  ;;  %v4095_v58 = vpop.f32.mrb[78].mxu1 }
 0x1e5   : > { %v1749_v52 = vadd.f32 %v3123_v5, %v1460_v12  ;;  %v1463_v53 = vadd.f32 %v4003_v28, %v1462_v49  ;;  %v1464_v26 = vpop.f32.mrb[79].mxu0  ;;  %v4098_v56 = vpop.f32.mrb[79].mxu1  ;;  %v1503_v5 = vadd.f32 %v4003_v28, %v3944_v31  ;;  %v1516_v31 = vadd.f32 %v4003_v28, %v3952_v43 }
 0x1e7   : > { %v1752_v6 = vadd.f32 %v3124_v9, %v1463_v53 }
 0x1e9   : > { %v2951_v62 = vpack.c.bf16 %v1752_v6, %v1749_v52  ;;  %v1532_v6 = vadd.f32 %v4003_v28, %v3968_v59 }
 0x1ea   : > { %v1467_v38 = vpop.f32.mrb[80].mxu0  ;;  %v3135_v30 = vpop.f32.mrb[80].mxu1 }
 0x1eb   : > { %3031 = vst [vmem:[%s4019_s5 + $0x98] sm:$0xff] %v2951_v62   ;;  %v1468_v0 = vadd.f32 %v4003_v28, %v1467_v38  ;;  %v1797_v1 = vadd.f32 %v3135_v30, %v1508_v60  ;;  %v1469_v4 = vpop.f32.mrb[81].mxu0  ;;  %v1788_v18 = vpop.f32.mrb[81].mxu1  ;;  %v1543_v62 = vadd.f32 %v4003_v28, %v3980_v7 }
 0x1ec   : > { %v1789_v35 = vadd.f32 %v1788_v18, %v1500_v57  ;;  %v1470_v2 = vpop.f32.mrb[82].mxu0  ;;  %v3136_v8 = vpop.f32.mrb[82].mxu1 }
 0x1ed   : > { %v1757_v27 = vadd.f32 %v1756_v54, %v1468_v0  ;;  %v1471_v50 = vadd.f32 %v4003_v28, %v1470_v2  ;;  %v1800_v10 = vadd.f32 %v3136_v8, %v1511_v29  ;;  %v1472_v39 = vpop.f32.mrb[83].mxu0  ;;  %v1791_v9 = vpop.f32.mrb[83].mxu1 }
 0x1ee   : > { %v1792_v13 = vadd.f32 %v1791_v9, %v1503_v5  ;;  %v1559_v9 = vadd.f32 %v4003_v28, %v4001_v23 }
 0x1ef   : > { %v1760_v16 = vadd.f32 %v1759_v40, %v1471_v50  ;;  %v2981_v17 = vpack.c.bf16 %v1800_v10, %v1797_v1  ;;  %v1548_v10 = vadd.f32 %v4003_v28, %v3984_v11 }
 0x1f0   : > { %v2976_v22 = vpack.c.bf16 %v1792_v13, %v1789_v35 }
 0x1f1   : > { %v2956_v14 = vpack.c.bf16 %v1760_v16, %v1757_v27  ;;  %3037 = vst [vmem:[%s4019_s5 + $0xc8] sm:$0xff] %v2981_v17  }
 0x1f2   : > { %3036 = vst [vmem:[%s4019_s5 + $0xc0] sm:$0xff] %v2976_v22   ;;  %v1475_v21 = vpop.f32.mrb[84].mxu0  ;;  %v3139_v24 = vpop.f32.mrb[84].mxu1 }
 0x1f3   : > { %3032 = vst [vmem:[%s4019_s5 + $0xa0] sm:$0xff] %v2956_v14   ;;  %v1476_v54 = vadd.f32 %v4003_v28, %v1475_v21  ;;  %v1813_v32 = vadd.f32 %v3139_v24, %v1524_v20  ;;  %v1477_v36 = vpop.f32.mrb[85].mxu0  ;;  %v1804_v46 = vpop.f32.mrb[85].mxu1 }
 0x1f4   : > { %v1805_v37 = vadd.f32 %v1804_v46, %v1516_v31  ;;  %v1478_v40 = vpop.f32.mrb[86].mxu0  ;;  %v3140_v43 = vpop.f32.mrb[86].mxu1 }
 0x1f5   : > { %v1765_v33 = vadd.f32 %v4082_v42, %v1476_v54  ;;  %v1479_v41 = vadd.f32 %v4003_v28, %v1478_v40  ;;  %v1816_v55 = vadd.f32 %v3140_v43, %v1527_v25  ;;  %v1480_v44 = vpop.f32.mrb[87].mxu0  ;;  %v1807_v12 = vpop.f32.mrb[87].mxu1  ;;  %v2210_v40 = vld [vmem:[%s4019_s5 + $0x18] sm:$0xf] (%p3467_p6)  ;;  %v2212_v43 = vld [vmem:[%s4019_s5 + $0x1c] sm:$0xf] (%p3467_p6) }
 0x1f6   : > { %v1808_v48 = vadd.f32 %v1807_v12, %v1519_v51  ;;  %v2206_v51 = vld [vmem:[%s4019_s5 + $0x10] sm:$0xf] (%p3467_p6)  ;;  %2211 = vst [vmem:[%s4167_s7 + $0x30] sm:$0xf] (%p3467_p6), %v2210_v40  ;;  %2213 = vst [vmem:[%s4167_s7 + $0x38] sm:$0xf] (%p3467_p6), %v2212_v43 }
 0x1f7   : > { %v1768_v49 = vadd.f32 %v4086_v61, %v1479_v41  ;;  %v2991_v52 = vpack.c.bf16 %v1816_v55, %v1813_v32  ;;  %2207 = vst [vmem:[%s4167_s7 + $0x20] sm:$0xf] (%p3467_p6), %v2206_v51  ;;  %v2216_v41 = vld [vmem:[%s4019_s5 + $0x24] sm:$0xf] (%p3467_p6)  ;;  %v2218_v55 = vld [vmem:[%s4019_s5 + $0x28] sm:$0xf] (%p3467_p6) }
 0x1f8   : > { %v2986_v53 = vpack.c.bf16 %v1808_v48, %v1805_v37  ;;  %v2208_v37 = vld [vmem:[%s4019_s5 + $0x14] sm:$0xf] (%p3467_p6)  ;;  %2217 = vst [vmem:[%s4167_s7 + $0x48] sm:$0xf] (%p3467_p6), %v2216_v41  ;;  %2219 = vst [vmem:[%s4167_s7 + $0x50] sm:$0xf] (%p3467_p6), %v2218_v55 }
 0x1f9   : > { %v2961_v26 = vpack.c.bf16 %v1768_v49, %v1765_v33  ;;  %3039 = vst [vmem:[%s4019_s5 + $0xd8] sm:$0xff] %v2991_v52   ;;  %2209 = vst [vmem:[%s4167_s7 + $0x28] sm:$0xf] (%p3467_p6), %v2208_v37  ;;  %v2214_v33 = vld [vmem:[%s4019_s5 + $0x20] sm:$0xf] (%p3467_p6) }
 0x1fa   : > { %3038 = vst [vmem:[%s4019_s5 + $0xd0] sm:$0xff] %v2986_v53   ;;  %v1483_v42 = vpop.f32.mrb[88].mxu0  ;;  %v3143_v60 = vpop.f32.mrb[88].mxu1  ;;  %2215 = vst [vmem:[%s4167_s7 + $0x40] sm:$0xf] (%p3467_p6), %v2214_v33 }
 0x1fb   : > { %3033 = vst [vmem:[%s4019_s5 + $0xa8] sm:$0xff] %v2961_v26   ;;  %v1484_v57 = vadd.f32 %v4003_v28, %v1483_v42  ;;  %v1829_v61 = vadd.f32 %v3143_v60, %v1540_v47  ;;  %v1485_v38 = vpop.f32.mrb[89].mxu0  ;;  %v1820_v30 = vpop.f32.mrb[89].mxu1  ;;  %v2220_v44 = vld [vmem:[%s4019_s5 + $0x2c] sm:$0xf] (%p3467_p6) }
 0x1fc   : > { %v1821_v29 = vadd.f32 %v1820_v30, %v1532_v6  ;;  %v1486_v0 = vpop.f32.mrb[90].mxu0  ;;  %v3144_v59 = vpop.f32.mrb[90].mxu1  ;;  %v2222_v12 = vld [vmem:[%s4019_s5 + $0x30] sm:$0xf] (%p3467_p6)  ;;  %v2224_v48 = vld [vmem:[%s4019_s5 + $0x34] sm:$0xf] (%p3467_p6) }
 0x1fd   : > { %v1773_v1 = vadd.f32 %v4093_v34, %v1484_v57  ;;  %v1487_v4 = vadd.f32 %v4003_v28, %v1486_v0  ;;  %v1832_v7 = vadd.f32 %v3144_v59, %v1543_v62  ;;  %v1488_v18 = vpop.f32.mrb[91].mxu0  ;;  %v1823_v5 = vpop.f32.mrb[91].mxu1  ;;  %2221 = vst [vmem:[%s4167_s7 + $0x58] sm:$0xf] (%p3467_p6), %v2220_v44  ;;  %2223 = vst [vmem:[%s4167_s7 + $0x60] sm:$0xf] (%p3467_p6), %v2222_v12 }
 0x1fe   : > { %v1824_v35 = vadd.f32 %v1823_v5, %v1535_v3  ;;  %2225 = vst [vmem:[%s4167_s7 + $0x68] sm:$0xf] (%p3467_p6), %v2224_v48  ;;  %v2226_v49 = vld [vmem:[%s4019_s5 + $0x38] sm:$0xf] (%p3467_p6)  ;;  %v2228_v52 = vld [vmem:[%s4019_s5 + $0x3c] sm:$0xf] (%p3467_p6) }
 0x1ff   : > { %v1776_v2 = vadd.f32 %v4098_v56, %v1487_v4  ;;  %v3001_v8 = vpack.c.bf16 %v1832_v7, %v1829_v61  ;;  %v2230_v53 = vld [vmem:[%s4019_s5 + $0x40] sm:$0xf] (%p3467_p6)  ;;  %2227 = vst [vmem:[%s4167_s7 + $0x70] sm:$0xf] (%p3467_p6), %v2226_v49  ;;  %2229 = vst [vmem:[%s4167_s7 + $0x78] sm:$0xf] (%p3467_p6), %v2228_v52 }
 0x200   : > { %v2996_v27 = vpack.c.bf16 %v1824_v35, %v1821_v29  ;;  %2231 = vst [vmem:[%s4167_s7 + $0x80] sm:$0xf] (%p3467_p6), %v2230_v53  ;;  %v2232_v47 = vld [vmem:[%s4019_s5 + $0x44] sm:$0xf] (%p3467_p6)  ;;  %v2234_v26 = vld [vmem:[%s4019_s5 + $0x48] sm:$0xf] (%p3467_p6) }
 0x201   : > { %v2966_v50 = vpack.c.bf16 %v1776_v2, %v1773_v1  ;;  %3041 = vst [vmem:[%s4019_s5 + $0xe8] sm:$0xff] %v3001_v8   ;;  %v2236_v6 = vld [vmem:[%s4019_s5 + $0x4c] sm:$0xf] (%p3467_p6)  ;;  %2233 = vst [vmem:[%s4167_s7 + $0x88] sm:$0xf] (%p3467_p6), %v2232_v47 }
 0x202   : > { %3040 = vst [vmem:[%s4019_s5 + $0xe0] sm:$0xff] %v2996_v27   ;;  %v1491_v34 = vpop.f32.mrb[92].mxu0  ;;  %v3147_v39 = vpop.f32.mrb[92].mxu1  ;;  %2235 = vst [vmem:[%s4167_s7 + $0x90] sm:$0xf] (%p3467_p6), %v2234_v26 }
 0x203   : > { %3034 = vst [vmem:[%s4019_s5 + $0xb0] sm:$0xff] %v2966_v50   ;;  %v1492_v13 = vadd.f32 %v4003_v28, %v1491_v34  ;;  %v1845_v56 = vadd.f32 %v3147_v39, %v1556_v63  ;;  %v1493_v16 = vpop.f32.mrb[93].mxu0  ;;  %v1836_v17 = vpop.f32.mrb[93].mxu1  ;;  %2237 = vst [vmem:[%s4167_s7 + $0x98] sm:$0xf] (%p3467_p6), %v2236_v6 }
 0x204   : > { %v1837_v22 = vadd.f32 %v1836_v17, %v1548_v10  ;;  %v1494_v11 = vpop.f32.mrb[94].mxu0  ;;  %v3148_v20 = vpop.f32.mrb[94].mxu1  ;;  %v2238_v42 = vld [vmem:[%s4019_s5 + $0x50] sm:$0xf] (%p3467_p6)  ;;  %v2240_v60 = vld [vmem:[%s4019_s5 + $0x54] sm:$0xf] (%p3467_p6) }
 0x205   : > { %v1781_v14 = vadd.f32 %v4089_v45, %v1492_v13  ;;  %v1495_v31 = vadd.f32 %v4003_v28, %v1494_v11  ;;  %v1848_v23 = vadd.f32 %v3148_v20, %v1559_v9  ;;  %v1496_v21 = vpop.f32.mrb[95].mxu0  ;;  %v1839_v24 = vpop.f32.mrb[95].mxu1  ;;  %2177 = sbr.rel (!%p3467_p6) target bundleno = 550 (0x226), region = 77  ;;  %v2200_v28 = vld [vmem:[%s4019_s5 + $0x4] sm:$0xf] (%p3467_p6) }
 0x206   : > { %v1840_v25 = vadd.f32 %v1839_v24, %v1551_v19  ;;  %v2202_v45 = vld [vmem:[%s4019_s5 + $0x8] sm:$0xf] (%p3467_p6)  ;;  %2201 = vst [vmem:[%s4167_s7 + $0x8] sm:$0xf] (%p3467_p6), %v2200_v28  ;;  %v2242_v62 = vld [vmem:[%s4019_s5 + $0x58] sm:$0xf] (%p3467_p6) }
 0x207   : > { %v1784_v54 = vadd.f32 %v4095_v58, %v1495_v31  ;;  %v3011_v32 = vpack.c.bf16 %v1848_v23, %v1845_v56  ;;  %v2204_v58 = vld [vmem:[%s4019_s5 + $0xc] sm:$0xf] (%p3467_p6)  ;;  %2203 = vst [vmem:[%s4167_s7 + $0x10] sm:$0xf] (%p3467_p6), %v2202_v45  ;;  %2239 = vst [vmem:[%s4167_s7 + $0xa0] sm:$0xf] (%p3467_p6), %v2238_v42 }
 0x208   : > { %v3006_v36 = vpack.c.bf16 %v1840_v25, %v1837_v22  ;;  %2205 = vst [vmem:[%s4167_s7 + $0x18] sm:$0xf] (%p3467_p6), %v2204_v58  ;;  %2241 = vst [vmem:[%s4167_s7 + $0xa8] sm:$0xf] (%p3467_p6), %v2240_v60  ;;  %v2244_v57 = vld [vmem:[%s4019_s5 + $0x5c] sm:$0xf] (%p3467_p6) }
 0x209   : > { %v2971_v46 = vpack.c.bf16 %v1784_v54, %v1781_v14  ;;  %3043 = vst [vmem:[%s4019_s5 + $0xf8] sm:$0xff] %v3011_v32   ;;  %2243 = vst [vmem:[%s4167_s7 + $0xb0] sm:$0xf] (%p3467_p6), %v2242_v62  ;;  %v2246_v61 = vld [vmem:[%s4019_s5 + $0x60] sm:$0xf] (%p3467_p6) }
 0x20a   : > { %3042 = vst [vmem:[%s4019_s5 + $0xf0] sm:$0xff] %v3006_v36   ;;  %v2248_v38 = vld [vmem:[%s4019_s5 + $0x64] sm:$0xf] (%p3467_p6)  ;;  %2245 = vst [vmem:[%s4167_s7 + $0xb8] sm:$0xf] (%p3467_p6), %v2244_v57 }
 0x20b   : > { %3035 = vst [vmem:[%s4019_s5 + $0xb8] sm:$0xff] %v2971_v46   ;;  %2247 = vst [vmem:[%s4167_s7 + $0xc0] sm:$0xf] (%p3467_p6), %v2246_v61  ;;  %v2250_v30 = vld [vmem:[%s4019_s5 + $0x68] sm:$0xf] (%p3467_p6) }
 0x20c   : > { %2249 = vst [vmem:[%s4167_s7 + $0xc8] sm:$0xf] %v2248_v38  ;;  %v2252_v3 = vld [vmem:[%s4019_s5 + $0x6c] sm:$0xf]  ;;  %v2254_v29 = vld [vmem:[%s4019_s5 + $0x70] sm:$0xf] }
 0x20d   : > { %2251 = vst [vmem:[%s4167_s7 + $0xd0] sm:$0xf] %v2250_v30  ;;  %2253 = vst [vmem:[%s4167_s7 + $0xd8] sm:$0xf] %v2252_v3  ;;  %v2256_v0 = vld [vmem:[%s4019_s5 + $0x74] sm:$0xf] }
 0x20e   : > { %2255 = vst [vmem:[%s4167_s7 + $0xe0] sm:$0xf] %v2254_v29  ;;  %v2258_v59 = vld [vmem:[%s4019_s5 + $0x78] sm:$0xf]  ;;  %v2260_v1 = vld [vmem:[%s4019_s5 + $0x7c] sm:$0xf] }
 0x20f   : > { %2257 = vst [vmem:[%s4167_s7 + $0xe8] sm:$0xf] %v2256_v0  ;;  %2259 = vst [vmem:[%s4167_s7 + $0xf0] sm:$0xf] %v2258_v59  ;;  %v2262_v4 = vld [vmem:[%s4019_s5 + $0x80] sm:$0xf] }
 0x210   : > { %2261 = vst [vmem:[%s4167_s7 + $0xf8] sm:$0xf] %v2260_v1  ;;  %v2264_v7 = vld [vmem:[%s4019_s5 + $0x84] sm:$0xf]  ;;  %v2266_v18 = vld [vmem:[%s4019_s5 + $0x88] sm:$0xf] }
 0x211   : > { %2263 = vst [vmem:[%s4167_s7 + $0x100] sm:$0xf] %v2262_v4  ;;  %2265 = vst [vmem:[%s4167_s7 + $0x108] sm:$0xf] %v2264_v7  ;;  %v2268_v5 = vld [vmem:[%s4019_s5 + $0x8c] sm:$0xf] }
 0x212   : > { %2267 = vst [vmem:[%s4167_s7 + $0x110] sm:$0xf] %v2266_v18  ;;  %v2270_v35 = vld [vmem:[%s4019_s5 + $0x90] sm:$0xf]  ;;  %v2272_v2 = vld [vmem:[%s4019_s5 + $0x94] sm:$0xf] }
 0x213   : > { %2269 = vst [vmem:[%s4167_s7 + $0x118] sm:$0xf] %v2268_v5  ;;  %2271 = vst [vmem:[%s4167_s7 + $0x120] sm:$0xf] %v2270_v35  ;;  %v2274_v8 = vld [vmem:[%s4019_s5 + $0x98] sm:$0xf] }
 0x214   : > { %2273 = vst [vmem:[%s4167_s7 + $0x128] sm:$0xf] %v2272_v2  ;;  %v2276_v27 = vld [vmem:[%s4019_s5 + $0x9c] sm:$0xf]  ;;  %v2278_v63 = vld [vmem:[%s4019_s5 + $0xa0] sm:$0xf] }
 0x215   : > { %2275 = vst [vmem:[%s4167_s7 + $0x130] sm:$0xf] %v2274_v8  ;;  %2277 = vst [vmem:[%s4167_s7 + $0x138] sm:$0xf] %v2276_v27  ;;  %v2280_v50 = vld [vmem:[%s4019_s5 + $0xa4] sm:$0xf] }
 0x216   : > { %2279 = vst [vmem:[%s4167_s7 + $0x140] sm:$0xf] %v2278_v63  ;;  %v2282_v10 = vld [vmem:[%s4019_s5 + $0xa8] sm:$0xf]  ;;  %v2284_v34 = vld [vmem:[%s4019_s5 + $0xac] sm:$0xf] }
 0x217   : > { %2281 = vst [vmem:[%s4167_s7 + $0x148] sm:$0xf] %v2280_v50  ;;  %2283 = vst [vmem:[%s4167_s7 + $0x150] sm:$0xf] %v2282_v10  ;;  %v2286_v39 = vld [vmem:[%s4019_s5 + $0xb0] sm:$0xf] }
 0x218   : > { %2285 = vst [vmem:[%s4167_s7 + $0x158] sm:$0xf] %v2284_v34  ;;  %v2288_v9 = vld [vmem:[%s4019_s5 + $0xb4] sm:$0xf]  ;;  %v2290_v13 = vld [vmem:[%s4019_s5 + $0xb8] sm:$0xf] }
 0x219   : > { %2287 = vst [vmem:[%s4167_s7 + $0x160] sm:$0xf] %v2286_v39  ;;  %2289 = vst [vmem:[%s4167_s7 + $0x168] sm:$0xf] %v2288_v9  ;;  %v2292_v56 = vld [vmem:[%s4019_s5 + $0xbc] sm:$0xf] }
 0x21a   : > { %2291 = vst [vmem:[%s4167_s7 + $0x170] sm:$0xf] %v2290_v13  ;;  %v2294_v16 = vld [vmem:[%s4019_s5 + $0xc0] sm:$0xf]  ;;  %v2296_v17 = vld [vmem:[%s4019_s5 + $0xc4] sm:$0xf] }
 0x21b   : > { %2293 = vst [vmem:[%s4167_s7 + $0x178] sm:$0xf] %v2292_v56  ;;  %2295 = vst [vmem:[%s4167_s7 + $0x180] sm:$0xf] %v2294_v16  ;;  %v2298_v19 = vld [vmem:[%s4019_s5 + $0xc8] sm:$0xf] }
 0x21c   : > { %2297 = vst [vmem:[%s4167_s7 + $0x188] sm:$0xf] %v2296_v17  ;;  %v2300_v22 = vld [vmem:[%s4019_s5 + $0xcc] sm:$0xf]  ;;  %v2302_v11 = vld [vmem:[%s4019_s5 + $0xd0] sm:$0xf] }
 0x21d   : > { %2299 = vst [vmem:[%s4167_s7 + $0x190] sm:$0xf] %v2298_v19  ;;  %2301 = vst [vmem:[%s4167_s7 + $0x198] sm:$0xf] %v2300_v22  ;;  %v2304_v20 = vld [vmem:[%s4019_s5 + $0xd4] sm:$0xf] }
 0x21e   : > { %2303 = vst [vmem:[%s4167_s7 + $0x1a0] sm:$0xf] %v2302_v11  ;;  %v2306_v14 = vld [vmem:[%s4019_s5 + $0xd8] sm:$0xf]  ;;  %v2308_v31 = vld [vmem:[%s4019_s5 + $0xdc] sm:$0xf] }
 0x21f   : > { %2305 = vst [vmem:[%s4167_s7 + $0x1a8] sm:$0xf] %v2304_v20  ;;  %2307 = vst [vmem:[%s4167_s7 + $0x1b0] sm:$0xf] %v2306_v14  ;;  %v2310_v23 = vld [vmem:[%s4019_s5 + $0xe0] sm:$0xf] }
 0x220   : > { %2309 = vst [vmem:[%s4167_s7 + $0x1b8] sm:$0xf] %v2308_v31  ;;  %v2312_v21 = vld [vmem:[%s4019_s5 + $0xe4] sm:$0xf]  ;;  %v2314_v24 = vld [vmem:[%s4019_s5 + $0xe8] sm:$0xf] }
 0x221   : > { %2311 = vst [vmem:[%s4167_s7 + $0x1c0] sm:$0xf] %v2310_v23  ;;  %2313 = vst [vmem:[%s4167_s7 + $0x1c8] sm:$0xf] %v2312_v21  ;;  %v2316_v25 = vld [vmem:[%s4019_s5 + $0xec] sm:$0xf] }
 0x222   : > { %2315 = vst [vmem:[%s4167_s7 + $0x1d0] sm:$0xf] %v2314_v24  ;;  %v2318_v54 = vld [vmem:[%s4019_s5 + $0xf0] sm:$0xf]  ;;  %v2320_v32 = vld [vmem:[%s4019_s5 + $0xf4] sm:$0xf] }
 0x223   : > { %2317 = vst [vmem:[%s4167_s7 + $0x1d8] sm:$0xf] %v2316_v25  ;;  %2319 = vst [vmem:[%s4167_s7 + $0x1e0] sm:$0xf] %v2318_v54  ;;  %v2322_v36 = vld [vmem:[%s4019_s5 + $0xf8] sm:$0xf] }
 0x224   : > { %2321 = vst [vmem:[%s4167_s7 + $0x1e8] sm:$0xf] %v2320_v32  ;;  %v2324_v46 = vld [vmem:[%s4019_s5 + $0xfc] sm:$0xf]  ;;  %2323 = vst [vmem:[%s4167_s7 + $0x1f0] sm:$0xf] %v2322_v36 }
 0x225   : > { %2325 = vst [vmem:[%s4167_s7 + $0x1f8] sm:$0xf] %v2324_v46 }
 0x226 PF: > { %s13_s16 = sadd.s32 1, %s3409_s16   ;;  %s4315_s12 = smov %s3397_s13 }
 0x227   : > { %p10_p12 = scmp.ge.s32.totalorder %s13_s16, 4   ;;  %s4316_s13 = smov %s3472_s22 }
 0x228   : > { %s4317_s14 = smov %s3405_s15  ;;  %s4318_s15 = smov %s4320_s17 }
 0x229   :  { %12 = sbr.rel (!%p10_p12) target bundleno = 3 (0x3), region = 155 }

</bundles_post_ra>
